<compile_context>
chip_gen: v7x
topology: tpu7x:2x2x1
jax: 0.10.0
libtpu: 0.0.40
codegen_flags: <defaults>
</compile_context>

<pallas_src>
import jax
import jax.numpy as jnp
from jax.experimental import pallas as pl
from jax.experimental.pallas import tpu as pltpu


# ---------------------------------------------------------------------------
# Fused Pallas kernel: 4 x (matmul + bias + ReLU) + masked softmax
# ---------------------------------------------------------------------------

def _policy_fused_kernel(x_ref, m1_ref, b1_ref, m2_ref, b2_ref,
                         wf1_ref, bf1_ref, wf2_ref, bf2_ref, mask_ref, o_ref):
    f32 = jnp.float32
    bf16 = jnp.bfloat16

    # conv1 (as matmul) + bias + ReLU : (TM, 256) -> (TM, 1568)
    h = jnp.dot(x_ref[...].astype(bf16), m1_ref[...], preferred_element_type=f32)
    h = jnp.maximum(h + b1_ref[...], 0.0)

    # conv2 (as matmul) + bias + ReLU : (TM, 1568) -> (TM, 1600)
    h = jnp.dot(h.astype(bf16), m2_ref[...], preferred_element_type=f32)
    h = jnp.maximum(h + b2_ref[...], 0.0)

    # fc1 + bias + ReLU : (TM, 1600) -> (TM, 256)
    h = jnp.dot(h.astype(bf16), wf1_ref[...], preferred_element_type=f32)
    h = jnp.maximum(h + bf1_ref[...], 0.0)

    # fc2 + bias + ReLU : (TM, 256) -> (TM, 128)   (cols 81..127 are padding)
    h = jnp.dot(h.astype(bf16), wf2_ref[...], preferred_element_type=f32)
    h = jnp.maximum(h + bf2_ref[...], 0.0)

    # Mask padded logits (after ReLU, before softmax) then row softmax.
    logits = h + mask_ref[...]                       # -1e30 on padded columns
    m = jnp.max(logits, axis=-1, keepdims=True)
    e = jnp.exp(logits - m)
    denom = jnp.sum(e, axis=-1, keepdims=True)
    o_ref[...] = (e * pl.reciprocal(denom, approx=True)).astype(o_ref.dtype)


# ---------------------------------------------------------------------------
# One-time weight preparation (conv -> matmul lowering, layout, padding)
# ---------------------------------------------------------------------------

def _conv_as_matmul(w, H, W):
    """Lower a valid stride-1 Conv2d weight (Cout, Cin, k, k) acting on an
    (H, W) input to a dense matrix M of shape (Cin*H*W, Cout*Ho*Wo) so that
    flatten_NCHW(conv(x, w)) == flatten_NCHW(x) @ M."""
    Cout, Cin, k, _ = w.shape
    Ho, Wo = H - k + 1, W - k + 1
    # A[kh, ih, oh] = 1 iff ih == oh + kh ;  Bm likewise along the width axis.
    A = (jnp.arange(H)[None, :, None]
         == (jnp.arange(Ho)[None, None, :] + jnp.arange(k)[:, None, None])
         ).astype(w.dtype)
    Bm = (jnp.arange(W)[None, :, None]
          == (jnp.arange(Wo)[None, None, :] + jnp.arange(k)[:, None, None])
          ).astype(w.dtype)
    # M6[cin, ih, iw, cout, oh, ow] = sum_{kh,kw} w[cout,cin,kh,kw] A[kh,ih,oh] Bm[kw,iw,ow]
    m6 = jnp.einsum("ocyx,yip,xjq->cijopq", w, A, Bm)
    return m6.reshape(Cin * H * W, Cout * Ho * Wo)


def init_params(seed=0):
    """Raw parameters with the same shapes as the PyTorch module."""
    keys = jax.random.split(jax.random.PRNGKey(seed), 8)

    def uinit(key, shape, fan_in):
        bound = 1.0 / jnp.sqrt(jnp.float32(fan_in))
        return jax.random.uniform(key, shape, jnp.float32, -bound, bound)

    return {
        "w_conv1": uinit(keys[0], (32, 2, 3, 3), 2 * 3 * 3),
        "b_conv1": uinit(keys[1], (32,), 2 * 3 * 3),
        "w_conv2": uinit(keys[2], (64, 32, 3, 3), 32 * 3 * 3),
        "b_conv2": uinit(keys[3], (64,), 32 * 3 * 3),
        "w_fc1": uinit(keys[4], (256, 1600), 1600),
        "b_fc1": uinit(keys[5], (256,), 1600),
        "w_fc2": uinit(keys[6], (81, 256), 256),
        "b_fc2": uinit(keys[7], (81,), 256),
    }


def prepare_params(raw):
    """One-time layout work: conv->matmul matrices, transposes, padding, bf16."""
    bf16 = jnp.bfloat16
    f32 = jnp.float32

    # conv1 on a 9x9 input -> (162, 32*7*7=1568); pad K to a lane-aligned 256.
    m1 = _conv_as_matmul(raw["w_conv1"], 9, 9)
    m1 = jnp.pad(m1, ((0, 256 - m1.shape[0]), (0, 0)))
    b1 = jnp.repeat(raw["b_conv1"], 7 * 7).reshape(1, -1)          # (1, 1568)

    # conv2 on a 7x7 input -> (1568, 64*5*5=1600); output order is the PyTorch
    # channel-major flatten, so fc1 needs only a transpose.
    m2 = _conv_as_matmul(raw["w_conv2"], 7, 7)
    b2 = jnp.repeat(raw["b_conv2"], 5 * 5).reshape(1, -1)          # (1, 1600)

    wf1 = raw["w_fc1"].T                                           # (1600, 256)
    bf1 = raw["b_fc1"].reshape(1, -1)

    # fc2: pad N from 81 -> 128 for lane-dense stores / full MXU tiles.
    wf2 = jnp.pad(raw["w_fc2"].T, ((0, 0), (0, 128 - 81)))         # (256, 128)
    bf2 = jnp.pad(raw["b_fc2"], (0, 128 - 81)).reshape(1, -1)      # (1, 128)

    mask = jnp.where(jnp.arange(128) < 81, 0.0, -1e30).astype(f32).reshape(1, -1)

    return {
        "m1": m1.astype(bf16), "b1": b1.astype(f32),
        "m2": m2.astype(bf16), "b2": b2.astype(f32),
        "wf1": wf1.astype(bf16), "bf1": bf1.astype(f32),
        "wf2": wf2.astype(bf16), "bf2": bf2.astype(f32),
        "mask": mask,
    }


# ---------------------------------------------------------------------------
# Forward pass (single fused pallas_call)
# ---------------------------------------------------------------------------

def policy_model_forward(p, x):
    """x: (B, 2, 9, 9) float32 (NCHW, as in the PyTorch module) -> (B, 81)."""
    B = x.shape[0]
    K1 = p["m1"].shape[0]        # 256
    N1 = p["m1"].shape[1]        # 1568
    N2 = p["m2"].shape[1]        # 1600
    N3 = p["wf1"].shape[1]       # 256
    N4 = p["wf2"].shape[1]       # 128

    # Flatten NCHW input and pad rows to a multiple of 8, cols to K1.
    x_flat = x.reshape(B, 2 * 9 * 9).astype(jnp.float32)
    m_pad = max(8, -(-B // 8) * 8)
    tm = min(128, m_pad)
    m_pad = -(-m_pad // tm) * tm
    x_p = jnp.pad(x_flat, ((0, m_pad - B), (0, K1 - x_flat.shape[1])))

    out = pl.pallas_call(
        _policy_fused_kernel,
        out_shape=jax.ShapeDtypeStruct((m_pad, N4), jnp.float32),
        grid=(m_pad // tm,),
        in_specs=[
            pl.BlockSpec((tm, K1), lambda i: (i, 0)),   # x tile
            pl.BlockSpec((K1, N1), lambda i: (0, 0)),   # conv1 matrix (resident)
            pl.BlockSpec((1, N1), lambda i: (0, 0)),
            pl.BlockSpec((N1, N2), lambda i: (0, 0)),   # conv2 matrix (resident)
            pl.BlockSpec((1, N2), lambda i: (0, 0)),
            pl.BlockSpec((N2, N3), lambda i: (0, 0)),   # fc1 (resident)
            pl.BlockSpec((1, N3), lambda i: (0, 0)),
            pl.BlockSpec((N3, N4), lambda i: (0, 0)),   # fc2 padded (resident)
            pl.BlockSpec((1, N4), lambda i: (0, 0)),
            pl.BlockSpec((1, N4), lambda i: (0, 0)),    # softmax pad mask
        ],
        out_specs=pl.BlockSpec((tm, N4), lambda i: (i, 0)),
        compiler_params=pltpu.CompilerParams(
            dimension_semantics=("parallel",),
            vmem_limit_bytes=48 * 1024 * 1024,
        ),
    )(x_p, p["m1"], p["b1"], p["m2"], p["b2"],
      p["wf1"], p["bf1"], p["wf2"], p["bf2"], p["mask"])

    return out[:B, :81]


# ---------------------------------------------------------------------------
# Pure-JAX reference (independent path: real convs, f32 weights)
# ---------------------------------------------------------------------------

def _reference_forward(raw, x):
    dn = ("NCHW", "OIHW", "NCHW")
    h = jax.lax.conv_general_dilated(x, raw["w_conv1"], (1, 1), "VALID",
                                     dimension_numbers=dn)
    h = jax.nn.relu(h + raw["b_conv1"][None, :, None, None])
    h = jax.lax.conv_general_dilated(h, raw["w_conv2"], (1, 1), "VALID",
                                     dimension_numbers=dn)
    h = jax.nn.relu(h + raw["b_conv2"][None, :, None, None])
    h = h.reshape(x.shape[0], 64 * 5 * 5)
    h = jax.nn.relu(h @ raw["w_fc1"].T + raw["b_fc1"])
    h = jax.nn.relu(h @ raw["w_fc2"].T + raw["b_fc2"])
    return jax.nn.softmax(h, axis=-1)


# ---------------------------------------------------------------------------
# Main
# ---------------------------------------------------------------------------

if __name__ == "__main__":
    B = 2
    key = jax.random.PRNGKey(0)
    # synthetic "board features": two binary planes (board == P1, board == P2)
    x = (jax.random.uniform(key, (B, 2, 9, 9)) > 0.5).astype(jnp.float32)

    raw = init_params(seed=0)
    prepared = prepare_params(raw)

    fwd = jax.jit(policy_model_forward)
    out = jax.block_until_ready(fwd(prepared, x))

    assert out.shape == (B, 81), out.shape
    assert bool(jnp.all(jnp.isfinite(out)))
    row_sums = jnp.sum(out, axis=-1)
    assert jnp.allclose(row_sums, 1.0, atol=2e-3), row_sums

    # Cross-check against an independent f32 reference (loose tol: bf16 weights).
    ref = _reference_forward(raw, x)
    assert jnp.allclose(out, ref, atol=2e-2), float(jnp.max(jnp.abs(out - ref)))

    print("KERNEL_OK")
</pallas_src>

<mosaic_0001>
module attributes {stable_mosaic.version = 11 : i64} {
  func.func @_policy_fused_kernel(%arg0: i32, %arg1: memref<8x256xf32, #tpu.memory_space<vmem>>, %arg2: memref<256x1568xbf16, #tpu.memory_space<vmem>>, %arg3: memref<1x1568xf32, #tpu.memory_space<vmem>>, %arg4: memref<1568x1600xbf16, #tpu.memory_space<vmem>>, %arg5: memref<1x1600xf32, #tpu.memory_space<vmem>>, %arg6: memref<1600x256xbf16, #tpu.memory_space<vmem>>, %arg7: memref<1x256xf32, #tpu.memory_space<vmem>>, %arg8: memref<256x128xbf16, #tpu.memory_space<vmem>>, %arg9: memref<1x128xf32, #tpu.memory_space<vmem>>, %arg10: memref<1x128xf32, #tpu.memory_space<vmem>>, %arg11: memref<8x128xf32, #tpu.memory_space<vmem>>) attributes {dimension_semantics = [#tpu.dimension_semantics<parallel>], iteration_bounds = array<i64: 1>, scalar_prefetch = 0 : i64, scratch_operands = 0 : i64, tpu.core_type = #tpu.core_type<tc>, window_params = [{transform_indices = @transform_0, window_bounds = array<i64: 8, 256>}, {pipeline_mode = #tpu.pipeline_mode<synchronous>, transform_indices = @transform_1, window_bounds = array<i64: 256, 1568>}, {pipeline_mode = #tpu.pipeline_mode<synchronous>, transform_indices = @transform_2, window_bounds = array<i64: 1, 1568>}, {pipeline_mode = #tpu.pipeline_mode<synchronous>, transform_indices = @transform_3, window_bounds = array<i64: 1568, 1600>}, {pipeline_mode = #tpu.pipeline_mode<synchronous>, transform_indices = @transform_4, window_bounds = array<i64: 1, 1600>}, {pipeline_mode = #tpu.pipeline_mode<synchronous>, transform_indices = @transform_5, window_bounds = array<i64: 1600, 256>}, {pipeline_mode = #tpu.pipeline_mode<synchronous>, transform_indices = @transform_6, window_bounds = array<i64: 1, 256>}, {pipeline_mode = #tpu.pipeline_mode<synchronous>, transform_indices = @transform_7, window_bounds = array<i64: 256, 128>}, {pipeline_mode = #tpu.pipeline_mode<synchronous>, transform_indices = @transform_8, window_bounds = array<i64: 1, 128>}, {pipeline_mode = #tpu.pipeline_mode<synchronous>, transform_indices = @transform_9, window_bounds = array<i64: 1, 128>}, {transform_indices = @transform_10, window_bounds = array<i64: 8, 128>}]} {
    %c0 = arith.constant 0 : index
    %c0_0 = arith.constant 0 : index
    %0 = vector.load %arg1[%c0, %c0_0] : memref<8x256xf32, #tpu.memory_space<vmem>>, vector<8x256xf32>
    %1 = arith.truncf %0 : vector<8x256xf32> to vector<8x256xbf16>
    %c0_1 = arith.constant 0 : index
    %c0_2 = arith.constant 0 : index
    %2 = vector.load %arg2[%c0_1, %c0_2] : memref<256x1568xbf16, #tpu.memory_space<vmem>>, vector<256x1568xbf16>
    %cst = arith.constant dense<0.000000e+00> : vector<8x1568xf32>
    %3 = tpu.matmul %1, %2, %cst {dimension_numbers = #tpu.dot_dimension_numbers<[1], [0], [0], [1], [0, 0, 1, 1], [], []>} : vector<8x256xbf16>, vector<256x1568xbf16>, vector<8x1568xf32> -> vector<8x1568xf32>
    %c0_3 = arith.constant 0 : index
    %c0_4 = arith.constant 0 : index
    %4 = vector.load %arg3[%c0_3, %c0_4] : memref<1x1568xf32, #tpu.memory_space<vmem>>, vector<1x1568xf32>
    %5 = vector.broadcast %4 : vector<1x1568xf32> to vector<8x1568xf32>
    %6 = arith.addf %3, %5 : vector<8x1568xf32>
    %cst_5 = arith.constant 0.000000e+00 : f32
    %7 = vector.broadcast %cst_5 : f32 to vector<8x1568xf32>
    %8 = arith.maximumf %6, %7 : vector<8x1568xf32>
    %9 = arith.truncf %8 : vector<8x1568xf32> to vector<8x1568xbf16>
    %c0_6 = arith.constant 0 : index
    %c0_7 = arith.constant 0 : index
    %10 = vector.load %arg4[%c0_6, %c0_7] : memref<1568x1600xbf16, #tpu.memory_space<vmem>>, vector<1568x1600xbf16>
    %cst_8 = arith.constant dense<0.000000e+00> : vector<8x1600xf32>
    %11 = tpu.matmul %9, %10, %cst_8 {dimension_numbers = #tpu.dot_dimension_numbers<[1], [0], [0], [1], [0, 0, 1, 1], [], []>} : vector<8x1568xbf16>, vector<1568x1600xbf16>, vector<8x1600xf32> -> vector<8x1600xf32>
    %c0_9 = arith.constant 0 : index
    %c0_10 = arith.constant 0 : index
    %12 = vector.load %arg5[%c0_9, %c0_10] : memref<1x1600xf32, #tpu.memory_space<vmem>>, vector<1x1600xf32>
    %13 = vector.broadcast %12 : vector<1x1600xf32> to vector<8x1600xf32>
    %14 = arith.addf %11, %13 : vector<8x1600xf32>
    %cst_11 = arith.constant 0.000000e+00 : f32
    %15 = vector.broadcast %cst_11 : f32 to vector<8x1600xf32>
    %16 = arith.maximumf %14, %15 : vector<8x1600xf32>
    %17 = arith.truncf %16 : vector<8x1600xf32> to vector<8x1600xbf16>
    %c0_12 = arith.constant 0 : index
    %c0_13 = arith.constant 0 : index
    %18 = vector.load %arg6[%c0_12, %c0_13] : memref<1600x256xbf16, #tpu.memory_space<vmem>>, vector<1600x256xbf16>
    %cst_14 = arith.constant dense<0.000000e+00> : vector<8x256xf32>
    %19 = tpu.matmul %17, %18, %cst_14 {dimension_numbers = #tpu.dot_dimension_numbers<[1], [0], [0], [1], [0, 0, 1, 1], [], []>} : vector<8x1600xbf16>, vector<1600x256xbf16>, vector<8x256xf32> -> vector<8x256xf32>
    %c0_15 = arith.constant 0 : index
    %c0_16 = arith.constant 0 : index
    %20 = vector.load %arg7[%c0_15, %c0_16] : memref<1x256xf32, #tpu.memory_space<vmem>>, vector<1x256xf32>
    %21 = vector.broadcast %20 : vector<1x256xf32> to vector<8x256xf32>
    %22 = arith.addf %19, %21 : vector<8x256xf32>
    %cst_17 = arith.constant 0.000000e+00 : f32
    %23 = vector.broadcast %cst_17 : f32 to vector<8x256xf32>
    %24 = arith.maximumf %22, %23 : vector<8x256xf32>
    %25 = arith.truncf %24 : vector<8x256xf32> to vector<8x256xbf16>
    %c0_18 = arith.constant 0 : index
    %c0_19 = arith.constant 0 : index
    %26 = vector.load %arg8[%c0_18, %c0_19] : memref<256x128xbf16, #tpu.memory_space<vmem>>, vector<256x128xbf16>
    %cst_20 = arith.constant dense<0.000000e+00> : vector<8x128xf32>
    %27 = tpu.matmul %25, %26, %cst_20 {dimension_numbers = #tpu.dot_dimension_numbers<[1], [0], [0], [1], [0, 0, 1, 1], [], []>} : vector<8x256xbf16>, vector<256x128xbf16>, vector<8x128xf32> -> vector<8x128xf32>
    %c0_21 = arith.constant 0 : index
    %c0_22 = arith.constant 0 : index
    %28 = vector.load %arg9[%c0_21, %c0_22] : memref<1x128xf32, #tpu.memory_space<vmem>>, vector<1x128xf32>
    %29 = vector.broadcast %28 : vector<1x128xf32> to vector<8x128xf32>
    %30 = arith.addf %27, %29 : vector<8x128xf32>
    %cst_23 = arith.constant 0.000000e+00 : f32
    %31 = vector.broadcast %cst_23 : f32 to vector<8x128xf32>
    %32 = arith.maximumf %30, %31 : vector<8x128xf32>
    %c0_24 = arith.constant 0 : index
    %c0_25 = arith.constant 0 : index
    %33 = vector.load %arg10[%c0_24, %c0_25] : memref<1x128xf32, #tpu.memory_space<vmem>>, vector<1x128xf32>
    %34 = vector.broadcast %33 : vector<1x128xf32> to vector<8x128xf32>
    %35 = arith.addf %32, %34 : vector<8x128xf32>
    %cst_26 = arith.constant dense<0xFF800000> : vector<8xf32>
    %36 = vector.multi_reduction <maximumf>, %35, %cst_26 [1] : vector<8x128xf32> to vector<8xf32>
    %37 = vector.shape_cast %36 : vector<8xf32> to vector<8x1xf32>
    %38 = vector.broadcast %37 : vector<8x1xf32> to vector<8x128xf32>
    %39 = arith.subf %35, %38 : vector<8x128xf32>
    %40 = math.exp %39 : vector<8x128xf32>
    %cst_27 = arith.constant dense<0.000000e+00> : vector<8xf32>
    %41 = vector.multi_reduction <add>, %40, %cst_27 [1] : vector<8x128xf32> to vector<8xf32>
    %42 = vector.shape_cast %41 : vector<8xf32> to vector<8x1xf32>
    %43 = tpu.reciprocal %42 {approx = true} : vector<8x1xf32> -> vector<8x1xf32>
    %44 = vector.broadcast %43 : vector<8x1xf32> to vector<8x128xf32>
    %45 = arith.mulf %40, %44 : vector<8x128xf32>
    %c0_28 = arith.constant 0 : index
    %c0_29 = arith.constant 0 : index
    %46 = vector.load %arg11[%c0_28, %c0_29] : memref<8x128xf32, #tpu.memory_space<vmem>>, vector<8x128xf32>
    tpu.vector_store %arg11[%c0_28, %c0_29], %45 {strides = array<i32>} : memref<8x128xf32, #tpu.memory_space<vmem>>, vector<8x128xf32>,
    return
  }
  func.func @transform_0(%arg0: i32) -> (i32, i32) {
    %c0_i32 = arith.constant 0 : i32
    %c0_i32_0 = arith.constant 0 : i32
    return %arg0, %c0_i32 : i32, i32
  }
  func.func @transform_1(%arg0: i32) -> (i32, i32) {
    %c0_i32 = arith.constant 0 : i32
    %c0_i32_0 = arith.constant 0 : i32
    %c0_i32_1 = arith.constant 0 : i32
    return %c0_i32, %c0_i32_0 : i32, i32
  }
  func.func @transform_2(%arg0: i32) -> (i32, i32) {
    %c0_i32 = arith.constant 0 : i32
    %c0_i32_0 = arith.constant 0 : i32
    %c0_i32_1 = arith.constant 0 : i32
    return %c0_i32, %c0_i32_0 : i32, i32
  }
  func.func @transform_3(%arg0: i32) -> (i32, i32) {
    %c0_i32 = arith.constant 0 : i32
    %c0_i32_0 = arith.constant 0 : i32
    %c0_i32_1 = arith.constant 0 : i32
    return %c0_i32, %c0_i32_0 : i32, i32
  }
  func.func @transform_4(%arg0: i32) -> (i32, i32) {
    %c0_i32 = arith.constant 0 : i32
    %c0_i32_0 = arith.constant 0 : i32
    %c0_i32_1 = arith.constant 0 : i32
    return %c0_i32, %c0_i32_0 : i32, i32
  }
  func.func @transform_5(%arg0: i32) -> (i32, i32) {
    %c0_i32 = arith.constant 0 : i32
    %c0_i32_0 = arith.constant 0 : i32
    %c0_i32_1 = arith.constant 0 : i32
    return %c0_i32, %c0_i32_0 : i32, i32
  }
  func.func @transform_6(%arg0: i32) -> (i32, i32) {
    %c0_i32 = arith.constant 0 : i32
    %c0_i32_0 = arith.constant 0 : i32
    %c0_i32_1 = arith.constant 0 : i32
    return %c0_i32, %c0_i32_0 : i32, i32
  }
  func.func @transform_7(%arg0: i32) -> (i32, i32) {
    %c0_i32 = arith.constant 0 : i32
    %c0_i32_0 = arith.constant 0 : i32
    %c0_i32_1 = arith.constant 0 : i32
    return %c0_i32, %c0_i32_0 : i32, i32
  }
  func.func @transform_8(%arg0: i32) -> (i32, i32) {
    %c0_i32 = arith.constant 0 : i32
    %c0_i32_0 = arith.constant 0 : i32
    %c0_i32_1 = arith.constant 0 : i32
    return %c0_i32, %c0_i32_0 : i32, i32
  }
  func.func @transform_9(%arg0: i32) -> (i32, i32) {
    %c0_i32 = arith.constant 0 : i32
    %c0_i32_0 = arith.constant 0 : i32
    %c0_i32_1 = arith.constant 0 : i32
    return %c0_i32, %c0_i32_0 : i32, i32
  }
  func.func @transform_10(%arg0: i32) -> (i32, i32) {
    %c0_i32 = arith.constant 0 : i32
    %c0_i32_0 = arith.constant 0 : i32
    return %arg0, %c0_i32 : i32, i32
  }
}

</mosaic_0001>

<bundles_post_ra>
// kernel: policy_model_forward.1
= control target key start
LH: loop header
LB: loop body
LE: loop exit
PB: predicated region body
PF: predicated region fallthrough
CT: control target
= control target key end

     0   :  { %15 = vsyncpa [#allocation3], 0  ;;  %s19306_s0 = inlined_call_operand.vmem [shape: f32[8,256], index: 0, kind: input, shape index: {}]   ;;  %s19307_s1 = inlined_call_operand.vmem [shape: bf16[256,1568], index: 1, kind: input, shape index: {}]   ;;  %s19308_s2 = inlined_call_operand.hbm [shape: f32[1,1568], index: 2, kind: input, shape index: {}]   ;;  %s19309_s3 = inlined_call_operand.hbm [shape: bf16[1568,1600], index: 3, kind: input, shape index: {}]   ;;  %s19310_s4 = inlined_call_operand.hbm [shape: f32[1,1600], index: 4, kind: input, shape index: {}]   ;;  %s19311_s5 = inlined_call_operand.hbm [shape: bf16[1600,256], index: 5, kind: input, shape index: {}]   ;;  %s19312_s6 = inlined_call_operand.hbm [shape: f32[1,256], index: 6, kind: input, shape index: {}]   ;;  %s19313_s7 = inlined_call_operand.hbm [shape: bf16[256,128], index: 7, kind: input, shape index: {}]   ;;  %s19314_s8 = inlined_call_operand.hbm [shape: f32[1,128], index: 8, kind: input, shape index: {}]   ;;  %s19315_s9 = inlined_call_operand.hbm [shape: f32[1,128], index: 9, kind: input, shape index: {}]   ;;  %s19316_s10 = inlined_call_operand.vmem [shape: f32[8,128], index: 10, kind: output, shape index: {}]  }
   0x1   :  { %16 = vsyncpa [#allocation5], 0 }
   0x2   :  { %17 = vsyncpa [#allocation8], 0 }
   0x3   :  { %18 = vsyncpa [#allocation11], 0 }
   0x4   :  { %19 = vsyncpa [#allocation14], 0  ;;  %s18217_s13 = smov [#allocation4]   ;;  %s18031_s17 = scalar_lea.hbm %s19309_s3, 163072 }
   0x5   :  { %s39_s14 = sshll.u32 %s18217_s13, 4  ;;  %p18032_p0 = scmp.ne.s32.totalorder %s19309_s3, %s18031_s17  ;;  %s40_s14 = int_to_ptr.vmem [resolvable:$true] %s39_s14 }
   0x6   :  { %p18035_p1 = scmp.lt.u32.totalorder %s18031_s17, %s19309_s3 }
   0x8   :  { %p18037_p2 = pnand %p18035_p1, %p18032_p0 }
   0xa   :  { %18040 = shalt.err (!%p18037_p2)
}
   0xb   :  { %s18041_s22 = scalar_lea.vmem %s40_s14, 163072  ;;  %p18046_p4 = scmp.lt.s32.totalorder %s40_s14, %s40_s14 }
   0xc   :  { %p18042_p3 = scmp.ne.s32.totalorder %s40_s14, %s18041_s22  ;;  %p18047_p5 = scmp.lt.s32.totalorder %s18041_s22, %s18041_s22 }
   0xe   :  { %p18048_p6 = por %p18047_p5, %p18046_p4 }
  0x10   :  { %p18049_p7 = pnand %p18048_p6, %p18042_p3 }
  0x12   :  { %18052 = shalt.err (!%p18049_p7)
}
  0x13   :  { %s18218_s23 = smov 832   ;;  %s18219_s24 = smov 52  }
  0x14   :  { %45 = dma.hbm_to_vmem [thread:$0]  %s19309_s3, 163072, %s40_s14, [#allocation5], %s18218_s23, %s18218_s23, %s18219_s24  }
  0x15   :  { %s18220_s27 = smov [#allocation7]   ;;  %s18053_s11 = scalar_lea.hbm %s19311_s5, 25600 }
  0x16   :  { %s61_s28 = sshll.u32 %s18220_s27, 4  ;;  %p18054_p8 = scmp.ne.s32.totalorder %s19311_s5, %s18053_s11  ;;  %s62_s28 = int_to_ptr.vmem [resolvable:$true] %s61_s28 }
  0x17   :  { %p18057_p9 = scmp.lt.u32.totalorder %s18053_s11, %s19311_s5 }
  0x19   :  { %p18059_p10 = pnand %p18057_p9, %p18054_p8 }
  0x1b   :  { %18062 = shalt.err (!%p18059_p10)
}
  0x1c   :  { %s18063_s17 = scalar_lea.vmem %s62_s28, 25600  ;;  %p18068_p12 = scmp.lt.s32.totalorder %s62_s28, %s62_s28 }
  0x1d   :  { %p18064_p11 = scmp.ne.s32.totalorder %s62_s28, %s18063_s17  ;;  %p18069_p13 = scmp.lt.s32.totalorder %s18063_s17, %s18063_s17 }
  0x1f   :  { %p18070_p0 = por %p18069_p13, %p18068_p12 }
  0x21   :  { %p18071_p1 = pnand %p18070_p0, %p18064_p11 }
  0x23   :  { %18074 = shalt.err (!%p18071_p1)
}
  0x24   :  { %s18221_s3 = smov 128   ;;  %s18222_s14 = smov 8  }
  0x25   :  { %67 = dma.hbm_to_vmem [thread:$0]  %s19311_s5, 25600, %s62_s28, [#allocation8], %s18221_s3, %s18221_s3, %s18222_s14  }
  0x26   :  { %s18223_s20 = smov [#allocation10]   ;;  %s18075_s24 = scalar_lea.hbm %s19313_s7, 2048 }
  0x27   :  { %s83_s21 = sshll.u32 %s18223_s20, 4  ;;  %p18076_p2 = scmp.ne.s32.totalorder %s19313_s7, %s18075_s24  ;;  %s84_s21 = int_to_ptr.vmem [resolvable:$true] %s83_s21 }
  0x28   :  { %p18079_p3 = scmp.lt.u32.totalorder %s18075_s24, %s19313_s7 }
  0x2a   :  { %p18081_p4 = pnand %p18079_p3, %p18076_p2 }
  0x2c   :  { %18084 = shalt.err (!%p18081_p4)
}
  0x2d   :  { %s18085_s30 = scalar_lea.vmem %s84_s21, 2048  ;;  %p18090_p6 = scmp.lt.s32.totalorder %s84_s21, %s84_s21 }
  0x2e   :  { %p18086_p5 = scmp.ne.s32.totalorder %s84_s21, %s18085_s30  ;;  %p18091_p7 = scmp.lt.s32.totalorder %s18085_s30, %s18085_s30 }
  0x30   :  { %p18092_p8 = por %p18091_p7, %p18090_p6 }
  0x32   :  { %p18093_p9 = pnand %p18092_p8, %p18086_p5 }
  0x34   :  { %18096 = shalt.err (!%p18093_p9)
}
  0x35   :  { %s18224_s5 = smov 64   ;;  %s18225_s28 = smov 4  }
  0x36   :  { %89 = dma.hbm_to_vmem [thread:$0]  %s19313_s7, 2048, %s84_s21, [#allocation11], %s18224_s5, %s18224_s5, %s18225_s28  }
  0x37   :  { %s18226_s13 = smov [#allocation2]   ;;  %s18227_s16 = smov [#allocation6]  }
  0x38   :  { %s30_s15 = sshll.u32 %s18226_s13, 4  ;;  %s52_s17 = sshll.u32 %s18227_s16, 4  ;;  %s31_s15 = int_to_ptr.vmem [resolvable:$true] %s30_s15  ;;  %s53_s17 = int_to_ptr.vmem [resolvable:$true] %s52_s17 }
  0x39   :  { %s18097_s18 = scalar_lea.hbm %s19308_s2, 208 }
  0x3a   :  { %p18098_p10 = scmp.ne.s32.totalorder %s19308_s2, %s18097_s18  ;;  %p18101_p11 = scmp.lt.u32.totalorder %s18097_s18, %s19308_s2 }
  0x3c   :  { %p18103_p12 = pnand %p18101_p11, %p18098_p10 }
  0x3e   :  { %18106 = shalt.err (!%p18103_p12)
}
  0x3f   :  { %s18107_s7 = scalar_lea.vmem %s31_s15, 208  ;;  %s18111_s21 = scalar_lea.vmem %s31_s15, 224 }
  0x40   :  { %p18108_p13 = scmp.ne.s32.totalorder %s31_s15, %s18107_s7  ;;  %p18112_p0 = scmp.lt.s32.totalorder %s31_s15, %s31_s15 }
  0x41   :  { %p18113_p1 = scmp.lt.s32.totalorder %s18111_s21, %s18107_s7 }
  0x43   :  { %p18114_p2 = por %p18113_p1, %p18112_p0 }
  0x45   :  { %p18115_p3 = pnand %p18114_p2, %p18108_p13 }
  0x47   :  { %18118 = shalt.err (!%p18115_p3)
}
  0x48   :  { %33 = dma.hbm_to_vmem [thread:$0]  %s19308_s2, 208, %s31_s15, [#allocation3]  }
  0x49   :  { %s18119_s29 = scalar_lea.hbm %s19310_s4, 208 }
  0x4a   :  { %p18120_p4 = scmp.ne.s32.totalorder %s19310_s4, %s18119_s29  ;;  %p18123_p5 = scmp.lt.u32.totalorder %s18119_s29, %s19310_s4 }
  0x4c   :  { %p18125_p6 = pnand %p18123_p5, %p18120_p4 }
  0x4e   :  { %18128 = shalt.err (!%p18125_p6)
}
  0x4f   :  { %s18129_s12 = scalar_lea.vmem %s53_s17, 208  ;;  %s18133_s13 = scalar_lea.vmem %s53_s17, 224 }
  0x50   :  { %p18130_p7 = scmp.ne.s32.totalorder %s53_s17, %s18129_s12  ;;  %p18134_p8 = scmp.lt.s32.totalorder %s53_s17, %s53_s17 }
  0x51   :  { %p18135_p9 = scmp.lt.s32.totalorder %s18133_s13, %s18129_s12 }
  0x53   :  { %p18136_p10 = por %p18135_p9, %p18134_p8 }
  0x55   :  { %p18137_p11 = pnand %p18136_p10, %p18130_p7 }
  0x57   :  { %18140 = shalt.err (!%p18137_p11)
}
  0x58   :  { %55 = dma.hbm_to_vmem [thread:$0]  %s19310_s4, 208, %s53_s17, [#allocation5]  }
  0x59   :  { %s18228_s16 = smov [#allocation9]   ;;  %s18229_s14 = smov [#allocation12]  }
  0x5a   :  { %s74_s3 = sshll.u32 %s18228_s16, 4  ;;  %s96_s18 = sshll.u32 %s18229_s14, 4  ;;  %s75_s3 = int_to_ptr.vmem [resolvable:$true] %s74_s3  ;;  %s97_s18 = int_to_ptr.vmem [resolvable:$true] %s96_s18 }
  0x5b   :  { %s18141_s22 = scalar_lea.hbm %s19312_s6, 32 }
  0x5c   :  { %p18142_p12 = scmp.ne.s32.totalorder %s19312_s6, %s18141_s22  ;;  %p18145_p13 = scmp.lt.u32.totalorder %s18141_s22, %s19312_s6 }
  0x5e   :  { %p18147_p0 = pnand %p18145_p13, %p18142_p12 }
  0x60   :  { %18150 = shalt.err (!%p18147_p0)
}
  0x61   :  { %s18151_s4 = scalar_lea.vmem %s75_s3, 32  ;;  %p18156_p2 = scmp.lt.s32.totalorder %s75_s3, %s75_s3 }
  0x62   :  { %p18152_p1 = scmp.ne.s32.totalorder %s75_s3, %s18151_s4  ;;  %p18157_p3 = scmp.lt.s32.totalorder %s18151_s4, %s18151_s4 }
  0x64   :  { %p18158_p4 = por %p18157_p3, %p18156_p2 }
  0x66   :  { %p18159_p5 = pnand %p18158_p4, %p18152_p1 }
  0x68   :  { %18162 = shalt.err (!%p18159_p5)
}
  0x69   :  { %77 = dma.hbm_to_vmem [thread:$0]  %s19312_s6, 32, %s75_s3, [#allocation8]  }
  0x6a   :  { %s18163_s29 = scalar_lea.hbm %s19314_s8, 16 }
  0x6b   :  { %p18164_p6 = scmp.ne.s32.totalorder %s19314_s8, %s18163_s29  ;;  %p18167_p7 = scmp.lt.u32.totalorder %s18163_s29, %s19314_s8 }
  0x6d   :  { %p18169_p8 = pnand %p18167_p7, %p18164_p6 }
  0x6f   :  { %18172 = shalt.err (!%p18169_p8)
}
  0x70   :  { %s18173_s12 = scalar_lea.vmem %s97_s18, 16  ;;  %s18177_s13 = scalar_lea.vmem %s97_s18, 32 }
  0x71   :  { %p18174_p9 = scmp.ne.s32.totalorder %s97_s18, %s18173_s12  ;;  %p18178_p10 = scmp.lt.s32.totalorder %s97_s18, %s97_s18 }
  0x72   :  { %p18179_p11 = scmp.lt.s32.totalorder %s18177_s13, %s18173_s12 }
  0x74   :  { %p18180_p12 = por %p18179_p11, %p18178_p10 }
  0x76   :  { %p18181_p13 = pnand %p18180_p12, %p18174_p9 }
  0x78   :  { %18184 = shalt.err (!%p18181_p13)
}
  0x79   :  { %99 = dma.hbm_to_vmem [thread:$0]  %s19314_s8, 16, %s97_s18, [#allocation11]  }
  0x7a   :  { %s18230_s15 = smov [#allocation13]   ;;  %s18185_s19 = scalar_lea.hbm %s19315_s9, 16 }
  0x7b   :  { %s106_s16 = sshll.u32 %s18230_s15, 4  ;;  %p18186_p0 = scmp.ne.s32.totalorder %s19315_s9, %s18185_s19  ;;  %s107_s16 = int_to_ptr.vmem [resolvable:$true] %s106_s16 }
  0x7c   :  { %p18189_p1 = scmp.lt.u32.totalorder %s18185_s19, %s19315_s9 }
  0x7e   :  { %p18191_p2 = pnand %p18189_p1, %p18186_p0 }
  0x80   :  { %18194 = shalt.err (!%p18191_p2)
}
  0x81   :  { %s18195_s21 = scalar_lea.vmem %s107_s16, 16  ;;  %s18199_s8 = scalar_lea.vmem %s107_s16, 32 }
  0x82   :  { %p18196_p3 = scmp.ne.s32.totalorder %s107_s16, %s18195_s21  ;;  %p18200_p4 = scmp.lt.s32.totalorder %s107_s16, %s107_s16 }
  0x83   :  { %p18201_p5 = scmp.lt.s32.totalorder %s18199_s8, %s18195_s21 }
  0x85   :  { %p18202_p6 = por %p18201_p5, %p18200_p4 }
  0x87   :  { %p18203_p7 = pnand %p18202_p6, %p18196_p3 }
  0x89   :  { %18206 = shalt.err (!%p18203_p7)
}
  0x8a   :  { %109 = dma.hbm_to_vmem [thread:$0]  %s19315_s9, 16, %s107_s16, [#allocation14]  }
  0x8b   :  { %18207 = dma.done.wait [#allocation3], 208  }
  0x8c   :  { %18208 = vsyncadd [#allocation3], 4294967088 }
  0x8d   :  { %18209 = dma.done.wait [#allocation5], 163280  }
  0x8e   :  { %18210 = vsyncadd [#allocation5], 4294804016 }
  0x8f   :  { %18211 = dma.done.wait [#allocation8], 25632  }
  0x90   :  { %18212 = vsyncadd [#allocation8], 4294941664 }
  0x91   :  { %18213 = dma.done.wait [#allocation11], 2064  }
  0x92   :  { %18214 = vsyncadd [#allocation11], 4294965232 }
  0x93   :  { %18215 = dma.done.wait [#allocation14], 16  }
  0x94   :  { %18216 = vsyncadd [#allocation14], 4294967280  ;;  %v15543_v0 = vld [vmem:[%s19307_s1 + $0x4] ss:$52 sps:$4 sm:$0xff]   ;;  %v15545_v1 = vld [vmem:[%s19307_s1] ss:$52 sps:$4 sm:$0xff]  }
  0x95   :  { %1488 = vmatprep.subr.bf16.mxu0 %v15543_v0  ;;  %v15546_v2 = vld [vmem:[%s19307_s1 + $0x6c] ss:$52 sps:$4 sm:$0xff]   ;;  %v15548_v3 = vld [vmem:[%s19307_s1 + $0x68] ss:$52 sps:$4 sm:$0xff]   ;;  %v15551_v5 = vld [vmem:[%s19307_s1 + $0xd0] ss:$52 sps:$4 sm:$0xff]  }
  0x96   :  { %1489 = vmatpush1.bf16.msra.mxu0 %v15545_v1  ;;  %v15549_v4 = vld [vmem:[%s19307_s1 + $0xd4] ss:$52 sps:$4 sm:$0xff]   ;;  %v15552_v6 = vld [vmem:[%s19307_s1 + $0x13c] ss:$52 sps:$4 sm:$0xff]   ;;  %v15554_v7 = vld [vmem:[%s19307_s1 + $0x138] ss:$52 sps:$4 sm:$0xff]  }
  0x97   :  { %1490 = vmatprep.subr.bf16.mxu0 %v15546_v2  ;;  %v15555_v8 = vld [vmem:[%s19307_s1 + $0x1a4] ss:$52 sps:$4 sm:$0xff]   ;;  %v15557_v9 = vld [vmem:[%s19307_s1 + $0x1a0] ss:$52 sps:$4 sm:$0xff]   ;;  %v15560_v11 = vld [vmem:[%s19307_s1 + $0x208] ss:$52 sps:$4 sm:$0xff]  }
  0x98   :  { %v15558_v10 = vld [vmem:[%s19307_s1 + $0x20c] ss:$52 sps:$4 sm:$0xff]   ;;  %v15561_v12 = vld [vmem:[%s19307_s1 + $0x274] ss:$52 sps:$4 sm:$0xff]   ;;  %v15563_v15 = vld [vmem:[%s19307_s1 + $0x270] ss:$52 sps:$4 sm:$0xff]  }
  0x99   :  { %v136_v13 = vld [vmem:[%s19306_s0 + $0x8] sm:$0xff]  ;;  %v15564_v16 = vld [vmem:[%s19307_s1 + $0x2dc] ss:$52 sps:$4 sm:$0xff]   ;;  %v15567_v18 = vld [vmem:[%s19307_s1 + $0x344] ss:$52 sps:$4 sm:$0xff]   ;;  %vm9709_vm0 = vcmask 261120  }
  0x9a   :  { %1491 = vmatpush1.bf16.msra.mxu0 %v15548_v3  ;;  %v18427_v14 = vpack.c.bf16 %v136_v13, %v136_v13  ;;  %v15566_v17 = vld [vmem:[%s19307_s1 + $0x2d8] ss:$52 sps:$4 sm:$0xff]   ;;  %v15569_v19 = vld [vmem:[%s19307_s1 + $0x340] ss:$52 sps:$4 sm:$0xff]   ;;  %v15572_v21 = vld [vmem:[%s19307_s1 + $0x3a8] ss:$52 sps:$4 sm:$0xff]  }
  0x9b   :  { %1492 = vmatprep.subr.bf16.mxu0 %v15549_v4  ;;  %v15570_v20 = vld [vmem:[%s19307_s1 + $0x3ac] ss:$52 sps:$4 sm:$0xff]   ;;  %v15573_v22 = vld [vmem:[%s19307_s1 + $0x414] ss:$52 sps:$4 sm:$0xff]   ;;  %v15575_v23 = vld [vmem:[%s19307_s1 + $0x410] ss:$52 sps:$4 sm:$0xff]  }
  0x9c   :  { %1520 = vmatprep.mubr.bf16.mxu0 %v18427_v14  ;;  %1725 = vmatprep.mubr.bf16.mxu1 %v18427_v14  ;;  %v15576_v24 = vld [vmem:[%s19307_s1 + $0x47c] ss:$52 sps:$4 sm:$0xff]   ;;  %v15578_v25 = vld [vmem:[%s19307_s1 + $0x478] ss:$52 sps:$4 sm:$0xff]   ;;  %v15581_v27 = vld [vmem:[%s19307_s1 + $0x4e0] ss:$52 sps:$4 sm:$0xff]  }
  0x9d   :  { %v15579_v26 = vld [vmem:[%s19307_s1 + $0x4e4] ss:$52 sps:$4 sm:$0xff]   ;;  %v15582_v28 = vld [vmem:[%s19307_s1 + $0x54c] ss:$52 sps:$4 sm:$0xff]   ;;  %v15584_v29 = vld [vmem:[%s19307_s1 + $0x548] ss:$52 sps:$4 sm:$0xff]  }
  0x9e   :  { %1493 = vmatpush1.bf16.msra.mxu0 %v15551_v5  ;;  %v15585_v30 = vld [vmem:[%s19307_s1 + $0x5b4] ss:$52 sps:$4 sm:$0xff]   ;;  %v15660_v31 = vld [vmem:[%s19307_s1 + $0x2c] ss:$52 sps:$4 sm:$0xff]   ;;  %v15587_v32 = vld [vmem:[%s19307_s1 + $0x5b0] ss:$52 sps:$4 sm:$0xff]  }
  0x9f   :  { %1494 = vmatprep.subr.bf16.mxu0 %v15552_v6  ;;  %v15588_v33 = vld [vmem:[%s19307_s1 + $0x61c] ss:$52 sps:$4 sm:$0xff]   ;;  %1693 = vmatprep.subr.bf16.mxu1 %v15660_v31  ;;  %v15666_v35 = vld [vmem:[%s19307_s1 + $0x94] ss:$52 sps:$4 sm:$0xff]   ;;  %v15590_v36 = vld [vmem:[%s19307_s1 + $0x618] ss:$52 sps:$4 sm:$0xff]  }
  0xa0   :  { %v15665_v34 = vld [vmem:[%s19307_s1 + $0x28] ss:$52 sps:$4 sm:$0xff]   ;;  %v15671_v37 = vld [vmem:[%s19307_s1 + $0x90] ss:$52 sps:$4 sm:$0xff]   ;;  %v15593_v40 = vld [vmem:[%s19307_s1 + $0xc] ss:$52 sps:$4 sm:$0xff]  }
  0xa1   :  { %1694 = vmatpush1.bf16.msra.mxu1 %v15665_v34  ;;  %v15672_v38 = vld [vmem:[%s19307_s1 + $0xfc] ss:$52 sps:$4 sm:$0xff]   ;;  %v135_v39 = vld [vmem:[%s19306_s0] sm:$0xff]  ;;  %v15677_v41 = vld [vmem:[%s19307_s1 + $0xf8] ss:$52 sps:$4 sm:$0xff]   ;;  %vm18233_vm1 = vmmov 0  }
  0xa2   :  { %1495 = vmatpush1.bf16.msra.mxu0 %v15554_v7  ;;  %1695 = vmatprep.subr.bf16.mxu1 %v15666_v35  ;;  %v18512_v42 = vpack.c.bf16 %v135_v39, %v135_v39  ;;  %v15678_v43 = vld [vmem:[%s19307_s1 + $0x164] ss:$52 sps:$4 sm:$0xff]   ;;  %v15591_v44 = vld [vmem:[%s19307_s1 + $0x8] ss:$52 sps:$4 sm:$0xff]   ;;  %v15683_v46 = vld [vmem:[%s19307_s1 + $0x160] ss:$52 sps:$4 sm:$0xff]  }
  0xa3   :  { %1496 = vmatprep.subr.bf16.mxu0 %v15555_v8  ;;  %v15596_v45 = vld [vmem:[%s19307_s1 + $0x74] ss:$52 sps:$4 sm:$0xff]   ;;  %v15684_v47 = vld [vmem:[%s19307_s1 + $0x1cc] ss:$52 sps:$4 sm:$0xff]   ;;  %v15594_v48 = vld [vmem:[%s19307_s1 + $0x70] ss:$52 sps:$4 sm:$0xff]  }
  0xa4   :  { %v15599_v49 = vld [vmem:[%s19307_s1 + $0xdc] ss:$52 sps:$4 sm:$0xff]   ;;  %v15690_v51 = vld [vmem:[%s19307_s1 + $0x234] ss:$52 sps:$4 sm:$0xff]   ;;  %v15597_v52 = vld [vmem:[%s19307_s1 + $0xd8] ss:$52 sps:$4 sm:$0xff]  }
  0xa5   :  { %1696 = vmatpush1.bf16.msra.mxu1 %v15671_v37  ;;  %v15689_v50 = vld [vmem:[%s19307_s1 + $0x1c8] ss:$52 sps:$4 sm:$0xff]   ;;  %v15602_v53 = vld [vmem:[%s19307_s1 + $0x144] ss:$52 sps:$4 sm:$0xff]   ;;  %v15600_v56 = vld [vmem:[%s19307_s1 + $0x140] ss:$52 sps:$4 sm:$0xff]  }
  0xa6   :  { %1497 = vmatpush1.bf16.msra.mxu0 %v15557_v9  ;;  %1697 = vmatprep.subr.bf16.mxu1 %v15672_v38  ;;  %v15695_v54 = vld [vmem:[%s19307_s1 + $0x230] ss:$52 sps:$4 sm:$0xff]   ;;  %v15605_v57 = vld [vmem:[%s19307_s1 + $0x1ac] ss:$52 sps:$4 sm:$0xff]   ;;  %v15603_v60 = vld [vmem:[%s19307_s1 + $0x1a8] ss:$52 sps:$4 sm:$0xff]  }
  0xa7   :  { %1498 = vmatprep.subr.bf16.mxu0 %v15558_v10  ;;  %v15696_v55 = vld [vmem:[%s19307_s1 + $0x29c] ss:$52 sps:$4 sm:$0xff]   ;;  %v15701_v58 = vld [vmem:[%s19307_s1 + $0x298] ss:$52 sps:$4 sm:$0xff]   ;;  %v15608_v61 = vld [vmem:[%s19307_s1 + $0x214] ss:$52 sps:$4 sm:$0xff]  }
  0xa8   :  { %v15702_v59 = vld [vmem:[%s19307_s1 + $0x304] ss:$52 sps:$4 sm:$0xff]   ;;  %v15707_v62 = vld [vmem:[%s19307_s1 + $0x300] ss:$52 sps:$4 sm:$0xff]   ;;  %v15611_v1 = vld [vmem:[%s19307_s1 + $0x27c] ss:$52 sps:$4 sm:$0xff]  }
  0xa9   :  { %1698 = vmatpush1.bf16.msra.mxu1 %v15677_v41  ;;  %v15708_v63 = vld [vmem:[%s19307_s1 + $0x36c] ss:$52 sps:$4 sm:$0xff]   ;;  %v15606_v0 = vld [vmem:[%s19307_s1 + $0x210] ss:$52 sps:$4 sm:$0xff]   ;;  %v15713_v2 = vld [vmem:[%s19307_s1 + $0x368] ss:$52 sps:$4 sm:$0xff]  }
  0xaa   :  { %1499 = vmatpush1.bf16.msra.mxu0 %v15560_v11  ;;  %1699 = vmatprep.subr.bf16.mxu1 %v15678_v43  ;;  %v15714_v3 = vld [vmem:[%s19307_s1 + $0x3d4] ss:$52 sps:$4 sm:$0xff]   ;;  %v15609_v4 = vld [vmem:[%s19307_s1 + $0x278] ss:$52 sps:$4 sm:$0xff]   ;;  %v15719_v6 = vld [vmem:[%s19307_s1 + $0x3d0] ss:$52 sps:$4 sm:$0xff]  }
  0xab   :  { %1500 = vmatprep.subr.bf16.mxu0 %v15561_v12  ;;  %v15614_v5 = vld [vmem:[%s19307_s1 + $0x2e4] ss:$52 sps:$4 sm:$0xff]   ;;  %v15720_v7 = vld [vmem:[%s19307_s1 + $0x43c] ss:$52 sps:$4 sm:$0xff]   ;;  %v15612_v8 = vld [vmem:[%s19307_s1 + $0x2e0] ss:$52 sps:$4 sm:$0xff]  }
  0xac   :  { %v15617_v9 = vld [vmem:[%s19307_s1 + $0x34c] ss:$52 sps:$4 sm:$0xff]   ;;  %v15726_v11 = vld [vmem:[%s19307_s1 + $0x4a4] ss:$52 sps:$4 sm:$0xff]   ;;  %v15615_v12 = vld [vmem:[%s19307_s1 + $0x348] ss:$52 sps:$4 sm:$0xff]  }
  0xad   :  { %1700 = vmatpush1.bf16.msra.mxu1 %v15683_v46  ;;  %v15725_v10 = vld [vmem:[%s19307_s1 + $0x438] ss:$52 sps:$4 sm:$0xff]   ;;  %v15620_v13 = vld [vmem:[%s19307_s1 + $0x3b4] ss:$52 sps:$4 sm:$0xff]   ;;  %v15635_v34 = vld [vmem:[%s19307_s1 + $0x5bc] ss:$52 sps:$4 sm:$0xff]  }
  0xae   :  { %1501 = vmatpush1.bf16.msra.mxu0 %v15563_v15  ;;  %1701 = vmatprep.subr.bf16.mxu1 %v15684_v47  ;;  %v15731_v15 = vld [vmem:[%s19307_s1 + $0x4a0] ss:$52 sps:$4 sm:$0xff]   ;;  %v15633_v37 = vld [vmem:[%s19307_s1 + $0x5b8] ss:$52 sps:$4 sm:$0xff]   ;;  %v15639_v46 = vld [vmem:[%s19307_s1 + $0x10] ss:$52 sps:$4 sm:$0xff]  }
  0xaf   :  { %1502 = vmatprep.subr.bf16.mxu0 %v15564_v16  ;;  %v15732_v16 = vld [vmem:[%s19307_s1 + $0x50c] ss:$52 sps:$4 sm:$0xff]   ;;  %v15638_v38 = vld [vmem:[%s19307_s1 + $0x624] ss:$52 sps:$4 sm:$0xff]   ;;  %v15641_v43 = vld [vmem:[%s19307_s1 + $0x14] ss:$52 sps:$4 sm:$0xff]  }
  0xb0   :  { %v15755_v31 = vld [vmem:[%s19307_s1 + $0x640] ss:$52 sps:$4 sm:$0xff]   ;;  %v15644_v47 = vld [vmem:[%s19307_s1 + $0x7c] ss:$52 sps:$4 sm:$0xff]   ;;  %vm12953_vm2 = vcmask 523264  }
  0xb1   :  { %1702 = vmatpush1.bf16.msra.mxu1 %v15689_v50  ;;  %v15756_v35 = vld [vmem:[#allocation4] ss:$52 sps:$4 sm:$0xff]   ;;  %v15762_v39 = vld [vmem:[#allocation4 + $0x68] ss:$52 sps:$4 sm:$0xff]  }
  0xb2   :  { %1503 = vmatpush1.bf16.msra.mxu0 %v15566_v17  ;;  %1703 = vmatprep.subr.bf16.mxu1 %v15690_v51  ;;  %v15618_v17 = vld [vmem:[%s19307_s1 + $0x3b0] ss:$52 sps:$4 sm:$0xff]   ;;  %v15636_v41 = vld [vmem:[%s19307_s1 + $0x620] ss:$52 sps:$4 sm:$0xff]   ;;  %v15642_v50 = vld [vmem:[%s19307_s1 + $0x78] ss:$52 sps:$4 sm:$0xff]  }
  0xb3   :  { %1504 = vmatprep.subr.bf16.mxu0 %v15567_v18  ;;  %v15623_v18 = vld [vmem:[%s19307_s1 + $0x41c] ss:$52 sps:$4 sm:$0xff]   ;;  %v15647_v51 = vld [vmem:[%s19307_s1 + $0xe4] ss:$52 sps:$4 sm:$0xff]  }
  0xb5   :  { %1704 = vmatpush1.bf16.msra.mxu1 %v15695_v54  ;;  %v15645_v54 = vld [vmem:[%s19307_s1 + $0xe0] ss:$52 sps:$4 sm:$0xff]  }
  0xb6   :  { %1505 = vmatpush1.bf16.msra.mxu0 %v15569_v19  ;;  %1705 = vmatprep.subr.bf16.mxu1 %v15696_v55  ;;  %v15737_v19 = vld [vmem:[%s19307_s1 + $0x508] ss:$52 sps:$4 sm:$0xff]   ;;  %v15650_v55 = vld [vmem:[%s19307_s1 + $0x14c] ss:$52 sps:$4 sm:$0xff]  }
  0xb7   :  { %1506 = vmatprep.subr.bf16.mxu0 %v15570_v20  ;;  %v15738_v20 = vld [vmem:[%s19307_s1 + $0x574] ss:$52 sps:$4 sm:$0xff]  }
  0xb9   :  { %1706 = vmatpush1.bf16.msra.mxu1 %v15701_v58  ;;  %v15648_v58 = vld [vmem:[%s19307_s1 + $0x148] ss:$52 sps:$4 sm:$0xff]  }
  0xba   :  { %1507 = vmatpush1.bf16.msra.mxu0 %v15572_v21  ;;  %1707 = vmatprep.subr.bf16.mxu1 %v15702_v59  ;;  %v15621_v21 = vld [vmem:[%s19307_s1 + $0x418] ss:$52 sps:$4 sm:$0xff]   ;;  %v15653_v59 = vld [vmem:[%s19307_s1 + $0x1b4] ss:$52 sps:$4 sm:$0xff]  }
  0xbb   :  { %1508 = vmatprep.subr.bf16.mxu0 %v15573_v22  ;;  %v15626_v22 = vld [vmem:[%s19307_s1 + $0x484] ss:$52 sps:$4 sm:$0xff]  }
  0xbd   :  { %1708 = vmatpush1.bf16.msra.mxu1 %v15707_v62  ;;  %v15651_v62 = vld [vmem:[%s19307_s1 + $0x1b0] ss:$52 sps:$4 sm:$0xff]  }
  0xbe   :  { %1509 = vmatpush1.bf16.msra.mxu0 %v15575_v23  ;;  %1709 = vmatprep.subr.bf16.mxu1 %v15708_v63  ;;  %v15743_v23 = vld [vmem:[%s19307_s1 + $0x570] ss:$52 sps:$4 sm:$0xff]  }
  0xbf   :  { %1510 = vmatprep.subr.bf16.mxu0 %v15576_v24  ;;  %v15744_v24 = vld [vmem:[%s19307_s1 + $0x5dc] ss:$52 sps:$4 sm:$0xff]  }
  0xc0   :  { %v15656_v63 = vld [vmem:[%s19307_s1 + $0x21c] ss:$52 sps:$4 sm:$0xff]  }
  0xc1   :  { %1710 = vmatpush1.bf16.msra.mxu1 %v15713_v2  ;;  %v15654_v2 = vld [vmem:[%s19307_s1 + $0x218] ss:$52 sps:$4 sm:$0xff]  }
  0xc2   :  { %1511 = vmatpush1.bf16.msra.mxu0 %v15578_v25  ;;  %1711 = vmatprep.subr.bf16.mxu1 %v15714_v3  ;;  %v15624_v25 = vld [vmem:[%s19307_s1 + $0x480] ss:$52 sps:$4 sm:$0xff]   ;;  %v15659_v3 = vld [vmem:[%s19307_s1 + $0x284] ss:$52 sps:$4 sm:$0xff]  }
  0xc3   :  { %1512 = vmatprep.subr.bf16.mxu0 %v15579_v26  ;;  %v15629_v26 = vld [vmem:[%s19307_s1 + $0x4ec] ss:$52 sps:$4 sm:$0xff]  }
  0xc5   :  { %1712 = vmatpush1.bf16.msra.mxu1 %v15719_v6  ;;  %v15657_v6 = vld [vmem:[%s19307_s1 + $0x280] ss:$52 sps:$4 sm:$0xff]  }
  0xc6   :  { %1513 = vmatpush1.bf16.msra.mxu0 %v15581_v27  ;;  %1713 = vmatprep.subr.bf16.mxu1 %v15720_v7  ;;  %v15749_v27 = vld [vmem:[%s19307_s1 + $0x5d8] ss:$52 sps:$4 sm:$0xff]  }
  0xc7   :  { %1514 = vmatprep.subr.bf16.mxu0 %v15582_v28  ;;  %v15750_v28 = vld [vmem:[%s19307_s1 + $0x644] ss:$52 sps:$4 sm:$0xff]   ;;  %v15664_v7 = vld [vmem:[%s19307_s1 + $0x2ec] ss:$52 sps:$4 sm:$0xff]  }
  0xc9   :  { %1714 = vmatpush1.bf16.msra.mxu1 %v15725_v10  ;;  %v15662_v10 = vld [vmem:[%s19307_s1 + $0x2e8] ss:$52 sps:$4 sm:$0xff]  }
  0xca   :  { %1515 = vmatpush1.bf16.msra.mxu0 %v15584_v29  ;;  %1715 = vmatprep.subr.bf16.mxu1 %v15726_v11  ;;  %v15627_v29 = vld [vmem:[%s19307_s1 + $0x4e8] ss:$52 sps:$4 sm:$0xff]  }
  0xcb   :  { %1516 = vmatprep.subr.bf16.mxu0 %v15585_v30  ;;  %v15632_v30 = vld [vmem:[%s19307_s1 + $0x554] ss:$52 sps:$4 sm:$0xff]  }
  0xcc   :  { %v15670_v11 = vld [vmem:[%s19307_s1 + $0x354] ss:$52 sps:$4 sm:$0xff]  }
  0xcd   :  { %1716 = vmatpush1.bf16.msra.mxu1 %v15731_v15  ;;  %v15668_v15 = vld [vmem:[%s19307_s1 + $0x350] ss:$52 sps:$4 sm:$0xff]  }
  0xce   :  { %1517 = vmatpush1.bf16.msra.mxu0 %v15587_v32  ;;  %1717 = vmatprep.subr.bf16.mxu1 %v15732_v16  ;;  %v15758_v32 = vld [vmem:[#allocation4 + $0x4] ss:$52 sps:$4 sm:$0xff]  }
  0xcf   :  { %1518 = vmatprep.subr.bf16.mxu0 %v15588_v33  ;;  %v15630_v33 = vld [vmem:[%s19307_s1 + $0x550] ss:$52 sps:$4 sm:$0xff]  }
  0xd0   :  { %v15676_v16 = vld [vmem:[%s19307_s1 + $0x3bc] ss:$52 sps:$4 sm:$0xff]  }
  0xd1   :  { %1718 = vmatpush1.bf16.msra.mxu1 %v15737_v19  ;;  %v15674_v19 = vld [vmem:[%s19307_s1 + $0x3b8] ss:$52 sps:$4 sm:$0xff]  }
  0xd2   :  { %1519 = vmatpush1.bf16.msra.mxu0 %v15590_v36  ;;  %1719 = vmatprep.subr.bf16.mxu1 %v15738_v20  ;;  %v15764_v36 = vld [vmem:[#allocation4 + $0x6c] ss:$52 sps:$4 sm:$0xff]  }
  0xd3   :  { %1529 = vmatprep.subr.bf16.mxu0 %v15593_v40  ;;  %v15770_v40 = vld [vmem:[#allocation4 + $0xd4] ss:$52 sps:$4 sm:$0xff]  }
  0xd4   :  { %v15682_v20 = vld [vmem:[%s19307_s1 + $0x424] ss:$52 sps:$4 sm:$0xff]  }
  0xd5   :  { %1521 = vmatmul.mubr.bf16.vlgmr.msra.gmra.mrb[0].mxu0 %v18512_v42  ;;  %1720 = vmatpush1.bf16.msra.mxu1 %v15743_v23  ;;  %v15680_v23 = vld [vmem:[%s19307_s1 + $0x420] ss:$52 sps:$4 sm:$0xff]  }
  0xd6   :  { %1530 = vmatpush1.bf16.msra.mxu0 %v15591_v44  ;;  %1561 = vmatprep.mubr.bf16.mxu0 %v18427_v14  ;;  %v15768_v44 = vld [vmem:[#allocation4 + $0xd0] ss:$52 sps:$4 sm:$0xff]  }
  0xd7   :  { %1531 = vmatprep.subr.bf16.mxu0 %v15596_v45  ;;  %1721 = vmatprep.subr.bf16.mxu1 %v15744_v24  ;;  %v15776_v45 = vld [vmem:[#allocation4 + $0x13c] ss:$52 sps:$4 sm:$0xff]  }
  0xd8   :  { %v15688_v24 = vld [vmem:[%s19307_s1 + $0x48c] ss:$52 sps:$4 sm:$0xff]  }
  0xd9   :  { %1722 = vmatpush1.bf16.msra.mxu1 %v15749_v27  ;;  %v15686_v27 = vld [vmem:[%s19307_s1 + $0x488] ss:$52 sps:$4 sm:$0xff]  }
  0xda   :  { %1532 = vmatpush1.bf16.msra.mxu0 %v15594_v48  ;;  %1723 = vmatprep.subr.bf16.mxu1 %v15750_v28  ;;  %v15774_v48 = vld [vmem:[#allocation4 + $0x138] ss:$52 sps:$4 sm:$0xff]  }
  0xdb   :  { %1533 = vmatprep.subr.bf16.mxu0 %v15599_v49  ;;  %v15782_v49 = vld [vmem:[#allocation4 + $0x1a4] ss:$52 sps:$4 sm:$0xff]  }
  0xdc   :  { %v15694_v28 = vld [vmem:[%s19307_s1 + $0x4f4] ss:$52 sps:$4 sm:$0xff]  }
  0xdd   :  { %1724 = vmatpush1.bf16.msra.mxu1 %v15755_v31  ;;  %v15692_v31 = vld [vmem:[%s19307_s1 + $0x4f0] ss:$52 sps:$4 sm:$0xff]  }
  0xde   :  { %1534 = vmatpush1.bf16.msra.mxu0 %v15597_v52  ;;  %9713 = vmatprep.subr.bf16.mxu1 %v15758_v32  ;;  %v15780_v52 = vld [vmem:[#allocation4 + $0x1a0] ss:$52 sps:$4 sm:$0xff]  }
  0xdf   :  { %1535 = vmatprep.subr.bf16.mxu0 %v15602_v53  ;;  %v15788_v53 = vld [vmem:[#allocation4 + $0x20c] ss:$52 sps:$4 sm:$0xff]  }
  0xe0   :  { %1726 = vmatmul.mubr.bf16.vlgmr.msra.gmra.mrb[0].mxu1 %v18512_v42  ;;  %v15700_v32 = vld [vmem:[%s19307_s1 + $0x55c] ss:$52 sps:$4 sm:$0xff]  }
  0xe1   :  { %9714 = vmatpush1.bf16.msra.mxu1 %v15756_v35  ;;  %v15698_v35 = vld [vmem:[%s19307_s1 + $0x558] ss:$52 sps:$4 sm:$0xff]  }
  0xe2   :  { %1536 = vmatpush1.bf16.msra.mxu0 %v15600_v56  ;;  %9715 = vmatprep.subr.bf16.mxu1 %v15764_v36  ;;  %v15786_v56 = vld [vmem:[#allocation4 + $0x208] ss:$52 sps:$4 sm:$0xff]  }
  0xe3   :  { %1537 = vmatprep.subr.bf16.mxu0 %v15605_v57  ;;  %v15794_v57 = vld [vmem:[#allocation4 + $0x274] ss:$52 sps:$4 sm:$0xff]  }
  0xe4   :  { %v15706_v36 = vld [vmem:[%s19307_s1 + $0x5c4] ss:$52 sps:$4 sm:$0xff]  }
  0xe5   :  { %9716 = vmatpush1.bf16.msra.mxu1 %v15762_v39  ;;  %v15710_v39 = vld [vmem:[%s19307_s1 + $0x628] ss:$52 sps:$4 sm:$0xff]  }
  0xe6   :  { %1538 = vmatpush1.bf16.msra.mxu0 %v15603_v60  ;;  %9717 = vmatprep.subr.bf16.mxu1 %v15770_v40  ;;  %v15792_v60 = vld [vmem:[#allocation4 + $0x270] ss:$52 sps:$4 sm:$0xff]  }
  0xe7   :  { %1539 = vmatprep.subr.bf16.mxu0 %v15608_v61  ;;  %v15800_v61 = vld [vmem:[#allocation4 + $0x2dc] ss:$52 sps:$4 sm:$0xff]  }
  0xe8   :  { %v15718_v40 = vld [vmem:[%s19307_s1 + $0x1c] ss:$52 sps:$4 sm:$0xff]  }
  0xe9   :  { %9718 = vmatpush1.bf16.msra.mxu1 %v15768_v44  ;;  %v15722_v44 = vld [vmem:[%s19307_s1 + $0x80] ss:$52 sps:$4 sm:$0xff]  }
  0xea   :  { %1540 = vmatpush1.bf16.msra.mxu0 %v15606_v0  ;;  %9719 = vmatprep.subr.bf16.mxu1 %v15776_v45  ;;  %v15798_v0 = vld [vmem:[#allocation4 + $0x2d8] ss:$52 sps:$4 sm:$0xff]   ;;  %v15730_v45 = vld [vmem:[%s19307_s1 + $0xec] ss:$52 sps:$4 sm:$0xff]  }
  0xeb   :  { %1541 = vmatprep.subr.bf16.mxu0 %v15611_v1  ;;  %v15806_v1 = vld [vmem:[#allocation4 + $0x344] ss:$52 sps:$4 sm:$0xff]  }
  0xed   :  { %9720 = vmatpush1.bf16.msra.mxu1 %v15774_v48  ;;  %v15734_v48 = vld [vmem:[%s19307_s1 + $0x150] ss:$52 sps:$4 sm:$0xff]  }
  0xee   :  { %1542 = vmatpush1.bf16.msra.mxu0 %v15609_v4  ;;  %9721 = vmatprep.subr.bf16.mxu1 %v15782_v49  ;;  %v15804_v4 = vld [vmem:[#allocation4 + $0x340] ss:$52 sps:$4 sm:$0xff]  }
  0xef   :  { %1543 = vmatprep.subr.bf16.mxu0 %v15614_v5  ;;  %v15812_v5 = vld [vmem:[#allocation4 + $0x3ac] ss:$52 sps:$4 sm:$0xff]  }
  0xf0   :  { %v15742_v49 = vld [vmem:[%s19307_s1 + $0x1bc] ss:$52 sps:$4 sm:$0xff]  }
  0xf1   :  { %9722 = vmatpush1.bf16.msra.mxu1 %v15780_v52  ;;  %v15746_v52 = vld [vmem:[%s19307_s1 + $0x220] ss:$52 sps:$4 sm:$0xff]  }
  0xf2   :  { %1544 = vmatpush1.bf16.msra.mxu0 %v15612_v8  ;;  %9723 = vmatprep.subr.bf16.mxu1 %v15788_v53  ;;  %v15810_v8 = vld [vmem:[#allocation4 + $0x3a8] ss:$52 sps:$4 sm:$0xff]  }
  0xf3   :  { %1545 = vmatprep.subr.bf16.mxu0 %v15617_v9  ;;  %v15818_v9 = vld [vmem:[#allocation4 + $0x414] ss:$52 sps:$4 sm:$0xff]  }
  0xf4   :  { %v15754_v53 = vld [vmem:[%s19307_s1 + $0x28c] ss:$52 sps:$4 sm:$0xff]  }
  0xf5   :  { %9724 = vmatpush1.bf16.msra.mxu1 %v15786_v56  ;;  %v15759_v56 = vld [vmem:[%s19307_s1 + $0x2f0] ss:$52 sps:$4 sm:$0xff]  }
  0xf6   :  { %1546 = vmatpush1.bf16.msra.mxu0 %v15615_v12  ;;  %9725 = vmatprep.subr.bf16.mxu1 %v15794_v57  ;;  %v15816_v12 = vld [vmem:[#allocation4 + $0x410] ss:$52 sps:$4 sm:$0xff]  }
  0xf7   :  { %1547 = vmatprep.subr.bf16.mxu0 %v15620_v13  ;;  %v15824_v13 = vld [vmem:[#allocation4 + $0x47c] ss:$52 sps:$4 sm:$0xff]  }
  0xf8   :  { %v15767_v57 = vld [vmem:[%s19307_s1 + $0x35c] ss:$52 sps:$4 sm:$0xff]  }
  0xf9   :  { %9726 = vmatpush1.bf16.msra.mxu1 %v15792_v60  ;;  %v15771_v60 = vld [vmem:[%s19307_s1 + $0x3c0] ss:$52 sps:$4 sm:$0xff]  }
  0xfa   :  { %1548 = vmatpush1.bf16.msra.mxu0 %v15618_v17  ;;  %9727 = vmatprep.subr.bf16.mxu1 %v15800_v61  ;;  %v15822_v17 = vld [vmem:[#allocation4 + $0x478] ss:$52 sps:$4 sm:$0xff]   ;;  %v15779_v61 = vld [vmem:[%s19307_s1 + $0x42c] ss:$52 sps:$4 sm:$0xff]  }
  0xfb   :  { %1549 = vmatprep.subr.bf16.mxu0 %v15623_v18  ;;  %v15830_v18 = vld [vmem:[#allocation4 + $0x4e4] ss:$52 sps:$4 sm:$0xff]  }
  0xfd   :  { %9728 = vmatpush1.bf16.msra.mxu1 %v15798_v0  ;;  %v15783_v0 = vld [vmem:[%s19307_s1 + $0x490] ss:$52 sps:$4 sm:$0xff]  }
  0xfe   :  { %1550 = vmatpush1.bf16.msra.mxu0 %v15621_v21  ;;  %9729 = vmatprep.subr.bf16.mxu1 %v15806_v1  ;;  %v15828_v21 = vld [vmem:[#allocation4 + $0x4e0] ss:$52 sps:$4 sm:$0xff]  }
  0xff   :  { %1551 = vmatprep.subr.bf16.mxu0 %v15626_v22  ;;  %v15836_v22 = vld [vmem:[#allocation4 + $0x54c] ss:$52 sps:$4 sm:$0xff]  }
 0x100   :  { %v15791_v1 = vld [vmem:[%s19307_s1 + $0x4fc] ss:$52 sps:$4 sm:$0xff]  }
 0x101   :  { %9730 = vmatpush1.bf16.msra.mxu1 %v15804_v4  ;;  %v15795_v4 = vld [vmem:[%s19307_s1 + $0x560] ss:$52 sps:$4 sm:$0xff]  }
 0x102   :  { %1552 = vmatpush1.bf16.msra.mxu0 %v15624_v25  ;;  %9731 = vmatprep.subr.bf16.mxu1 %v15812_v5  ;;  %v15834_v25 = vld [vmem:[#allocation4 + $0x548] ss:$52 sps:$4 sm:$0xff]  }
 0x103   :  { %1553 = vmatprep.subr.bf16.mxu0 %v15629_v26  ;;  %v15842_v26 = vld [vmem:[#allocation4 + $0x5b4] ss:$52 sps:$4 sm:$0xff]  }
 0x104   :  { %v15803_v5 = vld [vmem:[%s19307_s1 + $0x5cc] ss:$52 sps:$4 sm:$0xff]  }
 0x105   :  { %9732 = vmatpush1.bf16.msra.mxu1 %v15810_v8  ;;  %v15807_v8 = vld [vmem:[%s19307_s1 + $0x630] ss:$52 sps:$4 sm:$0xff]  }
 0x106   :  { %1554 = vmatpush1.bf16.msra.mxu0 %v15627_v29  ;;  %9733 = vmatprep.subr.bf16.mxu1 %v15818_v9  ;;  %v15840_v29 = vld [vmem:[#allocation4 + $0x5b0] ss:$52 sps:$4 sm:$0xff]   ;;  %v15815_v9 = vld [vmem:[%s19307_s1 + $0x24] ss:$52 sps:$4 sm:$0xff]  }
 0x107   :  { %1555 = vmatprep.subr.bf16.mxu0 %v15632_v30  ;;  %v15848_v30 = vld [vmem:[#allocation4 + $0x61c] ss:$52 sps:$4 sm:$0xff]  }
 0x109   :  { %9734 = vmatpush1.bf16.msra.mxu1 %v15816_v12  ;;  %v15819_v12 = vld [vmem:[%s19307_s1 + $0x88] ss:$52 sps:$4 sm:$0xff]  }
 0x10a   :  { %1556 = vmatpush1.bf16.msra.mxu0 %v15630_v33  ;;  %9735 = vmatprep.subr.bf16.mxu1 %v15824_v13  ;;  %v15846_v33 = vld [vmem:[#allocation4 + $0x618] ss:$52 sps:$4 sm:$0xff]  }
 0x10b   :  { %1557 = vmatprep.subr.bf16.mxu0 %v15635_v34  ;;  %v15854_v34 = vld [vmem:[#allocation4 + $0x684] ss:$52 sps:$4 sm:$0xff]  }
 0x10c   :  { %v15827_v13 = vld [vmem:[%s19307_s1 + $0xf4] ss:$52 sps:$4 sm:$0xff]  }
 0x10d   :  { %9736 = vmatpush1.bf16.msra.mxu1 %v15822_v17  ;;  %v15833_v17 = vld [vmem:[%s19307_s1 + $0x15c] ss:$52 sps:$4 sm:$0xff]  }
 0x10e   :  { %1558 = vmatpush1.bf16.msra.mxu0 %v15633_v37  ;;  %9737 = vmatprep.subr.bf16.mxu1 %v15830_v18  ;;  %v15704_v37 = vld [vmem:[%s19307_s1 + $0x5c0] ss:$52 sps:$4 sm:$0xff]  }
 0x10f   :  { %1559 = vmatprep.subr.bf16.mxu0 %v15638_v38  ;;  %v15712_v38 = vld [vmem:[%s19307_s1 + $0x62c] ss:$52 sps:$4 sm:$0xff]  }
 0x111   :  { %9738 = vmatpush1.bf16.msra.mxu1 %v15828_v21  ;;  %v15837_v21 = vld [vmem:[%s19307_s1 + $0x1c0] ss:$52 sps:$4 sm:$0xff]  }
 0x112   :  { %1560 = vmatpush1.bf16.msra.mxu0 %v15636_v41  ;;  %9739 = vmatprep.subr.bf16.mxu1 %v15836_v22  ;;  %v15716_v41 = vld [vmem:[%s19307_s1 + $0x18] ss:$52 sps:$4 sm:$0xff]  }
 0x113   :  { %1570 = vmatprep.subr.bf16.mxu0 %v15641_v43  ;;  %v15724_v43 = vld [vmem:[%s19307_s1 + $0x84] ss:$52 sps:$4 sm:$0xff]  }
 0x115   :  { %1562 = vmatmul.mubr.bf16.vlgmr.msra.gmra.mrb[4].mxu0 %v18512_v42  ;;  %9740 = vmatpush1.bf16.msra.mxu1 %v15834_v25  ;;  %v15845_v25 = vld [vmem:[%s19307_s1 + $0x22c] ss:$52 sps:$4 sm:$0xff]  }
 0x116   :  { %1571 = vmatpush1.bf16.msra.mxu0 %v15639_v46  ;;  %1602 = vmatprep.mubr.bf16.mxu0 %v18427_v14  ;;  %v15728_v46 = vld [vmem:[%s19307_s1 + $0xe8] ss:$52 sps:$4 sm:$0xff]  }
 0x117   :  { %1572 = vmatprep.subr.bf16.mxu0 %v15644_v47  ;;  %9741 = vmatprep.subr.bf16.mxu1 %v15842_v26  ;;  %v15736_v47 = vld [vmem:[%s19307_s1 + $0x154] ss:$52 sps:$4 sm:$0xff]  }
 0x118   :  { %v15843_v26 = vld [vmem:[%s19307_s1 + $0x228] ss:$52 sps:$4 sm:$0xff]  }
 0x119   :  { %9742 = vmatpush1.bf16.msra.mxu1 %v15840_v29  ;;  %v15851_v29 = vld [vmem:[%s19307_s1 + $0x294] ss:$52 sps:$4 sm:$0xff]  }
 0x11a   :  { %1573 = vmatpush1.bf16.msra.mxu0 %v15642_v50  ;;  %9743 = vmatprep.subr.bf16.mxu1 %v15848_v30  ;;  %v15740_v50 = vld [vmem:[%s19307_s1 + $0x1b8] ss:$52 sps:$4 sm:$0xff]  }
 0x11b   :  { %1574 = vmatprep.subr.bf16.mxu0 %v15647_v51  ;;  %v15748_v51 = vld [vmem:[%s19307_s1 + $0x224] ss:$52 sps:$4 sm:$0xff]  }
 0x11d   :  { %9744 = vmatpush1.bf16.msra.mxu1 %v15846_v33 }
 0x11e   :  { %1575 = vmatpush1.bf16.msra.mxu0 %v15645_v54  ;;  %9754 = vmatprep.subr.bf16.mxu1 %v15854_v34  ;;  %v15752_v54 = vld [vmem:[%s19307_s1 + $0x288] ss:$52 sps:$4 sm:$0xff]  }
 0x11f   :  { %1576 = vmatprep.subr.bf16.mxu0 %v15650_v55  ;;  %v15761_v55 = vld [vmem:[%s19307_s1 + $0x2f4] ss:$52 sps:$4 sm:$0xff]  }
 0x122   :  { %1577 = vmatpush1.bf16.msra.mxu0 %v15648_v58  ;;  %v15765_v58 = vld [vmem:[%s19307_s1 + $0x358] ss:$52 sps:$4 sm:$0xff]  }
 0x123   :  { %1578 = vmatprep.subr.bf16.mxu0 %v15653_v59  ;;  %v15773_v59 = vld [vmem:[%s19307_s1 + $0x3c4] ss:$52 sps:$4 sm:$0xff]  }
 0x126   :  { %1579 = vmatpush1.bf16.msra.mxu0 %v15651_v62  ;;  %v15777_v62 = vld [vmem:[%s19307_s1 + $0x428] ss:$52 sps:$4 sm:$0xff]  }
 0x127   :  { %1580 = vmatprep.subr.bf16.mxu0 %v15656_v63  ;;  %v15785_v63 = vld [vmem:[%s19307_s1 + $0x494] ss:$52 sps:$4 sm:$0xff]  }
 0x12a   :  { %1581 = vmatpush1.bf16.msra.mxu0 %v15654_v2  ;;  %v15789_v2 = vld [vmem:[%s19307_s1 + $0x4f8] ss:$52 sps:$4 sm:$0xff]  }
 0x12b   :  { %1582 = vmatprep.subr.bf16.mxu0 %v15659_v3  ;;  %v15797_v3 = vld [vmem:[%s19307_s1 + $0x564] ss:$52 sps:$4 sm:$0xff]  }
 0x12e   :  { %1583 = vmatpush1.bf16.msra.mxu0 %v15657_v6  ;;  %v15801_v6 = vld [vmem:[%s19307_s1 + $0x5c8] ss:$52 sps:$4 sm:$0xff]  }
 0x12f   :  { %1584 = vmatprep.subr.bf16.mxu0 %v15664_v7  ;;  %v15809_v7 = vld [vmem:[%s19307_s1 + $0x634] ss:$52 sps:$4 sm:$0xff]  }
 0x132   :  { %1585 = vmatpush1.bf16.msra.mxu0 %v15662_v10  ;;  %v15813_v10 = vld [vmem:[%s19307_s1 + $0x20] ss:$52 sps:$4 sm:$0xff]  }
 0x133   :  { %1586 = vmatprep.subr.bf16.mxu0 %v15670_v11  ;;  %v15821_v11 = vld [vmem:[%s19307_s1 + $0x8c] ss:$52 sps:$4 sm:$0xff]  }
 0x136   :  { %1587 = vmatpush1.bf16.msra.mxu0 %v15668_v15  ;;  %v367_v15 = vlaneseq }
 0x137   :  { %1588 = vmatprep.subr.bf16.mxu0 %v15676_v16  ;;  %v15825_v16 = vld [vmem:[%s19307_s1 + $0xf0] ss:$52 sps:$4 sm:$0xff]  }
 0x138   :  { %v18907_v18 = vshrl.u32 %v367_v15, 7  ;;  %v15909_v15 = vld [vmem:[%s19307_s1 + $0x370] ss:$52 sps:$4 sm:$0xff]  }
 0x13a   :  { %1589 = vmatpush1.bf16.msra.mxu0 %v15674_v19  ;;  %v15831_v19 = vld [vmem:[%s19307_s1 + $0x158] ss:$52 sps:$4 sm:$0xff]   ;;  %v18919_v22 = vsub.s32 0, %v18907_v18 }
 0x13b   :  { %1590 = vmatprep.subr.bf16.mxu0 %v15682_v20  ;;  %v15839_v20 = vld [vmem:[%s19307_s1 + $0x1c4] ss:$52 sps:$4 sm:$0xff]  }
 0x13e   :  { %1591 = vmatpush1.bf16.msra.mxu0 %v15680_v23  ;;  %v18921_v23 = vld [vmem:[#allocation2] sm:$0xff] }
 0x13f   :  { %1592 = vmatprep.subr.bf16.mxu0 %v15688_v24  ;;  %v18924_v24 = vsub.s32 1, %v18907_v18 }
 0x142   :  { %1593 = vmatpush1.bf16.msra.mxu0 %v15686_v27  ;;  %v370_v27 = vrot.slane %v18921_v23, %v18919_v22 }
 0x143   :  { %1594 = vmatprep.subr.bf16.mxu0 %v15694_v28  ;;  %v374_v28 = vrot.slane %v18921_v23, %v18924_v24 }
 0x146   :  { %1595 = vmatpush1.bf16.msra.mxu0 %v15692_v31  ;;  %v15849_v31 = vld [vmem:[%s19307_s1 + $0x290] ss:$52 sps:$4 sm:$0xff]  }
 0x147   :  { %1596 = vmatprep.subr.bf16.mxu0 %v15700_v32 }
 0x14a   :  { %1597 = vmatpush1.bf16.msra.mxu0 %v15698_v35 }
 0x14b   :  { %1598 = vmatprep.subr.bf16.mxu0 %v15706_v36 }
 0x14e   :  { %1599 = vmatpush1.bf16.msra.mxu0 %v15704_v37 }
 0x14f   :  { %1600 = vmatprep.subr.bf16.mxu0 %v15712_v38  ;;  %v15857_v38 = vld [vmem:[%s19307_s1 + $0x2fc] ss:$52 sps:$4 sm:$0xff]  }
 0x152   :  { %1601 = vmatpush1.bf16.msra.mxu0 %v15710_v39 }
 0x153   :  { %1611 = vmatprep.subr.bf16.mxu0 %v15718_v40  ;;  %v15852_v40 = vld [vmem:[#allocation4 + $0x680] ss:$52 sps:$4 sm:$0xff]  }
 0x155   :  { %1603 = vmatmul.mubr.bf16.vlgmr.msra.gmra.mrb[8].mxu0 %v18512_v42 }
 0x156   :  { %1612 = vmatpush1.bf16.msra.mxu0 %v15716_v41  ;;  %1643 = vmatprep.mubr.bf16.mxu0 %v18427_v14  ;;  %v15855_v41 = vld [vmem:[%s19307_s1 + $0x2f8] ss:$52 sps:$4 sm:$0xff]  }
 0x157   :  { %1613 = vmatprep.subr.bf16.mxu0 %v15724_v43 }
 0x15a   :  { %1614 = vmatpush1.bf16.msra.mxu0 %v15722_v44  ;;  %v15860_v44 = vld [vmem:[#allocation4 + $0x6ec] ss:$52 sps:$4 sm:$0xff]  }
 0x15b   :  { %1615 = vmatprep.subr.bf16.mxu0 %v15730_v45 }
 0x15e   :  { %1616 = vmatpush1.bf16.msra.mxu0 %v15728_v46  ;;  %v15863_v46 = vld [vmem:[%s19307_s1 + $0x364] ss:$52 sps:$4 sm:$0xff]  }
 0x15f   :  { %1617 = vmatprep.subr.bf16.mxu0 %v15736_v47  ;;  %v15858_v47 = vld [vmem:[#allocation4 + $0x6e8] ss:$52 sps:$4 sm:$0xff]  }
 0x162   :  { %1618 = vmatpush1.bf16.msra.mxu0 %v15734_v48  ;;  %v15861_v48 = vld [vmem:[%s19307_s1 + $0x360] ss:$52 sps:$4 sm:$0xff]  }
 0x163   :  { %1619 = vmatprep.subr.bf16.mxu0 %v15742_v49  ;;  %v15866_v49 = vld [vmem:[#allocation4 + $0x754] ss:$52 sps:$4 sm:$0xff]  }
 0x166   :  { %1620 = vmatpush1.bf16.msra.mxu0 %v15740_v50  ;;  %v15869_v50 = vld [vmem:[%s19307_s1 + $0x3cc] ss:$52 sps:$4 sm:$0xff]  }
 0x167   :  { %1621 = vmatprep.subr.bf16.mxu0 %v15748_v51  ;;  %v15864_v51 = vld [vmem:[#allocation4 + $0x750] ss:$52 sps:$4 sm:$0xff]  }
 0x16a   :  { %1622 = vmatpush1.bf16.msra.mxu0 %v15746_v52  ;;  %v15867_v52 = vld [vmem:[%s19307_s1 + $0x3c8] ss:$52 sps:$4 sm:$0xff]  }
 0x16b   :  { %1623 = vmatprep.subr.bf16.mxu0 %v15754_v53  ;;  %v15872_v53 = vld [vmem:[#allocation4 + $0x7bc] ss:$52 sps:$4 sm:$0xff]  }
 0x16e   :  { %1624 = vmatpush1.bf16.msra.mxu0 %v15752_v54  ;;  %v15875_v54 = vld [vmem:[%s19307_s1 + $0x434] ss:$52 sps:$4 sm:$0xff]  }
 0x16f   :  { %1625 = vmatprep.subr.bf16.mxu0 %v15761_v55  ;;  %v15870_v55 = vld [vmem:[#allocation4 + $0x7b8] ss:$52 sps:$4 sm:$0xff]  }
 0x172   :  { %1626 = vmatpush1.bf16.msra.mxu0 %v15759_v56  ;;  %v15873_v56 = vld [vmem:[%s19307_s1 + $0x430] ss:$52 sps:$4 sm:$0xff]  }
 0x173   :  { %1627 = vmatprep.subr.bf16.mxu0 %v15767_v57  ;;  %v15878_v57 = vld [vmem:[#allocation4 + $0x824] ss:$52 sps:$4 sm:$0xff]  }
 0x176   :  { %1628 = vmatpush1.bf16.msra.mxu0 %v15765_v58  ;;  %v15881_v58 = vld [vmem:[%s19307_s1 + $0x49c] ss:$52 sps:$4 sm:$0xff]  }
 0x177   :  { %1629 = vmatprep.subr.bf16.mxu0 %v15773_v59  ;;  %v15876_v59 = vld [vmem:[#allocation4 + $0x820] ss:$52 sps:$4 sm:$0xff]  }
 0x17a   :  { %1630 = vmatpush1.bf16.msra.mxu0 %v15771_v60  ;;  %v15879_v60 = vld [vmem:[%s19307_s1 + $0x498] ss:$52 sps:$4 sm:$0xff]  }
 0x17b   :  { %1631 = vmatprep.subr.bf16.mxu0 %v15779_v61  ;;  %v15884_v61 = vld [vmem:[#allocation4 + $0x88c] ss:$52 sps:$4 sm:$0xff]  }
 0x17e   :  { %1632 = vmatpush1.bf16.msra.mxu0 %v15777_v62  ;;  %v15887_v62 = vld [vmem:[%s19307_s1 + $0x504] ss:$52 sps:$4 sm:$0xff]  }
 0x17f   :  { %1633 = vmatprep.subr.bf16.mxu0 %v15785_v63  ;;  %v15882_v63 = vld [vmem:[#allocation4 + $0x888] ss:$52 sps:$4 sm:$0xff]  }
 0x182   :  { %1634 = vmatpush1.bf16.msra.mxu0 %v15783_v0  ;;  %v15885_v0 = vld [vmem:[%s19307_s1 + $0x500] ss:$52 sps:$4 sm:$0xff]  }
 0x183   :  { %1635 = vmatprep.subr.bf16.mxu0 %v15791_v1  ;;  %v15890_v1 = vld [vmem:[#allocation4 + $0x8f4] ss:$52 sps:$4 sm:$0xff]  }
 0x186   :  { %1636 = vmatpush1.bf16.msra.mxu0 %v15789_v2  ;;  %v15893_v2 = vld [vmem:[%s19307_s1 + $0x56c] ss:$52 sps:$4 sm:$0xff]  }
 0x187   :  { %1637 = vmatprep.subr.bf16.mxu0 %v15797_v3  ;;  %v15888_v3 = vld [vmem:[#allocation4 + $0x8f0] ss:$52 sps:$4 sm:$0xff]  }
 0x18a   :  { %1638 = vmatpush1.bf16.msra.mxu0 %v15795_v4  ;;  %v15891_v4 = vld [vmem:[%s19307_s1 + $0x568] ss:$52 sps:$4 sm:$0xff]  }
 0x18b   :  { %1639 = vmatprep.subr.bf16.mxu0 %v15803_v5  ;;  %v15896_v5 = vld [vmem:[#allocation4 + $0x95c] ss:$52 sps:$4 sm:$0xff]  }
 0x18e   :  { %1640 = vmatpush1.bf16.msra.mxu0 %v15801_v6  ;;  %v15899_v6 = vld [vmem:[%s19307_s1 + $0x5d4] ss:$52 sps:$4 sm:$0xff]  }
 0x18f   :  { %1641 = vmatprep.subr.bf16.mxu0 %v15809_v7  ;;  %v15894_v7 = vld [vmem:[#allocation4 + $0x958] ss:$52 sps:$4 sm:$0xff]  }
 0x192   :  { %1642 = vmatpush1.bf16.msra.mxu0 %v15807_v8  ;;  %v15897_v8 = vld [vmem:[%s19307_s1 + $0x5d0] ss:$52 sps:$4 sm:$0xff]  }
 0x193   :  { %1652 = vmatprep.subr.bf16.mxu0 %v15815_v9  ;;  %v15902_v9 = vld [vmem:[#allocation4 + $0x9c4] ss:$52 sps:$4 sm:$0xff]  }
 0x195   :  { %1644 = vmatmul.mubr.bf16.vlgmr.msra.gmra.mrb[12].mxu0 %v18512_v42 }
 0x196   :  { %1653 = vmatpush1.bf16.msra.mxu0 %v15813_v10  ;;  %1684 = vmatprep.mubr.bf16.mxu0 %v18427_v14  ;;  %v15905_v10 = vld [vmem:[%s19307_s1 + $0x63c] ss:$52 sps:$4 sm:$0xff]  }
 0x197   :  { %1654 = vmatprep.subr.bf16.mxu0 %v15821_v11  ;;  %v15900_v11 = vld [vmem:[#allocation4 + $0x9c0] ss:$52 sps:$4 sm:$0xff]  }
 0x19a   :  { %1655 = vmatpush1.bf16.msra.mxu0 %v15819_v12  ;;  %v15903_v12 = vld [vmem:[%s19307_s1 + $0x638] ss:$52 sps:$4 sm:$0xff]  }
 0x19b   :  { %1656 = vmatprep.subr.bf16.mxu0 %v15827_v13  ;;  %v15908_v13 = vld [vmem:[#allocation4 + $0xa2c] ss:$52 sps:$4 sm:$0xff]  }
 0x19e   :  { %1657 = vmatpush1.bf16.msra.mxu0 %v15825_v16  ;;  %v15906_v16 = vld [vmem:[#allocation4 + $0xa28] ss:$52 sps:$4 sm:$0xff]  }
 0x19f   :  { %1658 = vmatprep.subr.bf16.mxu0 %v15833_v17  ;;  %v15910_v17 = vld [vmem:[%s19307_s1 + $0x30] ss:$52 sps:$4 sm:$0xff]  }
 0x1a2   :  { %1659 = vmatpush1.bf16.msra.mxu0 %v15831_v19  ;;  %v15913_v19 = vld [vmem:[#allocation4 + $0xa94] ss:$52 sps:$4 sm:$0xff]  }
 0x1a3   :  { %1660 = vmatprep.subr.bf16.mxu0 %v15839_v20  ;;  %v15914_v20 = vld [vmem:[%s19307_s1 + $0x3d8] ss:$52 sps:$4 sm:$0xff]  }
 0x1a6   :  { %1661 = vmatpush1.bf16.msra.mxu0 %v15837_v21  ;;  %v15911_v21 = vld [vmem:[#allocation4 + $0xa90] ss:$52 sps:$4 sm:$0xff]  }
 0x1a7   :  { %1662 = vmatprep.subr.bf16.mxu0 %v15845_v25  ;;  %v15915_v25 = vld [vmem:[%s19307_s1 + $0x98] ss:$52 sps:$4 sm:$0xff]  }
 0x1a8   :  { %v1522_v30 = vpop.f32.mrb[0].mxu0 }
 0x1a9   :  { %v1523_v32 = vadd.f32 %v1522_v30, %v370_v27  ;;  %v1524_v33 = vpop.f32.mrb[1].mxu0  ;;  %v15919_v27 = vld [vmem:[%s19307_s1 + $0x440] ss:$52 sps:$4 sm:$0xff]  }
 0x1aa   :  { %v1525_v34 = vadd.f32 %v1524_v33, %v374_v28  ;;  %v1526_v35 = vpop.f32.mrb[2].mxu0  ;;  %1663 = vmatpush1.bf16.msra.mxu0 %v15843_v26  ;;  %v15918_v26 = vld [vmem:[#allocation4 + $0xafc] ss:$52 sps:$4 sm:$0xff]   ;;  %v15916_v28 = vld [vmem:[#allocation4 + $0xaf8] ss:$52 sps:$4 sm:$0xff]  }
 0x1ab   :  { %v1774_v36 = vmax.f32 %v1523_v32, 0.0  ;;  %v1527_v37 = vpop.f32.mrb[3].mxu0  ;;  %1664 = vmatprep.subr.bf16.mxu0 %v15851_v29  ;;  %v15920_v29 = vld [vmem:[%s19307_s1 + $0x100] ss:$52 sps:$4 sm:$0xff]   ;;  %v15925_v33 = vld [vmem:[%s19307_s1 + $0x168] ss:$52 sps:$4 sm:$0xff]  }
 0x1ac   :  { %v1775_v39 = vmax.f32 %v1525_v34, 0.0  ;;  %v15923_v30 = vld [vmem:[#allocation4 + $0xb64] ss:$52 sps:$4 sm:$0xff]   ;;  %v15921_v32 = vld [vmem:[#allocation4 + $0xb60] ss:$52 sps:$4 sm:$0xff]   ;;  %v19035_v37 = vsub.s32 2, %v18907_v18 }
 0x1ad   :  { %v18948_v43 = vpack.c.bf16 %v1774_v36, %v1774_v36  ;;  %v15928_v34 = vld [vmem:[#allocation4 + $0xbcc] ss:$52 sps:$4 sm:$0xff]   ;;  %v15926_v35 = vld [vmem:[#allocation4 + $0xbc8] ss:$52 sps:$4 sm:$0xff]  }
 0x1ae   :  { %v18950_v45 = vpack.c.bf16 %v1775_v39, %v1775_v39  ;;  %1665 = vmatpush1.bf16.msra.mxu0 %v15849_v31  ;;  %v15924_v31 = vld [vmem:[%s19307_s1 + $0x4a8] ss:$52 sps:$4 sm:$0xff]   ;;  %v15930_v36 = vld [vmem:[%s19307_s1 + $0x1d0] ss:$52 sps:$4 sm:$0xff]   ;;  %v19038_v39 = vsub.s32 3, %v18907_v18 }
 0x1af   :  { %1666 = vmatprep.subr.bf16.mxu0 %v15857_v38  ;;  %v15933_v38 = vld [vmem:[#allocation4 + $0xc34] ss:$52 sps:$4 sm:$0xff]  }
 0x1b0   :  { %9745 = vmatprep.mubr.bf16.mxu1 %v18950_v45 }
 0x1b1   :  { %9746 = vmatmul.mubr.bf16.vlgmr.msra.gmra.mrb[4].mxu1 %v18948_v43 }
 0x1b2   :  { %9755 = vmatpush1.bf16.msra.mxu1 %v15852_v40  ;;  %1667 = vmatpush1.bf16.msra.mxu0 %v15855_v41  ;;  %v15934_v40 = vld [vmem:[%s19307_s1 + $0x578] ss:$52 sps:$4 sm:$0xff]   ;;  %v15931_v41 = vld [vmem:[#allocation4 + $0xc30] ss:$52 sps:$4 sm:$0xff]  }
 0x1b3   :  { %9756 = vmatprep.subr.bf16.mxu1 %v15860_v44  ;;  %1668 = vmatprep.subr.bf16.mxu0 %v15863_v46  ;;  %v15935_v44 = vld [vmem:[%s19307_s1 + $0x238] ss:$52 sps:$4 sm:$0xff]   ;;  %v378_v46 = vrot.slane %v18921_v23, %v19035_v37 }
 0x1b6   :  { %9757 = vmatpush1.bf16.msra.mxu1 %v15858_v47  ;;  %1669 = vmatpush1.bf16.msra.mxu0 %v15861_v48  ;;  %v15938_v47 = vld [vmem:[#allocation4 + $0xc9c] ss:$52 sps:$4 sm:$0xff]   ;;  %v382_v48 = vrot.slane %v18921_v23, %v19038_v39 }
 0x1b7   :  { %9758 = vmatprep.subr.bf16.mxu1 %v15866_v49  ;;  %1670 = vmatprep.subr.bf16.mxu0 %v15869_v50  ;;  %v15939_v49 = vld [vmem:[%s19307_s1 + $0x5e0] ss:$52 sps:$4 sm:$0xff]  }
 0x1ba   :  { %9759 = vmatpush1.bf16.msra.mxu1 %v15864_v51  ;;  %1671 = vmatpush1.bf16.msra.mxu0 %v15867_v52  ;;  %v15936_v51 = vld [vmem:[#allocation4 + $0xc98] ss:$52 sps:$4 sm:$0xff]   ;;  %v15940_v52 = vld [vmem:[%s19307_s1 + $0x2a0] ss:$52 sps:$4 sm:$0xff]  }
 0x1bb   :  { %9760 = vmatprep.subr.bf16.mxu1 %v15872_v53  ;;  %1672 = vmatprep.subr.bf16.mxu0 %v15875_v54 }
 0x1be   :  { %9761 = vmatpush1.bf16.msra.mxu1 %v15870_v55  ;;  %1673 = vmatpush1.bf16.msra.mxu0 %v15873_v56  ;;  %v15943_v55 = vld [vmem:[#allocation4 + $0xd04] ss:$52 sps:$4 sm:$0xff]  }
 0x1bf   :  { %9762 = vmatprep.subr.bf16.mxu1 %v15878_v57  ;;  %1674 = vmatprep.subr.bf16.mxu0 %v15881_v58 }
 0x1c2   :  { %9763 = vmatpush1.bf16.msra.mxu1 %v15876_v59  ;;  %1675 = vmatpush1.bf16.msra.mxu0 %v15879_v60  ;;  %v15944_v59 = vld [vmem:[%s19307_s1 + $0x648] ss:$52 sps:$4 sm:$0xff]  }
 0x1c3   :  { %9764 = vmatprep.subr.bf16.mxu1 %v15884_v61  ;;  %1676 = vmatprep.subr.bf16.mxu0 %v15887_v62  ;;  %v15941_v61 = vld [vmem:[#allocation4 + $0xd00] ss:$52 sps:$4 sm:$0xff]   ;;  %v15945_v62 = vld [vmem:[%s19307_s1 + $0x308] ss:$52 sps:$4 sm:$0xff]  }
 0x1c6   :  { %9765 = vmatpush1.bf16.msra.mxu1 %v15882_v63  ;;  %1677 = vmatpush1.bf16.msra.mxu0 %v15885_v0 }
 0x1c7   :  { %9766 = vmatprep.subr.bf16.mxu1 %v15890_v1  ;;  %1678 = vmatprep.subr.bf16.mxu0 %v15893_v2  ;;  %v15948_v1 = vld [vmem:[#allocation4 + $0xd6c] ss:$52 sps:$4 sm:$0xff]   ;;  %v15946_v2 = vld [vmem:[#allocation4 + $0xd68] ss:$52 sps:$4 sm:$0xff]  }
 0x1ca   :  { %9767 = vmatpush1.bf16.msra.mxu1 %v15888_v3  ;;  %1679 = vmatpush1.bf16.msra.mxu0 %v15891_v4  ;;  %v15951_v3 = vld [vmem:[#allocation4 + $0xdd4] ss:$52 sps:$4 sm:$0xff]   ;;  %v15949_v4 = vld [vmem:[#allocation4 + $0xdd0] ss:$52 sps:$4 sm:$0xff]  }
 0x1cb   :  { %9768 = vmatprep.subr.bf16.mxu1 %v15896_v5  ;;  %1680 = vmatprep.subr.bf16.mxu0 %v15899_v6  ;;  %v15954_v5 = vld [vmem:[#allocation4 + $0xe3c] ss:$52 sps:$4 sm:$0xff]   ;;  %v15952_v6 = vld [vmem:[#allocation4 + $0xe38] ss:$52 sps:$4 sm:$0xff]  }
 0x1ce   :  { %9769 = vmatpush1.bf16.msra.mxu1 %v15894_v7  ;;  %1681 = vmatpush1.bf16.msra.mxu0 %v15897_v8  ;;  %v15957_v7 = vld [vmem:[#allocation4 + $0xea4] ss:$52 sps:$4 sm:$0xff]   ;;  %v15955_v8 = vld [vmem:[#allocation4 + $0xea0] ss:$52 sps:$4 sm:$0xff]  }
 0x1cf   :  { %9770 = vmatprep.subr.bf16.mxu1 %v15902_v9  ;;  %1682 = vmatprep.subr.bf16.mxu0 %v15905_v10  ;;  %v15960_v9 = vld [vmem:[#allocation4 + $0xf0c] ss:$52 sps:$4 sm:$0xff]   ;;  %v15958_v10 = vld [vmem:[#allocation4 + $0xf08] ss:$52 sps:$4 sm:$0xff]  }
 0x1d2   :  { %9771 = vmatpush1.bf16.msra.mxu1 %v15900_v11  ;;  %1683 = vmatpush1.bf16.msra.mxu0 %v15903_v12  ;;  %v15963_v11 = vld [vmem:[#allocation4 + $0xf74] ss:$52 sps:$4 sm:$0xff]   ;;  %v15961_v12 = vld [vmem:[#allocation4 + $0xf70] ss:$52 sps:$4 sm:$0xff]  }
 0x1d3   :  { %9772 = vmatprep.subr.bf16.mxu1 %v15908_v13  ;;  %15159 = vmatprep.subr.bf16.mxu0 %v15909_v15  ;;  %v15966_v13 = vld [vmem:[#allocation4 + $0xfdc] ss:$52 sps:$4 sm:$0xff]   ;;  %v15969_v15 = vld [vmem:[#allocation4 + $0x1044] ss:$52 sps:$4 sm:$0xff]  }
 0x1d5   :  { %1685 = vmatmul.mubr.bf16.vlgmr.msra.gmra.mrb[16].mxu0 %v18512_v42 }
 0x1d6   :  { %9773 = vmatpush1.bf16.msra.mxu1 %v15906_v16  ;;  %15160 = vmatpush3.bf16.msra.mxu0 %v15910_v17  ;;  %v15967_v16 = vld [vmem:[#allocation4 + $0x1040] ss:$52 sps:$4 sm:$0xff]  }
 0x1d7   :  { %9774 = vmatprep.subr.bf16.mxu1 %v15913_v19  ;;  %15161 = vmatprep.subr.bf16.mxu0 %v15914_v20  ;;  %v15972_v17 = vld [vmem:[#allocation4 + $0x10ac] ss:$52 sps:$4 sm:$0xff]   ;;  %v15970_v19 = vld [vmem:[#allocation4 + $0x10a8] ss:$52 sps:$4 sm:$0xff]  }
 0x1d8   :  { %1766 = vmatprep.mubr.bf16.mxu0 %v18427_v14  ;;  %v15929_v14 = vld [vmem:[%s19307_s1 + $0x510] ss:$52 sps:$4 sm:$0xff]  }
 0x1d9   :  { %v15975_v20 = vld [vmem:[#allocation4 + $0x1114] ss:$52 sps:$4 sm:$0xff]  }
 0x1da   :  { %9775 = vmatpush1.bf16.msra.mxu1 %v15911_v21  ;;  %15162 = vmatpush3.bf16.msra.mxu0 %v15915_v25  ;;  %v15973_v21 = vld [vmem:[#allocation4 + $0x1110] ss:$52 sps:$4 sm:$0xff]  }
 0x1db   :  { %9776 = vmatprep.subr.bf16.mxu1 %v15918_v26  ;;  %15163 = vmatprep.subr.bf16.mxu0 %v15919_v27  ;;  %v15978_v25 = vld [vmem:[#allocation4 + $0x117c] ss:$52 sps:$4 sm:$0xff]   ;;  %v15976_v26 = vld [vmem:[#allocation4 + $0x1178] ss:$52 sps:$4 sm:$0xff]  }
 0x1dc   :  { %v15981_v27 = vld [vmem:[#allocation4 + $0x11e4] ss:$52 sps:$4 sm:$0xff]  }
 0x1de   :  { %9777 = vmatpush1.bf16.msra.mxu1 %v15916_v28  ;;  %15164 = vmatpush3.bf16.msra.mxu0 %v15920_v29  ;;  %v15979_v28 = vld [vmem:[#allocation4 + $0x11e0] ss:$52 sps:$4 sm:$0xff]  }
 0x1df   :  { %9778 = vmatprep.subr.bf16.mxu1 %v15923_v30  ;;  %15165 = vmatprep.subr.bf16.mxu0 %v15924_v31  ;;  %v15984_v29 = vld [vmem:[#allocation4 + $0x124c] ss:$52 sps:$4 sm:$0xff]   ;;  %v19070_v30 = vsub.s32 4, %v18907_v18  ;;  %v15982_v31 = vld [vmem:[#allocation4 + $0x1248] ss:$52 sps:$4 sm:$0xff]  }
 0x1e2   :  { %9779 = vmatpush1.bf16.msra.mxu1 %v15921_v32  ;;  %15166 = vmatpush3.bf16.msra.mxu0 %v15925_v33  ;;  %v15987_v32 = vld [vmem:[#allocation4 + $0x12b4] ss:$52 sps:$4 sm:$0xff]   ;;  %v389_v33 = vsub.s32 5, %v18907_v18 }
 0x1e3   :  { %9780 = vmatprep.subr.bf16.mxu1 %v15928_v34  ;;  %15167 = vmatprep.subr.bf16.mxu0 %v15929_v14  ;;  %v19073_v34 = vld [vmem:[#allocation2] sm:$0xff] }
 0x1e4   :  { %v386_v14 = vrot.slane %v19073_v34, %v19070_v30 }
 0x1e6   :  { %9781 = vmatpush1.bf16.msra.mxu1 %v15926_v35  ;;  %15168 = vmatpush3.bf16.msra.mxu0 %v15930_v36  ;;  %v15985_v35 = vld [vmem:[#allocation4 + $0x12b0] ss:$52 sps:$4 sm:$0xff]   ;;  %v390_v36 = vrot.slane %v19073_v34, %v389_v33 }
 0x1e7   :  { %9782 = vmatprep.subr.bf16.mxu1 %v15933_v38  ;;  %15169 = vmatprep.subr.bf16.mxu0 %v15934_v40  ;;  %v15990_v38 = vld [vmem:[#allocation4 + $0x131c] ss:$52 sps:$4 sm:$0xff]  }
 0x1e8   :  { %v1563_v50 = vpop.f32.mrb[4].mxu0 }
 0x1e9   :  { %v1564_v53 = vadd.f32 %v1563_v50, %v378_v46  ;;  %v1565_v54 = vpop.f32.mrb[5].mxu0 }
 0x1ea   :  { %v1566_v56 = vadd.f32 %v1565_v54, %v382_v48  ;;  %9783 = vmatpush1.bf16.msra.mxu1 %v15931_v41  ;;  %v1567_v57 = vpop.f32.mrb[6].mxu0  ;;  %15170 = vmatpush3.bf16.msra.mxu0 %v15935_v44  ;;  %v15988_v41 = vld [vmem:[#allocation4 + $0x1318] ss:$52 sps:$4 sm:$0xff]  }
 0x1eb   :  { %v1776_v23 = vmax.f32 %v1564_v53, 0.0  ;;  %v1568_v58 = vpop.f32.mrb[7].mxu0  ;;  %9784 = vmatprep.subr.bf16.mxu1 %v15938_v47  ;;  %15171 = vmatprep.subr.bf16.mxu0 %v15939_v49  ;;  %v15991_v53 = vld [vmem:[#allocation4 + $0x1380] ss:$52 sps:$4 sm:$0xff]   ;;  %v15994_v57 = vld [vmem:[#allocation4 + $0x13e8] ss:$52 sps:$4 sm:$0xff]  }
 0x1ec   :  { %v1777_v60 = vmax.f32 %v1566_v56, 0.0  ;;  %v15996_v56 = vld [vmem:[#allocation4 + $0x13ec] ss:$52 sps:$4 sm:$0xff]   ;;  %v15997_v58 = vld [vmem:[#allocation4 + $0x1450] ss:$52 sps:$4 sm:$0xff]  }
 0x1ed   :  { %v19062_v63 = vpack.c.bf16 %v1776_v23, %v1776_v23  ;;  %v15999_v23 = vld [vmem:[#allocation4 + $0x1454] ss:$52 sps:$4 sm:$0xff]  }
 0x1ee   :  { %v19064_v0 = vpack.c.bf16 %v1777_v60, %v1777_v60  ;;  %9785 = vmatpush1.bf16.msra.mxu1 %v15936_v51  ;;  %15172 = vmatpush3.bf16.msra.mxu0 %v15940_v52  ;;  %v15993_v51 = vld [vmem:[#allocation4 + $0x1384] ss:$52 sps:$4 sm:$0xff]  }
 0x1ef   :  { %9795 = vmatprep.subr.bf16.mxu1 %v15943_v55  ;;  %15173 = vmatprep.subr.bf16.mxu0 %v15944_v59  ;;  %v16002_v59 = vld [vmem:[#allocation4 + $0x14bc] ss:$52 sps:$4 sm:$0xff]   ;;  %v16000_v60 = vld [vmem:[#allocation4 + $0x14b8] ss:$52 sps:$4 sm:$0xff]  }
 0x1f0   :  { %9786 = vmatprep.mubr.bf16.mxu1 %v19064_v0 }
 0x1f1   :  { %9787 = vmatmul.mubr.bf16.vlgmr.msra.gmra.mrb[4].mxu1 %v19062_v63 }
 0x1f2   :  { %9796 = vmatpush1.bf16.msra.mxu1 %v15941_v61  ;;  %15174 = vmatpush3.bf16.msra.mxu0 %v15945_v62  ;;  %v16005_v61 = vld [vmem:[#allocation4 + $0x1524] ss:$52 sps:$4 sm:$0xff]   ;;  %v16003_v62 = vld [vmem:[#allocation4 + $0x1520] ss:$52 sps:$4 sm:$0xff]  }
 0x1f3   :  { %9797 = vmatprep.subr.bf16.mxu1 %v15948_v1  ;;  %v16008_v1 = vld [vmem:[#allocation4 + $0x158c] ss:$52 sps:$4 sm:$0xff]  }
 0x1f5   :  { %1767 = vmatmul.mubr.bf16.vlgmr.msra.gmra.mrb[20].mxu0 %v18512_v42  ;;  %v15964_v42 = vld [vmem:[#allocation4 + $0xfd8] ss:$52 sps:$4 sm:$0xff]  }
 0x1f6   :  { %9798 = vmatpush1.bf16.msra.mxu1 %v15946_v2  ;;  %v16006_v2 = vld [vmem:[#allocation4 + $0x1588] ss:$52 sps:$4 sm:$0xff]  }
 0x1f7   :  { %9799 = vmatprep.subr.bf16.mxu1 %v15951_v3  ;;  %v16011_v3 = vld [vmem:[#allocation4 + $0x15f4] ss:$52 sps:$4 sm:$0xff]  }
 0x1fa   :  { %9800 = vmatpush1.bf16.msra.mxu1 %v15949_v4  ;;  %v16009_v4 = vld [vmem:[#allocation4 + $0x15f0] ss:$52 sps:$4 sm:$0xff]  }
 0x1fb   :  { %9801 = vmatprep.subr.bf16.mxu1 %v15954_v5  ;;  %v16014_v5 = vld [vmem:[#allocation4 + $0x165c] ss:$52 sps:$4 sm:$0xff]  }
 0x1fe   :  { %9802 = vmatpush1.bf16.msra.mxu1 %v15952_v6  ;;  %v16012_v6 = vld [vmem:[#allocation4 + $0x1658] ss:$52 sps:$4 sm:$0xff]  }
 0x1ff   :  { %9803 = vmatprep.subr.bf16.mxu1 %v15957_v7  ;;  %v16110_v7 = vld [vmem:[#allocation4 + $0x2704] ss:$52 sps:$4 sm:$0xff]  }
 0x200   :  { %9959 = vmatprep.subr.bf16.mxu0 %v16110_v7  ;;  %v16053_v7 = vld [vmem:[#allocation4 + $0x1ba4] ss:$52 sps:$4 sm:$0xff]  }
 0x202   :  { %9804 = vmatpush1.bf16.msra.mxu1 %v15955_v8  ;;  %v16108_v8 = vld [vmem:[#allocation4 + $0x2700] ss:$52 sps:$4 sm:$0xff]  }
 0x203   :  { %9805 = vmatprep.subr.bf16.mxu1 %v15960_v9  ;;  %v16017_v9 = vld [vmem:[#allocation4 + $0x16c4] ss:$52 sps:$4 sm:$0xff]   ;;  %9960 = vmatpush1.bf16.msra.mxu0 %v16108_v8  ;;  %v16051_v8 = vld [vmem:[#allocation4 + $0x1ba0] ss:$52 sps:$4 sm:$0xff]  }
 0x206   :  { %9806 = vmatpush1.bf16.msra.mxu1 %v15958_v10  ;;  %v16015_v10 = vld [vmem:[#allocation4 + $0x16c0] ss:$52 sps:$4 sm:$0xff]  }
 0x207   :  { %9807 = vmatprep.subr.bf16.mxu1 %v15963_v11  ;;  %v16116_v11 = vld [vmem:[#allocation4 + $0x276c] ss:$52 sps:$4 sm:$0xff]  }
 0x208   :  { %9961 = vmatprep.subr.bf16.mxu0 %v16116_v11  ;;  %v16059_v11 = vld [vmem:[#allocation4 + $0x1c74] ss:$52 sps:$4 sm:$0xff]  }
 0x20a   :  { %9808 = vmatpush1.bf16.msra.mxu1 %v15961_v12  ;;  %v16114_v12 = vld [vmem:[#allocation4 + $0x2768] ss:$52 sps:$4 sm:$0xff]  }
 0x20b   :  { %9809 = vmatprep.subr.bf16.mxu1 %v15966_v13  ;;  %v16020_v13 = vld [vmem:[#allocation4 + $0x172c] ss:$52 sps:$4 sm:$0xff]   ;;  %9962 = vmatpush1.bf16.msra.mxu0 %v16114_v12  ;;  %v16057_v12 = vld [vmem:[#allocation4 + $0x1c70] ss:$52 sps:$4 sm:$0xff]  }
 0x20e   :  { %9810 = vmatpush1.bf16.msra.mxu1 %v15964_v42  ;;  %v16122_v42 = vld [vmem:[#allocation4 + $0xc] ss:$52 sps:$4 sm:$0xff]  }
 0x20f   :  { %9811 = vmatprep.subr.bf16.mxu1 %v15969_v15  ;;  %v16018_v15 = vld [vmem:[#allocation4 + $0x1728] ss:$52 sps:$4 sm:$0xff]   ;;  %10000 = vmatprep.subr.bf16.mxu0 %v16122_v42  ;;  %v16060_v42 = vld [vmem:[#allocation4 + $0x1cd8] ss:$52 sps:$4 sm:$0xff]  }
 0x212   :  { %9812 = vmatpush1.bf16.msra.mxu1 %v15967_v16  ;;  %v18231_v16 = vmov 0  }
 0x213   :  { %9813 = vmatprep.subr.bf16.mxu1 %v15972_v17  ;;  %9991 = vmatprep.mubr.bf16.mxu0 %v18231_v16  ;;  %v16023_v17 = vld [vmem:[#allocation4 + $0x1794] ss:$52 sps:$4 sm:$0xff]  }
 0x216   :  { %9814 = vmatpush1.bf16.msra.mxu1 %v15970_v19  ;;  %v16021_v19 = vld [vmem:[#allocation4 + $0x1790] ss:$52 sps:$4 sm:$0xff]  }
 0x217   :  { %9815 = vmatprep.subr.bf16.mxu1 %v15975_v20  ;;  %v16026_v20 = vld [vmem:[#allocation4 + $0x17fc] ss:$52 sps:$4 sm:$0xff]  }
 0x21a   :  { %9816 = vmatpush1.bf16.msra.mxu1 %v15973_v21  ;;  %v16024_v21 = vld [vmem:[#allocation4 + $0x17f8] ss:$52 sps:$4 sm:$0xff]  }
 0x21b   :  { %9817 = vmatprep.subr.bf16.mxu1 %v15978_v25  ;;  %v16029_v25 = vld [vmem:[#allocation4 + $0x1864] ss:$52 sps:$4 sm:$0xff]  }
 0x21e   :  { %9818 = vmatpush1.bf16.msra.mxu1 %v15976_v26  ;;  %v16027_v26 = vld [vmem:[#allocation4 + $0x1860] ss:$52 sps:$4 sm:$0xff]  }
 0x21f   :  { %9819 = vmatprep.subr.bf16.mxu1 %v15981_v27  ;;  %v16032_v27 = vld [vmem:[#allocation4 + $0x18cc] ss:$52 sps:$4 sm:$0xff]  }
 0x222   :  { %9820 = vmatpush1.bf16.msra.mxu1 %v15979_v28  ;;  %v16030_v28 = vld [vmem:[#allocation4 + $0x18c8] ss:$52 sps:$4 sm:$0xff]  }
 0x223   :  { %9821 = vmatprep.subr.bf16.mxu1 %v15984_v29  ;;  %v393_v29 = vsub.s32 6, %v18907_v18 }
 0x226   :  { %9822 = vmatpush1.bf16.msra.mxu1 %v15982_v31  ;;  %v397_v31 = vsub.s32 7, %v18907_v18 }
 0x227   :  { %9823 = vmatprep.subr.bf16.mxu1 %v15987_v32  ;;  %v16035_v32 = vld [vmem:[#allocation4 + $0x1934] ss:$52 sps:$4 sm:$0xff]  }
 0x228   :  { %v1604_v40 = vpop.f32.mrb[8].mxu0 }
 0x229   :  { %v1605_v44 = vadd.f32 %v1604_v40, %v386_v14  ;;  %v1606_v46 = vpop.f32.mrb[9].mxu0  ;;  %v16033_v14 = vld [vmem:[#allocation4 + $0x1930] ss:$52 sps:$4 sm:$0xff]  }
 0x22a   :  { %v1607_v47 = vadd.f32 %v1606_v46, %v390_v36  ;;  %9824 = vmatpush1.bf16.msra.mxu1 %v15985_v35  ;;  %v1608_v48 = vpop.f32.mrb[10].mxu0  ;;  %v394_v35 = vrot.slane %v19073_v34, %v393_v29  ;;  %v19092_v36 = vld [vmem:[#allocation2 + $0x8] sm:$0x1f] }
 0x22b   :  { %v1778_v49 = vmax.f32 %v1605_v44, 0.0  ;;  %v1609_v50 = vpop.f32.mrb[11].mxu0  ;;  %9825 = vmatprep.subr.bf16.mxu1 %v15990_v38  ;;  %v398_v38 = vrot.slane %v19073_v34, %v397_v31  ;;  %v16038_v40 = vld [vmem:[#allocation4 + $0x199c] ss:$52 sps:$4 sm:$0xff]   ;;  %v1727_v44 = vpop.f32.mrb[0].mxu1 }
 0x22c   :  { %v1779_v52 = vmax.f32 %v1607_v47, 0.0  ;;  %v19099_v47 = vpop.f32.mrb[1].mxu1  ;;  %v16036_v50 = vld [vmem:[#allocation4 + $0x1998] ss:$52 sps:$4 sm:$0xff]  }
 0x22d   :  { %v19080_v54 = vpack.c.bf16 %v1778_v49, %v1778_v49 }
 0x22e   :  { %v19082_v55 = vpack.c.bf16 %v1779_v52, %v1779_v52  ;;  %9826 = vmatpush1.bf16.msra.mxu1 %v15988_v41  ;;  %v410_v41 = vrot.slane %v19092_v36, %v19035_v37  ;;  %v1731_v52 = vpop.f32.mrb[2].mxu1 }
 0x22f   :  { %9836 = vmatprep.subr.bf16.mxu1 %v15993_v51  ;;  %v16084_v52 = vld [vmem:[#allocation4 + $0x2018] ss:$52 sps:$4 sm:$0xff]  }
 0x230   :  { %9827 = vmatprep.mubr.bf16.mxu1 %v19082_v55  ;;  %v19101_v51 = vadd.f32 %v1727_v44, %v410_v41  ;;  %v16081_v41 = vld [vmem:[#allocation4 + $0x1fb0] ss:$52 sps:$4 sm:$0xff]   ;;  %v402_v44 = vrot.slane %v19092_v36, %v18919_v22 }
 0x231   :  { %9828 = vmatmul.mubr.bf16.vlgmr.msra.gmra.mrb[4].mxu1 %v19080_v54 }
 0x232   :  { %9837 = vmatpush1.bf16.msra.mxu1 %v15991_v53 }
 0x233   :  { %9838 = vmatprep.subr.bf16.mxu1 %v15996_v56 }
 0x236   :  { %9839 = vmatpush1.bf16.msra.mxu1 %v15994_v57  ;;  %v1732_v57 = vpop.f32.mrb[3].mxu1 }
 0x237   :  { %9840 = vmatprep.subr.bf16.mxu1 %v15999_v23 }
 0x23a   :  { %9841 = vmatpush1.bf16.msra.mxu1 %v15997_v58  ;;  %v16041_v58 = vld [vmem:[#allocation4 + $0x1a04] ss:$52 sps:$4 sm:$0xff]  }
 0x23b   :  { %9842 = vmatprep.subr.bf16.mxu1 %v16002_v59 }
 0x23e   :  { %9843 = vmatpush1.bf16.msra.mxu1 %v16000_v60 }
 0x23f   :  { %9844 = vmatprep.subr.bf16.mxu1 %v16005_v61  ;;  %v16039_v61 = vld [vmem:[#allocation4 + $0x1a00] ss:$52 sps:$4 sm:$0xff]  }
 0x242   :  { %9845 = vmatpush1.bf16.msra.mxu1 %v16003_v62 }
 0x243   :  { %9846 = vmatprep.subr.bf16.mxu1 %v16008_v1  ;;  %v16044_v1 = vld [vmem:[#allocation4 + $0x1a6c] ss:$52 sps:$4 sm:$0xff]  }
 0x246   :  { %9847 = vmatpush1.bf16.msra.mxu1 %v16006_v2  ;;  %v16042_v2 = vld [vmem:[#allocation4 + $0x1a68] ss:$52 sps:$4 sm:$0xff]  }
 0x247   :  { %9848 = vmatprep.subr.bf16.mxu1 %v16011_v3  ;;  %v16047_v3 = vld [vmem:[#allocation4 + $0x1ad4] ss:$52 sps:$4 sm:$0xff]  }
 0x24a   :  { %9849 = vmatpush1.bf16.msra.mxu1 %v16009_v4  ;;  %v16045_v4 = vld [vmem:[#allocation4 + $0x1ad0] ss:$52 sps:$4 sm:$0xff]  }
 0x24b   :  { %9850 = vmatprep.subr.bf16.mxu1 %v16014_v5  ;;  %v16050_v5 = vld [vmem:[#allocation4 + $0x1b3c] ss:$52 sps:$4 sm:$0xff]  }
 0x24e   :  { %9851 = vmatpush1.bf16.msra.mxu1 %v16012_v6  ;;  %v16048_v6 = vld [vmem:[#allocation4 + $0x1b38] ss:$52 sps:$4 sm:$0xff]  }
 0x24f   :  { %9852 = vmatprep.subr.bf16.mxu1 %v16017_v9  ;;  %v16056_v9 = vld [vmem:[#allocation4 + $0x1c0c] ss:$52 sps:$4 sm:$0xff]  }
 0x252   :  { %9853 = vmatpush1.bf16.msra.mxu1 %v16015_v10  ;;  %v16054_v10 = vld [vmem:[#allocation4 + $0x1c08] ss:$52 sps:$4 sm:$0xff]  }
 0x253   :  { %9854 = vmatprep.subr.bf16.mxu1 %v16020_v13  ;;  %v16062_v13 = vld [vmem:[#allocation4 + $0x1cdc] ss:$52 sps:$4 sm:$0xff]  }
 0x256   :  { %9855 = vmatpush1.bf16.msra.mxu1 %v16018_v15  ;;  %v16065_v15 = vld [vmem:[#allocation4 + $0x1d44] ss:$52 sps:$4 sm:$0xff]  }
 0x257   :  { %9856 = vmatprep.subr.bf16.mxu1 %v16023_v17  ;;  %v16063_v17 = vld [vmem:[#allocation4 + $0x1d40] ss:$52 sps:$4 sm:$0xff]  }
 0x25a   :  { %9857 = vmatpush1.bf16.msra.mxu1 %v16021_v19  ;;  %v16068_v19 = vld [vmem:[#allocation4 + $0x1dac] ss:$52 sps:$4 sm:$0xff]  }
 0x25b   :  { %9858 = vmatprep.subr.bf16.mxu1 %v16026_v20  ;;  %v16066_v20 = vld [vmem:[#allocation4 + $0x1da8] ss:$52 sps:$4 sm:$0xff]  }
 0x25e   :  { %9859 = vmatpush1.bf16.msra.mxu1 %v16024_v21  ;;  %v16071_v21 = vld [vmem:[#allocation4 + $0x1e14] ss:$52 sps:$4 sm:$0xff]  }
 0x25f   :  { %9860 = vmatprep.subr.bf16.mxu1 %v16029_v25  ;;  %v16069_v25 = vld [vmem:[#allocation4 + $0x1e10] ss:$52 sps:$4 sm:$0xff]  }
 0x262   :  { %9861 = vmatpush1.bf16.msra.mxu1 %v16027_v26  ;;  %v16074_v26 = vld [vmem:[#allocation4 + $0x1e7c] ss:$52 sps:$4 sm:$0xff]  }
 0x263   :  { %9862 = vmatprep.subr.bf16.mxu1 %v16032_v27  ;;  %v16072_v27 = vld [vmem:[#allocation4 + $0x1e78] ss:$52 sps:$4 sm:$0xff]  }
 0x266   :  { %9863 = vmatpush1.bf16.msra.mxu1 %v16030_v28  ;;  %v16077_v28 = vld [vmem:[#allocation4 + $0x1ee4] ss:$52 sps:$4 sm:$0xff]  }
 0x267   :  { %9864 = vmatprep.subr.bf16.mxu1 %v16035_v32  ;;  %v16075_v32 = vld [vmem:[#allocation4 + $0x1ee0] ss:$52 sps:$4 sm:$0xff]  }
 0x268   :  { %v1645_v46 = vpop.f32.mrb[12].mxu0 }
 0x269   :  { %v1646_v48 = vadd.f32 %v1645_v46, %v394_v35  ;;  %v1647_v49 = vpop.f32.mrb[13].mxu0  ;;  %v16078_v35 = vld [vmem:[#allocation4 + $0x1f48] ss:$52 sps:$4 sm:$0xff]   ;;  %v406_v46 = vrot.slane %v19092_v36, %v18924_v24 }
 0x26a   :  { %v1648_v53 = vadd.f32 %v1647_v49, %v398_v38  ;;  %9865 = vmatpush1.bf16.msra.mxu1 %v16033_v14  ;;  %v1649_v56 = vpop.f32.mrb[14].mxu0  ;;  %v16080_v14 = vld [vmem:[#allocation4 + $0x1f4c] ss:$52 sps:$4 sm:$0xff]   ;;  %v414_v38 = vrot.slane %v19092_v36, %v19038_v39  ;;  %v16086_v49 = vld [vmem:[#allocation4 + $0x201c] ss:$52 sps:$4 sm:$0xff]  }
 0x26b   :  { %v1780_v34 = vmax.f32 %v1646_v48, 0.0  ;;  %v1650_v23 = vpop.f32.mrb[15].mxu0  ;;  %9866 = vmatprep.subr.bf16.mxu1 %v16038_v40  ;;  %v16083_v40 = vld [vmem:[#allocation4 + $0x1fb4] ss:$52 sps:$4 sm:$0xff]  }
 0x26c   :  { %v1781_v59 = vmax.f32 %v1648_v53, 0.0  ;;  %v1730_v48 = vadd.f32 %v19099_v47, %v414_v38  ;;  %v16117_v38 = vld [vmem:[#allocation4 + $0x23c0] ss:$52 sps:$4 sm:$0xff]  }
 0x26d   :  { %v19103_v60 = vpack.c.bf16 %v1780_v34, %v1780_v34 }
 0x26e   :  { %v19105_v62 = vpack.c.bf16 %v1781_v59, %v1781_v59  ;;  %9867 = vmatpush1.bf16.msra.mxu1 %v16036_v50  ;;  %v1785_v23 = vmax.f32 %v1730_v48, 0.0  ;;  %v16128_v48 = vld [vmem:[#allocation4 + $0x74] ss:$52 sps:$4 sm:$0xff]  }
 0x26f   :  { %9877 = vmatprep.subr.bf16.mxu1 %v16041_v58 }
 0x270   :  { %9868 = vmatprep.mubr.bf16.mxu1 %v19105_v62  ;;  %v19120_v47 = vpack.c.bf16 %v1785_v23, %v1785_v23  ;;  %v16140_v23 = vld [vmem:[#allocation4 + $0x144] ss:$52 sps:$4 sm:$0xff]  }
 0x271   :  { %9869 = vmatmul.mubr.bf16.vlgmr.msra.gmra.mrb[4].mxu1 %v19103_v60 }
 0x272   :  { %9878 = vmatpush1.bf16.msra.mxu1 %v16039_v61  ;;  %v16089_v61 = vld [vmem:[#allocation4 + $0x2084] ss:$52 sps:$4 sm:$0xff]  }
 0x273   :  { %9879 = vmatprep.subr.bf16.mxu1 %v16044_v1 }
 0x276   :  { %9880 = vmatpush1.bf16.msra.mxu1 %v16042_v2  ;;  %v16087_v2 = vld [vmem:[#allocation4 + $0x2080] ss:$52 sps:$4 sm:$0xff]  }
 0x277   :  { %9881 = vmatprep.subr.bf16.mxu1 %v16047_v3 }
 0x27a   :  { %9882 = vmatpush1.bf16.msra.mxu1 %v16045_v4 }
 0x27b   :  { %9883 = vmatprep.subr.bf16.mxu1 %v16050_v5  ;;  %v16092_v5 = vld [vmem:[#allocation4 + $0x20ec] ss:$52 sps:$4 sm:$0xff]  }
 0x27e   :  { %9884 = vmatpush1.bf16.msra.mxu1 %v16048_v6  ;;  %v16090_v6 = vld [vmem:[#allocation4 + $0x20e8] ss:$52 sps:$4 sm:$0xff]  }
 0x27f   :  { %9885 = vmatprep.subr.bf16.mxu1 %v16053_v7  ;;  %v16095_v7 = vld [vmem:[#allocation4 + $0x2154] ss:$52 sps:$4 sm:$0xff]  }
 0x282   :  { %9886 = vmatpush1.bf16.msra.mxu1 %v16051_v8  ;;  %v16093_v8 = vld [vmem:[#allocation4 + $0x2150] ss:$52 sps:$4 sm:$0xff]  }
 0x283   :  { %9887 = vmatprep.subr.bf16.mxu1 %v16056_v9  ;;  %v16098_v9 = vld [vmem:[#allocation4 + $0x21bc] ss:$52 sps:$4 sm:$0xff]  }
 0x286   :  { %9888 = vmatpush1.bf16.msra.mxu1 %v16054_v10  ;;  %v16096_v10 = vld [vmem:[#allocation4 + $0x21b8] ss:$52 sps:$4 sm:$0xff]  }
 0x287   :  { %9889 = vmatprep.subr.bf16.mxu1 %v16059_v11  ;;  %v16101_v11 = vld [vmem:[#allocation4 + $0x2224] ss:$52 sps:$4 sm:$0xff]  }
 0x28a   :  { %9890 = vmatpush1.bf16.msra.mxu1 %v16057_v12  ;;  %v16099_v12 = vld [vmem:[#allocation4 + $0x2220] ss:$52 sps:$4 sm:$0xff]  }
 0x28b   :  { %9891 = vmatprep.subr.bf16.mxu1 %v16062_v13  ;;  %v16104_v13 = vld [vmem:[#allocation4 + $0x228c] ss:$52 sps:$4 sm:$0xff]  }
 0x28e   :  { %9892 = vmatpush1.bf16.msra.mxu1 %v16060_v42  ;;  %v16102_v42 = vld [vmem:[#allocation4 + $0x2288] ss:$52 sps:$4 sm:$0xff]  }
 0x28f   :  { %9893 = vmatprep.subr.bf16.mxu1 %v16065_v15  ;;  %v16107_v15 = vld [vmem:[#allocation4 + $0x22f4] ss:$52 sps:$4 sm:$0xff]  }
 0x292   :  { %9894 = vmatpush1.bf16.msra.mxu1 %v16063_v17  ;;  %v16105_v17 = vld [vmem:[#allocation4 + $0x22f0] ss:$52 sps:$4 sm:$0xff]  }
 0x293   :  { %9895 = vmatprep.subr.bf16.mxu1 %v16068_v19  ;;  %v16113_v19 = vld [vmem:[#allocation4 + $0x235c] ss:$52 sps:$4 sm:$0xff]  }
 0x296   :  { %9896 = vmatpush1.bf16.msra.mxu1 %v16066_v20 }
 0x297   :  { %9897 = vmatprep.subr.bf16.mxu1 %v16071_v21  ;;  %v418_v21 = vrot.slane %v19092_v36, %v19070_v30  ;;  %v16123_v36 = vld [vmem:[#allocation4 + $0x2428] ss:$52 sps:$4 sm:$0xff]  }
 0x29a   :  { %9898 = vmatpush1.bf16.msra.mxu1 %v16069_v25  ;;  %v16111_v25 = vld [vmem:[#allocation4 + $0x2358] ss:$52 sps:$4 sm:$0xff]  }
 0x29b   :  { %9899 = vmatprep.subr.bf16.mxu1 %v16074_v26 }
 0x29e   :  { %9900 = vmatpush1.bf16.msra.mxu1 %v16072_v27 }
 0x29f   :  { %9901 = vmatprep.subr.bf16.mxu1 %v16077_v28 }
 0x2a2   :  { %9902 = vmatpush1.bf16.msra.mxu1 %v16075_v32 }
 0x2a3   :  { %9903 = vmatprep.subr.bf16.mxu1 %v16080_v14  ;;  %v16119_v14 = vld [vmem:[#allocation4 + $0x23c4] ss:$52 sps:$4 sm:$0xff]  }
 0x2a6   :  { %9904 = vmatpush1.bf16.msra.mxu1 %v16078_v35 }
 0x2a7   :  { %9905 = vmatprep.subr.bf16.mxu1 %v16083_v40 }
 0x2a8   :  { %v1686_v50 = vpop.f32.mrb[16].mxu0 }
 0x2a9   :  { %v1687_v53 = vadd.f32 %v1686_v50, %v402_v44  ;;  %v1688_v56 = vpop.f32.mrb[17].mxu0  ;;  %v16125_v44 = vld [vmem:[#allocation4 + $0x242c] ss:$52 sps:$4 sm:$0xff]   ;;  %v16131_v50 = vld [vmem:[#allocation4 + $0x2494] ss:$52 sps:$4 sm:$0xff]  }
 0x2aa   :  { %v1689_v57 = vadd.f32 %v1688_v56, %v406_v46  ;;  %9906 = vmatpush1.bf16.msra.mxu1 %v16081_v41  ;;  %v1690_v34 = vpop.f32.mrb[18].mxu0  ;;  %v16120_v41 = vld [vmem:[#allocation4 + $0x8] ss:$52 sps:$4 sm:$0xff]   ;;  %v16132_v56 = vld [vmem:[#allocation4 + $0xd8] ss:$52 sps:$4 sm:$0xff]  }
 0x2ab   :  { %v1782_v58 = vmax.f32 %v1687_v53, 0.0  ;;  %v1691_v59 = vpop.f32.mrb[19].mxu0  ;;  %9907 = vmatprep.subr.bf16.mxu1 %v16086_v49  ;;  %v16126_v49 = vld [vmem:[#allocation4 + $0x70] ss:$52 sps:$4 sm:$0xff]   ;;  %v16135_v34 = vld [vmem:[#allocation4 + $0x24f8] ss:$52 sps:$4 sm:$0xff]  }
 0x2ac   :  { %v1783_v1 = vmax.f32 %v1689_v57, 0.0  ;;  %v16134_v53 = vld [vmem:[#allocation4 + $0xdc] ss:$52 sps:$4 sm:$0xff]   ;;  %v16143_v59 = vld [vmem:[#allocation4 + $0x2564] ss:$52 sps:$4 sm:$0xff]  }
 0x2ad   :  { %v19116_v3 = vpack.c.bf16 %v1782_v58, %v1782_v58  ;;  %v16137_v57 = vld [vmem:[#allocation4 + $0x24fc] ss:$52 sps:$4 sm:$0xff]   ;;  %v16138_v58 = vld [vmem:[#allocation4 + $0x140] ss:$52 sps:$4 sm:$0xff]  }
 0x2ae   :  { %v19118_v4 = vpack.c.bf16 %v1783_v1, %v1783_v1  ;;  %9908 = vmatpush1.bf16.msra.mxu1 %v16084_v52  ;;  %v16129_v52 = vld [vmem:[#allocation4 + $0x2490] ss:$52 sps:$4 sm:$0xff]   ;;  %v16146_v1 = vld [vmem:[#allocation4 + $0x1ac] ss:$52 sps:$4 sm:$0xff]  }
 0x2af   :  { %9918 = vmatprep.subr.bf16.mxu1 %v16089_v61  ;;  %v16141_v61 = vld [vmem:[#allocation4 + $0x2560] ss:$52 sps:$4 sm:$0xff]  }
 0x2b0   :  { %9909 = vmatprep.mubr.bf16.mxu1 %v19118_v4 }
 0x2b1   :  { %9910 = vmatmul.mubr.bf16.vlgmr.msra.gmra.mrb[4].mxu1 %v19116_v3 }
 0x2b2   :  { %9919 = vmatpush1.bf16.msra.mxu1 %v16087_v2  ;;  %9950 = vmatprep.mubr.bf16.mxu1 %v19120_v47  ;;  %v16144_v2 = vld [vmem:[#allocation4 + $0x1a8] ss:$52 sps:$4 sm:$0xff]  }
 0x2b3   :  { %9920 = vmatprep.subr.bf16.mxu1 %v16092_v5  ;;  %v16149_v5 = vld [vmem:[#allocation4 + $0x25cc] ss:$52 sps:$4 sm:$0xff]  }
 0x2b6   :  { %9921 = vmatpush1.bf16.msra.mxu1 %v16090_v6  ;;  %v16147_v6 = vld [vmem:[#allocation4 + $0x25c8] ss:$52 sps:$4 sm:$0xff]  }
 0x2b7   :  { %9922 = vmatprep.subr.bf16.mxu1 %v16095_v7  ;;  %v16152_v7 = vld [vmem:[#allocation4 + $0x214] ss:$52 sps:$4 sm:$0xff]  }
 0x2ba   :  { %9923 = vmatpush1.bf16.msra.mxu1 %v16093_v8  ;;  %v16150_v8 = vld [vmem:[#allocation4 + $0x210] ss:$52 sps:$4 sm:$0xff]  }
 0x2bb   :  { %9924 = vmatprep.subr.bf16.mxu1 %v16098_v9  ;;  %v16155_v9 = vld [vmem:[#allocation4 + $0x2634] ss:$52 sps:$4 sm:$0xff]  }
 0x2be   :  { %9925 = vmatpush1.bf16.msra.mxu1 %v16096_v10  ;;  %v16153_v10 = vld [vmem:[#allocation4 + $0x2630] ss:$52 sps:$4 sm:$0xff]  }
 0x2bf   :  { %9926 = vmatprep.subr.bf16.mxu1 %v16101_v11  ;;  %v16158_v11 = vld [vmem:[#allocation4 + $0x27c] ss:$52 sps:$4 sm:$0xff]  }
 0x2c2   :  { %9927 = vmatpush1.bf16.msra.mxu1 %v16099_v12  ;;  %v16156_v12 = vld [vmem:[#allocation4 + $0x278] ss:$52 sps:$4 sm:$0xff]  }
 0x2c3   :  { %9928 = vmatprep.subr.bf16.mxu1 %v16104_v13  ;;  %v16161_v13 = vld [vmem:[#allocation4 + $0x269c] ss:$52 sps:$4 sm:$0xff]  }
 0x2c6   :  { %9929 = vmatpush1.bf16.msra.mxu1 %v16102_v42  ;;  %v1784_v42 = vmax.f32 %v19101_v51, 0.0  ;;  %v16176_v51 = vld [vmem:[#allocation4 + $0x3b4] ss:$52 sps:$4 sm:$0xff]  }
 0x2c7   :  { %9930 = vmatprep.subr.bf16.mxu1 %v16107_v15  ;;  %v16159_v15 = vld [vmem:[#allocation4 + $0x2698] ss:$52 sps:$4 sm:$0xff]  }
 0x2c8   :  { %v15175_v20 = vpop.f32.mrb[20].mxu0 }
 0x2c9   :  { %v15176_v26 = vpop.f32.mrb[21].mxu0 }
 0x2ca   :  { %v15177_v27 = vadd.f32 %v15176_v26, %v15175_v20  ;;  %9931 = vmatpush1.bf16.msra.mxu1 %v16105_v17  ;;  %v15178_v28 = vpop.f32.mrb[22].mxu0  ;;  %v16164_v17 = vld [vmem:[#allocation4 + $0x2e4] ss:$52 sps:$4 sm:$0xff]   ;;  %v16167_v20 = vld [vmem:[#allocation4 + $0x14] ss:$52 sps:$4 sm:$0xff]   ;;  %v19133_v26 = vpack.c.bf16 %v1784_v42, %v1784_v42 }
 0x2cb   :  { %v15179_v32 = vpop.f32.mrb[23].mxu0  ;;  %9932 = vmatprep.subr.bf16.mxu1 %v16113_v19  ;;  %v16162_v19 = vld [vmem:[#allocation4 + $0x2e0] ss:$52 sps:$4 sm:$0xff]   ;;  %v16173_v28 = vld [vmem:[#allocation4 + $0x7c] ss:$52 sps:$4 sm:$0xff]  }
 0x2cc   :  { %v1769_v35 = vadd.f32 %v15177_v27, %v418_v21  ;;  %v16165_v21 = vld [vmem:[#allocation4 + $0x10] ss:$52 sps:$4 sm:$0xff]   ;;  %v16168_v27 = vld [vmem:[#allocation4 + $0x348] ss:$52 sps:$4 sm:$0xff]   ;;  %v16171_v32 = vld [vmem:[#allocation4 + $0x78] ss:$52 sps:$4 sm:$0xff]  }
 0x2cd   :  { %v16224_v42 = vld [vmem:[#allocation4 + $0x6f4] ss:$52 sps:$4 sm:$0xff]  }
 0x2ce   :  { %v1786_v40 = vmax.f32 %v1769_v35, 0.0  ;;  %9933 = vmatpush1.bf16.msra.mxu1 %v16111_v25  ;;  %v16170_v25 = vld [vmem:[#allocation4 + $0x34c] ss:$52 sps:$4 sm:$0xff]   ;;  %v16179_v35 = vld [vmem:[#allocation4 + $0xe4] ss:$52 sps:$4 sm:$0xff]  }
 0x2cf   :  { %9934 = vmatprep.subr.bf16.mxu1 %v16119_v14  ;;  %v16174_v14 = vld [vmem:[#allocation4 + $0x3b0] ss:$52 sps:$4 sm:$0xff]  }
 0x2d0   :  { %v19127_v46 = vpack.c.bf16 %v1786_v40, %v1786_v40  ;;  %v16182_v40 = vld [vmem:[#allocation4 + $0x41c] ss:$52 sps:$4 sm:$0xff]  }
 0x2d2   :  { %9935 = vmatpush1.bf16.msra.mxu1 %v16117_v38  ;;  %14933 = vmatmul.mubr.msk.bf16.vlgmr.msra.gmra.mrb[24].mxu0 %vm9709_vm0, %v19127_v46  ;;  %v16177_v38 = vld [vmem:[#allocation4 + $0xe0] ss:$52 sps:$4 sm:$0xff]  }
 0x2d3   :  { %10001 = vmatpush1.bf16.msra.mxu0 %v16120_v41  ;;  %10032 = vmatprep.mubr.bf16.mxu0 %v18950_v45  ;;  %v16180_v41 = vld [vmem:[#allocation4 + $0x418] ss:$52 sps:$4 sm:$0xff]  }
 0x2d4   :  { %9936 = vmatprep.subr.bf16.mxu1 %v16125_v44  ;;  %10002 = vmatprep.subr.bf16.mxu0 %v16128_v48  ;;  %v16185_v44 = vld [vmem:[#allocation4 + $0x14c] ss:$52 sps:$4 sm:$0xff]   ;;  %v16183_v48 = vld [vmem:[#allocation4 + $0x148] ss:$52 sps:$4 sm:$0xff]  }
 0x2d6   :  { %9937 = vmatpush1.bf16.msra.mxu1 %v16123_v36  ;;  %v16188_v36 = vld [vmem:[#allocation4 + $0x484] ss:$52 sps:$4 sm:$0xff]  }
 0x2d7   :  { %10003 = vmatpush1.bf16.msra.mxu0 %v16126_v49  ;;  %9938 = vmatprep.subr.bf16.mxu1 %v16131_v50  ;;  %v16186_v49 = vld [vmem:[#allocation4 + $0x480] ss:$52 sps:$4 sm:$0xff]  }
 0x2d8   :  { %10004 = vmatprep.subr.bf16.mxu0 %v16134_v53  ;;  %v16191_v50 = vld [vmem:[#allocation4 + $0x1b4] ss:$52 sps:$4 sm:$0xff]   ;;  %v16194_v53 = vld [vmem:[#allocation4 + $0x4ec] ss:$52 sps:$4 sm:$0xff]  }
 0x2da   :  { %9939 = vmatpush1.bf16.msra.mxu1 %v16129_v52  ;;  %v16189_v52 = vld [vmem:[#allocation4 + $0x1b0] ss:$52 sps:$4 sm:$0xff]  }
 0x2db   :  { %10005 = vmatpush1.bf16.msra.mxu0 %v16132_v56  ;;  %9940 = vmatprep.subr.bf16.mxu1 %v16137_v57  ;;  %v16192_v56 = vld [vmem:[#allocation4 + $0x4e8] ss:$52 sps:$4 sm:$0xff]  }
 0x2dc   :  { %10006 = vmatprep.subr.bf16.mxu0 %v16140_v23  ;;  %v16197_v57 = vld [vmem:[#allocation4 + $0x21c] ss:$52 sps:$4 sm:$0xff]   ;;  %v16200_v23 = vld [vmem:[#allocation4 + $0x554] ss:$52 sps:$4 sm:$0xff]  }
 0x2de   :  { %9941 = vmatpush1.bf16.msra.mxu1 %v16135_v34  ;;  %v16195_v34 = vld [vmem:[#allocation4 + $0x218] ss:$52 sps:$4 sm:$0xff]  }
 0x2df   :  { %10007 = vmatpush1.bf16.msra.mxu0 %v16138_v58  ;;  %9942 = vmatprep.subr.bf16.mxu1 %v16143_v59  ;;  %v16198_v58 = vld [vmem:[#allocation4 + $0x550] ss:$52 sps:$4 sm:$0xff]  }
 0x2e0   :  { %10008 = vmatprep.subr.bf16.mxu0 %v16146_v1  ;;  %v16203_v59 = vld [vmem:[#allocation4 + $0x284] ss:$52 sps:$4 sm:$0xff]   ;;  %v16206_v1 = vld [vmem:[#allocation4 + $0x5bc] ss:$52 sps:$4 sm:$0xff]  }
 0x2e2   :  { %9943 = vmatpush1.bf16.msra.mxu1 %v16141_v61  ;;  %v16201_v61 = vld [vmem:[#allocation4 + $0x280] ss:$52 sps:$4 sm:$0xff]  }
 0x2e3   :  { %10009 = vmatpush1.bf16.msra.mxu0 %v16144_v2  ;;  %9944 = vmatprep.subr.bf16.mxu1 %v16149_v5  ;;  %v16204_v2 = vld [vmem:[#allocation4 + $0x5b8] ss:$52 sps:$4 sm:$0xff]  }
 0x2e4   :  { %10010 = vmatprep.subr.bf16.mxu0 %v16152_v7  ;;  %v16209_v5 = vld [vmem:[#allocation4 + $0x2ec] ss:$52 sps:$4 sm:$0xff]   ;;  %v16212_v7 = vld [vmem:[#allocation4 + $0x624] ss:$52 sps:$4 sm:$0xff]  }
 0x2e6   :  { %9945 = vmatpush1.bf16.msra.mxu1 %v16147_v6  ;;  %v16207_v6 = vld [vmem:[#allocation4 + $0x2e8] ss:$52 sps:$4 sm:$0xff]  }
 0x2e7   :  { %10011 = vmatpush1.bf16.msra.mxu0 %v16150_v8  ;;  %9946 = vmatprep.subr.bf16.mxu1 %v16155_v9  ;;  %v16210_v8 = vld [vmem:[#allocation4 + $0x620] ss:$52 sps:$4 sm:$0xff]  }
 0x2e8   :  { %10012 = vmatprep.subr.bf16.mxu0 %v16158_v11  ;;  %v16215_v9 = vld [vmem:[#allocation4 + $0x354] ss:$52 sps:$4 sm:$0xff]   ;;  %v16218_v11 = vld [vmem:[#allocation4 + $0x68c] ss:$52 sps:$4 sm:$0xff]  }
 0x2ea   :  { %9947 = vmatpush1.bf16.msra.mxu1 %v16153_v10  ;;  %v16213_v10 = vld [vmem:[#allocation4 + $0x350] ss:$52 sps:$4 sm:$0xff]  }
 0x2eb   :  { %10013 = vmatpush1.bf16.msra.mxu0 %v16156_v12  ;;  %9948 = vmatprep.subr.bf16.mxu1 %v16161_v13  ;;  %v16216_v12 = vld [vmem:[#allocation4 + $0x688] ss:$52 sps:$4 sm:$0xff]  }
 0x2ec   :  { %10014 = vmatprep.subr.bf16.mxu0 %v16164_v17  ;;  %v16221_v13 = vld [vmem:[#allocation4 + $0x3bc] ss:$52 sps:$4 sm:$0xff]  }
 0x2ed   :  { %v16222_v17 = vld [vmem:[#allocation4 + $0x6f0] ss:$52 sps:$4 sm:$0xff]  }
 0x2ee   :  { %9949 = vmatpush1.bf16.msra.mxu1 %v16159_v15  ;;  %v16219_v15 = vld [vmem:[#allocation4 + $0x3b8] ss:$52 sps:$4 sm:$0xff]  }
 0x2ef   :  { %10015 = vmatpush1.bf16.msra.mxu0 %v16162_v19  ;;  %10287 = vmatprep.subr.bf16.mxu1 %v16167_v20  ;;  %v16227_v19 = vld [vmem:[#allocation4 + $0x424] ss:$52 sps:$4 sm:$0xff]   ;;  %v16225_v20 = vld [vmem:[#allocation4 + $0x420] ss:$52 sps:$4 sm:$0xff]  }
 0x2f0   :  { %10016 = vmatprep.subr.bf16.mxu0 %v16170_v25  ;;  %v16228_v25 = vld [vmem:[#allocation4 + $0x758] ss:$52 sps:$4 sm:$0xff]  }
 0x2f1   :  { %9951 = vmatmul.mubr.bf16.vlgmr.msra.gmra.mrb[4].mxu1 %v19133_v26 }
 0x2f2   :  { %10288 = vmatpush1.bf16.msra.mxu1 %v16165_v21  ;;  %10319 = vmatprep.mubr.bf16.mxu1 %v18950_v45  ;;  %v16230_v21 = vld [vmem:[#allocation4 + $0x75c] ss:$52 sps:$4 sm:$0xff]  }
 0x2f3   :  { %10017 = vmatpush1.bf16.msra.mxu0 %v16168_v27  ;;  %10289 = vmatprep.subr.bf16.mxu1 %v16173_v28  ;;  %v16233_v27 = vld [vmem:[#allocation4 + $0x48c] ss:$52 sps:$4 sm:$0xff]   ;;  %v16231_v28 = vld [vmem:[#allocation4 + $0x488] ss:$52 sps:$4 sm:$0xff]  }
 0x2f4   :  { %10018 = vmatprep.subr.bf16.mxu0 %v16176_v51  ;;  %v16236_v51 = vld [vmem:[#allocation4 + $0x7c4] ss:$52 sps:$4 sm:$0xff]  }
 0x2f6   :  { %10290 = vmatpush1.bf16.msra.mxu1 %v16171_v32  ;;  %v16234_v32 = vld [vmem:[#allocation4 + $0x7c0] ss:$52 sps:$4 sm:$0xff]  }
 0x2f7   :  { %10019 = vmatpush1.bf16.msra.mxu0 %v16174_v14  ;;  %10291 = vmatprep.subr.bf16.mxu1 %v16179_v35  ;;  %v16239_v14 = vld [vmem:[#allocation4 + $0x4f4] ss:$52 sps:$4 sm:$0xff]   ;;  %v16237_v35 = vld [vmem:[#allocation4 + $0x4f0] ss:$52 sps:$4 sm:$0xff]  }
 0x2f8   :  { %10020 = vmatprep.subr.bf16.mxu0 %v16182_v40  ;;  %v16240_v40 = vld [vmem:[#allocation4 + $0x828] ss:$52 sps:$4 sm:$0xff]  }
 0x2fa   :  { %10292 = vmatpush1.bf16.msra.mxu1 %v16177_v38  ;;  %v16242_v38 = vld [vmem:[#allocation4 + $0x82c] ss:$52 sps:$4 sm:$0xff]  }
 0x2fb   :  { %10021 = vmatpush1.bf16.msra.mxu0 %v16180_v41  ;;  %10293 = vmatprep.subr.bf16.mxu1 %v16185_v44  ;;  %v16245_v41 = vld [vmem:[#allocation4 + $0x55c] ss:$52 sps:$4 sm:$0xff]   ;;  %v16243_v44 = vld [vmem:[#allocation4 + $0x558] ss:$52 sps:$4 sm:$0xff]  }
 0x2fc   :  { %10022 = vmatprep.subr.bf16.mxu0 %v16188_v36  ;;  %v16246_v36 = vld [vmem:[#allocation4 + $0x890] ss:$52 sps:$4 sm:$0xff]  }
 0x2fe   :  { %10294 = vmatpush1.bf16.msra.mxu1 %v16183_v48  ;;  %v16248_v48 = vld [vmem:[#allocation4 + $0x894] ss:$52 sps:$4 sm:$0xff]  }
 0x2ff   :  { %10023 = vmatpush1.bf16.msra.mxu0 %v16186_v49  ;;  %10295 = vmatprep.subr.bf16.mxu1 %v16191_v50  ;;  %v16251_v49 = vld [vmem:[#allocation4 + $0x5c4] ss:$52 sps:$4 sm:$0xff]   ;;  %v16249_v50 = vld [vmem:[#allocation4 + $0x5c0] ss:$52 sps:$4 sm:$0xff]  }
 0x300   :  { %10024 = vmatprep.subr.bf16.mxu0 %v16194_v53  ;;  %v16252_v53 = vld [vmem:[#allocation4 + $0x8f8] ss:$52 sps:$4 sm:$0xff]  }
 0x302   :  { %10296 = vmatpush1.bf16.msra.mxu1 %v16189_v52  ;;  %v16254_v52 = vld [vmem:[#allocation4 + $0x8fc] ss:$52 sps:$4 sm:$0xff]  }
 0x303   :  { %10025 = vmatpush1.bf16.msra.mxu0 %v16192_v56  ;;  %10297 = vmatprep.subr.bf16.mxu1 %v16197_v57  ;;  %v16257_v56 = vld [vmem:[#allocation4 + $0x62c] ss:$52 sps:$4 sm:$0xff]   ;;  %v16255_v57 = vld [vmem:[#allocation4 + $0x628] ss:$52 sps:$4 sm:$0xff]  }
 0x304   :  { %10026 = vmatprep.subr.bf16.mxu0 %v16200_v23  ;;  %v16258_v23 = vld [vmem:[#allocation4 + $0x960] ss:$52 sps:$4 sm:$0xff]  }
 0x306   :  { %10298 = vmatpush1.bf16.msra.mxu1 %v16195_v34  ;;  %v16260_v34 = vld [vmem:[#allocation4 + $0x964] ss:$52 sps:$4 sm:$0xff]  }
 0x307   :  { %10027 = vmatpush1.bf16.msra.mxu0 %v16198_v58  ;;  %10299 = vmatprep.subr.bf16.mxu1 %v16203_v59  ;;  %v16263_v58 = vld [vmem:[#allocation4 + $0x694] ss:$52 sps:$4 sm:$0xff]   ;;  %v16261_v59 = vld [vmem:[#allocation4 + $0x690] ss:$52 sps:$4 sm:$0xff]  }
 0x308   :  { %10028 = vmatprep.subr.bf16.mxu0 %v16206_v1  ;;  %v16264_v1 = vld [vmem:[#allocation4 + $0x9c8] ss:$52 sps:$4 sm:$0xff]  }
 0x30a   :  { %10300 = vmatpush1.bf16.msra.mxu1 %v16201_v61  ;;  %v16266_v61 = vld [vmem:[#allocation4 + $0x9cc] ss:$52 sps:$4 sm:$0xff]  }
 0x30b   :  { %10029 = vmatpush1.bf16.msra.mxu0 %v16204_v2  ;;  %10301 = vmatprep.subr.bf16.mxu1 %v16209_v5  ;;  %v16269_v2 = vld [vmem:[#allocation4 + $0x6fc] ss:$52 sps:$4 sm:$0xff]   ;;  %v16272_v5 = vld [vmem:[#allocation4 + $0xa34] ss:$52 sps:$4 sm:$0xff]  }
 0x30c   :  { %10030 = vmatprep.subr.bf16.mxu0 %v16212_v7  ;;  %v16270_v7 = vld [vmem:[#allocation4 + $0xa30] ss:$52 sps:$4 sm:$0xff]  }
 0x30e   :  { %10302 = vmatpush1.bf16.msra.mxu1 %v16207_v6  ;;  %v16267_v6 = vld [vmem:[#allocation4 + $0x6f8] ss:$52 sps:$4 sm:$0xff]  }
 0x30f   :  { %10031 = vmatpush1.bf16.msra.mxu0 %v16210_v8  ;;  %10303 = vmatprep.subr.bf16.mxu1 %v16215_v9  ;;  %v16275_v8 = vld [vmem:[#allocation4 + $0x764] ss:$52 sps:$4 sm:$0xff]   ;;  %v16273_v9 = vld [vmem:[#allocation4 + $0x760] ss:$52 sps:$4 sm:$0xff]  }
 0x310   :  { %10041 = vmatprep.subr.bf16.mxu0 %v16218_v11  ;;  %v16276_v11 = vld [vmem:[#allocation4 + $0xa98] ss:$52 sps:$4 sm:$0xff]  }
 0x312   :  { %10033 = vmatmul.mubr.bf16.vlgmr.msra.gmra.mrb[28].mxu0 %v18948_v43  ;;  %10304 = vmatpush1.bf16.msra.mxu1 %v16213_v10  ;;  %v16278_v10 = vld [vmem:[#allocation4 + $0xa9c] ss:$52 sps:$4 sm:$0xff]  }
 0x313   :  { %10042 = vmatpush1.bf16.msra.mxu0 %v16216_v12  ;;  %10073 = vmatprep.mubr.bf16.mxu0 %v19064_v0  ;;  %v16281_v12 = vld [vmem:[#allocation4 + $0x7cc] ss:$52 sps:$4 sm:$0xff]  }
 0x314   :  { %10305 = vmatprep.subr.bf16.mxu1 %v16221_v13  ;;  %10043 = vmatprep.subr.bf16.mxu0 %v16224_v42  ;;  %v16279_v13 = vld [vmem:[#allocation4 + $0x7c8] ss:$52 sps:$4 sm:$0xff]   ;;  %v16284_v42 = vld [vmem:[#allocation4 + $0xb04] ss:$52 sps:$4 sm:$0xff]  }
 0x316   :  { %10306 = vmatpush1.bf16.msra.mxu1 %v16219_v15  ;;  %v16282_v15 = vld [vmem:[#allocation4 + $0xb00] ss:$52 sps:$4 sm:$0xff]  }
 0x317   :  { %10044 = vmatpush1.bf16.msra.mxu0 %v16222_v17  ;;  %10307 = vmatprep.subr.bf16.mxu1 %v16227_v19  ;;  %v16287_v17 = vld [vmem:[#allocation4 + $0x834] ss:$52 sps:$4 sm:$0xff]   ;;  %v16285_v19 = vld [vmem:[#allocation4 + $0x830] ss:$52 sps:$4 sm:$0xff]  }
 0x318   :  { %10045 = vmatprep.subr.bf16.mxu0 %v16230_v21  ;;  %v16288_v21 = vld [vmem:[#allocation4 + $0xb68] ss:$52 sps:$4 sm:$0xff]  }
 0x31a   :  { %10308 = vmatpush1.bf16.msra.mxu1 %v16225_v20  ;;  %v16290_v20 = vld [vmem:[#allocation4 + $0xb6c] ss:$52 sps:$4 sm:$0xff]  }
 0x31b   :  { %10046 = vmatpush1.bf16.msra.mxu0 %v16228_v25  ;;  %10309 = vmatprep.subr.bf16.mxu1 %v16233_v27  ;;  %v16293_v25 = vld [vmem:[#allocation4 + $0x89c] ss:$52 sps:$4 sm:$0xff]   ;;  %v16291_v27 = vld [vmem:[#allocation4 + $0x898] ss:$52 sps:$4 sm:$0xff]  }
 0x31c   :  { %10047 = vmatprep.subr.bf16.mxu0 %v16236_v51  ;;  %v16294_v51 = vld [vmem:[#allocation4 + $0xbd0] ss:$52 sps:$4 sm:$0xff]  }
 0x31e   :  { %10310 = vmatpush1.bf16.msra.mxu1 %v16231_v28  ;;  %v16296_v28 = vld [vmem:[#allocation4 + $0xbd4] ss:$52 sps:$4 sm:$0xff]  }
 0x31f   :  { %10048 = vmatpush1.bf16.msra.mxu0 %v16234_v32  ;;  %10311 = vmatprep.subr.bf16.mxu1 %v16239_v14  ;;  %v16299_v32 = vld [vmem:[#allocation4 + $0x904] ss:$52 sps:$4 sm:$0xff]   ;;  %v16297_v14 = vld [vmem:[#allocation4 + $0x900] ss:$52 sps:$4 sm:$0xff]  }
 0x320   :  { %10049 = vmatprep.subr.bf16.mxu0 %v16242_v38  ;;  %v16300_v38 = vld [vmem:[#allocation4 + $0xc38] ss:$52 sps:$4 sm:$0xff]  }
 0x322   :  { %10312 = vmatpush1.bf16.msra.mxu1 %v16237_v35  ;;  %v16302_v35 = vld [vmem:[#allocation4 + $0xc3c] ss:$52 sps:$4 sm:$0xff]  }
 0x323   :  { %10050 = vmatpush1.bf16.msra.mxu0 %v16240_v40  ;;  %10313 = vmatprep.subr.bf16.mxu1 %v16245_v41  ;;  %v16305_v40 = vld [vmem:[#allocation4 + $0x96c] ss:$52 sps:$4 sm:$0xff]   ;;  %v16303_v41 = vld [vmem:[#allocation4 + $0x968] ss:$52 sps:$4 sm:$0xff]  }
 0x324   :  { %10051 = vmatprep.subr.bf16.mxu0 %v16248_v48  ;;  %v16306_v48 = vld [vmem:[#allocation4 + $0xca0] ss:$52 sps:$4 sm:$0xff]  }
 0x326   :  { %10314 = vmatpush1.bf16.msra.mxu1 %v16243_v44  ;;  %v16308_v44 = vld [vmem:[#allocation4 + $0xca4] ss:$52 sps:$4 sm:$0xff]  }
 0x327   :  { %10052 = vmatpush1.bf16.msra.mxu0 %v16246_v36  ;;  %10315 = vmatprep.subr.bf16.mxu1 %v16251_v49  ;;  %v16311_v36 = vld [vmem:[#allocation4 + $0x9d4] ss:$52 sps:$4 sm:$0xff]   ;;  %v16309_v49 = vld [vmem:[#allocation4 + $0x9d0] ss:$52 sps:$4 sm:$0xff]  }
 0x328   :  { %10053 = vmatprep.subr.bf16.mxu0 %v16254_v52  ;;  %v16312_v52 = vld [vmem:[#allocation4 + $0xd08] ss:$52 sps:$4 sm:$0xff]  }
 0x32a   :  { %10316 = vmatpush1.bf16.msra.mxu1 %v16249_v50  ;;  %v16314_v50 = vld [vmem:[#allocation4 + $0xd0c] ss:$52 sps:$4 sm:$0xff]  }
 0x32b   :  { %10054 = vmatpush1.bf16.msra.mxu0 %v16252_v53  ;;  %10317 = vmatprep.subr.bf16.mxu1 %v16257_v56  ;;  %v16317_v53 = vld [vmem:[#allocation4 + $0xa3c] ss:$52 sps:$4 sm:$0xff]   ;;  %v16320_v56 = vld [vmem:[#allocation4 + $0xd74] ss:$52 sps:$4 sm:$0xff]  }
 0x32c   :  { %10055 = vmatprep.subr.bf16.mxu0 %v16260_v34  ;;  %v16318_v34 = vld [vmem:[#allocation4 + $0xd70] ss:$52 sps:$4 sm:$0xff]  }
 0x32e   :  { %10318 = vmatpush1.bf16.msra.mxu1 %v16255_v57  ;;  %v16315_v57 = vld [vmem:[#allocation4 + $0xa38] ss:$52 sps:$4 sm:$0xff]  }
 0x32f   :  { %10056 = vmatpush1.bf16.msra.mxu0 %v16258_v23  ;;  %10328 = vmatprep.subr.bf16.mxu1 %v16263_v58  ;;  %v16323_v23 = vld [vmem:[#allocation4 + $0xaa4] ss:$52 sps:$4 sm:$0xff]   ;;  %v16321_v58 = vld [vmem:[#allocation4 + $0xaa0] ss:$52 sps:$4 sm:$0xff]  }
 0x330   :  { %10057 = vmatprep.subr.bf16.mxu0 %v16266_v61  ;;  %v16324_v61 = vld [vmem:[#allocation4 + $0xdd8] ss:$52 sps:$4 sm:$0xff]  }
 0x331   :  { %10320 = vmatmul.mubr.bf16.vlgmr.msra.gmra.mrb[8].mxu1 %v18948_v43 }
 0x332   :  { %10329 = vmatpush1.bf16.msra.mxu1 %v16261_v59  ;;  %10360 = vmatprep.mubr.bf16.mxu1 %v19064_v0  ;;  %v16326_v59 = vld [vmem:[#allocation4 + $0xddc] ss:$52 sps:$4 sm:$0xff]  }
 0x333   :  { %10058 = vmatpush1.bf16.msra.mxu0 %v16264_v1  ;;  %10330 = vmatprep.subr.bf16.mxu1 %v16269_v2  ;;  %v16329_v1 = vld [vmem:[#allocation4 + $0xb0c] ss:$52 sps:$4 sm:$0xff]   ;;  %v16327_v2 = vld [vmem:[#allocation4 + $0xb08] ss:$52 sps:$4 sm:$0xff]  }
 0x334   :  { %10059 = vmatprep.subr.bf16.mxu0 %v16272_v5  ;;  %v16332_v5 = vld [vmem:[#allocation4 + $0xe44] ss:$52 sps:$4 sm:$0xff]  }
 0x336   :  { %10331 = vmatpush1.bf16.msra.mxu1 %v16267_v6  ;;  %v16330_v6 = vld [vmem:[#allocation4 + $0xe40] ss:$52 sps:$4 sm:$0xff]  }
 0x337   :  { %10060 = vmatpush1.bf16.msra.mxu0 %v16270_v7  ;;  %10332 = vmatprep.subr.bf16.mxu1 %v16275_v8  ;;  %v16335_v7 = vld [vmem:[#allocation4 + $0xb74] ss:$52 sps:$4 sm:$0xff]   ;;  %v16333_v8 = vld [vmem:[#allocation4 + $0xb70] ss:$52 sps:$4 sm:$0xff]  }
 0x338   :  { %10061 = vmatprep.subr.bf16.mxu0 %v16278_v10  ;;  %v16336_v10 = vld [vmem:[#allocation4 + $0xea8] ss:$52 sps:$4 sm:$0xff]  }
 0x33a   :  { %10333 = vmatpush1.bf16.msra.mxu1 %v16273_v9  ;;  %v16338_v9 = vld [vmem:[#allocation4 + $0xeac] ss:$52 sps:$4 sm:$0xff]  }
 0x33b   :  { %10062 = vmatpush1.bf16.msra.mxu0 %v16276_v11  ;;  %10334 = vmatprep.subr.bf16.mxu1 %v16281_v12  ;;  %v16341_v11 = vld [vmem:[#allocation4 + $0xbdc] ss:$52 sps:$4 sm:$0xff]   ;;  %v16339_v12 = vld [vmem:[#allocation4 + $0xbd8] ss:$52 sps:$4 sm:$0xff]  }
 0x33c   :  { %10063 = vmatprep.subr.bf16.mxu0 %v16284_v42  ;;  %v16342_v42 = vld [vmem:[#allocation4 + $0xf10] ss:$52 sps:$4 sm:$0xff]  }
 0x33e   :  { %10335 = vmatpush1.bf16.msra.mxu1 %v16279_v13  ;;  %v16344_v13 = vld [vmem:[#allocation4 + $0xf14] ss:$52 sps:$4 sm:$0xff]  }
 0x33f   :  { %10064 = vmatpush1.bf16.msra.mxu0 %v16282_v15  ;;  %10336 = vmatprep.subr.bf16.mxu1 %v16287_v17  ;;  %v16347_v15 = vld [vmem:[#allocation4 + $0xc44] ss:$52 sps:$4 sm:$0xff]   ;;  %v16345_v17 = vld [vmem:[#allocation4 + $0xc40] ss:$52 sps:$4 sm:$0xff]  }
 0x340   :  { %10065 = vmatprep.subr.bf16.mxu0 %v16290_v20  ;;  %v16348_v20 = vld [vmem:[#allocation4 + $0xf78] ss:$52 sps:$4 sm:$0xff]  }
 0x342   :  { %10337 = vmatpush1.bf16.msra.mxu1 %v16285_v19  ;;  %v16350_v19 = vld [vmem:[#allocation4 + $0xf7c] ss:$52 sps:$4 sm:$0xff]  }
 0x343   :  { %10066 = vmatpush1.bf16.msra.mxu0 %v16288_v21  ;;  %10338 = vmatprep.subr.bf16.mxu1 %v16293_v25  ;;  %v16353_v21 = vld [vmem:[#allocation4 + $0xcac] ss:$52 sps:$4 sm:$0xff]   ;;  %v16351_v25 = vld [vmem:[#allocation4 + $0xca8] ss:$52 sps:$4 sm:$0xff]  }
 0x344   :  { %10067 = vmatprep.subr.bf16.mxu0 %v16296_v28  ;;  %v16354_v28 = vld [vmem:[#allocation4 + $0xfe0] ss:$52 sps:$4 sm:$0xff]  }
 0x346   :  { %10339 = vmatpush1.bf16.msra.mxu1 %v16291_v27  ;;  %v16356_v27 = vld [vmem:[#allocation4 + $0xfe4] ss:$52 sps:$4 sm:$0xff]  }
 0x347   :  { %10068 = vmatpush1.bf16.msra.mxu0 %v16294_v51  ;;  %10340 = vmatprep.subr.bf16.mxu1 %v16299_v32  ;;  %v16359_v51 = vld [vmem:[#allocation4 + $0xd14] ss:$52 sps:$4 sm:$0xff]   ;;  %v16357_v32 = vld [vmem:[#allocation4 + $0xd10] ss:$52 sps:$4 sm:$0xff]  }
 0x348   :  { %10069 = vmatprep.subr.bf16.mxu0 %v16302_v35  ;;  %v16360_v35 = vld [vmem:[#allocation4 + $0x1048] ss:$52 sps:$4 sm:$0xff]  }
 0x34a   :  { %10341 = vmatpush1.bf16.msra.mxu1 %v16297_v14  ;;  %v16362_v14 = vld [vmem:[#allocation4 + $0x104c] ss:$52 sps:$4 sm:$0xff]  }
 0x34b   :  { %10070 = vmatpush1.bf16.msra.mxu0 %v16300_v38  ;;  %10342 = vmatprep.subr.bf16.mxu1 %v16305_v40  ;;  %v16365_v38 = vld [vmem:[#allocation4 + $0xd7c] ss:$52 sps:$4 sm:$0xff]   ;;  %v16368_v40 = vld [vmem:[#allocation4 + $0x10b4] ss:$52 sps:$4 sm:$0xff]  }
 0x34c   :  { %10071 = vmatprep.subr.bf16.mxu0 %v16308_v44  ;;  %v16366_v44 = vld [vmem:[#allocation4 + $0x10b0] ss:$52 sps:$4 sm:$0xff]  }
 0x34e   :  { %10343 = vmatpush1.bf16.msra.mxu1 %v16303_v41  ;;  %v16363_v41 = vld [vmem:[#allocation4 + $0xd78] ss:$52 sps:$4 sm:$0xff]  }
 0x34f   :  { %10072 = vmatpush1.bf16.msra.mxu0 %v16306_v48  ;;  %10344 = vmatprep.subr.bf16.mxu1 %v16311_v36  ;;  %v16371_v48 = vld [vmem:[#allocation4 + $0xde4] ss:$52 sps:$4 sm:$0xff]   ;;  %v16369_v36 = vld [vmem:[#allocation4 + $0xde0] ss:$52 sps:$4 sm:$0xff]  }
 0x350   :  { %10082 = vmatprep.subr.bf16.mxu0 %v16314_v50  ;;  %v16372_v50 = vld [vmem:[#allocation4 + $0x1118] ss:$52 sps:$4 sm:$0xff]  }
 0x352   :  { %10074 = vmatmul.mubr.bf16.vlgmr.msra.gmra.mrb[28].mxu0 %v19062_v63  ;;  %10345 = vmatpush1.bf16.msra.mxu1 %v16309_v49  ;;  %v16374_v49 = vld [vmem:[#allocation4 + $0x111c] ss:$52 sps:$4 sm:$0xff]  }
 0x353   :  { %10083 = vmatpush1.bf16.msra.mxu0 %v16312_v52  ;;  %10114 = vmatprep.mubr.bf16.mxu0 %v19082_v55  ;;  %v16377_v52 = vld [vmem:[#allocation4 + $0xe4c] ss:$52 sps:$4 sm:$0xff]  }
 0x354   :  { %10346 = vmatprep.subr.bf16.mxu1 %v16317_v53  ;;  %10084 = vmatprep.subr.bf16.mxu0 %v16320_v56  ;;  %v16375_v53 = vld [vmem:[#allocation4 + $0xe48] ss:$52 sps:$4 sm:$0xff]   ;;  %v16380_v56 = vld [vmem:[#allocation4 + $0x1184] ss:$52 sps:$4 sm:$0xff]  }
 0x356   :  { %10347 = vmatpush1.bf16.msra.mxu1 %v16315_v57  ;;  %v16378_v57 = vld [vmem:[#allocation4 + $0x1180] ss:$52 sps:$4 sm:$0xff]  }
 0x357   :  { %10085 = vmatpush1.bf16.msra.mxu0 %v16318_v34  ;;  %10348 = vmatprep.subr.bf16.mxu1 %v16323_v23  ;;  %v16383_v34 = vld [vmem:[#allocation4 + $0xeb4] ss:$52 sps:$4 sm:$0xff]   ;;  %v16381_v23 = vld [vmem:[#allocation4 + $0xeb0] ss:$52 sps:$4 sm:$0xff]  }
 0x358   :  { %10086 = vmatprep.subr.bf16.mxu0 %v16326_v59  ;;  %v16384_v59 = vld [vmem:[#allocation4 + $0x11e8] ss:$52 sps:$4 sm:$0xff]  }
 0x35a   :  { %10349 = vmatpush1.bf16.msra.mxu1 %v16321_v58  ;;  %v16386_v58 = vld [vmem:[#allocation4 + $0x11ec] ss:$52 sps:$4 sm:$0xff]  }
 0x35b   :  { %10087 = vmatpush1.bf16.msra.mxu0 %v16324_v61  ;;  %10350 = vmatprep.subr.bf16.mxu1 %v16329_v1  ;;  %v16389_v61 = vld [vmem:[#allocation4 + $0xf1c] ss:$52 sps:$4 sm:$0xff]   ;;  %v16387_v1 = vld [vmem:[#allocation4 + $0xf18] ss:$52 sps:$4 sm:$0xff]  }
 0x35c   :  { %10088 = vmatprep.subr.bf16.mxu0 %v16332_v5  ;;  %v16390_v5 = vld [vmem:[#allocation4 + $0x1250] ss:$52 sps:$4 sm:$0xff]  }
 0x35e   :  { %10351 = vmatpush1.bf16.msra.mxu1 %v16327_v2  ;;  %v16392_v2 = vld [vmem:[#allocation4 + $0x1254] ss:$52 sps:$4 sm:$0xff]  }
 0x35f   :  { %10089 = vmatpush1.bf16.msra.mxu0 %v16330_v6  ;;  %10352 = vmatprep.subr.bf16.mxu1 %v16335_v7  ;;  %v16395_v6 = vld [vmem:[#allocation4 + $0xf84] ss:$52 sps:$4 sm:$0xff]   ;;  %v16393_v7 = vld [vmem:[#allocation4 + $0xf80] ss:$52 sps:$4 sm:$0xff]  }
 0x360   :  { %10090 = vmatprep.subr.bf16.mxu0 %v16338_v9  ;;  %v16396_v9 = vld [vmem:[#allocation4 + $0x12b8] ss:$52 sps:$4 sm:$0xff]  }
 0x362   :  { %10353 = vmatpush1.bf16.msra.mxu1 %v16333_v8  ;;  %v16398_v8 = vld [vmem:[#allocation4 + $0x12bc] ss:$52 sps:$4 sm:$0xff]  }
 0x363   :  { %10091 = vmatpush1.bf16.msra.mxu0 %v16336_v10  ;;  %10354 = vmatprep.subr.bf16.mxu1 %v16341_v11  ;;  %v16401_v10 = vld [vmem:[#allocation4 + $0xfec] ss:$52 sps:$4 sm:$0xff]   ;;  %v16399_v11 = vld [vmem:[#allocation4 + $0xfe8] ss:$52 sps:$4 sm:$0xff]  }
 0x364   :  { %10092 = vmatprep.subr.bf16.mxu0 %v16344_v13  ;;  %v16402_v13 = vld [vmem:[#allocation4 + $0x1320] ss:$52 sps:$4 sm:$0xff]  }
 0x366   :  { %10355 = vmatpush1.bf16.msra.mxu1 %v16339_v12  ;;  %v16404_v12 = vld [vmem:[#allocation4 + $0x1324] ss:$52 sps:$4 sm:$0xff]  }
 0x367   :  { %10093 = vmatpush1.bf16.msra.mxu0 %v16342_v42  ;;  %10356 = vmatprep.subr.bf16.mxu1 %v16347_v15  ;;  %v16407_v42 = vld [vmem:[#allocation4 + $0x1054] ss:$52 sps:$4 sm:$0xff]   ;;  %v16405_v15 = vld [vmem:[#allocation4 + $0x1050] ss:$52 sps:$4 sm:$0xff]  }
 0x368   :  { %10094 = vmatprep.subr.bf16.mxu0 %v16350_v19  ;;  %v16408_v19 = vld [vmem:[#allocation4 + $0x1388] ss:$52 sps:$4 sm:$0xff]  }
 0x36a   :  { %10357 = vmatpush1.bf16.msra.mxu1 %v16345_v17  ;;  %v16410_v17 = vld [vmem:[#allocation4 + $0x138c] ss:$52 sps:$4 sm:$0xff]  }
 0x36b   :  { %10095 = vmatpush1.bf16.msra.mxu0 %v16348_v20  ;;  %10358 = vmatprep.subr.bf16.mxu1 %v16353_v21  ;;  %v16413_v20 = vld [vmem:[#allocation4 + $0x10bc] ss:$52 sps:$4 sm:$0xff]   ;;  %v16416_v21 = vld [vmem:[#allocation4 + $0x13f4] ss:$52 sps:$4 sm:$0xff]  }
 0x36c   :  { %10096 = vmatprep.subr.bf16.mxu0 %v16356_v27  ;;  %v16414_v27 = vld [vmem:[#allocation4 + $0x13f0] ss:$52 sps:$4 sm:$0xff]  }
 0x36e   :  { %10359 = vmatpush1.bf16.msra.mxu1 %v16351_v25  ;;  %v16411_v25 = vld [vmem:[#allocation4 + $0x10b8] ss:$52 sps:$4 sm:$0xff]  }
 0x36f   :  { %10097 = vmatpush1.bf16.msra.mxu0 %v16354_v28  ;;  %10369 = vmatprep.subr.bf16.mxu1 %v16359_v51  ;;  %v16419_v28 = vld [vmem:[#allocation4 + $0x1124] ss:$52 sps:$4 sm:$0xff]   ;;  %v16417_v51 = vld [vmem:[#allocation4 + $0x1120] ss:$52 sps:$4 sm:$0xff]  }
 0x370   :  { %10098 = vmatprep.subr.bf16.mxu0 %v16362_v14  ;;  %v16420_v14 = vld [vmem:[#allocation4 + $0x1458] ss:$52 sps:$4 sm:$0xff]  }
 0x371   :  { %10361 = vmatmul.mubr.bf16.vlgmr.msra.gmra.mrb[8].mxu1 %v19062_v63 }
 0x372   :  { %10370 = vmatpush1.bf16.msra.mxu1 %v16357_v32  ;;  %10401 = vmatprep.mubr.bf16.mxu1 %v19082_v55  ;;  %v16422_v32 = vld [vmem:[#allocation4 + $0x145c] ss:$52 sps:$4 sm:$0xff]  }
 0x373   :  { %10099 = vmatpush1.bf16.msra.mxu0 %v16360_v35  ;;  %10371 = vmatprep.subr.bf16.mxu1 %v16365_v38  ;;  %v16425_v35 = vld [vmem:[#allocation4 + $0x118c] ss:$52 sps:$4 sm:$0xff]   ;;  %v16423_v38 = vld [vmem:[#allocation4 + $0x1188] ss:$52 sps:$4 sm:$0xff]  }
 0x374   :  { %10100 = vmatprep.subr.bf16.mxu0 %v16368_v40  ;;  %v16428_v40 = vld [vmem:[#allocation4 + $0x14c4] ss:$52 sps:$4 sm:$0xff]  }
 0x376   :  { %10372 = vmatpush1.bf16.msra.mxu1 %v16363_v41  ;;  %v16426_v41 = vld [vmem:[#allocation4 + $0x14c0] ss:$52 sps:$4 sm:$0xff]  }
 0x377   :  { %10101 = vmatpush1.bf16.msra.mxu0 %v16366_v44  ;;  %10373 = vmatprep.subr.bf16.mxu1 %v16371_v48  ;;  %v16431_v44 = vld [vmem:[#allocation4 + $0x11f4] ss:$52 sps:$4 sm:$0xff]   ;;  %v16429_v48 = vld [vmem:[#allocation4 + $0x11f0] ss:$52 sps:$4 sm:$0xff]  }
 0x378   :  { %10102 = vmatprep.subr.bf16.mxu0 %v16374_v49  ;;  %v16432_v49 = vld [vmem:[#allocation4 + $0x1528] ss:$52 sps:$4 sm:$0xff]  }
 0x37a   :  { %10374 = vmatpush1.bf16.msra.mxu1 %v16369_v36  ;;  %v16434_v36 = vld [vmem:[#allocation4 + $0x152c] ss:$52 sps:$4 sm:$0xff]  }
 0x37b   :  { %10103 = vmatpush1.bf16.msra.mxu0 %v16372_v50  ;;  %10375 = vmatprep.subr.bf16.mxu1 %v16377_v52  ;;  %v16437_v50 = vld [vmem:[#allocation4 + $0x125c] ss:$52 sps:$4 sm:$0xff]   ;;  %v16435_v52 = vld [vmem:[#allocation4 + $0x1258] ss:$52 sps:$4 sm:$0xff]  }
 0x37c   :  { %10104 = vmatprep.subr.bf16.mxu0 %v16380_v56  ;;  %v16438_v56 = vld [vmem:[#allocation4 + $0x1590] ss:$52 sps:$4 sm:$0xff]  }
 0x37e   :  { %10376 = vmatpush1.bf16.msra.mxu1 %v16375_v53  ;;  %v16440_v53 = vld [vmem:[#allocation4 + $0x1594] ss:$52 sps:$4 sm:$0xff]  }
 0x37f   :  { %10105 = vmatpush1.bf16.msra.mxu0 %v16378_v57  ;;  %10377 = vmatprep.subr.bf16.mxu1 %v16383_v34  ;;  %v16443_v57 = vld [vmem:[#allocation4 + $0x12c4] ss:$52 sps:$4 sm:$0xff]   ;;  %v16441_v34 = vld [vmem:[#allocation4 + $0x12c0] ss:$52 sps:$4 sm:$0xff]  }
 0x380   :  { %10106 = vmatprep.subr.bf16.mxu0 %v16386_v58 }
 0x382   :  { %10378 = vmatpush1.bf16.msra.mxu1 %v16381_v23  ;;  %v16446_v23 = vld [vmem:[#allocation4 + $0x15fc] ss:$52 sps:$4 sm:$0xff]  }
 0x383   :  { %10107 = vmatpush1.bf16.msra.mxu0 %v16384_v59  ;;  %10379 = vmatprep.subr.bf16.mxu1 %v16389_v61 }
 0x384   :  { %10108 = vmatprep.subr.bf16.mxu0 %v16392_v2  ;;  %v16449_v2 = vld [vmem:[#allocation4 + $0x132c] ss:$52 sps:$4 sm:$0xff]  }
 0x386   :  { %10380 = vmatpush1.bf16.msra.mxu1 %v16387_v1  ;;  %v16444_v1 = vld [vmem:[#allocation4 + $0x15f8] ss:$52 sps:$4 sm:$0xff]  }
 0x387   :  { %10109 = vmatpush1.bf16.msra.mxu0 %v16390_v5  ;;  %10381 = vmatprep.subr.bf16.mxu1 %v16395_v6  ;;  %v16447_v6 = vld [vmem:[#allocation4 + $0x1328] ss:$52 sps:$4 sm:$0xff]  }
 0x388   :  { %10110 = vmatprep.subr.bf16.mxu0 %v16398_v8  ;;  %v16450_v8 = vld [vmem:[#allocation4 + $0x1660] ss:$52 sps:$4 sm:$0xff]  }
 0x38a   :  { %10382 = vmatpush1.bf16.msra.mxu1 %v16393_v7  ;;  %v16452_v7 = vld [vmem:[#allocation4 + $0x1664] ss:$52 sps:$4 sm:$0xff]  }
 0x38b   :  { %10111 = vmatpush1.bf16.msra.mxu0 %v16396_v9  ;;  %10383 = vmatprep.subr.bf16.mxu1 %v16401_v10  ;;  %v16455_v9 = vld [vmem:[#allocation4 + $0x1394] ss:$52 sps:$4 sm:$0xff]   ;;  %v16453_v10 = vld [vmem:[#allocation4 + $0x1390] ss:$52 sps:$4 sm:$0xff]  }
 0x38c   :  { %10112 = vmatprep.subr.bf16.mxu0 %v16404_v12  ;;  %v16456_v12 = vld [vmem:[#allocation4 + $0x16c8] ss:$52 sps:$4 sm:$0xff]  }
 0x38e   :  { %10384 = vmatpush1.bf16.msra.mxu1 %v16399_v11  ;;  %v16458_v11 = vld [vmem:[#allocation4 + $0x16cc] ss:$52 sps:$4 sm:$0xff]  }
 0x38f   :  { %10113 = vmatpush1.bf16.msra.mxu0 %v16402_v13  ;;  %10385 = vmatprep.subr.bf16.mxu1 %v16407_v42  ;;  %v16461_v13 = vld [vmem:[#allocation4 + $0x13fc] ss:$52 sps:$4 sm:$0xff]   ;;  %v16464_v42 = vld [vmem:[#allocation4 + $0x1734] ss:$52 sps:$4 sm:$0xff]  }
 0x390   :  { %10123 = vmatprep.subr.bf16.mxu0 %v16410_v17  ;;  %v16462_v17 = vld [vmem:[#allocation4 + $0x1730] ss:$52 sps:$4 sm:$0xff]  }
 0x392   :  { %10115 = vmatmul.mubr.bf16.vlgmr.msra.gmra.mrb[28].mxu0 %v19080_v54  ;;  %10386 = vmatpush1.bf16.msra.mxu1 %v16405_v15  ;;  %v16459_v15 = vld [vmem:[#allocation4 + $0x13f8] ss:$52 sps:$4 sm:$0xff]  }
 0x393   :  { %10124 = vmatpush1.bf16.msra.mxu0 %v16408_v19  ;;  %10155 = vmatprep.mubr.bf16.mxu0 %v19105_v62  ;;  %v16467_v19 = vld [vmem:[#allocation4 + $0x1464] ss:$52 sps:$4 sm:$0xff]  }
 0x394   :  { %10387 = vmatprep.subr.bf16.mxu1 %v16413_v20  ;;  %10125 = vmatprep.subr.bf16.mxu0 %v16416_v21  ;;  %v16465_v20 = vld [vmem:[#allocation4 + $0x1460] ss:$52 sps:$4 sm:$0xff]   ;;  %v16470_v21 = vld [vmem:[#allocation4 + $0x179c] ss:$52 sps:$4 sm:$0xff]  }
 0x396   :  { %10388 = vmatpush1.bf16.msra.mxu1 %v16411_v25  ;;  %v16468_v25 = vld [vmem:[#allocation4 + $0x1798] ss:$52 sps:$4 sm:$0xff]  }
 0x397   :  { %10126 = vmatpush1.bf16.msra.mxu0 %v16414_v27  ;;  %10389 = vmatprep.subr.bf16.mxu1 %v16419_v28  ;;  %v16473_v27 = vld [vmem:[#allocation4 + $0x14cc] ss:$52 sps:$4 sm:$0xff]   ;;  %v16471_v28 = vld [vmem:[#allocation4 + $0x14c8] ss:$52 sps:$4 sm:$0xff]  }
 0x398   :  { %10127 = vmatprep.subr.bf16.mxu0 %v16422_v32  ;;  %v16474_v32 = vld [vmem:[#allocation4 + $0x1800] ss:$52 sps:$4 sm:$0xff]  }
 0x39a   :  { %10390 = vmatpush1.bf16.msra.mxu1 %v16417_v51  ;;  %v16476_v51 = vld [vmem:[#allocation4 + $0x1804] ss:$52 sps:$4 sm:$0xff]  }
 0x39b   :  { %10128 = vmatpush1.bf16.msra.mxu0 %v16420_v14  ;;  %10391 = vmatprep.subr.bf16.mxu1 %v16425_v35  ;;  %v16479_v14 = vld [vmem:[#allocation4 + $0x1534] ss:$52 sps:$4 sm:$0xff]   ;;  %v16482_v35 = vld [vmem:[#allocation4 + $0x186c] ss:$52 sps:$4 sm:$0xff]  }
 0x39c   :  { %10129 = vmatprep.subr.bf16.mxu0 %v16428_v40  ;;  %v3172_v40 = vld [vmem:[#allocation6] sm:$0xff] }
 0x39e   :  { %10392 = vmatpush1.bf16.msra.mxu1 %v16423_v38  ;;  %v16477_v38 = vld [vmem:[#allocation4 + $0x1530] ss:$52 sps:$4 sm:$0xff]  }
 0x39f   :  { %10130 = vmatpush1.bf16.msra.mxu0 %v16426_v41  ;;  %10393 = vmatprep.subr.bf16.mxu1 %v16431_v44  ;;  %v16480_v41 = vld [vmem:[#allocation4 + $0x1868] ss:$52 sps:$4 sm:$0xff]  }
 0x3a0   :  { %10131 = vmatprep.subr.bf16.mxu0 %v16434_v36  ;;  %v16485_v44 = vld [vmem:[#allocation4 + $0x159c] ss:$52 sps:$4 sm:$0xff]   ;;  %v16488_v36 = vld [vmem:[#allocation4 + $0x18d4] ss:$52 sps:$4 sm:$0xff]  }
 0x3a2   :  { %10394 = vmatpush1.bf16.msra.mxu1 %v16429_v48  ;;  %v16483_v48 = vld [vmem:[#allocation4 + $0x1598] ss:$52 sps:$4 sm:$0xff]  }
 0x3a3   :  { %10132 = vmatpush1.bf16.msra.mxu0 %v16432_v49  ;;  %10395 = vmatprep.subr.bf16.mxu1 %v16437_v50  ;;  %v3179_v49 = vrot.slane %v3172_v40, %v18919_v22  ;;  %v3183_v50 = vrot.slane %v3172_v40, %v18924_v24  ;;  %v16530_v40 = vld [vmem:[#allocation4 + $0x1bac] ss:$52 sps:$4 sm:$0xff]  }
 0x3a4   :  { %10133 = vmatprep.subr.bf16.mxu0 %v16440_v53  ;;  %v16491_v53 = vld [vmem:[#allocation4 + $0x1604] ss:$52 sps:$4 sm:$0xff]  }
 0x3a5   :  { %v19147_v58 = vpop.f32.mrb[24].mxu0 }
 0x3a6   :  { %10396 = vmatpush1.bf16.msra.mxu1 %v16435_v52  ;;  %v19149_v59 = vpop.f32.mrb[25].mxu0  ;;  %v16486_v52 = vld [vmem:[#allocation4 + $0x18d0] ss:$52 sps:$4 sm:$0xff]  }
 0x3a7   :  { %10134 = vmatpush1.bf16.msra.mxu0 %v16438_v56  ;;  %v9997_v61 = vpop.f32.mrb[26].mxu0  ;;  %10397 = vmatprep.subr.bf16.mxu1 %v16443_v57  ;;  %v16489_v57 = vld [vmem:[#allocation4 + $0x1600] ss:$52 sps:$4 sm:$0xff]  }
 0x3a8   :  { %v9998_v5 = vpop.f32.mrb[27].mxu0  ;;  %10135 = vmatprep.subr.bf16.mxu0 %v16446_v23 }
 0x3aa   :  { %10398 = vmatpush1.bf16.msra.mxu1 %v16441_v34  ;;  %v16494_v34 = vld [vmem:[#allocation4 + $0x193c] ss:$52 sps:$4 sm:$0xff]  }
 0x3ab   :  { %10136 = vmatpush1.bf16.msra.mxu0 %v16444_v1  ;;  %10399 = vmatprep.subr.bf16.mxu1 %v16449_v2 }
 0x3ac   :  { %10137 = vmatprep.subr.bf16.mxu0 %v16452_v7  ;;  %v16492_v7 = vld [vmem:[#allocation4 + $0x1938] ss:$52 sps:$4 sm:$0xff]  }
 0x3ae   :  { %10400 = vmatpush1.bf16.msra.mxu1 %v16447_v6 }
 0x3af   :  { %10138 = vmatpush1.bf16.msra.mxu0 %v16450_v8  ;;  %10410 = vmatprep.subr.bf16.mxu1 %v16455_v9  ;;  %v16497_v8 = vld [vmem:[#allocation4 + $0x166c] ss:$52 sps:$4 sm:$0xff]  }
 0x3b0   :  { %10139 = vmatprep.subr.bf16.mxu0 %v16458_v11  ;;  %v16500_v11 = vld [vmem:[#allocation4 + $0x19a4] ss:$52 sps:$4 sm:$0xff]  }
 0x3b1   :  { %10402 = vmatmul.mubr.bf16.vlgmr.msra.gmra.mrb[8].mxu1 %v19080_v54 }
 0x3b2   :  { %10411 = vmatpush1.bf16.msra.mxu1 %v16453_v10  ;;  %10442 = vmatprep.mubr.bf16.mxu1 %v19105_v62  ;;  %v16495_v10 = vld [vmem:[#allocation4 + $0x1668] ss:$52 sps:$4 sm:$0xff]  }
 0x3b3   :  { %10140 = vmatpush1.bf16.msra.mxu0 %v16456_v12  ;;  %10412 = vmatprep.subr.bf16.mxu1 %v16461_v13  ;;  %v16498_v12 = vld [vmem:[#allocation4 + $0x19a0] ss:$52 sps:$4 sm:$0xff]  }
 0x3b4   :  { %10141 = vmatprep.subr.bf16.mxu0 %v16464_v42  ;;  %v16503_v13 = vld [vmem:[#allocation4 + $0x16d4] ss:$52 sps:$4 sm:$0xff]   ;;  %v16501_v42 = vld [vmem:[#allocation4 + $0x16d0] ss:$52 sps:$4 sm:$0xff]  }
 0x3b6   :  { %10413 = vmatpush1.bf16.msra.mxu1 %v16459_v15  ;;  %v16504_v15 = vld [vmem:[#allocation4 + $0x1a08] ss:$52 sps:$4 sm:$0xff]  }
 0x3b7   :  { %10142 = vmatpush1.bf16.msra.mxu0 %v16462_v17  ;;  %10414 = vmatprep.subr.bf16.mxu1 %v16467_v19  ;;  %v16509_v17 = vld [vmem:[#allocation4 + $0x173c] ss:$52 sps:$4 sm:$0xff]   ;;  %v16512_v19 = vld [vmem:[#allocation4 + $0x1a74] ss:$52 sps:$4 sm:$0xff]  }
 0x3b8   :  { %10143 = vmatprep.subr.bf16.mxu0 %v16470_v21  ;;  %v16515_v21 = vld [vmem:[#allocation4 + $0x17a4] ss:$52 sps:$4 sm:$0xff]  }
 0x3ba   :  { %10415 = vmatpush1.bf16.msra.mxu1 %v16465_v20  ;;  %v16510_v20 = vld [vmem:[#allocation4 + $0x1a70] ss:$52 sps:$4 sm:$0xff]  }
 0x3bb   :  { %10144 = vmatpush1.bf16.msra.mxu0 %v16468_v25  ;;  %10416 = vmatprep.subr.bf16.mxu1 %v16473_v27  ;;  %v16518_v25 = vld [vmem:[#allocation4 + $0x1adc] ss:$52 sps:$4 sm:$0xff]   ;;  %v16513_v27 = vld [vmem:[#allocation4 + $0x17a0] ss:$52 sps:$4 sm:$0xff]  }
 0x3bc   :  { %10145 = vmatprep.subr.bf16.mxu0 %v16476_v51  ;;  %v16521_v51 = vld [vmem:[#allocation4 + $0x180c] ss:$52 sps:$4 sm:$0xff]  }
 0x3be   :  { %10417 = vmatpush1.bf16.msra.mxu1 %v16471_v28  ;;  %v16516_v28 = vld [vmem:[#allocation4 + $0x1ad8] ss:$52 sps:$4 sm:$0xff]  }
 0x3bf   :  { %10146 = vmatpush1.bf16.msra.mxu0 %v16474_v32  ;;  %10418 = vmatprep.subr.bf16.mxu1 %v16479_v14  ;;  %v16524_v32 = vld [vmem:[#allocation4 + $0x1b44] ss:$52 sps:$4 sm:$0xff]   ;;  %v16519_v14 = vld [vmem:[#allocation4 + $0x1808] ss:$52 sps:$4 sm:$0xff]  }
 0x3c0   :  { %10147 = vmatprep.subr.bf16.mxu0 %v16482_v35  ;;  %v16522_v35 = vld [vmem:[#allocation4 + $0x1b40] ss:$52 sps:$4 sm:$0xff]  }
 0x3c2   :  { %10419 = vmatpush1.bf16.msra.mxu1 %v16477_v38  ;;  %v16527_v38 = vld [vmem:[#allocation4 + $0x1874] ss:$52 sps:$4 sm:$0xff]  }
 0x3c3   :  { %10148 = vmatpush1.bf16.msra.mxu0 %v16480_v41  ;;  %10420 = vmatprep.subr.bf16.mxu1 %v16485_v44  ;;  %v16525_v41 = vld [vmem:[#allocation4 + $0x1870] ss:$52 sps:$4 sm:$0xff]   ;;  %v16528_v44 = vld [vmem:[#allocation4 + $0x1ba8] ss:$52 sps:$4 sm:$0xff]  }
 0x3c4   :  { %v9952_v56 = vpop.f32.mrb[4].mxu1  ;;  %10149 = vmatprep.subr.bf16.mxu0 %v16488_v36  ;;  %v16531_v36 = vld [vmem:[#allocation4 + $0x18d8] ss:$52 sps:$4 sm:$0xff]  }
 0x3c5   :  { %v15346_v23 = vadd.f32 %v9952_v56, %v3179_v49  ;;  %v9954_v61 = vpop.f32.mrb[5].mxu1  ;;  %v16536_v49 = vld [vmem:[#allocation4 + $0x1c14] ss:$52 sps:$4 sm:$0xff]   ;;  %v16542_v56 = vld [vmem:[#allocation4 + $0x1c7c] ss:$52 sps:$4 sm:$0xff]  }
 0x3c6   :  { %v15348_v1 = vadd.f32 %v9954_v61, %v3183_v50  ;;  %v9956_v2 = vpop.f32.mrb[6].mxu1  ;;  %10421 = vmatpush1.bf16.msra.mxu1 %v16483_v48  ;;  %v16533_v48 = vld [vmem:[#allocation4 + $0x18dc] ss:$52 sps:$4 sm:$0xff]   ;;  %v16548_v61 = vld [vmem:[#allocation4 + $0x1ce4] ss:$52 sps:$4 sm:$0xff]  }
 0x3c7   :  { %v19156_v5 = vadd.f32 %v15346_v23, %v19147_v58  ;;  %v9957_v6 = vpop.f32.mrb[7].mxu1  ;;  %10150 = vmatpush1.bf16.msra.mxu0 %v16486_v52  ;;  %10422 = vmatprep.subr.bf16.mxu1 %v16491_v53  ;;  %v16506_v58 = vld [vmem:[#allocation4 + $0x1a0c] ss:$52 sps:$4 sm:$0xff]   ;;  %v16534_v50 = vld [vmem:[#allocation4 + $0x1c10] ss:$52 sps:$4 sm:$0xff]  }
 0x3c8   :  { %v19159_v9 = vadd.f32 %v15348_v1, %v19149_v59  ;;  %10151 = vmatprep.subr.bf16.mxu0 %v16494_v34  ;;  %v16507_v59 = vld [vmem:[#allocation4 + $0x1738] ss:$52 sps:$4 sm:$0xff]   ;;  %v16537_v53 = vld [vmem:[#allocation4 + $0x1940] ss:$52 sps:$4 sm:$0xff]   ;;  %v16543_v23 = vld [vmem:[#allocation4 + $0x19a8] ss:$52 sps:$4 sm:$0xff]  }
 0x3c9   :  { %v16539_v52 = vld [vmem:[#allocation4 + $0x1944] ss:$52 sps:$4 sm:$0xff]   ;;  %v16545_v34 = vld [vmem:[#allocation4 + $0x19ac] ss:$52 sps:$4 sm:$0xff]   ;;  %v16551_v2 = vld [vmem:[#allocation4 + $0x1a14] ss:$52 sps:$4 sm:$0xff]  }
 0x3ca   :  { %10423 = vmatpush1.bf16.msra.mxu1 %v16489_v57  ;;  %v16540_v57 = vld [vmem:[#allocation4 + $0x1c78] ss:$52 sps:$4 sm:$0xff]   ;;  %v16546_v1 = vld [vmem:[#allocation4 + $0x1ce0] ss:$52 sps:$4 sm:$0xff]   ;;  %v16549_v6 = vld [vmem:[#allocation4 + $0x1a10] ss:$52 sps:$4 sm:$0xff]  }
 0x3cb   :  { %10152 = vmatpush1.bf16.msra.mxu0 %v16492_v7  ;;  %10424 = vmatprep.subr.bf16.mxu1 %v16497_v8  ;;  %v16554_v7 = vld [vmem:[#allocation4 + $0x1d4c] ss:$52 sps:$4 sm:$0xff]   ;;  %v16552_v8 = vld [vmem:[#allocation4 + $0x1d48] ss:$52 sps:$4 sm:$0xff]  }
 0x3cc   :  { %10153 = vmatprep.subr.bf16.mxu0 %v16500_v11  ;;  %v16560_v11 = vld [vmem:[#allocation4 + $0x1db4] ss:$52 sps:$4 sm:$0xff]  }
 0x3ce   :  { %10425 = vmatpush1.bf16.msra.mxu1 %v16495_v10  ;;  %v16557_v10 = vld [vmem:[#allocation4 + $0x1a7c] ss:$52 sps:$4 sm:$0xff]  }
 0x3cf   :  { %10154 = vmatpush1.bf16.msra.mxu0 %v16498_v12  ;;  %10426 = vmatprep.subr.bf16.mxu1 %v16503_v13  ;;  %v16555_v12 = vld [vmem:[#allocation4 + $0x1a78] ss:$52 sps:$4 sm:$0xff]   ;;  %v16558_v13 = vld [vmem:[#allocation4 + $0x1db0] ss:$52 sps:$4 sm:$0xff]  }
 0x3d0   :  { %10164 = vmatprep.subr.bf16.mxu0 %v16506_v58  ;;  %v16561_v58 = vld [vmem:[#allocation4 + $0x1ae0] ss:$52 sps:$4 sm:$0xff]  }
 0x3d2   :  { %10156 = vmatmul.mubr.bf16.vlgmr.msra.gmra.mrb[28].mxu0 %v19103_v60  ;;  %10427 = vmatpush1.bf16.msra.mxu1 %v16501_v42  ;;  %v16563_v42 = vld [vmem:[#allocation4 + $0x1ae4] ss:$52 sps:$4 sm:$0xff]  }
 0x3d3   :  { %10165 = vmatpush1.bf16.msra.mxu0 %v16504_v15  ;;  %10196 = vmatprep.mubr.bf16.mxu0 %v19118_v4  ;;  %v16566_v15 = vld [vmem:[#allocation4 + $0x1e1c] ss:$52 sps:$4 sm:$0xff]  }
 0x3d4   :  { %10428 = vmatprep.subr.bf16.mxu1 %v16509_v17  ;;  %10166 = vmatprep.subr.bf16.mxu0 %v16512_v19  ;;  %v16564_v17 = vld [vmem:[#allocation4 + $0x1e18] ss:$52 sps:$4 sm:$0xff]  }
 0x3d5   :  { %v16569_v19 = vld [vmem:[#allocation4 + $0x1b4c] ss:$52 sps:$4 sm:$0xff]  }
 0x3d6   :  { %10429 = vmatpush1.bf16.msra.mxu1 %v16507_v59  ;;  %v16567_v59 = vld [vmem:[#allocation4 + $0x1b48] ss:$52 sps:$4 sm:$0xff]  }
 0x3d7   :  { %10167 = vmatpush1.bf16.msra.mxu0 %v16510_v20  ;;  %10430 = vmatprep.subr.bf16.mxu1 %v16515_v21  ;;  %v16572_v20 = vld [vmem:[#allocation4 + $0x1e84] ss:$52 sps:$4 sm:$0xff]   ;;  %v16570_v21 = vld [vmem:[#allocation4 + $0x1e80] ss:$52 sps:$4 sm:$0xff]  }
 0x3d8   :  { %10168 = vmatprep.subr.bf16.mxu0 %v16518_v25  ;;  %v16575_v25 = vld [vmem:[#allocation4 + $0x1bb4] ss:$52 sps:$4 sm:$0xff]  }
 0x3da   :  { %10431 = vmatpush1.bf16.msra.mxu1 %v16513_v27  ;;  %v16578_v27 = vld [vmem:[#allocation4 + $0x1eec] ss:$52 sps:$4 sm:$0xff]  }
 0x3db   :  { %10169 = vmatpush1.bf16.msra.mxu0 %v16516_v28  ;;  %10432 = vmatprep.subr.bf16.mxu1 %v16521_v51  ;;  %v16573_v28 = vld [vmem:[#allocation4 + $0x1bb0] ss:$52 sps:$4 sm:$0xff]   ;;  %v16576_v51 = vld [vmem:[#allocation4 + $0x1ee8] ss:$52 sps:$4 sm:$0xff]  }
 0x3dc   :  { %10170 = vmatprep.subr.bf16.mxu0 %v16524_v32  ;;  %v16581_v32 = vld [vmem:[#allocation4 + $0x1c1c] ss:$52 sps:$4 sm:$0xff]  }
 0x3de   :  { %10433 = vmatpush1.bf16.msra.mxu1 %v16519_v14  ;;  %v16579_v14 = vld [vmem:[#allocation4 + $0x1c18] ss:$52 sps:$4 sm:$0xff]  }
 0x3df   :  { %10171 = vmatpush1.bf16.msra.mxu0 %v16522_v35  ;;  %10434 = vmatprep.subr.bf16.mxu1 %v16527_v38  ;;  %v16584_v35 = vld [vmem:[#allocation4 + $0x1f54] ss:$52 sps:$4 sm:$0xff]   ;;  %v16582_v38 = vld [vmem:[#allocation4 + $0x1f50] ss:$52 sps:$4 sm:$0xff]  }
 0x3e0   :  { %10172 = vmatprep.subr.bf16.mxu0 %v16530_v40  ;;  %v16587_v40 = vld [vmem:[#allocation4 + $0x1c84] ss:$52 sps:$4 sm:$0xff]  }
 0x3e2   :  { %10435 = vmatpush1.bf16.msra.mxu1 %v16525_v41  ;;  %v16585_v41 = vld [vmem:[#allocation4 + $0x1c80] ss:$52 sps:$4 sm:$0xff]  }
 0x3e3   :  { %10173 = vmatpush1.bf16.msra.mxu0 %v16528_v44  ;;  %10436 = vmatprep.subr.bf16.mxu1 %v16533_v48  ;;  %v16590_v44 = vld [vmem:[#allocation4 + $0x1fbc] ss:$52 sps:$4 sm:$0xff]   ;;  %v16588_v48 = vld [vmem:[#allocation4 + $0x1fb8] ss:$52 sps:$4 sm:$0xff]  }
 0x3e4   :  { %10174 = vmatprep.subr.bf16.mxu0 %v16536_v49  ;;  %v16591_v49 = vld [vmem:[#allocation4 + $0x1ce8] ss:$52 sps:$4 sm:$0xff]  }
 0x3e6   :  { %10437 = vmatpush1.bf16.msra.mxu1 %v16531_v36  ;;  %v16593_v36 = vld [vmem:[#allocation4 + $0x1cec] ss:$52 sps:$4 sm:$0xff]  }
 0x3e7   :  { %10175 = vmatpush1.bf16.msra.mxu0 %v16534_v50  ;;  %10438 = vmatprep.subr.bf16.mxu1 %v16539_v52  ;;  %v16596_v50 = vld [vmem:[#allocation4 + $0x2024] ss:$52 sps:$4 sm:$0xff]   ;;  %v16594_v52 = vld [vmem:[#allocation4 + $0x2020] ss:$52 sps:$4 sm:$0xff]  }
 0x3e8   :  { %10176 = vmatprep.subr.bf16.mxu0 %v16542_v56  ;;  %v16602_v56 = vld [vmem:[#allocation4 + $0x208c] ss:$52 sps:$4 sm:$0xff]  }
 0x3ea   :  { %10439 = vmatpush1.bf16.msra.mxu1 %v16537_v53  ;;  %v16599_v53 = vld [vmem:[#allocation4 + $0x1d54] ss:$52 sps:$4 sm:$0xff]  }
 0x3eb   :  { %10177 = vmatpush1.bf16.msra.mxu0 %v16540_v57  ;;  %10440 = vmatprep.subr.bf16.mxu1 %v16545_v34  ;;  %v16597_v57 = vld [vmem:[#allocation4 + $0x1d50] ss:$52 sps:$4 sm:$0xff]   ;;  %v16600_v34 = vld [vmem:[#allocation4 + $0x2088] ss:$52 sps:$4 sm:$0xff]  }
 0x3ec   :  { %10178 = vmatprep.subr.bf16.mxu0 %v16548_v61  ;;  %v16608_v61 = vld [vmem:[#allocation4 + $0x20f4] ss:$52 sps:$4 sm:$0xff]  }
 0x3ee   :  { %10441 = vmatpush1.bf16.msra.mxu1 %v16543_v23  ;;  %v16605_v23 = vld [vmem:[#allocation4 + $0x1dbc] ss:$52 sps:$4 sm:$0xff]  }
 0x3ef   :  { %10179 = vmatpush1.bf16.msra.mxu0 %v16546_v1  ;;  %10451 = vmatprep.subr.bf16.mxu1 %v16551_v2  ;;  %v16603_v1 = vld [vmem:[#allocation4 + $0x1db8] ss:$52 sps:$4 sm:$0xff]   ;;  %v16606_v2 = vld [vmem:[#allocation4 + $0x20f0] ss:$52 sps:$4 sm:$0xff]  }
 0x3f0   :  { %10180 = vmatprep.subr.bf16.mxu0 %v16554_v7  ;;  %v16614_v7 = vld [vmem:[#allocation4 + $0x215c] ss:$52 sps:$4 sm:$0xff]  }
 0x3f1   :  { %10443 = vmatmul.mubr.bf16.vlgmr.msra.gmra.mrb[8].mxu1 %v19103_v60 }
 0x3f2   :  { %10452 = vmatpush1.bf16.msra.mxu1 %v16549_v6  ;;  %10483 = vmatprep.mubr.bf16.mxu1 %v19118_v4  ;;  %v16611_v6 = vld [vmem:[#allocation4 + $0x1e24] ss:$52 sps:$4 sm:$0xff]  }
 0x3f3   :  { %10181 = vmatpush1.bf16.msra.mxu0 %v16552_v8  ;;  %10453 = vmatprep.subr.bf16.mxu1 %v16557_v10  ;;  %v16609_v8 = vld [vmem:[#allocation4 + $0x1e20] ss:$52 sps:$4 sm:$0xff]   ;;  %v16612_v10 = vld [vmem:[#allocation4 + $0x2158] ss:$52 sps:$4 sm:$0xff]  }
 0x3f4   :  { %10182 = vmatprep.subr.bf16.mxu0 %v16560_v11  ;;  %v16617_v11 = vld [vmem:[#allocation4 + $0x1e8c] ss:$52 sps:$4 sm:$0xff]  }
 0x3f6   :  { %10454 = vmatpush1.bf16.msra.mxu1 %v16555_v12  ;;  %v16620_v12 = vld [vmem:[#allocation4 + $0x21c4] ss:$52 sps:$4 sm:$0xff]  }
 0x3f7   :  { %10183 = vmatpush1.bf16.msra.mxu0 %v16558_v13  ;;  %10455 = vmatprep.subr.bf16.mxu1 %v16563_v42  ;;  %v16615_v13 = vld [vmem:[#allocation4 + $0x1e88] ss:$52 sps:$4 sm:$0xff]   ;;  %v16618_v42 = vld [vmem:[#allocation4 + $0x21c0] ss:$52 sps:$4 sm:$0xff]  }
 0x3f8   :  { %10184 = vmatprep.subr.bf16.mxu0 %v16566_v15  ;;  %v16626_v15 = vld [vmem:[#allocation4 + $0x222c] ss:$52 sps:$4 sm:$0xff]  }
 0x3fa   :  { %10456 = vmatpush1.bf16.msra.mxu1 %v16561_v58  ;;  %v16623_v58 = vld [vmem:[#allocation4 + $0x1ef4] ss:$52 sps:$4 sm:$0xff]  }
 0x3fb   :  { %10185 = vmatpush1.bf16.msra.mxu0 %v16564_v17  ;;  %10457 = vmatprep.subr.bf16.mxu1 %v16569_v19  ;;  %v16621_v17 = vld [vmem:[#allocation4 + $0x1ef0] ss:$52 sps:$4 sm:$0xff]   ;;  %v16624_v19 = vld [vmem:[#allocation4 + $0x2228] ss:$52 sps:$4 sm:$0xff]  }
 0x3fc   :  { %10186 = vmatprep.subr.bf16.mxu0 %v16572_v20  ;;  %v16632_v20 = vld [vmem:[#allocation4 + $0x2294] ss:$52 sps:$4 sm:$0xff]  }
 0x3fe   :  { %10458 = vmatpush1.bf16.msra.mxu1 %v16567_v59  ;;  %v16629_v59 = vld [vmem:[#allocation4 + $0x1f5c] ss:$52 sps:$4 sm:$0xff]  }
 0x3ff   :  { %10187 = vmatpush1.bf16.msra.mxu0 %v16570_v21  ;;  %10459 = vmatprep.subr.bf16.mxu1 %v16575_v25  ;;  %v16627_v21 = vld [vmem:[#allocation4 + $0x1f58] ss:$52 sps:$4 sm:$0xff]   ;;  %v16630_v25 = vld [vmem:[#allocation4 + $0x2290] ss:$52 sps:$4 sm:$0xff]  }
 0x400   :  { %10188 = vmatprep.subr.bf16.mxu0 %v16578_v27  ;;  %v16635_v27 = vld [vmem:[#allocation4 + $0x1fc4] ss:$52 sps:$4 sm:$0xff]  }
 0x402   :  { %10460 = vmatpush1.bf16.msra.mxu1 %v16573_v28  ;;  %v16638_v28 = vld [vmem:[#allocation4 + $0x22fc] ss:$52 sps:$4 sm:$0xff]  }
 0x403   :  { %10189 = vmatpush1.bf16.msra.mxu0 %v16576_v51  ;;  %10461 = vmatprep.subr.bf16.mxu1 %v16581_v32  ;;  %v16633_v51 = vld [vmem:[#allocation4 + $0x1fc0] ss:$52 sps:$4 sm:$0xff]   ;;  %v16636_v32 = vld [vmem:[#allocation4 + $0x22f8] ss:$52 sps:$4 sm:$0xff]  }
 0x404   :  { %10190 = vmatprep.subr.bf16.mxu0 %v16584_v35  ;;  %v16644_v35 = vld [vmem:[#allocation4 + $0x2364] ss:$52 sps:$4 sm:$0xff]  }
 0x406   :  { %10462 = vmatpush1.bf16.msra.mxu1 %v16579_v14  ;;  %v16641_v14 = vld [vmem:[#allocation4 + $0x202c] ss:$52 sps:$4 sm:$0xff]  }
 0x407   :  { %10191 = vmatpush1.bf16.msra.mxu0 %v16582_v38  ;;  %10463 = vmatprep.subr.bf16.mxu1 %v16587_v40  ;;  %v16639_v38 = vld [vmem:[#allocation4 + $0x2028] ss:$52 sps:$4 sm:$0xff]   ;;  %v16642_v40 = vld [vmem:[#allocation4 + $0x2360] ss:$52 sps:$4 sm:$0xff]  }
 0x408   :  { %10192 = vmatprep.subr.bf16.mxu0 %v16590_v44  ;;  %v16650_v44 = vld [vmem:[#allocation4 + $0x23cc] ss:$52 sps:$4 sm:$0xff]  }
 0x40a   :  { %10464 = vmatpush1.bf16.msra.mxu1 %v16585_v41  ;;  %v16647_v41 = vld [vmem:[#allocation4 + $0x2094] ss:$52 sps:$4 sm:$0xff]  }
 0x40b   :  { %10193 = vmatpush1.bf16.msra.mxu0 %v16588_v48  ;;  %10465 = vmatprep.subr.bf16.mxu1 %v16593_v36  ;;  %v16645_v48 = vld [vmem:[#allocation4 + $0x2090] ss:$52 sps:$4 sm:$0xff]   ;;  %v16648_v36 = vld [vmem:[#allocation4 + $0x23c8] ss:$52 sps:$4 sm:$0xff]  }
 0x40c   :  { %10194 = vmatprep.subr.bf16.mxu0 %v16596_v50  ;;  %v16656_v50 = vld [vmem:[#allocation4 + $0x2434] ss:$52 sps:$4 sm:$0xff]  }
 0x40e   :  { %10466 = vmatpush1.bf16.msra.mxu1 %v16591_v49  ;;  %v16653_v49 = vld [vmem:[#allocation4 + $0x20fc] ss:$52 sps:$4 sm:$0xff]  }
 0x40f   :  { %10195 = vmatpush1.bf16.msra.mxu0 %v16594_v52  ;;  %10467 = vmatprep.subr.bf16.mxu1 %v16599_v53  ;;  %v16651_v52 = vld [vmem:[#allocation4 + $0x20f8] ss:$52 sps:$4 sm:$0xff]   ;;  %v16654_v53 = vld [vmem:[#allocation4 + $0x2430] ss:$52 sps:$4 sm:$0xff]  }
 0x410   :  { %10205 = vmatprep.subr.bf16.mxu0 %v16602_v56  ;;  %v16659_v56 = vld [vmem:[#allocation4 + $0x2164] ss:$52 sps:$4 sm:$0xff]  }
 0x412   :  { %10197 = vmatmul.mubr.bf16.vlgmr.msra.gmra.mrb[28].mxu0 %v19116_v3  ;;  %10468 = vmatpush1.bf16.msra.mxu1 %v16597_v57  ;;  %v16662_v57 = vld [vmem:[#allocation4 + $0x249c] ss:$52 sps:$4 sm:$0xff]  }
 0x413   :  { %10206 = vmatpush1.bf16.msra.mxu0 %v16600_v34  ;;  %10237 = vmatprep.mubr.bf16.mxu0 %v19120_v47  ;;  %v16657_v34 = vld [vmem:[#allocation4 + $0x2160] ss:$52 sps:$4 sm:$0xff]  }
 0x414   :  { %10469 = vmatprep.subr.bf16.mxu1 %v16605_v23  ;;  %10207 = vmatprep.subr.bf16.mxu0 %v16608_v61  ;;  %v16660_v23 = vld [vmem:[#allocation4 + $0x2498] ss:$52 sps:$4 sm:$0xff]  }
 0x415   :  { %v16665_v61 = vld [vmem:[#allocation4 + $0x21cc] ss:$52 sps:$4 sm:$0xff]  }
 0x416   :  { %10470 = vmatpush1.bf16.msra.mxu1 %v16603_v1  ;;  %v16668_v1 = vld [vmem:[#allocation4 + $0x2504] ss:$52 sps:$4 sm:$0xff]  }
 0x417   :  { %10208 = vmatpush1.bf16.msra.mxu0 %v16606_v2  ;;  %10471 = vmatprep.subr.bf16.mxu1 %v16611_v6  ;;  %v16663_v2 = vld [vmem:[#allocation4 + $0x21c8] ss:$52 sps:$4 sm:$0xff]   ;;  %v16666_v6 = vld [vmem:[#allocation4 + $0x2500] ss:$52 sps:$4 sm:$0xff]  }
 0x418   :  { %10209 = vmatprep.subr.bf16.mxu0 %v16614_v7  ;;  %v16671_v7 = vld [vmem:[#allocation4 + $0x2234] ss:$52 sps:$4 sm:$0xff]  }
 0x41a   :  { %10472 = vmatpush1.bf16.msra.mxu1 %v16609_v8  ;;  %v16674_v8 = vld [vmem:[#allocation4 + $0x256c] ss:$52 sps:$4 sm:$0xff]  }
 0x41b   :  { %10210 = vmatpush1.bf16.msra.mxu0 %v16612_v10  ;;  %10473 = vmatprep.subr.bf16.mxu1 %v16617_v11  ;;  %v16669_v10 = vld [vmem:[#allocation4 + $0x2230] ss:$52 sps:$4 sm:$0xff]   ;;  %v16672_v11 = vld [vmem:[#allocation4 + $0x2568] ss:$52 sps:$4 sm:$0xff]  }
 0x41c   :  { %10211 = vmatprep.subr.bf16.mxu0 %v16620_v12  ;;  %v16677_v12 = vld [vmem:[#allocation4 + $0x229c] ss:$52 sps:$4 sm:$0xff]  }
 0x41e   :  { %10474 = vmatpush1.bf16.msra.mxu1 %v16615_v13  ;;  %v16680_v13 = vld [vmem:[#allocation4 + $0x25d4] ss:$52 sps:$4 sm:$0xff]  }
 0x41f   :  { %10212 = vmatpush1.bf16.msra.mxu0 %v16618_v42  ;;  %10475 = vmatprep.subr.bf16.mxu1 %v16623_v58  ;;  %v16675_v42 = vld [vmem:[#allocation4 + $0x2298] ss:$52 sps:$4 sm:$0xff]   ;;  %v16678_v58 = vld [vmem:[#allocation4 + $0x25d0] ss:$52 sps:$4 sm:$0xff]  }
 0x420   :  { %10213 = vmatprep.subr.bf16.mxu0 %v16626_v15  ;;  %v16683_v15 = vld [vmem:[#allocation4 + $0x2304] ss:$52 sps:$4 sm:$0xff]  }
 0x422   :  { %10476 = vmatpush1.bf16.msra.mxu1 %v16621_v17  ;;  %v16686_v17 = vld [vmem:[#allocation4 + $0x263c] ss:$52 sps:$4 sm:$0xff]  }
 0x423   :  { %10214 = vmatpush1.bf16.msra.mxu0 %v16624_v19  ;;  %10477 = vmatprep.subr.bf16.mxu1 %v16629_v59  ;;  %v16681_v19 = vld [vmem:[#allocation4 + $0x2300] ss:$52 sps:$4 sm:$0xff]   ;;  %v16684_v59 = vld [vmem:[#allocation4 + $0x2638] ss:$52 sps:$4 sm:$0xff]  }
 0x424   :  { %10215 = vmatprep.subr.bf16.mxu0 %v16632_v20  ;;  %v16689_v20 = vld [vmem:[#allocation4 + $0x236c] ss:$52 sps:$4 sm:$0xff]  }
 0x426   :  { %10478 = vmatpush1.bf16.msra.mxu1 %v16627_v21  ;;  %v16692_v21 = vld [vmem:[#allocation4 + $0x26a4] ss:$52 sps:$4 sm:$0xff]  }
 0x427   :  { %10216 = vmatpush1.bf16.msra.mxu0 %v16630_v25  ;;  %10479 = vmatprep.subr.bf16.mxu1 %v16635_v27  ;;  %v16687_v25 = vld [vmem:[#allocation4 + $0x2368] ss:$52 sps:$4 sm:$0xff]   ;;  %v16690_v27 = vld [vmem:[#allocation4 + $0x26a0] ss:$52 sps:$4 sm:$0xff]  }
 0x428   :  { %10217 = vmatprep.subr.bf16.mxu0 %v16638_v28  ;;  %v16695_v28 = vld [vmem:[#allocation4 + $0x23d4] ss:$52 sps:$4 sm:$0xff]  }
 0x42a   :  { %10480 = vmatpush1.bf16.msra.mxu1 %v16633_v51  ;;  %v16698_v51 = vld [vmem:[#allocation4 + $0x270c] ss:$52 sps:$4 sm:$0xff]  }
 0x42b   :  { %10218 = vmatpush1.bf16.msra.mxu0 %v16636_v32  ;;  %10481 = vmatprep.subr.bf16.mxu1 %v16641_v14  ;;  %v16693_v32 = vld [vmem:[#allocation4 + $0x23d0] ss:$52 sps:$4 sm:$0xff]   ;;  %v16696_v14 = vld [vmem:[#allocation4 + $0x2708] ss:$52 sps:$4 sm:$0xff]  }
 0x42c   :  { %10219 = vmatprep.subr.bf16.mxu0 %v16644_v35  ;;  %v16701_v35 = vld [vmem:[#allocation4 + $0x243c] ss:$52 sps:$4 sm:$0xff]  }
 0x42e   :  { %10482 = vmatpush1.bf16.msra.mxu1 %v16639_v38  ;;  %v16704_v38 = vld [vmem:[#allocation4 + $0x2774] ss:$52 sps:$4 sm:$0xff]  }
 0x42f   :  { %10220 = vmatpush1.bf16.msra.mxu0 %v16642_v40  ;;  %10492 = vmatprep.subr.bf16.mxu1 %v16647_v41  ;;  %v16699_v40 = vld [vmem:[#allocation4 + $0x2438] ss:$52 sps:$4 sm:$0xff]   ;;  %v16702_v41 = vld [vmem:[#allocation4 + $0x2770] ss:$52 sps:$4 sm:$0xff]  }
 0x430   :  { %10221 = vmatprep.subr.bf16.mxu0 %v16650_v44  ;;  %v16707_v44 = vld [vmem:[#allocation4 + $0x24a4] ss:$52 sps:$4 sm:$0xff]  }
 0x431   :  { %10484 = vmatmul.mubr.bf16.vlgmr.msra.gmra.mrb[8].mxu1 %v19116_v3 }
 0x432   :  { %10493 = vmatpush1.bf16.msra.mxu1 %v16645_v48  ;;  %10524 = vmatprep.mubr.bf16.mxu1 %v19120_v47  ;;  %v16713_v48 = vld [vmem:[#allocation4 + $0x1c] ss:$52 sps:$4 sm:$0xff]  }
 0x433   :  { %10222 = vmatpush1.bf16.msra.mxu0 %v16648_v36  ;;  %10494 = vmatprep.subr.bf16.mxu1 %v16653_v49  ;;  %v16705_v36 = vld [vmem:[#allocation4 + $0x24a0] ss:$52 sps:$4 sm:$0xff]  }
 0x434   :  { %10223 = vmatprep.subr.bf16.mxu0 %v16656_v50  ;;  %v16710_v49 = vld [vmem:[#allocation4 + $0x250c] ss:$52 sps:$4 sm:$0xff]   ;;  %v16708_v50 = vld [vmem:[#allocation4 + $0x2508] ss:$52 sps:$4 sm:$0xff]  }
 0x436   :  { %10495 = vmatpush1.bf16.msra.mxu1 %v16651_v52  ;;  %v16711_v52 = vld [vmem:[#allocation4 + $0x18] ss:$52 sps:$4 sm:$0xff]  }
 0x437   :  { %10224 = vmatpush1.bf16.msra.mxu0 %v16654_v53  ;;  %10496 = vmatprep.subr.bf16.mxu1 %v16659_v56  ;;  %v16716_v53 = vld [vmem:[#allocation4 + $0x2574] ss:$52 sps:$4 sm:$0xff]   ;;  %v16719_v56 = vld [vmem:[#allocation4 + $0x84] ss:$52 sps:$4 sm:$0xff]  }
 0x438   :  { %10225 = vmatprep.subr.bf16.mxu0 %v16662_v57  ;;  %v16714_v57 = vld [vmem:[#allocation4 + $0x2570] ss:$52 sps:$4 sm:$0xff]  }
 0x43a   :  { %10497 = vmatpush1.bf16.msra.mxu1 %v16657_v34  ;;  %v16717_v34 = vld [vmem:[#allocation4 + $0x80] ss:$52 sps:$4 sm:$0xff]  }
 0x43b   :  { %10226 = vmatpush1.bf16.msra.mxu0 %v16660_v23  ;;  %10498 = vmatprep.subr.bf16.mxu1 %v16665_v61  ;;  %v16722_v23 = vld [vmem:[#allocation4 + $0x25dc] ss:$52 sps:$4 sm:$0xff]   ;;  %v16725_v61 = vld [vmem:[#allocation4 + $0xec] ss:$52 sps:$4 sm:$0xff]  }
 0x43c   :  { %10227 = vmatprep.subr.bf16.mxu0 %v16668_v1  ;;  %v16720_v1 = vld [vmem:[#allocation4 + $0x25d8] ss:$52 sps:$4 sm:$0xff]  }
 0x43e   :  { %10499 = vmatpush1.bf16.msra.mxu1 %v16663_v2  ;;  %v16723_v2 = vld [vmem:[#allocation4 + $0xe8] ss:$52 sps:$4 sm:$0xff]  }
 0x43f   :  { %10228 = vmatpush1.bf16.msra.mxu0 %v16666_v6  ;;  %10500 = vmatprep.subr.bf16.mxu1 %v16671_v7  ;;  %v16728_v6 = vld [vmem:[#allocation4 + $0x2644] ss:$52 sps:$4 sm:$0xff]   ;;  %v16731_v7 = vld [vmem:[#allocation4 + $0x154] ss:$52 sps:$4 sm:$0xff]  }
 0x440   :  { %10229 = vmatprep.subr.bf16.mxu0 %v16674_v8  ;;  %v16726_v8 = vld [vmem:[#allocation4 + $0x2640] ss:$52 sps:$4 sm:$0xff]  }
 0x442   :  { %10501 = vmatpush1.bf16.msra.mxu1 %v16669_v10  ;;  %v16729_v10 = vld [vmem:[#allocation4 + $0x150] ss:$52 sps:$4 sm:$0xff]  }
 0x443   :  { %10230 = vmatpush1.bf16.msra.mxu0 %v16672_v11  ;;  %10502 = vmatprep.subr.bf16.mxu1 %v16677_v12  ;;  %v16734_v11 = vld [vmem:[#allocation4 + $0x26ac] ss:$52 sps:$4 sm:$0xff]   ;;  %v16737_v12 = vld [vmem:[#allocation4 + $0x1bc] ss:$52 sps:$4 sm:$0xff]  }
 0x444   :  { %10231 = vmatprep.subr.bf16.mxu0 %v16680_v13  ;;  %v16732_v13 = vld [vmem:[#allocation4 + $0x26a8] ss:$52 sps:$4 sm:$0xff]  }
 0x446   :  { %10503 = vmatpush1.bf16.msra.mxu1 %v16675_v42  ;;  %v16735_v42 = vld [vmem:[#allocation4 + $0x1b8] ss:$52 sps:$4 sm:$0xff]  }
 0x447   :  { %10232 = vmatpush1.bf16.msra.mxu0 %v16678_v58  ;;  %10504 = vmatprep.subr.bf16.mxu1 %v16683_v15  ;;  %v16743_v58 = vld [vmem:[#allocation4 + $0x2714] ss:$52 sps:$4 sm:$0xff]   ;;  %v16740_v15 = vld [vmem:[#allocation4 + $0x224] ss:$52 sps:$4 sm:$0xff]  }
 0x448   :  { %10233 = vmatprep.subr.bf16.mxu0 %v16686_v17  ;;  %v16741_v17 = vld [vmem:[#allocation4 + $0x2710] ss:$52 sps:$4 sm:$0xff]  }
 0x44a   :  { %10505 = vmatpush1.bf16.msra.mxu1 %v16681_v19  ;;  %v16738_v19 = vld [vmem:[#allocation4 + $0x220] ss:$52 sps:$4 sm:$0xff]  }
 0x44b   :  { %10234 = vmatpush1.bf16.msra.mxu0 %v16684_v59  ;;  %10506 = vmatprep.subr.bf16.mxu1 %v16689_v20  ;;  %v16749_v59 = vld [vmem:[#allocation4 + $0x277c] ss:$52 sps:$4 sm:$0xff]   ;;  %v16746_v20 = vld [vmem:[#allocation4 + $0x28c] ss:$52 sps:$4 sm:$0xff]  }
 0x44c   :  { %10235 = vmatprep.subr.bf16.mxu0 %v16692_v21  ;;  %v16747_v21 = vld [vmem:[#allocation4 + $0x2778] ss:$52 sps:$4 sm:$0xff]  }
 0x44e   :  { %10507 = vmatpush1.bf16.msra.mxu1 %v16687_v25  ;;  %v16744_v25 = vld [vmem:[#allocation4 + $0x288] ss:$52 sps:$4 sm:$0xff]  }
 0x44f   :  { %10236 = vmatpush1.bf16.msra.mxu0 %v16690_v27  ;;  %10508 = vmatprep.subr.bf16.mxu1 %v16695_v28  ;;  %v16755_v27 = vld [vmem:[#allocation4 + $0x24] ss:$52 sps:$4 sm:$0xff]   ;;  %v16752_v28 = vld [vmem:[#allocation4 + $0x2f4] ss:$52 sps:$4 sm:$0xff]  }
 0x450   :  { %10246 = vmatprep.subr.bf16.mxu0 %v16698_v51  ;;  %v16750_v51 = vld [vmem:[#allocation4 + $0x2f0] ss:$52 sps:$4 sm:$0xff]  }
 0x452   :  { %10238 = vmatmul.mubr.bf16.vlgmr.msra.gmra.mrb[28].mxu0 %v19133_v26  ;;  %10509 = vmatpush1.bf16.msra.mxu1 %v16693_v32  ;;  %v16758_v32 = vld [vmem:[#allocation4 + $0x35c] ss:$52 sps:$4 sm:$0xff]  }
 0x453   :  { %10247 = vmatpush1.bf16.msra.mxu0 %v16696_v14  ;;  %10510 = vmatprep.subr.bf16.mxu1 %v16701_v35  ;;  %v16753_v14 = vld [vmem:[#allocation4 + $0x20] ss:$52 sps:$4 sm:$0xff]   ;;  %v16756_v35 = vld [vmem:[#allocation4 + $0x358] ss:$52 sps:$4 sm:$0xff]  }
 0x454   :  { %10248 = vmatprep.subr.bf16.mxu0 %v16704_v38  ;;  %10278 = vmatprep.mubr.bf16.mxu0 %v18231_v16  ;;  %v16761_v38 = vld [vmem:[#allocation4 + $0x8c] ss:$52 sps:$4 sm:$0xff]  }
 0x456   :  { %10511 = vmatpush1.bf16.msra.mxu1 %v16699_v40  ;;  %v16764_v40 = vld [vmem:[#allocation4 + $0x3c4] ss:$52 sps:$4 sm:$0xff]  }
 0x457   :  { %10249 = vmatpush1.bf16.msra.mxu0 %v16702_v41  ;;  %10512 = vmatprep.subr.bf16.mxu1 %v16707_v44  ;;  %v16759_v41 = vld [vmem:[#allocation4 + $0x88] ss:$52 sps:$4 sm:$0xff]   ;;  %v16762_v44 = vld [vmem:[#allocation4 + $0x3c0] ss:$52 sps:$4 sm:$0xff]  }
 0x458   :  { %10574 = vmatprep.subr.bf16.mxu0 %v16713_v48  ;;  %v16767_v48 = vld [vmem:[#allocation4 + $0xf4] ss:$52 sps:$4 sm:$0xff]  }
 0x45a   :  { %10513 = vmatpush1.bf16.msra.mxu1 %v16705_v36  ;;  %v16770_v36 = vld [vmem:[#allocation4 + $0x42c] ss:$52 sps:$4 sm:$0xff]  }
 0x45b   :  { %10514 = vmatprep.subr.bf16.mxu1 %v16710_v49  ;;  %v16765_v49 = vld [vmem:[#allocation4 + $0xf0] ss:$52 sps:$4 sm:$0xff]  }
 0x45e   :  { %14934 = vmatmul.mubr.msk.bf16.vlgmr.msra.gmra.mrb[28].mxu0 %vm9709_vm0, %v19127_v46  ;;  %10515 = vmatpush1.bf16.msra.mxu1 %v16708_v50  ;;  %v16768_v50 = vld [vmem:[#allocation4 + $0x428] ss:$52 sps:$4 sm:$0xff]  }
 0x45f   :  { %10575 = vmatpush1.bf16.msra.mxu0 %v16711_v52  ;;  %10606 = vmatprep.mubr.bf16.mxu0 %v18950_v45  ;;  %v16773_v52 = vld [vmem:[#allocation4 + $0x15c] ss:$52 sps:$4 sm:$0xff]  }
 0x460   :  { %10516 = vmatprep.subr.bf16.mxu1 %v16716_v53  ;;  %10576 = vmatprep.subr.bf16.mxu0 %v16719_v56  ;;  %v16776_v53 = vld [vmem:[#allocation4 + $0x494] ss:$52 sps:$4 sm:$0xff]   ;;  %v16771_v56 = vld [vmem:[#allocation4 + $0x158] ss:$52 sps:$4 sm:$0xff]  }
 0x462   :  { %10517 = vmatpush1.bf16.msra.mxu1 %v16714_v57  ;;  %v16774_v57 = vld [vmem:[#allocation4 + $0x490] ss:$52 sps:$4 sm:$0xff]  }
 0x463   :  { %10577 = vmatpush1.bf16.msra.mxu0 %v16717_v34  ;;  %10518 = vmatprep.subr.bf16.mxu1 %v16722_v23  ;;  %v16779_v34 = vld [vmem:[#allocation4 + $0x1c4] ss:$52 sps:$4 sm:$0xff]   ;;  %v16782_v23 = vld [vmem:[#allocation4 + $0x4fc] ss:$52 sps:$4 sm:$0xff]  }
 0x464   :  { %10578 = vmatprep.subr.bf16.mxu0 %v16725_v61  ;;  %v16777_v61 = vld [vmem:[#allocation4 + $0x1c0] ss:$52 sps:$4 sm:$0xff]  }
 0x466   :  { %10519 = vmatpush1.bf16.msra.mxu1 %v16720_v1  ;;  %v16780_v1 = vld [vmem:[#allocation4 + $0x4f8] ss:$52 sps:$4 sm:$0xff]  }
 0x467   :  { %10579 = vmatpush1.bf16.msra.mxu0 %v16723_v2  ;;  %10520 = vmatprep.subr.bf16.mxu1 %v16728_v6  ;;  %v16785_v2 = vld [vmem:[#allocation4 + $0x22c] ss:$52 sps:$4 sm:$0xff]   ;;  %v16788_v6 = vld [vmem:[#allocation4 + $0x564] ss:$52 sps:$4 sm:$0xff]  }
 0x468   :  { %10580 = vmatprep.subr.bf16.mxu0 %v16731_v7  ;;  %v16783_v7 = vld [vmem:[#allocation4 + $0x228] ss:$52 sps:$4 sm:$0xff]  }
 0x46a   :  { %10521 = vmatpush1.bf16.msra.mxu1 %v16726_v8  ;;  %v16786_v8 = vld [vmem:[#allocation4 + $0x560] ss:$52 sps:$4 sm:$0xff]  }
 0x46b   :  { %10581 = vmatpush1.bf16.msra.mxu0 %v16729_v10  ;;  %10522 = vmatprep.subr.bf16.mxu1 %v16734_v11  ;;  %v16791_v10 = vld [vmem:[#allocation4 + $0x294] ss:$52 sps:$4 sm:$0xff]   ;;  %v16794_v11 = vld [vmem:[#allocation4 + $0x5cc] ss:$52 sps:$4 sm:$0xff]  }
 0x46c   :  { %10582 = vmatprep.subr.bf16.mxu0 %v16737_v12  ;;  %v16789_v12 = vld [vmem:[#allocation4 + $0x290] ss:$52 sps:$4 sm:$0xff]  }
 0x46e   :  { %10523 = vmatpush1.bf16.msra.mxu1 %v16732_v13  ;;  %v16792_v13 = vld [vmem:[#allocation4 + $0x5c8] ss:$52 sps:$4 sm:$0xff]  }
 0x46f   :  { %10583 = vmatpush1.bf16.msra.mxu0 %v16735_v42  ;;  %10533 = vmatprep.subr.bf16.mxu1 %v16743_v58  ;;  %v16797_v42 = vld [vmem:[#allocation4 + $0x2fc] ss:$52 sps:$4 sm:$0xff]   ;;  %v16800_v58 = vld [vmem:[#allocation4 + $0x634] ss:$52 sps:$4 sm:$0xff]  }
 0x470   :  { %10584 = vmatprep.subr.bf16.mxu0 %v16740_v15  ;;  %v16795_v15 = vld [vmem:[#allocation4 + $0x2f8] ss:$52 sps:$4 sm:$0xff]  }
 0x471   :  { %10525 = vmatmul.mubr.bf16.vlgmr.msra.gmra.mrb[8].mxu1 %v19133_v26 }
 0x472   :  { %10534 = vmatpush1.bf16.msra.mxu1 %v16741_v17  ;;  %10565 = vmatprep.mubr.bf16.mxu1 %v18231_v16  ;;  %v16798_v17 = vld [vmem:[#allocation4 + $0x630] ss:$52 sps:$4 sm:$0xff]  }
 0x473   :  { %10585 = vmatpush1.bf16.msra.mxu0 %v16738_v19  ;;  %10535 = vmatprep.subr.bf16.mxu1 %v16749_v59  ;;  %v16803_v19 = vld [vmem:[#allocation4 + $0x364] ss:$52 sps:$4 sm:$0xff]   ;;  %v16806_v59 = vld [vmem:[#allocation4 + $0x69c] ss:$52 sps:$4 sm:$0xff]  }
 0x474   :  { %10586 = vmatprep.subr.bf16.mxu0 %v16746_v20  ;;  %v16801_v20 = vld [vmem:[#allocation4 + $0x360] ss:$52 sps:$4 sm:$0xff]  }
 0x476   :  { %10536 = vmatpush1.bf16.msra.mxu1 %v16747_v21  ;;  %v16804_v21 = vld [vmem:[#allocation4 + $0x698] ss:$52 sps:$4 sm:$0xff]  }
 0x477   :  { %10587 = vmatpush1.bf16.msra.mxu0 %v16744_v25  ;;  %10861 = vmatprep.subr.bf16.mxu1 %v16755_v27  ;;  %v16809_v25 = vld [vmem:[#allocation4 + $0x3cc] ss:$52 sps:$4 sm:$0xff]   ;;  %v16812_v27 = vld [vmem:[#allocation4 + $0x704] ss:$52 sps:$4 sm:$0xff]  }
 0x478   :  { %10588 = vmatprep.subr.bf16.mxu0 %v16752_v28  ;;  %v16807_v28 = vld [vmem:[#allocation4 + $0x3c8] ss:$52 sps:$4 sm:$0xff]  }
 0x47b   :  { %10589 = vmatpush1.bf16.msra.mxu0 %v16750_v51  ;;  %v16810_v51 = vld [vmem:[#allocation4 + $0x700] ss:$52 sps:$4 sm:$0xff]  }
 0x47c   :  { %10590 = vmatprep.subr.bf16.mxu0 %v16758_v32  ;;  %v16815_v32 = vld [vmem:[#allocation4 + $0x434] ss:$52 sps:$4 sm:$0xff]  }
 0x47d   :  { %14935 = vmatmul.mubr.msk.bf16.vlgmr.msra.gmra.mrb[8].mxu1 %vm9709_vm0, %v19127_v46 }
 0x47e   :  { %10862 = vmatpush1.bf16.msra.mxu1 %v16753_v14  ;;  %10893 = vmatprep.mubr.bf16.mxu1 %v18950_v45  ;;  %v16818_v14 = vld [vmem:[#allocation4 + $0x76c] ss:$52 sps:$4 sm:$0xff]  }
 0x47f   :  { %10591 = vmatpush1.bf16.msra.mxu0 %v16756_v35  ;;  %10863 = vmatprep.subr.bf16.mxu1 %v16761_v38  ;;  %v16813_v35 = vld [vmem:[#allocation4 + $0x430] ss:$52 sps:$4 sm:$0xff]   ;;  %v16816_v38 = vld [vmem:[#allocation4 + $0x768] ss:$52 sps:$4 sm:$0xff]  }
 0x480   :  { %10592 = vmatprep.subr.bf16.mxu0 %v16764_v40  ;;  %v16821_v40 = vld [vmem:[#allocation4 + $0x49c] ss:$52 sps:$4 sm:$0xff]  }
 0x482   :  { %10864 = vmatpush1.bf16.msra.mxu1 %v16759_v41  ;;  %v16824_v41 = vld [vmem:[#allocation4 + $0x7d4] ss:$52 sps:$4 sm:$0xff]  }
 0x483   :  { %10593 = vmatpush1.bf16.msra.mxu0 %v16762_v44  ;;  %10865 = vmatprep.subr.bf16.mxu1 %v16767_v48  ;;  %v16819_v44 = vld [vmem:[#allocation4 + $0x498] ss:$52 sps:$4 sm:$0xff]   ;;  %v16822_v48 = vld [vmem:[#allocation4 + $0x7d0] ss:$52 sps:$4 sm:$0xff]  }
 0x484   :  { %10594 = vmatprep.subr.bf16.mxu0 %v16770_v36  ;;  %v16827_v36 = vld [vmem:[#allocation4 + $0x504] ss:$52 sps:$4 sm:$0xff]  }
 0x486   :  { %10866 = vmatpush1.bf16.msra.mxu1 %v16765_v49  ;;  %v16830_v49 = vld [vmem:[#allocation4 + $0x83c] ss:$52 sps:$4 sm:$0xff]  }
 0x487   :  { %10595 = vmatpush1.bf16.msra.mxu0 %v16768_v50  ;;  %10867 = vmatprep.subr.bf16.mxu1 %v16773_v52  ;;  %v16825_v50 = vld [vmem:[#allocation4 + $0x500] ss:$52 sps:$4 sm:$0xff]   ;;  %v16828_v52 = vld [vmem:[#allocation4 + $0x838] ss:$52 sps:$4 sm:$0xff]  }
 0x488   :  { %10596 = vmatprep.subr.bf16.mxu0 %v16776_v53  ;;  %v16833_v53 = vld [vmem:[#allocation4 + $0x56c] ss:$52 sps:$4 sm:$0xff]  }
 0x48a   :  { %10868 = vmatpush1.bf16.msra.mxu1 %v16771_v56  ;;  %v16836_v56 = vld [vmem:[#allocation4 + $0x8a4] ss:$52 sps:$4 sm:$0xff]  }
 0x48b   :  { %10597 = vmatpush1.bf16.msra.mxu0 %v16774_v57  ;;  %10869 = vmatprep.subr.bf16.mxu1 %v16779_v34  ;;  %v16831_v57 = vld [vmem:[#allocation4 + $0x568] ss:$52 sps:$4 sm:$0xff]   ;;  %v16834_v34 = vld [vmem:[#allocation4 + $0x8a0] ss:$52 sps:$4 sm:$0xff]  }
 0x48c   :  { %10598 = vmatprep.subr.bf16.mxu0 %v16782_v23  ;;  %v16839_v23 = vld [vmem:[#allocation4 + $0x5d4] ss:$52 sps:$4 sm:$0xff]  }
 0x48e   :  { %10870 = vmatpush1.bf16.msra.mxu1 %v16777_v61  ;;  %v16842_v61 = vld [vmem:[#allocation4 + $0x90c] ss:$52 sps:$4 sm:$0xff]  }
 0x48f   :  { %10599 = vmatpush1.bf16.msra.mxu0 %v16780_v1  ;;  %10871 = vmatprep.subr.bf16.mxu1 %v16785_v2  ;;  %v16837_v1 = vld [vmem:[#allocation4 + $0x5d0] ss:$52 sps:$4 sm:$0xff]   ;;  %v16840_v2 = vld [vmem:[#allocation4 + $0x908] ss:$52 sps:$4 sm:$0xff]  }
 0x490   :  { %10600 = vmatprep.subr.bf16.mxu0 %v16788_v6  ;;  %v16845_v6 = vld [vmem:[#allocation4 + $0x63c] ss:$52 sps:$4 sm:$0xff]  }
 0x492   :  { %10872 = vmatpush1.bf16.msra.mxu1 %v16783_v7  ;;  %v16848_v7 = vld [vmem:[#allocation4 + $0x974] ss:$52 sps:$4 sm:$0xff]  }
 0x493   :  { %10601 = vmatpush1.bf16.msra.mxu0 %v16786_v8  ;;  %10873 = vmatprep.subr.bf16.mxu1 %v16791_v10  ;;  %v16843_v8 = vld [vmem:[#allocation4 + $0x638] ss:$52 sps:$4 sm:$0xff]   ;;  %v16846_v10 = vld [vmem:[#allocation4 + $0x970] ss:$52 sps:$4 sm:$0xff]  }
 0x494   :  { %10602 = vmatprep.subr.bf16.mxu0 %v16794_v11  ;;  %v16851_v11 = vld [vmem:[#allocation4 + $0x6a4] ss:$52 sps:$4 sm:$0xff]  }
 0x496   :  { %10874 = vmatpush1.bf16.msra.mxu1 %v16789_v12  ;;  %v16854_v12 = vld [vmem:[#allocation4 + $0x9dc] ss:$52 sps:$4 sm:$0xff]  }
 0x497   :  { %10603 = vmatpush1.bf16.msra.mxu0 %v16792_v13  ;;  %10875 = vmatprep.subr.bf16.mxu1 %v16797_v42  ;;  %v16849_v13 = vld [vmem:[#allocation4 + $0x6a0] ss:$52 sps:$4 sm:$0xff]   ;;  %v16852_v42 = vld [vmem:[#allocation4 + $0x9d8] ss:$52 sps:$4 sm:$0xff]  }
 0x498   :  { %10604 = vmatprep.subr.bf16.mxu0 %v16800_v58  ;;  %v16857_v58 = vld [vmem:[#allocation4 + $0x70c] ss:$52 sps:$4 sm:$0xff]  }
 0x49a   :  { %10876 = vmatpush1.bf16.msra.mxu1 %v16795_v15  ;;  %v16860_v15 = vld [vmem:[#allocation4 + $0xa44] ss:$52 sps:$4 sm:$0xff]  }
 0x49b   :  { %10605 = vmatpush1.bf16.msra.mxu0 %v16798_v17  ;;  %10877 = vmatprep.subr.bf16.mxu1 %v16803_v19  ;;  %v16855_v17 = vld [vmem:[#allocation4 + $0x708] ss:$52 sps:$4 sm:$0xff]   ;;  %v16858_v19 = vld [vmem:[#allocation4 + $0xa40] ss:$52 sps:$4 sm:$0xff]  }
 0x49c   :  { %10615 = vmatprep.subr.bf16.mxu0 %v16806_v59  ;;  %v16863_v59 = vld [vmem:[#allocation4 + $0x774] ss:$52 sps:$4 sm:$0xff]  }
 0x49e   :  { %10607 = vmatmul.mubr.bf16.vlgmr.msra.gmra.mrb[32].mxu0 %v18948_v43  ;;  %10878 = vmatpush1.bf16.msra.mxu1 %v16801_v20  ;;  %v16866_v20 = vld [vmem:[#allocation4 + $0xaac] ss:$52 sps:$4 sm:$0xff]  }
 0x49f   :  { %10616 = vmatpush1.bf16.msra.mxu0 %v16804_v21  ;;  %10647 = vmatprep.mubr.bf16.mxu0 %v19064_v0  ;;  %v16861_v21 = vld [vmem:[#allocation4 + $0x770] ss:$52 sps:$4 sm:$0xff]  }
 0x4a0   :  { %10879 = vmatprep.subr.bf16.mxu1 %v16809_v25  ;;  %10617 = vmatprep.subr.bf16.mxu0 %v16812_v27  ;;  %v16864_v25 = vld [vmem:[#allocation4 + $0xaa8] ss:$52 sps:$4 sm:$0xff]  }
 0x4a1   :  { %v16869_v27 = vld [vmem:[#allocation4 + $0x7dc] ss:$52 sps:$4 sm:$0xff]  }
 0x4a2   :  { %10880 = vmatpush1.bf16.msra.mxu1 %v16807_v28  ;;  %v16872_v28 = vld [vmem:[#allocation4 + $0xb14] ss:$52 sps:$4 sm:$0xff]  }
 0x4a3   :  { %10618 = vmatpush1.bf16.msra.mxu0 %v16810_v51  ;;  %10881 = vmatprep.subr.bf16.mxu1 %v16815_v32  ;;  %v16867_v51 = vld [vmem:[#allocation4 + $0x7d8] ss:$52 sps:$4 sm:$0xff]   ;;  %v16870_v32 = vld [vmem:[#allocation4 + $0xb10] ss:$52 sps:$4 sm:$0xff]  }
 0x4a4   :  { %10619 = vmatprep.subr.bf16.mxu0 %v16818_v14  ;;  %v16875_v14 = vld [vmem:[#allocation4 + $0x844] ss:$52 sps:$4 sm:$0xff]  }
 0x4a6   :  { %10882 = vmatpush1.bf16.msra.mxu1 %v16813_v35  ;;  %v16878_v35 = vld [vmem:[#allocation4 + $0xb7c] ss:$52 sps:$4 sm:$0xff]  }
 0x4a7   :  { %10620 = vmatpush1.bf16.msra.mxu0 %v16816_v38  ;;  %10883 = vmatprep.subr.bf16.mxu1 %v16821_v40  ;;  %v16873_v38 = vld [vmem:[#allocation4 + $0x840] ss:$52 sps:$4 sm:$0xff]   ;;  %v16876_v40 = vld [vmem:[#allocation4 + $0xb78] ss:$52 sps:$4 sm:$0xff]  }
 0x4a8   :  { %10621 = vmatprep.subr.bf16.mxu0 %v16824_v41  ;;  %v16881_v41 = vld [vmem:[#allocation4 + $0x8ac] ss:$52 sps:$4 sm:$0xff]  }
 0x4aa   :  { %10884 = vmatpush1.bf16.msra.mxu1 %v16819_v44  ;;  %v16884_v44 = vld [vmem:[#allocation4 + $0xbe4] ss:$52 sps:$4 sm:$0xff]  }
 0x4ab   :  { %10622 = vmatpush1.bf16.msra.mxu0 %v16822_v48  ;;  %10885 = vmatprep.subr.bf16.mxu1 %v16827_v36  ;;  %v16879_v48 = vld [vmem:[#allocation4 + $0x8a8] ss:$52 sps:$4 sm:$0xff]   ;;  %v16882_v36 = vld [vmem:[#allocation4 + $0xbe0] ss:$52 sps:$4 sm:$0xff]  }
 0x4ac   :  { %10623 = vmatprep.subr.bf16.mxu0 %v16830_v49  ;;  %v16887_v49 = vld [vmem:[#allocation4 + $0x914] ss:$52 sps:$4 sm:$0xff]  }
 0x4ae   :  { %10886 = vmatpush1.bf16.msra.mxu1 %v16825_v50  ;;  %v16890_v50 = vld [vmem:[#allocation4 + $0xc4c] ss:$52 sps:$4 sm:$0xff]  }
 0x4af   :  { %10624 = vmatpush1.bf16.msra.mxu0 %v16828_v52  ;;  %10887 = vmatprep.subr.bf16.mxu1 %v16833_v53  ;;  %v16885_v52 = vld [vmem:[#allocation4 + $0x910] ss:$52 sps:$4 sm:$0xff]   ;;  %v16888_v53 = vld [vmem:[#allocation4 + $0xc48] ss:$52 sps:$4 sm:$0xff]  }
 0x4b0   :  { %10625 = vmatprep.subr.bf16.mxu0 %v16836_v56  ;;  %v16893_v56 = vld [vmem:[#allocation4 + $0x97c] ss:$52 sps:$4 sm:$0xff]  }
 0x4b2   :  { %10888 = vmatpush1.bf16.msra.mxu1 %v16831_v57  ;;  %v16896_v57 = vld [vmem:[#allocation4 + $0xcb4] ss:$52 sps:$4 sm:$0xff]  }
 0x4b3   :  { %10626 = vmatpush1.bf16.msra.mxu0 %v16834_v34  ;;  %10889 = vmatprep.subr.bf16.mxu1 %v16839_v23  ;;  %v16891_v34 = vld [vmem:[#allocation4 + $0x978] ss:$52 sps:$4 sm:$0xff]   ;;  %v16894_v23 = vld [vmem:[#allocation4 + $0xcb0] ss:$52 sps:$4 sm:$0xff]  }
 0x4b4   :  { %10627 = vmatprep.subr.bf16.mxu0 %v16842_v61  ;;  %v16899_v61 = vld [vmem:[#allocation4 + $0x9e4] ss:$52 sps:$4 sm:$0xff]  }
 0x4b6   :  { %10890 = vmatpush1.bf16.msra.mxu1 %v16837_v1  ;;  %v16902_v1 = vld [vmem:[#allocation4 + $0xd1c] ss:$52 sps:$4 sm:$0xff]  }
 0x4b7   :  { %10628 = vmatpush1.bf16.msra.mxu0 %v16840_v2  ;;  %10891 = vmatprep.subr.bf16.mxu1 %v16845_v6  ;;  %v16897_v2 = vld [vmem:[#allocation4 + $0x9e0] ss:$52 sps:$4 sm:$0xff]   ;;  %v16900_v6 = vld [vmem:[#allocation4 + $0xd18] ss:$52 sps:$4 sm:$0xff]  }
 0x4b8   :  { %10629 = vmatprep.subr.bf16.mxu0 %v16848_v7  ;;  %v16905_v7 = vld [vmem:[#allocation4 + $0xa4c] ss:$52 sps:$4 sm:$0xff]  }
 0x4ba   :  { %10892 = vmatpush1.bf16.msra.mxu1 %v16843_v8  ;;  %v16908_v8 = vld [vmem:[#allocation4 + $0xd84] ss:$52 sps:$4 sm:$0xff]  }
 0x4bb   :  { %10630 = vmatpush1.bf16.msra.mxu0 %v16846_v10  ;;  %10902 = vmatprep.subr.bf16.mxu1 %v16851_v11  ;;  %v16903_v10 = vld [vmem:[#allocation4 + $0xa48] ss:$52 sps:$4 sm:$0xff]   ;;  %v16906_v11 = vld [vmem:[#allocation4 + $0xd80] ss:$52 sps:$4 sm:$0xff]  }
 0x4bc   :  { %10631 = vmatprep.subr.bf16.mxu0 %v16854_v12  ;;  %v16911_v12 = vld [vmem:[#allocation4 + $0xab4] ss:$52 sps:$4 sm:$0xff]  }
 0x4bd   :  { %10894 = vmatmul.mubr.bf16.vlgmr.msra.gmra.mrb[12].mxu1 %v18948_v43 }
 0x4be   :  { %10903 = vmatpush1.bf16.msra.mxu1 %v16849_v13  ;;  %10934 = vmatprep.mubr.bf16.mxu1 %v19064_v0  ;;  %v16914_v13 = vld [vmem:[#allocation4 + $0xdec] ss:$52 sps:$4 sm:$0xff]  }
 0x4bf   :  { %10632 = vmatpush1.bf16.msra.mxu0 %v16852_v42  ;;  %10904 = vmatprep.subr.bf16.mxu1 %v16857_v58  ;;  %v16909_v42 = vld [vmem:[#allocation4 + $0xab0] ss:$52 sps:$4 sm:$0xff]   ;;  %v16912_v58 = vld [vmem:[#allocation4 + $0xde8] ss:$52 sps:$4 sm:$0xff]  }
 0x4c0   :  { %10633 = vmatprep.subr.bf16.mxu0 %v16860_v15  ;;  %v16917_v15 = vld [vmem:[#allocation4 + $0xb1c] ss:$52 sps:$4 sm:$0xff]  }
 0x4c2   :  { %10905 = vmatpush1.bf16.msra.mxu1 %v16855_v17  ;;  %v16920_v17 = vld [vmem:[#allocation4 + $0xe54] ss:$52 sps:$4 sm:$0xff]  }
 0x4c3   :  { %10634 = vmatpush1.bf16.msra.mxu0 %v16858_v19  ;;  %10906 = vmatprep.subr.bf16.mxu1 %v16863_v59  ;;  %v16915_v19 = vld [vmem:[#allocation4 + $0xb18] ss:$52 sps:$4 sm:$0xff]   ;;  %v16918_v59 = vld [vmem:[#allocation4 + $0xe50] ss:$52 sps:$4 sm:$0xff]  }
 0x4c4   :  { %10635 = vmatprep.subr.bf16.mxu0 %v16866_v20  ;;  %v16923_v20 = vld [vmem:[#allocation4 + $0xb84] ss:$52 sps:$4 sm:$0xff]  }
 0x4c6   :  { %10907 = vmatpush1.bf16.msra.mxu1 %v16861_v21  ;;  %v16926_v21 = vld [vmem:[#allocation4 + $0xebc] ss:$52 sps:$4 sm:$0xff]  }
 0x4c7   :  { %10636 = vmatpush1.bf16.msra.mxu0 %v16864_v25  ;;  %10908 = vmatprep.subr.bf16.mxu1 %v16869_v27  ;;  %v16921_v25 = vld [vmem:[#allocation4 + $0xb80] ss:$52 sps:$4 sm:$0xff]   ;;  %v16924_v27 = vld [vmem:[#allocation4 + $0xeb8] ss:$52 sps:$4 sm:$0xff]  }
 0x4c8   :  { %10637 = vmatprep.subr.bf16.mxu0 %v16872_v28  ;;  %v16929_v28 = vld [vmem:[#allocation4 + $0xbec] ss:$52 sps:$4 sm:$0xff]  }
 0x4ca   :  { %10909 = vmatpush1.bf16.msra.mxu1 %v16867_v51  ;;  %v16932_v51 = vld [vmem:[#allocation4 + $0xf24] ss:$52 sps:$4 sm:$0xff]  }
 0x4cb   :  { %10638 = vmatpush1.bf16.msra.mxu0 %v16870_v32  ;;  %10910 = vmatprep.subr.bf16.mxu1 %v16875_v14  ;;  %v16927_v32 = vld [vmem:[#allocation4 + $0xbe8] ss:$52 sps:$4 sm:$0xff]   ;;  %v16930_v14 = vld [vmem:[#allocation4 + $0xf20] ss:$52 sps:$4 sm:$0xff]  }
 0x4cc   :  { %10639 = vmatprep.subr.bf16.mxu0 %v16878_v35  ;;  %v16935_v35 = vld [vmem:[#allocation4 + $0xc54] ss:$52 sps:$4 sm:$0xff]  }
 0x4ce   :  { %10911 = vmatpush1.bf16.msra.mxu1 %v16873_v38  ;;  %v16938_v38 = vld [vmem:[#allocation4 + $0xf8c] ss:$52 sps:$4 sm:$0xff]  }
 0x4cf   :  { %10640 = vmatpush1.bf16.msra.mxu0 %v16876_v40  ;;  %10912 = vmatprep.subr.bf16.mxu1 %v16881_v41  ;;  %v16933_v40 = vld [vmem:[#allocation4 + $0xc50] ss:$52 sps:$4 sm:$0xff]   ;;  %v16936_v41 = vld [vmem:[#allocation4 + $0xf88] ss:$52 sps:$4 sm:$0xff]  }
 0x4d0   :  { %10641 = vmatprep.subr.bf16.mxu0 %v16884_v44  ;;  %v16941_v44 = vld [vmem:[#allocation4 + $0xcbc] ss:$52 sps:$4 sm:$0xff]  }
 0x4d2   :  { %10913 = vmatpush1.bf16.msra.mxu1 %v16879_v48  ;;  %v16944_v48 = vld [vmem:[#allocation4 + $0xff4] ss:$52 sps:$4 sm:$0xff]  }
 0x4d3   :  { %10642 = vmatpush1.bf16.msra.mxu0 %v16882_v36  ;;  %10914 = vmatprep.subr.bf16.mxu1 %v16887_v49  ;;  %v16939_v36 = vld [vmem:[#allocation4 + $0xcb8] ss:$52 sps:$4 sm:$0xff]   ;;  %v16942_v49 = vld [vmem:[#allocation4 + $0xff0] ss:$52 sps:$4 sm:$0xff]  }
 0x4d4   :  { %10643 = vmatprep.subr.bf16.mxu0 %v16890_v50  ;;  %v16947_v50 = vld [vmem:[#allocation4 + $0xd24] ss:$52 sps:$4 sm:$0xff]  }
 0x4d6   :  { %10915 = vmatpush1.bf16.msra.mxu1 %v16885_v52  ;;  %v16950_v52 = vld [vmem:[#allocation4 + $0x105c] ss:$52 sps:$4 sm:$0xff]  }
 0x4d7   :  { %10644 = vmatpush1.bf16.msra.mxu0 %v16888_v53  ;;  %10916 = vmatprep.subr.bf16.mxu1 %v16893_v56  ;;  %v16945_v53 = vld [vmem:[#allocation4 + $0xd20] ss:$52 sps:$4 sm:$0xff]   ;;  %v16948_v56 = vld [vmem:[#allocation4 + $0x1058] ss:$52 sps:$4 sm:$0xff]  }
 0x4d8   :  { %10645 = vmatprep.subr.bf16.mxu0 %v16896_v57  ;;  %v16953_v57 = vld [vmem:[#allocation4 + $0xd8c] ss:$52 sps:$4 sm:$0xff]  }
 0x4da   :  { %10917 = vmatpush1.bf16.msra.mxu1 %v16891_v34  ;;  %v16956_v34 = vld [vmem:[#allocation4 + $0x10c4] ss:$52 sps:$4 sm:$0xff]  }
 0x4db   :  { %10646 = vmatpush1.bf16.msra.mxu0 %v16894_v23  ;;  %10918 = vmatprep.subr.bf16.mxu1 %v16899_v61  ;;  %v16951_v23 = vld [vmem:[#allocation4 + $0xd88] ss:$52 sps:$4 sm:$0xff]   ;;  %v16954_v61 = vld [vmem:[#allocation4 + $0x10c0] ss:$52 sps:$4 sm:$0xff]  }
 0x4dc   :  { %10656 = vmatprep.subr.bf16.mxu0 %v16902_v1  ;;  %v16959_v1 = vld [vmem:[#allocation4 + $0xdf4] ss:$52 sps:$4 sm:$0xff]  }
 0x4de   :  { %10648 = vmatmul.mubr.bf16.vlgmr.msra.gmra.mrb[32].mxu0 %v19062_v63  ;;  %10919 = vmatpush1.bf16.msra.mxu1 %v16897_v2  ;;  %v16962_v2 = vld [vmem:[#allocation4 + $0x112c] ss:$52 sps:$4 sm:$0xff]  }
 0x4df   :  { %10657 = vmatpush1.bf16.msra.mxu0 %v16900_v6  ;;  %10688 = vmatprep.mubr.bf16.mxu0 %v19082_v55  ;;  %v16957_v6 = vld [vmem:[#allocation4 + $0xdf0] ss:$52 sps:$4 sm:$0xff]  }
 0x4e0   :  { %10920 = vmatprep.subr.bf16.mxu1 %v16905_v7  ;;  %10658 = vmatprep.subr.bf16.mxu0 %v16908_v8  ;;  %v16960_v7 = vld [vmem:[#allocation4 + $0x1128] ss:$52 sps:$4 sm:$0xff]  }
 0x4e1   :  { %v16965_v8 = vld [vmem:[#allocation4 + $0xe5c] ss:$52 sps:$4 sm:$0xff]  }
 0x4e2   :  { %10921 = vmatpush1.bf16.msra.mxu1 %v16903_v10  ;;  %v16968_v10 = vld [vmem:[#allocation4 + $0x1194] ss:$52 sps:$4 sm:$0xff]  }
 0x4e3   :  { %10659 = vmatpush1.bf16.msra.mxu0 %v16906_v11  ;;  %10922 = vmatprep.subr.bf16.mxu1 %v16911_v12  ;;  %v16963_v11 = vld [vmem:[#allocation4 + $0xe58] ss:$52 sps:$4 sm:$0xff]   ;;  %v16966_v12 = vld [vmem:[#allocation4 + $0x1190] ss:$52 sps:$4 sm:$0xff]  }
 0x4e4   :  { %10660 = vmatprep.subr.bf16.mxu0 %v16914_v13  ;;  %v16971_v13 = vld [vmem:[#allocation4 + $0xec4] ss:$52 sps:$4 sm:$0xff]  }
 0x4e6   :  { %10923 = vmatpush1.bf16.msra.mxu1 %v16909_v42  ;;  %v16974_v42 = vld [vmem:[#allocation4 + $0x11fc] ss:$52 sps:$4 sm:$0xff]  }
 0x4e7   :  { %10661 = vmatpush1.bf16.msra.mxu0 %v16912_v58  ;;  %10924 = vmatprep.subr.bf16.mxu1 %v16917_v15  ;;  %v16969_v58 = vld [vmem:[#allocation4 + $0xec0] ss:$52 sps:$4 sm:$0xff]   ;;  %v16972_v15 = vld [vmem:[#allocation4 + $0x11f8] ss:$52 sps:$4 sm:$0xff]  }
 0x4e8   :  { %10662 = vmatprep.subr.bf16.mxu0 %v16920_v17  ;;  %v16977_v17 = vld [vmem:[#allocation4 + $0xf2c] ss:$52 sps:$4 sm:$0xff]  }
 0x4ea   :  { %10925 = vmatpush1.bf16.msra.mxu1 %v16915_v19  ;;  %v16980_v19 = vld [vmem:[#allocation4 + $0x1264] ss:$52 sps:$4 sm:$0xff]  }
 0x4eb   :  { %10663 = vmatpush1.bf16.msra.mxu0 %v16918_v59  ;;  %10926 = vmatprep.subr.bf16.mxu1 %v16923_v20  ;;  %v16975_v59 = vld [vmem:[#allocation4 + $0xf28] ss:$52 sps:$4 sm:$0xff]   ;;  %v16978_v20 = vld [vmem:[#allocation4 + $0x1260] ss:$52 sps:$4 sm:$0xff]  }
 0x4ec   :  { %10664 = vmatprep.subr.bf16.mxu0 %v16926_v21  ;;  %v16983_v21 = vld [vmem:[#allocation4 + $0xf94] ss:$52 sps:$4 sm:$0xff]  }
 0x4ee   :  { %10927 = vmatpush1.bf16.msra.mxu1 %v16921_v25  ;;  %v16986_v25 = vld [vmem:[#allocation4 + $0x12cc] ss:$52 sps:$4 sm:$0xff]  }
 0x4ef   :  { %10665 = vmatpush1.bf16.msra.mxu0 %v16924_v27  ;;  %10928 = vmatprep.subr.bf16.mxu1 %v16929_v28  ;;  %v16981_v27 = vld [vmem:[#allocation4 + $0xf90] ss:$52 sps:$4 sm:$0xff]   ;;  %v16984_v28 = vld [vmem:[#allocation4 + $0x12c8] ss:$52 sps:$4 sm:$0xff]  }
 0x4f0   :  { %10666 = vmatprep.subr.bf16.mxu0 %v16932_v51  ;;  %v16989_v51 = vld [vmem:[#allocation4 + $0xffc] ss:$52 sps:$4 sm:$0xff]  }
 0x4f2   :  { %10929 = vmatpush1.bf16.msra.mxu1 %v16927_v32  ;;  %v16992_v32 = vld [vmem:[#allocation4 + $0x1334] ss:$52 sps:$4 sm:$0xff]  }
 0x4f3   :  { %10667 = vmatpush1.bf16.msra.mxu0 %v16930_v14  ;;  %10930 = vmatprep.subr.bf16.mxu1 %v16935_v35  ;;  %v16987_v14 = vld [vmem:[#allocation4 + $0xff8] ss:$52 sps:$4 sm:$0xff]   ;;  %v16990_v35 = vld [vmem:[#allocation4 + $0x1330] ss:$52 sps:$4 sm:$0xff]  }
 0x4f4   :  { %10668 = vmatprep.subr.bf16.mxu0 %v16938_v38  ;;  %v16995_v38 = vld [vmem:[#allocation4 + $0x1064] ss:$52 sps:$4 sm:$0xff]  }
 0x4f6   :  { %10931 = vmatpush1.bf16.msra.mxu1 %v16933_v40  ;;  %v16998_v40 = vld [vmem:[#allocation4 + $0x139c] ss:$52 sps:$4 sm:$0xff]  }
 0x4f7   :  { %10669 = vmatpush1.bf16.msra.mxu0 %v16936_v41  ;;  %10932 = vmatprep.subr.bf16.mxu1 %v16941_v44  ;;  %v16993_v41 = vld [vmem:[#allocation4 + $0x1060] ss:$52 sps:$4 sm:$0xff]   ;;  %v16996_v44 = vld [vmem:[#allocation4 + $0x1398] ss:$52 sps:$4 sm:$0xff]  }
 0x4f8   :  { %10670 = vmatprep.subr.bf16.mxu0 %v16944_v48  ;;  %v17001_v48 = vld [vmem:[#allocation4 + $0x10cc] ss:$52 sps:$4 sm:$0xff]  }
 0x4fa   :  { %10933 = vmatpush1.bf16.msra.mxu1 %v16939_v36  ;;  %v17004_v36 = vld [vmem:[#allocation4 + $0x1404] ss:$52 sps:$4 sm:$0xff]  }
 0x4fb   :  { %10671 = vmatpush1.bf16.msra.mxu0 %v16942_v49  ;;  %10943 = vmatprep.subr.bf16.mxu1 %v16947_v50  ;;  %v16999_v49 = vld [vmem:[#allocation4 + $0x10c8] ss:$52 sps:$4 sm:$0xff]   ;;  %v17002_v50 = vld [vmem:[#allocation4 + $0x1400] ss:$52 sps:$4 sm:$0xff]  }
 0x4fc   :  { %10672 = vmatprep.subr.bf16.mxu0 %v16950_v52  ;;  %v17007_v52 = vld [vmem:[#allocation4 + $0x1134] ss:$52 sps:$4 sm:$0xff]  }
 0x4fd   :  { %10935 = vmatmul.mubr.bf16.vlgmr.msra.gmra.mrb[12].mxu1 %v19062_v63 }
 0x4fe   :  { %10944 = vmatpush1.bf16.msra.mxu1 %v16945_v53  ;;  %10975 = vmatprep.mubr.bf16.mxu1 %v19082_v55  ;;  %v17010_v53 = vld [vmem:[#allocation4 + $0x146c] ss:$52 sps:$4 sm:$0xff]  }
 0x4ff   :  { %10673 = vmatpush1.bf16.msra.mxu0 %v16948_v56  ;;  %10945 = vmatprep.subr.bf16.mxu1 %v16953_v57  ;;  %v17005_v56 = vld [vmem:[#allocation4 + $0x1130] ss:$52 sps:$4 sm:$0xff]   ;;  %v17008_v57 = vld [vmem:[#allocation4 + $0x1468] ss:$52 sps:$4 sm:$0xff]  }
 0x500   :  { %10674 = vmatprep.subr.bf16.mxu0 %v16956_v34  ;;  %v17013_v34 = vld [vmem:[#allocation4 + $0x119c] ss:$52 sps:$4 sm:$0xff]  }
 0x502   :  { %10946 = vmatpush1.bf16.msra.mxu1 %v16951_v23  ;;  %v17016_v23 = vld [vmem:[#allocation4 + $0x14d4] ss:$52 sps:$4 sm:$0xff]  }
 0x503   :  { %10675 = vmatpush1.bf16.msra.mxu0 %v16954_v61  ;;  %10947 = vmatprep.subr.bf16.mxu1 %v16959_v1  ;;  %v17011_v61 = vld [vmem:[#allocation4 + $0x1198] ss:$52 sps:$4 sm:$0xff]   ;;  %v17014_v1 = vld [vmem:[#allocation4 + $0x14d0] ss:$52 sps:$4 sm:$0xff]  }
 0x504   :  { %10676 = vmatprep.subr.bf16.mxu0 %v16962_v2  ;;  %v17019_v2 = vld [vmem:[#allocation4 + $0x1204] ss:$52 sps:$4 sm:$0xff]  }
 0x506   :  { %10948 = vmatpush1.bf16.msra.mxu1 %v16957_v6  ;;  %v17022_v6 = vld [vmem:[#allocation4 + $0x153c] ss:$52 sps:$4 sm:$0xff]  }
 0x507   :  { %10677 = vmatpush1.bf16.msra.mxu0 %v16960_v7  ;;  %10949 = vmatprep.subr.bf16.mxu1 %v16965_v8  ;;  %v17017_v7 = vld [vmem:[#allocation4 + $0x1200] ss:$52 sps:$4 sm:$0xff]   ;;  %v17020_v8 = vld [vmem:[#allocation4 + $0x1538] ss:$52 sps:$4 sm:$0xff]  }
 0x508   :  { %10678 = vmatprep.subr.bf16.mxu0 %v16968_v10  ;;  %v17025_v10 = vld [vmem:[#allocation4 + $0x126c] ss:$52 sps:$4 sm:$0xff]  }
 0x50a   :  { %10950 = vmatpush1.bf16.msra.mxu1 %v16963_v11  ;;  %v17028_v11 = vld [vmem:[#allocation4 + $0x15a4] ss:$52 sps:$4 sm:$0xff]  }
 0x50b   :  { %10679 = vmatpush1.bf16.msra.mxu0 %v16966_v12  ;;  %10951 = vmatprep.subr.bf16.mxu1 %v16971_v13  ;;  %v17023_v12 = vld [vmem:[#allocation4 + $0x1268] ss:$52 sps:$4 sm:$0xff]   ;;  %v17026_v13 = vld [vmem:[#allocation4 + $0x15a0] ss:$52 sps:$4 sm:$0xff]  }
 0x50c   :  { %10680 = vmatprep.subr.bf16.mxu0 %v16974_v42  ;;  %v17031_v42 = vld [vmem:[#allocation4 + $0x12d4] ss:$52 sps:$4 sm:$0xff]  }
 0x50e   :  { %10952 = vmatpush1.bf16.msra.mxu1 %v16969_v58  ;;  %v17034_v58 = vld [vmem:[#allocation4 + $0x160c] ss:$52 sps:$4 sm:$0xff]  }
 0x50f   :  { %10681 = vmatpush1.bf16.msra.mxu0 %v16972_v15  ;;  %10953 = vmatprep.subr.bf16.mxu1 %v16977_v17 }
 0x510   :  { %10682 = vmatprep.subr.bf16.mxu0 %v16980_v19  ;;  %v17029_v19 = vld [vmem:[#allocation4 + $0x12d0] ss:$52 sps:$4 sm:$0xff]  }
 0x512   :  { %10954 = vmatpush1.bf16.msra.mxu1 %v16975_v59 }
 0x513   :  { %10683 = vmatpush1.bf16.msra.mxu0 %v16978_v20  ;;  %10955 = vmatprep.subr.bf16.mxu1 %v16983_v21  ;;  %v17032_v20 = vld [vmem:[#allocation4 + $0x1608] ss:$52 sps:$4 sm:$0xff]  }
 0x514   :  { %10684 = vmatprep.subr.bf16.mxu0 %v16986_v25  ;;  %v17037_v21 = vld [vmem:[#allocation4 + $0x133c] ss:$52 sps:$4 sm:$0xff]  }
 0x516   :  { %10956 = vmatpush1.bf16.msra.mxu1 %v16981_v27  ;;  %v17040_v27 = vld [vmem:[#allocation4 + $0x1674] ss:$52 sps:$4 sm:$0xff]  }
 0x517   :  { %10685 = vmatpush1.bf16.msra.mxu0 %v16984_v28  ;;  %10957 = vmatprep.subr.bf16.mxu1 %v16989_v51  ;;  %v17035_v28 = vld [vmem:[#allocation4 + $0x1338] ss:$52 sps:$4 sm:$0xff]   ;;  %v17038_v51 = vld [vmem:[#allocation4 + $0x1670] ss:$52 sps:$4 sm:$0xff]  }
 0x518   :  { %10686 = vmatprep.subr.bf16.mxu0 %v16992_v32  ;;  %v17043_v32 = vld [vmem:[#allocation4 + $0x13a4] ss:$52 sps:$4 sm:$0xff]  }
 0x51a   :  { %10958 = vmatpush1.bf16.msra.mxu1 %v16987_v14  ;;  %v17046_v14 = vld [vmem:[#allocation4 + $0x16dc] ss:$52 sps:$4 sm:$0xff]  }
 0x51b   :  { %10687 = vmatpush1.bf16.msra.mxu0 %v16990_v35  ;;  %10959 = vmatprep.subr.bf16.mxu1 %v16995_v38  ;;  %v17041_v35 = vld [vmem:[#allocation4 + $0x13a0] ss:$52 sps:$4 sm:$0xff]   ;;  %v17044_v38 = vld [vmem:[#allocation4 + $0x16d8] ss:$52 sps:$4 sm:$0xff]  }
 0x51c   :  { %10697 = vmatprep.subr.bf16.mxu0 %v16998_v40  ;;  %v17049_v40 = vld [vmem:[#allocation4 + $0x140c] ss:$52 sps:$4 sm:$0xff]  }
 0x51e   :  { %10689 = vmatmul.mubr.bf16.vlgmr.msra.gmra.mrb[32].mxu0 %v19080_v54  ;;  %10960 = vmatpush1.bf16.msra.mxu1 %v16993_v41  ;;  %v17052_v41 = vld [vmem:[#allocation4 + $0x1744] ss:$52 sps:$4 sm:$0xff]  }
 0x51f   :  { %10698 = vmatpush1.bf16.msra.mxu0 %v16996_v44  ;;  %10729 = vmatprep.mubr.bf16.mxu0 %v19105_v62  ;;  %v17047_v44 = vld [vmem:[#allocation4 + $0x1408] ss:$52 sps:$4 sm:$0xff]  }
 0x520   :  { %10961 = vmatprep.subr.bf16.mxu1 %v17001_v48  ;;  %10699 = vmatprep.subr.bf16.mxu0 %v17004_v36  ;;  %v17050_v48 = vld [vmem:[#allocation4 + $0x1740] ss:$52 sps:$4 sm:$0xff]  }
 0x521   :  { %v17055_v36 = vld [vmem:[#allocation4 + $0x1474] ss:$52 sps:$4 sm:$0xff]  }
 0x522   :  { %10962 = vmatpush1.bf16.msra.mxu1 %v16999_v49  ;;  %v17058_v49 = vld [vmem:[#allocation4 + $0x17ac] ss:$52 sps:$4 sm:$0xff]  }
 0x523   :  { %10700 = vmatpush1.bf16.msra.mxu0 %v17002_v50  ;;  %10963 = vmatprep.subr.bf16.mxu1 %v17007_v52  ;;  %v17053_v50 = vld [vmem:[#allocation4 + $0x1470] ss:$52 sps:$4 sm:$0xff]   ;;  %v17056_v52 = vld [vmem:[#allocation4 + $0x17a8] ss:$52 sps:$4 sm:$0xff]  }
 0x524   :  { %10701 = vmatprep.subr.bf16.mxu0 %v17010_v53  ;;  %v17061_v53 = vld [vmem:[#allocation4 + $0x14dc] ss:$52 sps:$4 sm:$0xff]  }
 0x526   :  { %10964 = vmatpush1.bf16.msra.mxu1 %v17005_v56  ;;  %v17064_v56 = vld [vmem:[#allocation4 + $0x1814] ss:$52 sps:$4 sm:$0xff]  }
 0x527   :  { %10702 = vmatpush1.bf16.msra.mxu0 %v17008_v57  ;;  %10965 = vmatprep.subr.bf16.mxu1 %v17013_v34  ;;  %v17059_v57 = vld [vmem:[#allocation4 + $0x14d8] ss:$52 sps:$4 sm:$0xff]   ;;  %v17062_v34 = vld [vmem:[#allocation4 + $0x1810] ss:$52 sps:$4 sm:$0xff]  }
 0x528   :  { %10703 = vmatprep.subr.bf16.mxu0 %v17016_v23  ;;  %v17067_v23 = vld [vmem:[#allocation4 + $0x1544] ss:$52 sps:$4 sm:$0xff]  }
 0x52a   :  { %10966 = vmatpush1.bf16.msra.mxu1 %v17011_v61  ;;  %v17070_v61 = vld [vmem:[#allocation4 + $0x187c] ss:$52 sps:$4 sm:$0xff]  }
 0x52b   :  { %10704 = vmatpush1.bf16.msra.mxu0 %v17014_v1  ;;  %10967 = vmatprep.subr.bf16.mxu1 %v17019_v2  ;;  %v17065_v1 = vld [vmem:[#allocation4 + $0x1540] ss:$52 sps:$4 sm:$0xff]   ;;  %v17068_v2 = vld [vmem:[#allocation4 + $0x1878] ss:$52 sps:$4 sm:$0xff]  }
 0x52c   :  { %10705 = vmatprep.subr.bf16.mxu0 %v17022_v6  ;;  %v17073_v6 = vld [vmem:[#allocation4 + $0x15ac] ss:$52 sps:$4 sm:$0xff]  }
 0x52e   :  { %10968 = vmatpush1.bf16.msra.mxu1 %v17017_v7  ;;  %v17076_v7 = vld [vmem:[#allocation4 + $0x18e4] ss:$52 sps:$4 sm:$0xff]  }
 0x52f   :  { %10706 = vmatpush1.bf16.msra.mxu0 %v17020_v8  ;;  %10969 = vmatprep.subr.bf16.mxu1 %v17025_v10  ;;  %v17071_v8 = vld [vmem:[#allocation4 + $0x15a8] ss:$52 sps:$4 sm:$0xff]   ;;  %v17074_v10 = vld [vmem:[#allocation4 + $0x18e0] ss:$52 sps:$4 sm:$0xff]  }
 0x530   :  { %10707 = vmatprep.subr.bf16.mxu0 %v17028_v11  ;;  %v17079_v11 = vld [vmem:[#allocation4 + $0x1614] ss:$52 sps:$4 sm:$0xff]  }
 0x531   :  { %v19189_v15 = vpop.f32.mrb[28].mxu0 }
 0x532   :  { %10970 = vmatpush1.bf16.msra.mxu1 %v17023_v12  ;;  %v19191_v17 = vpop.f32.mrb[29].mxu0 }
 0x533   :  { %10708 = vmatpush1.bf16.msra.mxu0 %v17026_v13  ;;  %v10284_v59 = vpop.f32.mrb[30].mxu0  ;;  %10971 = vmatprep.subr.bf16.mxu1 %v17031_v42  ;;  %v17082_v13 = vld [vmem:[#allocation4 + $0x194c] ss:$52 sps:$4 sm:$0xff]  }
 0x534   :  { %v10285_v25 = vpop.f32.mrb[31].mxu0  ;;  %10709 = vmatprep.subr.bf16.mxu0 %v17034_v58 }
 0x535   :  { %v17088_v25 = vld [vmem:[#allocation4 + $0x19b4] ss:$52 sps:$4 sm:$0xff]  }
 0x536   :  { %10972 = vmatpush1.bf16.msra.mxu1 %v17029_v19  ;;  %v17077_v19 = vld [vmem:[#allocation4 + $0x1610] ss:$52 sps:$4 sm:$0xff]  }
 0x537   :  { %10710 = vmatpush1.bf16.msra.mxu0 %v17032_v20  ;;  %10973 = vmatprep.subr.bf16.mxu1 %v17037_v21  ;;  %v17080_v20 = vld [vmem:[#allocation4 + $0x1948] ss:$52 sps:$4 sm:$0xff]  }
 0x538   :  { %10711 = vmatprep.subr.bf16.mxu0 %v17040_v27  ;;  %v17085_v21 = vld [vmem:[#allocation4 + $0x167c] ss:$52 sps:$4 sm:$0xff]   ;;  %v17083_v27 = vld [vmem:[#allocation4 + $0x1678] ss:$52 sps:$4 sm:$0xff]  }
 0x53a   :  { %10974 = vmatpush1.bf16.msra.mxu1 %v17035_v28  ;;  %v17086_v28 = vld [vmem:[#allocation4 + $0x19b0] ss:$52 sps:$4 sm:$0xff]  }
 0x53b   :  { %10712 = vmatpush1.bf16.msra.mxu0 %v17038_v51  ;;  %10984 = vmatprep.subr.bf16.mxu1 %v17043_v32  ;;  %v17091_v51 = vld [vmem:[#allocation4 + $0x16e4] ss:$52 sps:$4 sm:$0xff]   ;;  %v17094_v32 = vld [vmem:[#allocation4 + $0x1a1c] ss:$52 sps:$4 sm:$0xff]  }
 0x53c   :  { %10713 = vmatprep.subr.bf16.mxu0 %v17046_v14  ;;  %v17089_v14 = vld [vmem:[#allocation4 + $0x16e0] ss:$52 sps:$4 sm:$0xff]  }
 0x53d   :  { %10976 = vmatmul.mubr.bf16.vlgmr.msra.gmra.mrb[12].mxu1 %v19080_v54 }
 0x53e   :  { %10985 = vmatpush1.bf16.msra.mxu1 %v17041_v35  ;;  %11016 = vmatprep.mubr.bf16.mxu1 %v19105_v62  ;;  %v17092_v35 = vld [vmem:[#allocation4 + $0x1a18] ss:$52 sps:$4 sm:$0xff]  }
 0x53f   :  { %10714 = vmatpush1.bf16.msra.mxu0 %v17044_v38  ;;  %10986 = vmatprep.subr.bf16.mxu1 %v17049_v40  ;;  %v17097_v38 = vld [vmem:[#allocation4 + $0x174c] ss:$52 sps:$4 sm:$0xff]   ;;  %v17100_v40 = vld [vmem:[#allocation4 + $0x1a84] ss:$52 sps:$4 sm:$0xff]  }
 0x540   :  { %10715 = vmatprep.subr.bf16.mxu0 %v17052_v41  ;;  %v17095_v41 = vld [vmem:[#allocation4 + $0x1748] ss:$52 sps:$4 sm:$0xff]  }
 0x542   :  { %10987 = vmatpush1.bf16.msra.mxu1 %v17047_v44  ;;  %v17098_v44 = vld [vmem:[#allocation4 + $0x1a80] ss:$52 sps:$4 sm:$0xff]  }
 0x543   :  { %10716 = vmatpush1.bf16.msra.mxu0 %v17050_v48  ;;  %10988 = vmatprep.subr.bf16.mxu1 %v17055_v36  ;;  %v17103_v48 = vld [vmem:[#allocation4 + $0x17b4] ss:$52 sps:$4 sm:$0xff]   ;;  %v17106_v36 = vld [vmem:[#allocation4 + $0x1aec] ss:$52 sps:$4 sm:$0xff]  }
 0x544   :  { %10717 = vmatprep.subr.bf16.mxu0 %v17058_v49  ;;  %v17101_v49 = vld [vmem:[#allocation4 + $0x17b0] ss:$52 sps:$4 sm:$0xff]  }
 0x546   :  { %10989 = vmatpush1.bf16.msra.mxu1 %v17053_v50  ;;  %v17104_v50 = vld [vmem:[#allocation4 + $0x1ae8] ss:$52 sps:$4 sm:$0xff]  }
 0x547   :  { %10718 = vmatpush1.bf16.msra.mxu0 %v17056_v52  ;;  %10990 = vmatprep.subr.bf16.mxu1 %v17061_v53  ;;  %v17109_v52 = vld [vmem:[#allocation4 + $0x181c] ss:$52 sps:$4 sm:$0xff]   ;;  %v17112_v53 = vld [vmem:[#allocation4 + $0x1b54] ss:$52 sps:$4 sm:$0xff]  }
 0x548   :  { %10719 = vmatprep.subr.bf16.mxu0 %v17064_v56  ;;  %v17107_v56 = vld [vmem:[#allocation4 + $0x1818] ss:$52 sps:$4 sm:$0xff]  }
 0x54a   :  { %10991 = vmatpush1.bf16.msra.mxu1 %v17059_v57  ;;  %v17110_v57 = vld [vmem:[#allocation4 + $0x1b50] ss:$52 sps:$4 sm:$0xff]  }
 0x54b   :  { %10720 = vmatpush1.bf16.msra.mxu0 %v17062_v34  ;;  %10992 = vmatprep.subr.bf16.mxu1 %v17067_v23  ;;  %v17115_v34 = vld [vmem:[#allocation4 + $0x1884] ss:$52 sps:$4 sm:$0xff]   ;;  %v17118_v23 = vld [vmem:[#allocation4 + $0x1bbc] ss:$52 sps:$4 sm:$0xff]  }
 0x54c   :  { %10721 = vmatprep.subr.bf16.mxu0 %v17070_v61  ;;  %v17113_v61 = vld [vmem:[#allocation4 + $0x1880] ss:$52 sps:$4 sm:$0xff]  }
 0x54e   :  { %10993 = vmatpush1.bf16.msra.mxu1 %v17065_v1  ;;  %v17116_v1 = vld [vmem:[#allocation4 + $0x1bb8] ss:$52 sps:$4 sm:$0xff]  }
 0x54f   :  { %10722 = vmatpush1.bf16.msra.mxu0 %v17068_v2  ;;  %10994 = vmatprep.subr.bf16.mxu1 %v17073_v6  ;;  %v17121_v2 = vld [vmem:[#allocation4 + $0x18ec] ss:$52 sps:$4 sm:$0xff]   ;;  %v17124_v6 = vld [vmem:[#allocation4 + $0x1c24] ss:$52 sps:$4 sm:$0xff]  }
 0x550   :  { %v19195_v12 = vpop.f32.mrb[8].mxu1  ;;  %10723 = vmatprep.subr.bf16.mxu0 %v17076_v7  ;;  %v17119_v7 = vld [vmem:[#allocation4 + $0x18e8] ss:$52 sps:$4 sm:$0xff]  }
 0x551   :  { %v19197_v42 = vpop.f32.mrb[9].mxu1 }
 0x552   :  { %10995 = vmatpush1.bf16.msra.mxu1 %v17071_v8  ;;  %v10571_v58 = vpop.f32.mrb[10].mxu1  ;;  %v17122_v8 = vld [vmem:[#allocation4 + $0x1c20] ss:$52 sps:$4 sm:$0xff]  }
 0x553   :  { %10724 = vmatpush1.bf16.msra.mxu0 %v17074_v10  ;;  %v10572_v59 = vpop.f32.mrb[11].mxu1  ;;  %10996 = vmatprep.subr.bf16.mxu1 %v17079_v11  ;;  %v17127_v10 = vld [vmem:[#allocation4 + $0x1954] ss:$52 sps:$4 sm:$0xff]   ;;  %v17130_v11 = vld [vmem:[#allocation4 + $0x1c8c] ss:$52 sps:$4 sm:$0xff]  }
 0x554   :  { %10725 = vmatprep.subr.bf16.mxu0 %v17082_v13  ;;  %v17125_v13 = vld [vmem:[#allocation4 + $0x1950] ss:$52 sps:$4 sm:$0xff]   ;;  %v17128_v58 = vld [vmem:[#allocation4 + $0x1c88] ss:$52 sps:$4 sm:$0xff]  }
 0x555   :  { %v17136_v59 = vld [vmem:[#allocation4 + $0x1cf4] ss:$52 sps:$4 sm:$0xff]  }
 0x556   :  { %10997 = vmatpush1.bf16.msra.mxu1 %v17077_v19  ;;  %v17133_v19 = vld [vmem:[#allocation4 + $0x19bc] ss:$52 sps:$4 sm:$0xff]  }
 0x557   :  { %10726 = vmatpush1.bf16.msra.mxu0 %v17080_v20  ;;  %10998 = vmatprep.subr.bf16.mxu1 %v17085_v21  ;;  %v17131_v20 = vld [vmem:[#allocation4 + $0x19b8] ss:$52 sps:$4 sm:$0xff]   ;;  %v17134_v21 = vld [vmem:[#allocation4 + $0x1cf0] ss:$52 sps:$4 sm:$0xff]  }
 0x558   :  { %10727 = vmatprep.subr.bf16.mxu0 %v17088_v25  ;;  %v17139_v25 = vld [vmem:[#allocation4 + $0x1a24] ss:$52 sps:$4 sm:$0xff]  }
 0x55a   :  { %10999 = vmatpush1.bf16.msra.mxu1 %v17083_v27  ;;  %v17142_v27 = vld [vmem:[#allocation4 + $0x1d5c] ss:$52 sps:$4 sm:$0xff]  }
 0x55b   :  { %10728 = vmatpush1.bf16.msra.mxu0 %v17086_v28  ;;  %11000 = vmatprep.subr.bf16.mxu1 %v17091_v51  ;;  %v17137_v28 = vld [vmem:[#allocation4 + $0x1a20] ss:$52 sps:$4 sm:$0xff]   ;;  %v17140_v51 = vld [vmem:[#allocation4 + $0x1d58] ss:$52 sps:$4 sm:$0xff]  }
 0x55c   :  { %10738 = vmatprep.subr.bf16.mxu0 %v17094_v32  ;;  %v17145_v32 = vld [vmem:[#allocation4 + $0x1a8c] ss:$52 sps:$4 sm:$0xff]  }
 0x55e   :  { %10730 = vmatmul.mubr.bf16.vlgmr.msra.gmra.mrb[32].mxu0 %v19103_v60  ;;  %11001 = vmatpush1.bf16.msra.mxu1 %v17089_v14  ;;  %v17148_v14 = vld [vmem:[#allocation4 + $0x1dc4] ss:$52 sps:$4 sm:$0xff]  }
 0x55f   :  { %10739 = vmatpush1.bf16.msra.mxu0 %v17092_v35  ;;  %10770 = vmatprep.mubr.bf16.mxu0 %v19118_v4  ;;  %v17143_v35 = vld [vmem:[#allocation4 + $0x1a88] ss:$52 sps:$4 sm:$0xff]  }
 0x560   :  { %11002 = vmatprep.subr.bf16.mxu1 %v17097_v38  ;;  %10740 = vmatprep.subr.bf16.mxu0 %v17100_v40  ;;  %v17146_v38 = vld [vmem:[#allocation4 + $0x1dc0] ss:$52 sps:$4 sm:$0xff]  }
 0x561   :  { %v17151_v40 = vld [vmem:[#allocation4 + $0x1af4] ss:$52 sps:$4 sm:$0xff]  }
 0x562   :  { %11003 = vmatpush1.bf16.msra.mxu1 %v17095_v41  ;;  %v17154_v41 = vld [vmem:[#allocation4 + $0x1e2c] ss:$52 sps:$4 sm:$0xff]  }
 0x563   :  { %10741 = vmatpush1.bf16.msra.mxu0 %v17098_v44  ;;  %11004 = vmatprep.subr.bf16.mxu1 %v17103_v48  ;;  %v17149_v44 = vld [vmem:[#allocation4 + $0x1af0] ss:$52 sps:$4 sm:$0xff]   ;;  %v17152_v48 = vld [vmem:[#allocation4 + $0x1e28] ss:$52 sps:$4 sm:$0xff]  }
 0x564   :  { %10742 = vmatprep.subr.bf16.mxu0 %v17106_v36  ;;  %v17157_v36 = vld [vmem:[#allocation4 + $0x1b5c] ss:$52 sps:$4 sm:$0xff]  }
 0x566   :  { %11005 = vmatpush1.bf16.msra.mxu1 %v17101_v49  ;;  %v17160_v49 = vld [vmem:[#allocation4 + $0x1e94] ss:$52 sps:$4 sm:$0xff]  }
 0x567   :  { %10743 = vmatpush1.bf16.msra.mxu0 %v17104_v50  ;;  %11006 = vmatprep.subr.bf16.mxu1 %v17109_v52  ;;  %v17155_v50 = vld [vmem:[#allocation4 + $0x1b58] ss:$52 sps:$4 sm:$0xff]   ;;  %v17158_v52 = vld [vmem:[#allocation4 + $0x1e90] ss:$52 sps:$4 sm:$0xff]  }
 0x568   :  { %10744 = vmatprep.subr.bf16.mxu0 %v17112_v53  ;;  %v17163_v53 = vld [vmem:[#allocation4 + $0x1bc4] ss:$52 sps:$4 sm:$0xff]  }
 0x56a   :  { %11007 = vmatpush1.bf16.msra.mxu1 %v17107_v56  ;;  %v17166_v56 = vld [vmem:[#allocation4 + $0x1efc] ss:$52 sps:$4 sm:$0xff]  }
 0x56b   :  { %10745 = vmatpush1.bf16.msra.mxu0 %v17110_v57  ;;  %11008 = vmatprep.subr.bf16.mxu1 %v17115_v34  ;;  %v17161_v57 = vld [vmem:[#allocation4 + $0x1bc0] ss:$52 sps:$4 sm:$0xff]   ;;  %v17164_v34 = vld [vmem:[#allocation4 + $0x1ef8] ss:$52 sps:$4 sm:$0xff]  }
 0x56c   :  { %10746 = vmatprep.subr.bf16.mxu0 %v17118_v23  ;;  %v17169_v23 = vld [vmem:[#allocation4 + $0x1c2c] ss:$52 sps:$4 sm:$0xff]  }
 0x56e   :  { %11009 = vmatpush1.bf16.msra.mxu1 %v17113_v61  ;;  %v17172_v61 = vld [vmem:[#allocation4 + $0x1f64] ss:$52 sps:$4 sm:$0xff]  }
 0x56f   :  { %10747 = vmatpush1.bf16.msra.mxu0 %v17116_v1  ;;  %11010 = vmatprep.subr.bf16.mxu1 %v17121_v2  ;;  %v17167_v1 = vld [vmem:[#allocation4 + $0x1c28] ss:$52 sps:$4 sm:$0xff]   ;;  %v17170_v2 = vld [vmem:[#allocation4 + $0x1f60] ss:$52 sps:$4 sm:$0xff]  }
 0x570   :  { %10748 = vmatprep.subr.bf16.mxu0 %v17124_v6  ;;  %v17175_v6 = vld [vmem:[#allocation4 + $0x1c94] ss:$52 sps:$4 sm:$0xff]  }
 0x572   :  { %11011 = vmatpush1.bf16.msra.mxu1 %v17119_v7  ;;  %v17178_v7 = vld [vmem:[#allocation4 + $0x1fcc] ss:$52 sps:$4 sm:$0xff]  }
 0x573   :  { %10749 = vmatpush1.bf16.msra.mxu0 %v17122_v8  ;;  %11012 = vmatprep.subr.bf16.mxu1 %v17127_v10  ;;  %v17173_v8 = vld [vmem:[#allocation4 + $0x1c90] ss:$52 sps:$4 sm:$0xff]   ;;  %v17176_v10 = vld [vmem:[#allocation4 + $0x1fc8] ss:$52 sps:$4 sm:$0xff]  }
 0x574   :  { %10750 = vmatprep.subr.bf16.mxu0 %v17130_v11  ;;  %v17181_v11 = vld [vmem:[#allocation4 + $0x1cfc] ss:$52 sps:$4 sm:$0xff]  }
 0x576   :  { %11013 = vmatpush1.bf16.msra.mxu1 %v17125_v13  ;;  %v17184_v13 = vld [vmem:[#allocation4 + $0x2034] ss:$52 sps:$4 sm:$0xff]  }
 0x577   :  { %10751 = vmatpush1.bf16.msra.mxu0 %v17128_v58  ;;  %11014 = vmatprep.subr.bf16.mxu1 %v17133_v19  ;;  %v17179_v58 = vld [vmem:[#allocation4 + $0x1cf8] ss:$52 sps:$4 sm:$0xff]   ;;  %v17182_v19 = vld [vmem:[#allocation4 + $0x2030] ss:$52 sps:$4 sm:$0xff]  }
 0x578   :  { %10752 = vmatprep.subr.bf16.mxu0 %v17136_v59  ;;  %v17187_v59 = vld [vmem:[#allocation4 + $0x1d64] ss:$52 sps:$4 sm:$0xff]  }
 0x57a   :  { %11015 = vmatpush1.bf16.msra.mxu1 %v17131_v20  ;;  %v17190_v20 = vld [vmem:[#allocation4 + $0x209c] ss:$52 sps:$4 sm:$0xff]  }
 0x57b   :  { %10753 = vmatpush1.bf16.msra.mxu0 %v17134_v21  ;;  %11025 = vmatprep.subr.bf16.mxu1 %v17139_v25  ;;  %v17185_v21 = vld [vmem:[#allocation4 + $0x1d60] ss:$52 sps:$4 sm:$0xff]   ;;  %v17188_v25 = vld [vmem:[#allocation4 + $0x2098] ss:$52 sps:$4 sm:$0xff]  }
 0x57c   :  { %10754 = vmatprep.subr.bf16.mxu0 %v17142_v27  ;;  %v17193_v27 = vld [vmem:[#allocation4 + $0x1dcc] ss:$52 sps:$4 sm:$0xff]  }
 0x57d   :  { %11017 = vmatmul.mubr.bf16.vlgmr.msra.gmra.mrb[12].mxu1 %v19103_v60 }
 0x57e   :  { %11026 = vmatpush1.bf16.msra.mxu1 %v17137_v28  ;;  %11057 = vmatprep.mubr.bf16.mxu1 %v19118_v4  ;;  %v17196_v28 = vld [vmem:[#allocation4 + $0x2104] ss:$52 sps:$4 sm:$0xff]  }
 0x57f   :  { %10755 = vmatpush1.bf16.msra.mxu0 %v17140_v51  ;;  %11027 = vmatprep.subr.bf16.mxu1 %v17145_v32  ;;  %v17191_v51 = vld [vmem:[#allocation4 + $0x1dc8] ss:$52 sps:$4 sm:$0xff]   ;;  %v17194_v32 = vld [vmem:[#allocation4 + $0x2100] ss:$52 sps:$4 sm:$0xff]  }
 0x580   :  { %10756 = vmatprep.subr.bf16.mxu0 %v17148_v14  ;;  %v17199_v14 = vld [vmem:[#allocation4 + $0x1e34] ss:$52 sps:$4 sm:$0xff]  }
 0x582   :  { %11028 = vmatpush1.bf16.msra.mxu1 %v17143_v35  ;;  %v17202_v35 = vld [vmem:[#allocation4 + $0x216c] ss:$52 sps:$4 sm:$0xff]  }
 0x583   :  { %10757 = vmatpush1.bf16.msra.mxu0 %v17146_v38  ;;  %11029 = vmatprep.subr.bf16.mxu1 %v17151_v40  ;;  %v17197_v38 = vld [vmem:[#allocation4 + $0x1e30] ss:$52 sps:$4 sm:$0xff]   ;;  %v17200_v40 = vld [vmem:[#allocation4 + $0x2168] ss:$52 sps:$4 sm:$0xff]  }
 0x584   :  { %10758 = vmatprep.subr.bf16.mxu0 %v17154_v41  ;;  %v17205_v41 = vld [vmem:[#allocation4 + $0x1e9c] ss:$52 sps:$4 sm:$0xff]  }
 0x586   :  { %11030 = vmatpush1.bf16.msra.mxu1 %v17149_v44  ;;  %v17208_v44 = vld [vmem:[#allocation4 + $0x21d4] ss:$52 sps:$4 sm:$0xff]  }
 0x587   :  { %10759 = vmatpush1.bf16.msra.mxu0 %v17152_v48  ;;  %11031 = vmatprep.subr.bf16.mxu1 %v17157_v36  ;;  %v17203_v48 = vld [vmem:[#allocation4 + $0x1e98] ss:$52 sps:$4 sm:$0xff]   ;;  %v17206_v36 = vld [vmem:[#allocation4 + $0x21d0] ss:$52 sps:$4 sm:$0xff]  }
 0x588   :  { %10760 = vmatprep.subr.bf16.mxu0 %v17160_v49  ;;  %v17211_v49 = vld [vmem:[#allocation4 + $0x1f04] ss:$52 sps:$4 sm:$0xff]  }
 0x58a   :  { %11032 = vmatpush1.bf16.msra.mxu1 %v17155_v50  ;;  %v17214_v50 = vld [vmem:[#allocation4 + $0x223c] ss:$52 sps:$4 sm:$0xff]  }
 0x58b   :  { %10761 = vmatpush1.bf16.msra.mxu0 %v17158_v52  ;;  %11033 = vmatprep.subr.bf16.mxu1 %v17163_v53  ;;  %v17209_v52 = vld [vmem:[#allocation4 + $0x1f00] ss:$52 sps:$4 sm:$0xff]   ;;  %v17212_v53 = vld [vmem:[#allocation4 + $0x2238] ss:$52 sps:$4 sm:$0xff]  }
 0x58c   :  { %10762 = vmatprep.subr.bf16.mxu0 %v17166_v56  ;;  %v17217_v56 = vld [vmem:[#allocation4 + $0x1f6c] ss:$52 sps:$4 sm:$0xff]  }
 0x58e   :  { %11034 = vmatpush1.bf16.msra.mxu1 %v17161_v57  ;;  %v17220_v57 = vld [vmem:[#allocation4 + $0x22a4] ss:$52 sps:$4 sm:$0xff]  }
 0x58f   :  { %10763 = vmatpush1.bf16.msra.mxu0 %v17164_v34  ;;  %11035 = vmatprep.subr.bf16.mxu1 %v17169_v23  ;;  %v17215_v34 = vld [vmem:[#allocation4 + $0x1f68] ss:$52 sps:$4 sm:$0xff]   ;;  %v17218_v23 = vld [vmem:[#allocation4 + $0x22a0] ss:$52 sps:$4 sm:$0xff]  }
 0x590   :  { %10764 = vmatprep.subr.bf16.mxu0 %v17172_v61  ;;  %v17223_v61 = vld [vmem:[#allocation4 + $0x1fd4] ss:$52 sps:$4 sm:$0xff]  }
 0x592   :  { %11036 = vmatpush1.bf16.msra.mxu1 %v17167_v1  ;;  %v17226_v1 = vld [vmem:[#allocation4 + $0x230c] ss:$52 sps:$4 sm:$0xff]  }
 0x593   :  { %10765 = vmatpush1.bf16.msra.mxu0 %v17170_v2  ;;  %11037 = vmatprep.subr.bf16.mxu1 %v17175_v6  ;;  %v17221_v2 = vld [vmem:[#allocation4 + $0x1fd0] ss:$52 sps:$4 sm:$0xff]   ;;  %v17224_v6 = vld [vmem:[#allocation4 + $0x2308] ss:$52 sps:$4 sm:$0xff]  }
 0x594   :  { %10766 = vmatprep.subr.bf16.mxu0 %v17178_v7  ;;  %v17229_v7 = vld [vmem:[#allocation4 + $0x203c] ss:$52 sps:$4 sm:$0xff]  }
 0x596   :  { %11038 = vmatpush1.bf16.msra.mxu1 %v17173_v8  ;;  %v17232_v8 = vld [vmem:[#allocation4 + $0x2374] ss:$52 sps:$4 sm:$0xff]  }
 0x597   :  { %10767 = vmatpush1.bf16.msra.mxu0 %v17176_v10  ;;  %11039 = vmatprep.subr.bf16.mxu1 %v17181_v11  ;;  %v17227_v10 = vld [vmem:[#allocation4 + $0x2038] ss:$52 sps:$4 sm:$0xff]   ;;  %v17230_v11 = vld [vmem:[#allocation4 + $0x2370] ss:$52 sps:$4 sm:$0xff]  }
 0x598   :  { %10768 = vmatprep.subr.bf16.mxu0 %v17184_v13  ;;  %v17235_v13 = vld [vmem:[#allocation4 + $0x20a4] ss:$52 sps:$4 sm:$0xff]  }
 0x59a   :  { %11040 = vmatpush1.bf16.msra.mxu1 %v17179_v58  ;;  %v17238_v58 = vld [vmem:[#allocation4 + $0x23dc] ss:$52 sps:$4 sm:$0xff]  }
 0x59b   :  { %10769 = vmatpush1.bf16.msra.mxu0 %v17182_v19  ;;  %11041 = vmatprep.subr.bf16.mxu1 %v17187_v59  ;;  %v17233_v19 = vld [vmem:[#allocation4 + $0x20a0] ss:$52 sps:$4 sm:$0xff]   ;;  %v17236_v59 = vld [vmem:[#allocation4 + $0x23d8] ss:$52 sps:$4 sm:$0xff]  }
 0x59c   :  { %10779 = vmatprep.subr.bf16.mxu0 %v17190_v20  ;;  %v17241_v20 = vld [vmem:[#allocation4 + $0x210c] ss:$52 sps:$4 sm:$0xff]  }
 0x59e   :  { %10771 = vmatmul.mubr.bf16.vlgmr.msra.gmra.mrb[32].mxu0 %v19116_v3  ;;  %11042 = vmatpush1.bf16.msra.mxu1 %v17185_v21  ;;  %v17244_v21 = vld [vmem:[#allocation4 + $0x2444] ss:$52 sps:$4 sm:$0xff]  }
 0x59f   :  { %10780 = vmatpush1.bf16.msra.mxu0 %v17188_v25  ;;  %10811 = vmatprep.mubr.bf16.mxu0 %v19120_v47  ;;  %v17239_v25 = vld [vmem:[#allocation4 + $0x2108] ss:$52 sps:$4 sm:$0xff]  }
 0x5a0   :  { %11043 = vmatprep.subr.bf16.mxu1 %v17193_v27  ;;  %10781 = vmatprep.subr.bf16.mxu0 %v17196_v28  ;;  %v17242_v27 = vld [vmem:[#allocation4 + $0x2440] ss:$52 sps:$4 sm:$0xff]  }
 0x5a1   :  { %v17247_v28 = vld [vmem:[#allocation4 + $0x2174] ss:$52 sps:$4 sm:$0xff]  }
 0x5a2   :  { %11044 = vmatpush1.bf16.msra.mxu1 %v17191_v51  ;;  %v17250_v51 = vld [vmem:[#allocation4 + $0x24ac] ss:$52 sps:$4 sm:$0xff]  }
 0x5a3   :  { %10782 = vmatpush1.bf16.msra.mxu0 %v17194_v32  ;;  %11045 = vmatprep.subr.bf16.mxu1 %v17199_v14  ;;  %v17245_v32 = vld [vmem:[#allocation4 + $0x2170] ss:$52 sps:$4 sm:$0xff]   ;;  %v17248_v14 = vld [vmem:[#allocation4 + $0x24a8] ss:$52 sps:$4 sm:$0xff]  }
 0x5a4   :  { %10783 = vmatprep.subr.bf16.mxu0 %v17202_v35  ;;  %v17253_v35 = vld [vmem:[#allocation4 + $0x21dc] ss:$52 sps:$4 sm:$0xff]  }
 0x5a6   :  { %11046 = vmatpush1.bf16.msra.mxu1 %v17197_v38  ;;  %v17256_v38 = vld [vmem:[#allocation4 + $0x2514] ss:$52 sps:$4 sm:$0xff]  }
 0x5a7   :  { %10784 = vmatpush1.bf16.msra.mxu0 %v17200_v40  ;;  %11047 = vmatprep.subr.bf16.mxu1 %v17205_v41  ;;  %v17251_v40 = vld [vmem:[#allocation4 + $0x21d8] ss:$52 sps:$4 sm:$0xff]   ;;  %v17254_v41 = vld [vmem:[#allocation4 + $0x2510] ss:$52 sps:$4 sm:$0xff]  }
 0x5a8   :  { %10785 = vmatprep.subr.bf16.mxu0 %v17208_v44  ;;  %v17259_v44 = vld [vmem:[#allocation4 + $0x2244] ss:$52 sps:$4 sm:$0xff]  }
 0x5aa   :  { %11048 = vmatpush1.bf16.msra.mxu1 %v17203_v48  ;;  %v17262_v48 = vld [vmem:[#allocation4 + $0x257c] ss:$52 sps:$4 sm:$0xff]  }
 0x5ab   :  { %10786 = vmatpush1.bf16.msra.mxu0 %v17206_v36  ;;  %11049 = vmatprep.subr.bf16.mxu1 %v17211_v49  ;;  %v17257_v36 = vld [vmem:[#allocation4 + $0x2240] ss:$52 sps:$4 sm:$0xff]   ;;  %v17260_v49 = vld [vmem:[#allocation4 + $0x2578] ss:$52 sps:$4 sm:$0xff]  }
 0x5ac   :  { %10787 = vmatprep.subr.bf16.mxu0 %v17214_v50  ;;  %v17265_v50 = vld [vmem:[#allocation4 + $0x22ac] ss:$52 sps:$4 sm:$0xff]  }
 0x5ae   :  { %11050 = vmatpush1.bf16.msra.mxu1 %v17209_v52  ;;  %v17268_v52 = vld [vmem:[#allocation4 + $0x25e4] ss:$52 sps:$4 sm:$0xff]  }
 0x5af   :  { %10788 = vmatpush1.bf16.msra.mxu0 %v17212_v53  ;;  %11051 = vmatprep.subr.bf16.mxu1 %v17217_v56  ;;  %v17263_v53 = vld [vmem:[#allocation4 + $0x22a8] ss:$52 sps:$4 sm:$0xff]   ;;  %v17266_v56 = vld [vmem:[#allocation4 + $0x25e0] ss:$52 sps:$4 sm:$0xff]  }
 0x5b0   :  { %10789 = vmatprep.subr.bf16.mxu0 %v17220_v57  ;;  %v17271_v57 = vld [vmem:[#allocation4 + $0x2314] ss:$52 sps:$4 sm:$0xff]  }
 0x5b2   :  { %11052 = vmatpush1.bf16.msra.mxu1 %v17215_v34  ;;  %v17274_v34 = vld [vmem:[#allocation4 + $0x264c] ss:$52 sps:$4 sm:$0xff]  }
 0x5b3   :  { %10790 = vmatpush1.bf16.msra.mxu0 %v17218_v23  ;;  %11053 = vmatprep.subr.bf16.mxu1 %v17223_v61  ;;  %v17269_v23 = vld [vmem:[#allocation4 + $0x2310] ss:$52 sps:$4 sm:$0xff]   ;;  %v17272_v61 = vld [vmem:[#allocation4 + $0x2648] ss:$52 sps:$4 sm:$0xff]  }
 0x5b4   :  { %10791 = vmatprep.subr.bf16.mxu0 %v17226_v1  ;;  %v17277_v1 = vld [vmem:[#allocation4 + $0x237c] ss:$52 sps:$4 sm:$0xff]  }
 0x5b6   :  { %11054 = vmatpush1.bf16.msra.mxu1 %v17221_v2  ;;  %v17280_v2 = vld [vmem:[#allocation4 + $0x26b4] ss:$52 sps:$4 sm:$0xff]  }
 0x5b7   :  { %10792 = vmatpush1.bf16.msra.mxu0 %v17224_v6  ;;  %11055 = vmatprep.subr.bf16.mxu1 %v17229_v7  ;;  %v17275_v6 = vld [vmem:[#allocation4 + $0x2378] ss:$52 sps:$4 sm:$0xff]   ;;  %v17278_v7 = vld [vmem:[#allocation4 + $0x26b0] ss:$52 sps:$4 sm:$0xff]  }
 0x5b8   :  { %10793 = vmatprep.subr.bf16.mxu0 %v17232_v8  ;;  %v17283_v8 = vld [vmem:[#allocation4 + $0x23e4] ss:$52 sps:$4 sm:$0xff]  }
 0x5ba   :  { %11056 = vmatpush1.bf16.msra.mxu1 %v17227_v10  ;;  %v17286_v10 = vld [vmem:[#allocation4 + $0x271c] ss:$52 sps:$4 sm:$0xff]  }
 0x5bb   :  { %10794 = vmatpush1.bf16.msra.mxu0 %v17230_v11  ;;  %11066 = vmatprep.subr.bf16.mxu1 %v17235_v13  ;;  %v17281_v11 = vld [vmem:[#allocation4 + $0x23e0] ss:$52 sps:$4 sm:$0xff]   ;;  %v17284_v13 = vld [vmem:[#allocation4 + $0x2718] ss:$52 sps:$4 sm:$0xff]  }
 0x5bc   :  { %10795 = vmatprep.subr.bf16.mxu0 %v17238_v58  ;;  %v17289_v58 = vld [vmem:[#allocation4 + $0x244c] ss:$52 sps:$4 sm:$0xff]  }
 0x5bd   :  { %11058 = vmatmul.mubr.bf16.vlgmr.msra.gmra.mrb[12].mxu1 %v19116_v3 }
 0x5be   :  { %11067 = vmatpush1.bf16.msra.mxu1 %v17233_v19  ;;  %11098 = vmatprep.mubr.bf16.mxu1 %v19120_v47  ;;  %v17292_v19 = vld [vmem:[#allocation4 + $0x2784] ss:$52 sps:$4 sm:$0xff]  }
 0x5bf   :  { %10796 = vmatpush1.bf16.msra.mxu0 %v17236_v59  ;;  %11068 = vmatprep.subr.bf16.mxu1 %v17241_v20  ;;  %v17287_v59 = vld [vmem:[#allocation4 + $0x2448] ss:$52 sps:$4 sm:$0xff]   ;;  %v17290_v20 = vld [vmem:[#allocation4 + $0x2780] ss:$52 sps:$4 sm:$0xff]  }
 0x5c0   :  { %10797 = vmatprep.subr.bf16.mxu0 %v17244_v21  ;;  %v17295_v21 = vld [vmem:[#allocation4 + $0x24b4] ss:$52 sps:$4 sm:$0xff]  }
 0x5c2   :  { %11069 = vmatpush1.bf16.msra.mxu1 %v17239_v25  ;;  %v17301_v25 = vld [vmem:[#allocation4 + $0x2c] ss:$52 sps:$4 sm:$0xff]  }
 0x5c3   :  { %10798 = vmatpush1.bf16.msra.mxu0 %v17242_v27  ;;  %11070 = vmatprep.subr.bf16.mxu1 %v17247_v28  ;;  %v17293_v27 = vld [vmem:[#allocation4 + $0x24b0] ss:$52 sps:$4 sm:$0xff]  }
 0x5c4   :  { %10799 = vmatprep.subr.bf16.mxu0 %v17250_v51  ;;  %v17298_v28 = vld [vmem:[#allocation4 + $0x251c] ss:$52 sps:$4 sm:$0xff]   ;;  %v17296_v51 = vld [vmem:[#allocation4 + $0x2518] ss:$52 sps:$4 sm:$0xff]  }
 0x5c6   :  { %11071 = vmatpush1.bf16.msra.mxu1 %v17245_v32  ;;  %v17299_v32 = vld [vmem:[#allocation4 + $0x28] ss:$52 sps:$4 sm:$0xff]  }
 0x5c7   :  { %10800 = vmatpush1.bf16.msra.mxu0 %v17248_v14  ;;  %11072 = vmatprep.subr.bf16.mxu1 %v17253_v35  ;;  %v17304_v14 = vld [vmem:[#allocation4 + $0x2584] ss:$52 sps:$4 sm:$0xff]   ;;  %v17307_v35 = vld [vmem:[#allocation4 + $0x94] ss:$52 sps:$4 sm:$0xff]  }
 0x5c8   :  { %10801 = vmatprep.subr.bf16.mxu0 %v17256_v38  ;;  %v17302_v38 = vld [vmem:[#allocation4 + $0x2580] ss:$52 sps:$4 sm:$0xff]  }
 0x5ca   :  { %11073 = vmatpush1.bf16.msra.mxu1 %v17251_v40  ;;  %v17305_v40 = vld [vmem:[#allocation4 + $0x90] ss:$52 sps:$4 sm:$0xff]  }
 0x5cb   :  { %10802 = vmatpush1.bf16.msra.mxu0 %v17254_v41  ;;  %11074 = vmatprep.subr.bf16.mxu1 %v17259_v44  ;;  %v17310_v41 = vld [vmem:[#allocation4 + $0x25ec] ss:$52 sps:$4 sm:$0xff]   ;;  %v17313_v44 = vld [vmem:[#allocation4 + $0xfc] ss:$52 sps:$4 sm:$0xff]  }
 0x5cc   :  { %10803 = vmatprep.subr.bf16.mxu0 %v17262_v48  ;;  %v17308_v48 = vld [vmem:[#allocation4 + $0x25e8] ss:$52 sps:$4 sm:$0xff]  }
 0x5ce   :  { %11075 = vmatpush1.bf16.msra.mxu1 %v17257_v36  ;;  %v17311_v36 = vld [vmem:[#allocation4 + $0xf8] ss:$52 sps:$4 sm:$0xff]  }
 0x5cf   :  { %10804 = vmatpush1.bf16.msra.mxu0 %v17260_v49  ;;  %11076 = vmatprep.subr.bf16.mxu1 %v17265_v50  ;;  %v17316_v49 = vld [vmem:[#allocation4 + $0x2654] ss:$52 sps:$4 sm:$0xff]   ;;  %v17319_v50 = vld [vmem:[#allocation4 + $0x164] ss:$52 sps:$4 sm:$0xff]  }
 0x5d0   :  { %10805 = vmatprep.subr.bf16.mxu0 %v17268_v52  ;;  %v17314_v52 = vld [vmem:[#allocation4 + $0x2650] ss:$52 sps:$4 sm:$0xff]  }
 0x5d2   :  { %11077 = vmatpush1.bf16.msra.mxu1 %v17263_v53  ;;  %v17317_v53 = vld [vmem:[#allocation4 + $0x160] ss:$52 sps:$4 sm:$0xff]  }
 0x5d3   :  { %10806 = vmatpush1.bf16.msra.mxu0 %v17266_v56  ;;  %11078 = vmatprep.subr.bf16.mxu1 %v17271_v57  ;;  %v17322_v56 = vld [vmem:[#allocation4 + $0x26bc] ss:$52 sps:$4 sm:$0xff]   ;;  %v17325_v57 = vld [vmem:[#allocation4 + $0x1cc] ss:$52 sps:$4 sm:$0xff]  }
 0x5d4   :  { %10807 = vmatprep.subr.bf16.mxu0 %v17274_v34  ;;  %v17320_v34 = vld [vmem:[#allocation4 + $0x26b8] ss:$52 sps:$4 sm:$0xff]  }
 0x5d6   :  { %11079 = vmatpush1.bf16.msra.mxu1 %v17269_v23  ;;  %v17323_v23 = vld [vmem:[#allocation4 + $0x1c8] ss:$52 sps:$4 sm:$0xff]  }
 0x5d7   :  { %10808 = vmatpush1.bf16.msra.mxu0 %v17272_v61  ;;  %11080 = vmatprep.subr.bf16.mxu1 %v17277_v1  ;;  %v17331_v61 = vld [vmem:[#allocation4 + $0x2724] ss:$52 sps:$4 sm:$0xff]   ;;  %v17328_v1 = vld [vmem:[#allocation4 + $0x234] ss:$52 sps:$4 sm:$0xff]  }
 0x5d8   :  { %10809 = vmatprep.subr.bf16.mxu0 %v17280_v2  ;;  %v17329_v2 = vld [vmem:[#allocation4 + $0x2720] ss:$52 sps:$4 sm:$0xff]  }
 0x5da   :  { %11081 = vmatpush1.bf16.msra.mxu1 %v17275_v6  ;;  %v17326_v6 = vld [vmem:[#allocation4 + $0x230] ss:$52 sps:$4 sm:$0xff]  }
 0x5db   :  { %10810 = vmatpush1.bf16.msra.mxu0 %v17278_v7  ;;  %11082 = vmatprep.subr.bf16.mxu1 %v17283_v8  ;;  %v17337_v7 = vld [vmem:[#allocation4 + $0x278c] ss:$52 sps:$4 sm:$0xff]   ;;  %v17334_v8 = vld [vmem:[#allocation4 + $0x29c] ss:$52 sps:$4 sm:$0xff]  }
 0x5dc   :  { %10820 = vmatprep.subr.bf16.mxu0 %v17286_v10  ;;  %v17335_v10 = vld [vmem:[#allocation4 + $0x2788] ss:$52 sps:$4 sm:$0xff]  }
 0x5de   :  { %10812 = vmatmul.mubr.bf16.vlgmr.msra.gmra.mrb[32].mxu0 %v19133_v26  ;;  %11083 = vmatpush1.bf16.msra.mxu1 %v17281_v11  ;;  %v17332_v11 = vld [vmem:[#allocation4 + $0x298] ss:$52 sps:$4 sm:$0xff]  }
 0x5df   :  { %10821 = vmatpush1.bf16.msra.mxu0 %v17284_v13  ;;  %11084 = vmatprep.subr.bf16.mxu1 %v17289_v58  ;;  %v17341_v13 = vld [vmem:[#allocation4 + $0x1070] ss:$52 sps:$4 sm:$0xff]  }
 0x5e0   :  { %10822 = vmatprep.subr.bf16.mxu0 %v17292_v19  ;;  %10852 = vmatprep.mubr.bf16.mxu0 %v18231_v16  ;;  %v17340_v58 = vld [vmem:[#allocation4 + $0x304] ss:$52 sps:$4 sm:$0xff]   ;;  %v17338_v19 = vld [vmem:[#allocation4 + $0x300] ss:$52 sps:$4 sm:$0xff]  }
 0x5e2   :  { %11085 = vmatpush1.bf16.msra.mxu1 %v17287_v59  ;;  %v17344_v59 = vld [vmem:[#allocation4 + $0x36c] ss:$52 sps:$4 sm:$0xff]  }
 0x5e3   :  { %10823 = vmatpush1.bf16.msra.mxu0 %v17290_v20  ;;  %11086 = vmatprep.subr.bf16.mxu1 %v17295_v21  ;;  %v17345_v20 = vld [vmem:[#allocation4 + $0xd30] ss:$52 sps:$4 sm:$0xff]   ;;  %v17342_v21 = vld [vmem:[#allocation4 + $0x368] ss:$52 sps:$4 sm:$0xff]  }
 0x5e4   :  { %11148 = vmatprep.subr.bf16.mxu0 %v17301_v25  ;;  %v17346_v25 = vld [vmem:[#allocation4 + $0x10d8] ss:$52 sps:$4 sm:$0xff]  }
 0x5e6   :  { %11087 = vmatpush1.bf16.msra.mxu1 %v17293_v27  ;;  %v17349_v27 = vld [vmem:[#allocation4 + $0x3d4] ss:$52 sps:$4 sm:$0xff]  }
 0x5e7   :  { %11088 = vmatprep.subr.bf16.mxu1 %v17298_v28  ;;  %v17350_v28 = vld [vmem:[#allocation4 + $0xd98] ss:$52 sps:$4 sm:$0xff]  }
 0x5ea   :  { %14936 = vmatmul.mubr.msk.bf16.vlgmr.msra.gmra.mrb[32].mxu0 %vm9709_vm0, %v19127_v46  ;;  %11089 = vmatpush1.bf16.msra.mxu1 %v17296_v51  ;;  %v17347_v51 = vld [vmem:[#allocation4 + $0x3d0] ss:$52 sps:$4 sm:$0xff]  }
 0x5eb   :  { %11149 = vmatpush1.bf16.msra.mxu0 %v17299_v32  ;;  %11180 = vmatprep.mubr.bf16.mxu0 %v18950_v45  ;;  %v17351_v32 = vld [vmem:[#allocation4 + $0x1140] ss:$52 sps:$4 sm:$0xff]  }
 0x5ec   :  { %11090 = vmatprep.subr.bf16.mxu1 %v17304_v14  ;;  %11150 = vmatprep.subr.bf16.mxu0 %v17307_v35  ;;  %v17354_v14 = vld [vmem:[#allocation4 + $0x43c] ss:$52 sps:$4 sm:$0xff]   ;;  %v17355_v35 = vld [vmem:[#allocation4 + $0xe00] ss:$52 sps:$4 sm:$0xff]  }
 0x5ee   :  { %11091 = vmatpush1.bf16.msra.mxu1 %v17302_v38  ;;  %v17352_v38 = vld [vmem:[#allocation4 + $0x438] ss:$52 sps:$4 sm:$0xff]  }
 0x5ef   :  { %11151 = vmatpush1.bf16.msra.mxu0 %v17305_v40  ;;  %11092 = vmatprep.subr.bf16.mxu1 %v17310_v41  ;;  %v17356_v40 = vld [vmem:[#allocation4 + $0x11a8] ss:$52 sps:$4 sm:$0xff]   ;;  %v17359_v41 = vld [vmem:[#allocation4 + $0x4a4] ss:$52 sps:$4 sm:$0xff]  }
 0x5f0   :  { %11152 = vmatprep.subr.bf16.mxu0 %v17313_v44  ;;  %v17360_v44 = vld [vmem:[#allocation4 + $0xe68] ss:$52 sps:$4 sm:$0xff]  }
 0x5f2   :  { %11093 = vmatpush1.bf16.msra.mxu1 %v17308_v48  ;;  %v17357_v48 = vld [vmem:[#allocation4 + $0x4a0] ss:$52 sps:$4 sm:$0xff]  }
 0x5f3   :  { %11153 = vmatpush1.bf16.msra.mxu0 %v17311_v36  ;;  %11094 = vmatprep.subr.bf16.mxu1 %v17316_v49  ;;  %v17361_v36 = vld [vmem:[#allocation4 + $0x1210] ss:$52 sps:$4 sm:$0xff]   ;;  %v17364_v49 = vld [vmem:[#allocation4 + $0x50c] ss:$52 sps:$4 sm:$0xff]  }
 0x5f4   :  { %11154 = vmatprep.subr.bf16.mxu0 %v17319_v50  ;;  %v17365_v50 = vld [vmem:[#allocation4 + $0xed0] ss:$52 sps:$4 sm:$0xff]  }
 0x5f6   :  { %11095 = vmatpush1.bf16.msra.mxu1 %v17314_v52  ;;  %v17362_v52 = vld [vmem:[#allocation4 + $0x508] ss:$52 sps:$4 sm:$0xff]  }
 0x5f7   :  { %11155 = vmatpush1.bf16.msra.mxu0 %v17317_v53  ;;  %11096 = vmatprep.subr.bf16.mxu1 %v17322_v56  ;;  %v17366_v53 = vld [vmem:[#allocation4 + $0x1278] ss:$52 sps:$4 sm:$0xff]   ;;  %v17369_v56 = vld [vmem:[#allocation4 + $0x574] ss:$52 sps:$4 sm:$0xff]  }
 0x5f8   :  { %11156 = vmatprep.subr.bf16.mxu0 %v17325_v57  ;;  %v17370_v57 = vld [vmem:[#allocation4 + $0xf38] ss:$52 sps:$4 sm:$0xff]  }
 0x5fa   :  { %11097 = vmatpush1.bf16.msra.mxu1 %v17320_v34  ;;  %v17367_v34 = vld [vmem:[#allocation4 + $0x570] ss:$52 sps:$4 sm:$0xff]  }
 0x5fb   :  { %11157 = vmatpush1.bf16.msra.mxu0 %v17323_v23  ;;  %11107 = vmatprep.subr.bf16.mxu1 %v17331_v61  ;;  %v17371_v23 = vld [vmem:[#allocation4 + $0x12e0] ss:$52 sps:$4 sm:$0xff]   ;;  %v17374_v61 = vld [vmem:[#allocation4 + $0x5dc] ss:$52 sps:$4 sm:$0xff]  }
 0x5fc   :  { %11158 = vmatprep.subr.bf16.mxu0 %v17328_v1  ;;  %v17375_v1 = vld [vmem:[#allocation4 + $0xfa0] ss:$52 sps:$4 sm:$0xff]  }
 0x5fd   :  { %11099 = vmatmul.mubr.bf16.vlgmr.msra.gmra.mrb[12].mxu1 %v19133_v26 }
 0x5fe   :  { %11108 = vmatpush1.bf16.msra.mxu1 %v17329_v2  ;;  %11139 = vmatprep.mubr.bf16.mxu1 %v18231_v16  ;;  %v17372_v2 = vld [vmem:[#allocation4 + $0x5d8] ss:$52 sps:$4 sm:$0xff]  }
 0x5ff   :  { %11159 = vmatpush1.bf16.msra.mxu0 %v17326_v6  ;;  %11109 = vmatprep.subr.bf16.mxu1 %v17337_v7  ;;  %v17376_v6 = vld [vmem:[#allocation4 + $0x1348] ss:$52 sps:$4 sm:$0xff]   ;;  %v17379_v7 = vld [vmem:[#allocation4 + $0x644] ss:$52 sps:$4 sm:$0xff]  }
 0x600   :  { %11160 = vmatprep.subr.bf16.mxu0 %v17334_v8  ;;  %v17380_v8 = vld [vmem:[#allocation4 + $0x1008] ss:$52 sps:$4 sm:$0xff]  }
 0x602   :  { %11110 = vmatpush1.bf16.msra.mxu1 %v17335_v10  ;;  %v17377_v10 = vld [vmem:[#allocation4 + $0x640] ss:$52 sps:$4 sm:$0xff]  }
 0x603   :  { %11161 = vmatpush1.bf16.msra.mxu0 %v17332_v11  ;;  %15225 = vmatprep.subr.bf16.mxu1 %v17341_v13  ;;  %v17381_v11 = vld [vmem:[#allocation4 + $0x1d70] ss:$52 sps:$4 sm:$0xff]   ;;  %v17384_v13 = vld [vmem:[#allocation4 + $0x6ac] ss:$52 sps:$4 sm:$0xff]  }
 0x604   :  { %11162 = vmatprep.subr.bf16.mxu0 %v17340_v58  ;;  %v17385_v58 = vld [vmem:[#allocation4 + $0x1a30] ss:$52 sps:$4 sm:$0xff]  }
 0x607   :  { %11163 = vmatpush1.bf16.msra.mxu0 %v17338_v19  ;;  %v17382_v19 = vld [vmem:[#allocation4 + $0x6a8] ss:$52 sps:$4 sm:$0xff]  }
 0x608   :  { %11164 = vmatprep.subr.bf16.mxu0 %v17344_v59  ;;  %v17386_v59 = vld [vmem:[#allocation4 + $0x1dd8] ss:$52 sps:$4 sm:$0xff]  }
 0x609   :  { %14937 = vmatmul.mubr.msk.bf16.vlgmr.msra.gmra.mrb[12].mxu1 %vm9709_vm0, %v19127_v46 }
 0x60a   :  { %15226 = vmatpush3.bf16.msra.mxu1 %v17345_v20  ;;  %11547 = vmatprep.mubr.bf16.mxu1 %v19082_v55  ;;  %v17389_v20 = vld [vmem:[#allocation4 + $0x714] ss:$52 sps:$4 sm:$0xff]  }
 0x60b   :  { %11165 = vmatpush1.bf16.msra.mxu0 %v17342_v21  ;;  %15227 = vmatprep.subr.bf16.mxu1 %v17346_v25  ;;  %v17390_v21 = vld [vmem:[#allocation4 + $0x1a98] ss:$52 sps:$4 sm:$0xff]   ;;  %v17387_v25 = vld [vmem:[#allocation4 + $0x710] ss:$52 sps:$4 sm:$0xff]  }
 0x60c   :  { %11166 = vmatprep.subr.bf16.mxu0 %v17349_v27  ;;  %v17391_v27 = vld [vmem:[#allocation4 + $0x1e40] ss:$52 sps:$4 sm:$0xff]  }
 0x60e   :  { %15228 = vmatpush3.bf16.msra.mxu1 %v17350_v28  ;;  %v17394_v28 = vld [vmem:[#allocation4 + $0x77c] ss:$52 sps:$4 sm:$0xff]  }
 0x60f   :  { %11167 = vmatpush1.bf16.msra.mxu0 %v17347_v51  ;;  %15229 = vmatprep.subr.bf16.mxu1 %v17351_v32  ;;  %v17395_v51 = vld [vmem:[#allocation4 + $0x1b00] ss:$52 sps:$4 sm:$0xff]   ;;  %v17392_v32 = vld [vmem:[#allocation4 + $0x778] ss:$52 sps:$4 sm:$0xff]  }
 0x610   :  { %11168 = vmatprep.subr.bf16.mxu0 %v17354_v14  ;;  %v17396_v14 = vld [vmem:[#allocation4 + $0x1ea8] ss:$52 sps:$4 sm:$0xff]  }
 0x612   :  { %15230 = vmatpush3.bf16.msra.mxu1 %v17355_v35  ;;  %v17399_v35 = vld [vmem:[#allocation4 + $0x7e4] ss:$52 sps:$4 sm:$0xff]  }
 0x613   :  { %11169 = vmatpush1.bf16.msra.mxu0 %v17352_v38  ;;  %15231 = vmatprep.subr.bf16.mxu1 %v17356_v40  ;;  %v17400_v38 = vld [vmem:[#allocation4 + $0x1b68] ss:$52 sps:$4 sm:$0xff]   ;;  %v17397_v40 = vld [vmem:[#allocation4 + $0x7e0] ss:$52 sps:$4 sm:$0xff]  }
 0x614   :  { %11170 = vmatprep.subr.bf16.mxu0 %v17359_v41  ;;  %v17401_v41 = vld [vmem:[#allocation4 + $0x1f10] ss:$52 sps:$4 sm:$0xff]  }
 0x616   :  { %15232 = vmatpush3.bf16.msra.mxu1 %v17360_v44  ;;  %v17404_v44 = vld [vmem:[#allocation4 + $0x84c] ss:$52 sps:$4 sm:$0xff]  }
 0x617   :  { %11171 = vmatpush1.bf16.msra.mxu0 %v17357_v48  ;;  %15233 = vmatprep.subr.bf16.mxu1 %v17361_v36  ;;  %v17405_v48 = vld [vmem:[#allocation4 + $0x1bd0] ss:$52 sps:$4 sm:$0xff]   ;;  %v17402_v36 = vld [vmem:[#allocation4 + $0x848] ss:$52 sps:$4 sm:$0xff]  }
 0x618   :  { %11172 = vmatprep.subr.bf16.mxu0 %v17364_v49  ;;  %v17406_v49 = vld [vmem:[#allocation4 + $0x1f78] ss:$52 sps:$4 sm:$0xff]  }
 0x61a   :  { %15234 = vmatpush3.bf16.msra.mxu1 %v17365_v50  ;;  %v17409_v50 = vld [vmem:[#allocation4 + $0x8b4] ss:$52 sps:$4 sm:$0xff]  }
 0x61b   :  { %11173 = vmatpush1.bf16.msra.mxu0 %v17362_v52  ;;  %15235 = vmatprep.subr.bf16.mxu1 %v17366_v53  ;;  %v17410_v52 = vld [vmem:[#allocation4 + $0x1c38] ss:$52 sps:$4 sm:$0xff]   ;;  %v17407_v53 = vld [vmem:[#allocation4 + $0x8b0] ss:$52 sps:$4 sm:$0xff]  }
 0x61c   :  { %11174 = vmatprep.subr.bf16.mxu0 %v17369_v56  ;;  %v17411_v56 = vld [vmem:[#allocation4 + $0x1fe0] ss:$52 sps:$4 sm:$0xff]  }
 0x61e   :  { %15236 = vmatpush3.bf16.msra.mxu1 %v17370_v57  ;;  %v17414_v57 = vld [vmem:[#allocation4 + $0x91c] ss:$52 sps:$4 sm:$0xff]  }
 0x61f   :  { %11175 = vmatpush1.bf16.msra.mxu0 %v17367_v34  ;;  %15237 = vmatprep.subr.bf16.mxu1 %v17371_v23  ;;  %v17415_v34 = vld [vmem:[#allocation4 + $0x1ca0] ss:$52 sps:$4 sm:$0xff]   ;;  %v17412_v23 = vld [vmem:[#allocation4 + $0x918] ss:$52 sps:$4 sm:$0xff]  }
 0x620   :  { %11176 = vmatprep.subr.bf16.mxu0 %v17374_v61  ;;  %v17416_v61 = vld [vmem:[#allocation4 + $0x2048] ss:$52 sps:$4 sm:$0xff]  }
 0x622   :  { %15238 = vmatpush3.bf16.msra.mxu1 %v17375_v1  ;;  %v17419_v1 = vld [vmem:[#allocation4 + $0x984] ss:$52 sps:$4 sm:$0xff]  }
 0x623   :  { %11177 = vmatpush1.bf16.msra.mxu0 %v17372_v2  ;;  %15239 = vmatprep.subr.bf16.mxu1 %v17376_v6  ;;  %v17420_v2 = vld [vmem:[#allocation4 + $0x1d08] ss:$52 sps:$4 sm:$0xff]   ;;  %v17417_v6 = vld [vmem:[#allocation4 + $0x980] ss:$52 sps:$4 sm:$0xff]  }
 0x624   :  { %11178 = vmatprep.subr.bf16.mxu0 %v17379_v7  ;;  %v17423_v7 = vld [vmem:[#allocation4 + $0x9ec] ss:$52 sps:$4 sm:$0xff]  }
 0x626   :  { %15240 = vmatpush3.bf16.msra.mxu1 %v17380_v8  ;;  %v17424_v8 = vld [vmem:[#allocation4 + $0x2730] ss:$52 sps:$4 sm:$0xff]  }
 0x627   :  { %11179 = vmatpush1.bf16.msra.mxu0 %v17377_v10  ;;  %15269 = vmatprep.subr.bf16.mxu1 %v17381_v11  ;;  %v18232_v10 = vmov 0.0   ;;  %v17421_v11 = vld [vmem:[#allocation4 + $0x9e8] ss:$52 sps:$4 sm:$0xff]  }
 0x628   :  { %11189 = vmatprep.subr.bf16.mxu0 %v17384_v13  ;;  %v17427_v13 = vld [vmem:[#allocation4 + $0xa54] ss:$52 sps:$4 sm:$0xff]  }
 0x629   :  { %11548 = vmatmul.mubr.bf16.vlgmr.msra.gmra.mrb[16].mxu1 %v19080_v54 }
 0x62a   :  { %11181 = vmatmul.mubr.bf16.vlgmr.msra.gmra.mrb[36].mxu0 %v18948_v43  ;;  %15270 = vmatpush3.bf16.msra.mxu1 %v17385_v58  ;;  %v17428_v58 = vld [vmem:[#allocation4 + $0x2798] ss:$52 sps:$4 sm:$0xff]  }
 0x62b   :  { %11627 = vmatprep.mubr.bf16.mxu1 %v19118_v4  ;;  %11190 = vmatpush1.bf16.msra.mxu0 %v17382_v19  ;;  %v17425_v19 = vld [vmem:[#allocation4 + $0xa50] ss:$52 sps:$4 sm:$0xff]  }
 0x62c   :  { %11221 = vmatprep.mubr.bf16.mxu0 %v19064_v0  ;;  %15271 = vmatprep.subr.bf16.mxu1 %v17386_v59  ;;  %v17431_v59 = vld [vmem:[#allocation7 + $0x4] ss:$8 sps:$4 sm:$0xff]  }
 0x62d   :  { %11191 = vmatprep.subr.bf16.mxu0 %v17389_v20  ;;  %v11716_v20 = vmax.f32 %v19159_v9, 0.0  ;;  %v17438_v9 = vld [vmem:[#allocation4 + $0xb20] ss:$52 sps:$4 sm:$0xff]  }
 0x62e   :  { %15272 = vmatpush3.bf16.msra.mxu1 %v17390_v21  ;;  %v17434_v21 = vld [vmem:[#allocation4 + $0xabc] ss:$52 sps:$4 sm:$0xff]  }
 0x62f   :  { %11192 = vmatpush1.bf16.msra.mxu0 %v17387_v25  ;;  %15273 = vmatprep.subr.bf16.mxu1 %v17391_v27  ;;  %v17429_v25 = vld [vmem:[#allocation7] ss:$8 sps:$4 sm:$0xff]   ;;  %v17432_v27 = vld [vmem:[#allocation4 + $0xab8] ss:$52 sps:$4 sm:$0xff]  }
 0x630   :  { %11193 = vmatprep.subr.bf16.mxu0 %v17394_v28  ;;  %v17437_v28 = vld [vmem:[#allocation7 + $0x14] ss:$8 sps:$4 sm:$0xff]  }
 0x632   :  { %15274 = vmatpush3.bf16.msra.mxu1 %v17395_v51  ;;  %v11729_v51 = vpack.c.bf16 %v11716_v20, %v11716_v20  ;;  %v17480_v20 = vld [vmem:[#allocation4 + $0xdf8] ss:$52 sps:$4 sm:$0xff]  }
 0x633   :  { %11194 = vmatpush1.bf16.msra.mxu0 %v17392_v32  ;;  %15275 = vmatprep.subr.bf16.mxu1 %v17396_v14  ;;  %v17440_v32 = vld [vmem:[#allocation4 + $0xb24] ss:$52 sps:$4 sm:$0xff]  }
 0x634   :  { %11195 = vmatprep.subr.bf16.mxu0 %v17399_v35  ;;  %v17435_v14 = vld [vmem:[#allocation7 + $0x10] ss:$8 sps:$4 sm:$0xff]   ;;  %v17443_v35 = vld [vmem:[#allocation7 + $0x24] ss:$8 sps:$4 sm:$0xff]  }
 0x636   :  { %15276 = vmatpush3.bf16.msra.mxu1 %v17400_v38  ;;  %v17446_v38 = vld [vmem:[#allocation4 + $0xb8c] ss:$52 sps:$4 sm:$0xff]  }
 0x637   :  { %11196 = vmatpush1.bf16.msra.mxu0 %v17397_v40  ;;  %15277 = vmatprep.subr.bf16.mxu1 %v17401_v41  ;;  %v17441_v40 = vld [vmem:[#allocation7 + $0x20] ss:$8 sps:$4 sm:$0xff]  }
 0x638   :  { %11197 = vmatprep.subr.bf16.mxu0 %v17404_v44  ;;  %v17444_v41 = vld [vmem:[#allocation4 + $0xb88] ss:$52 sps:$4 sm:$0xff]  }
 0x639   :  { %v17449_v44 = vld [vmem:[#allocation7 + $0x34] ss:$8 sps:$4 sm:$0xff]  }
 0x63a   :  { %15278 = vmatpush3.bf16.msra.mxu1 %v17405_v48  ;;  %v17452_v48 = vld [vmem:[#allocation4 + $0xbf4] ss:$52 sps:$4 sm:$0xff]  }
 0x63b   :  { %11198 = vmatpush1.bf16.msra.mxu0 %v17402_v36  ;;  %15279 = vmatprep.subr.bf16.mxu1 %v17406_v49  ;;  %v17447_v36 = vld [vmem:[#allocation7 + $0x30] ss:$8 sps:$4 sm:$0xff]  }
 0x63c   :  { %11199 = vmatprep.subr.bf16.mxu0 %v17409_v50  ;;  %v17450_v49 = vld [vmem:[#allocation4 + $0xbf0] ss:$52 sps:$4 sm:$0xff]  }
 0x63d   :  { %v17455_v50 = vld [vmem:[#allocation7 + $0x44] ss:$8 sps:$4 sm:$0xff]  }
 0x63e   :  { %15280 = vmatpush3.bf16.msra.mxu1 %v17410_v52  ;;  %v17458_v52 = vld [vmem:[#allocation4 + $0xc5c] ss:$52 sps:$4 sm:$0xff]  }
 0x63f   :  { %11200 = vmatpush1.bf16.msra.mxu0 %v17407_v53  ;;  %15281 = vmatprep.subr.bf16.mxu1 %v17411_v56  ;;  %v17453_v53 = vld [vmem:[#allocation7 + $0x40] ss:$8 sps:$4 sm:$0xff]   ;;  %v17456_v56 = vld [vmem:[#allocation4 + $0xc58] ss:$52 sps:$4 sm:$0xff]  }
 0x640   :  { %11201 = vmatprep.subr.bf16.mxu0 %v17414_v57  ;;  %v17461_v57 = vld [vmem:[#allocation7 + $0x54] ss:$8 sps:$4 sm:$0xff]  }
 0x642   :  { %15282 = vmatpush3.bf16.msra.mxu1 %v17415_v34  ;;  %v17464_v34 = vld [vmem:[#allocation4 + $0xcc4] ss:$52 sps:$4 sm:$0xff]  }
 0x643   :  { %11202 = vmatpush1.bf16.msra.mxu0 %v17412_v23  ;;  %15283 = vmatprep.subr.bf16.mxu1 %v17416_v61  ;;  %v17459_v23 = vld [vmem:[#allocation7 + $0x50] ss:$8 sps:$4 sm:$0xff]  }
 0x644   :  { %11203 = vmatprep.subr.bf16.mxu0 %v17419_v1  ;;  %v17462_v61 = vld [vmem:[#allocation4 + $0xcc0] ss:$52 sps:$4 sm:$0xff]  }
 0x645   :  { %v17467_v1 = vld [vmem:[#allocation7 + $0x64] ss:$8 sps:$4 sm:$0xff]  }
 0x646   :  { %15284 = vmatpush3.bf16.msra.mxu1 %v17420_v2  ;;  %v17470_v2 = vld [vmem:[#allocation4 + $0xd2c] ss:$52 sps:$4 sm:$0xff]  }
 0x647   :  { %11204 = vmatpush1.bf16.msra.mxu0 %v17417_v6  ;;  %15338 = vmatprep.subr.bf16.mxu1 %v18232_v10  ;;  %v17465_v6 = vld [vmem:[#allocation7 + $0x60] ss:$8 sps:$4 sm:$0xff]  }
 0x648   :  { %11205 = vmatprep.subr.bf16.mxu0 %v17423_v7  ;;  %v17468_v7 = vld [vmem:[#allocation4 + $0xd28] ss:$52 sps:$4 sm:$0xff]  }
 0x649   :  { %11628 = vmatmul.mubr.bf16.vlgmr.msra.gmra.mrb[20].mxu1 %v19116_v3 }
 0x64a   :  { %15339 = vmatpush3.bf16.msra.mxu1 %v17424_v8  ;;  %15342 = vmatprep.mubr.msk.bf16.mxu1 %vm18233_vm1, %v18232_v10  ;;  %v17473_v8 = vld [vmem:[#allocation7 + $0x74] ss:$8 sps:$4 sm:$0xff]  }
 0x64b   :  { %11206 = vmatpush1.bf16.msra.mxu0 %v17421_v11  ;;  %15340 = vmatprep.subr.bf16.mxu1 %v18232_v10  ;;  %v17476_v10 = vld [vmem:[#allocation4 + $0xd94] ss:$52 sps:$4 sm:$0xff]  }
 0x64c   :  { %11207 = vmatprep.subr.bf16.mxu0 %v17427_v13  ;;  %v17471_v11 = vld [vmem:[#allocation7 + $0x70] ss:$8 sps:$4 sm:$0xff]  }
 0x64d   :  { %v17474_v13 = vld [vmem:[#allocation4 + $0xd90] ss:$52 sps:$4 sm:$0xff]  }
 0x64e   :  { %15341 = vmatpush3.bf16.msra.mxu1 %v17428_v58  ;;  %v17479_v58 = vld [vmem:[#allocation7 + $0x84] ss:$8 sps:$4 sm:$0xff]  }
 0x64f   :  { %11208 = vmatpush1.bf16.msra.mxu0 %v17425_v19  ;;  %12957 = vmatprep.subr.bf16.mxu1 %v17431_v59  ;;  %v17482_v19 = vld [vmem:[#allocation4 + $0xdfc] ss:$52 sps:$4 sm:$0xff]  }
 0x650   :  { %11209 = vmatprep.subr.bf16.mxu0 %v17434_v21  ;;  %v17477_v59 = vld [vmem:[#allocation7 + $0x80] ss:$8 sps:$4 sm:$0xff]   ;;  %v17485_v21 = vld [vmem:[#allocation7 + $0x94] ss:$8 sps:$4 sm:$0xff]  }
 0x651   :  { %15343 = vmatmul.mubr.msk.bf16.vlgmr.msra.gmra.mrb[24].mxu1 %vm9709_vm0, %v19127_v46 }
 0x652   :  { %12958 = vmatpush1.bf16.msra.mxu1 %v17429_v25  ;;  %12989 = vmatprep.mubr.bf16.mxu1 %v11729_v51  ;;  %v17488_v25 = vld [vmem:[#allocation4 + $0xe64] ss:$52 sps:$4 sm:$0xff]  }
 0x653   :  { %11210 = vmatpush1.bf16.msra.mxu0 %v17432_v27  ;;  %12959 = vmatprep.subr.bf16.mxu1 %v17437_v28  ;;  %v17483_v27 = vld [vmem:[#allocation7 + $0x90] ss:$8 sps:$4 sm:$0xff]   ;;  %v17491_v51 = vld [vmem:[#allocation7 + $0xa4] ss:$8 sps:$4 sm:$0xff]  }
 0x654   :  { %11211 = vmatprep.subr.bf16.mxu0 %v17440_v32  ;;  %v17486_v28 = vld [vmem:[#allocation4 + $0xe60] ss:$52 sps:$4 sm:$0xff]  }
 0x655   :  { %v17489_v32 = vld [vmem:[#allocation7 + $0xa0] ss:$8 sps:$4 sm:$0xff]  }
 0x656   :  { %12960 = vmatpush1.bf16.msra.mxu1 %v17435_v14  ;;  %v17492_v14 = vld [vmem:[#allocation4 + $0xec8] ss:$52 sps:$4 sm:$0xff]  }
 0x657   :  { %11212 = vmatpush1.bf16.msra.mxu0 %v17438_v9  ;;  %12961 = vmatprep.subr.bf16.mxu1 %v17443_v35  ;;  %v17497_v9 = vld [vmem:[#allocation7 + $0xb4] ss:$8 sps:$4 sm:$0xff]  }
 0x658   :  { %11213 = vmatprep.subr.bf16.mxu0 %v17446_v38  ;;  %v17500_v35 = vld [vmem:[#allocation4 + $0xf34] ss:$52 sps:$4 sm:$0xff]  }
 0x659   :  { %v17495_v38 = vld [vmem:[#allocation7 + $0xb0] ss:$8 sps:$4 sm:$0xff]  }
 0x65a   :  { %12962 = vmatpush1.bf16.msra.mxu1 %v17441_v40  ;;  %v17498_v40 = vld [vmem:[#allocation4 + $0xf30] ss:$52 sps:$4 sm:$0xff]  }
 0x65b   :  { %11214 = vmatpush1.bf16.msra.mxu0 %v17444_v41  ;;  %12963 = vmatprep.subr.bf16.mxu1 %v17449_v44  ;;  %v17503_v41 = vld [vmem:[#allocation7 + $0xc4] ss:$8 sps:$4 sm:$0xff]   ;;  %v17506_v44 = vld [vmem:[#allocation4 + $0xf9c] ss:$52 sps:$4 sm:$0xff]  }
 0x65c   :  { %11215 = vmatprep.subr.bf16.mxu0 %v17452_v48  ;;  %v17501_v48 = vld [vmem:[#allocation7 + $0xc0] ss:$8 sps:$4 sm:$0xff]  }
 0x65e   :  { %12964 = vmatpush1.bf16.msra.mxu1 %v17447_v36  ;;  %v17504_v36 = vld [vmem:[#allocation4 + $0xf98] ss:$52 sps:$4 sm:$0xff]  }
 0x65f   :  { %11216 = vmatpush1.bf16.msra.mxu0 %v17450_v49  ;;  %12965 = vmatprep.subr.bf16.mxu1 %v17455_v50  ;;  %v17509_v49 = vld [vmem:[#allocation7 + $0xd4] ss:$8 sps:$4 sm:$0xff]  }
 0x660   :  { %11217 = vmatprep.subr.bf16.mxu0 %v17458_v52  ;;  %v17512_v50 = vld [vmem:[#allocation4 + $0x1004] ss:$52 sps:$4 sm:$0xff]  }
 0x661   :  { %v17507_v52 = vld [vmem:[#allocation7 + $0xd0] ss:$8 sps:$4 sm:$0xff]  }
 0x662   :  { %12966 = vmatpush1.bf16.msra.mxu1 %v17453_v53  ;;  %v17510_v53 = vld [vmem:[#allocation4 + $0x1000] ss:$52 sps:$4 sm:$0xff]  }
 0x663   :  { %11218 = vmatpush1.bf16.msra.mxu0 %v17456_v56  ;;  %12967 = vmatprep.subr.bf16.mxu1 %v17461_v57  ;;  %v17515_v56 = vld [vmem:[#allocation7 + $0xe4] ss:$8 sps:$4 sm:$0xff]   ;;  %v19227_v57 = vld [vmem:[#allocation6] sm:$0xff] }
 0x664   :  { %11219 = vmatprep.subr.bf16.mxu0 %v17464_v34  ;;  %v3191_v34 = vrot.slane %v19227_v57, %v19038_v39 }
 0x666   :  { %12968 = vmatpush1.bf16.msra.mxu1 %v17459_v23  ;;  %v17518_v23 = vld [vmem:[#allocation4 + $0x106c] ss:$52 sps:$4 sm:$0xff]  }
 0x667   :  { %11220 = vmatpush1.bf16.msra.mxu0 %v17462_v61  ;;  %12969 = vmatprep.subr.bf16.mxu1 %v17467_v1  ;;  %v17513_v61 = vld [vmem:[#allocation7 + $0xe0] ss:$8 sps:$4 sm:$0xff]  }
 0x668   :  { %11230 = vmatprep.subr.bf16.mxu0 %v17470_v2  ;;  %v17516_v1 = vld [vmem:[#allocation4 + $0x1068] ss:$52 sps:$4 sm:$0xff]  }
 0x669   :  { %v17521_v2 = vld [vmem:[#allocation7 + $0xf4] ss:$8 sps:$4 sm:$0xff]  }
 0x66a   :  { %11222 = vmatmul.mubr.bf16.vlgmr.msra.gmra.mrb[36].mxu0 %v19062_v63  ;;  %12970 = vmatpush1.bf16.msra.mxu1 %v17465_v6  ;;  %v15351_v6 = vadd.f32 %v19191_v17, %v3191_v34  ;;  %v17533_v17 = vld [vmem:[#allocation7 + $0x114] ss:$8 sps:$4 sm:$0xff]   ;;  %v17566_v34 = vld [vmem:[#allocation4 + $0x13ac] ss:$52 sps:$4 sm:$0xff]  }
 0x66b   :  { %11231 = vmatpush1.bf16.msra.mxu0 %v17468_v7  ;;  %11262 = vmatprep.mubr.bf16.mxu0 %v19082_v55  ;;  %v17494_v55 = vld [vmem:[#allocation4 + $0xecc] ss:$52 sps:$4 sm:$0xff]   ;;  %v17524_v7 = vld [vmem:[#allocation4 + $0x10d4] ss:$52 sps:$4 sm:$0xff]  }
 0x66c   :  { %12971 = vmatprep.subr.bf16.mxu1 %v17473_v8  ;;  %11232 = vmatprep.subr.bf16.mxu0 %v17476_v10  ;;  %v17519_v8 = vld [vmem:[#allocation7 + $0xf0] ss:$8 sps:$4 sm:$0xff]   ;;  %v11715_v10 = vmax.f32 %v19156_v5, 0.0 }
 0x66d   :  { %v17531_v5 = vld [vmem:[#allocation7 + $0x110] ss:$8 sps:$4 sm:$0xff]  }
 0x66e   :  { %12972 = vmatpush1.bf16.msra.mxu1 %v17471_v11  ;;  %v17522_v11 = vld [vmem:[#allocation4 + $0x10d0] ss:$52 sps:$4 sm:$0xff]  }
 0x66f   :  { %11233 = vmatpush1.bf16.msra.mxu0 %v17474_v13  ;;  %12973 = vmatprep.subr.bf16.mxu1 %v17479_v58  ;;  %v17527_v13 = vld [vmem:[#allocation7 + $0x104] ss:$8 sps:$4 sm:$0xff]   ;;  %v11718_v58 = vmax.f32 %v15351_v6, 0.0  ;;  %v17567_v6 = vld [vmem:[#allocation7 + $0x170] ss:$8 sps:$4 sm:$0xff]  }
 0x670   :  { %11234 = vmatprep.subr.bf16.mxu0 %v17482_v19  ;;  %v17530_v19 = vld [vmem:[#allocation4 + $0x113c] ss:$52 sps:$4 sm:$0xff]  }
 0x672   :  { %12974 = vmatpush1.bf16.msra.mxu1 %v17477_v59  ;;  %v17525_v59 = vld [vmem:[#allocation7 + $0x100] ss:$8 sps:$4 sm:$0xff]  }
 0x673   :  { %11235 = vmatpush1.bf16.msra.mxu0 %v17480_v20  ;;  %12975 = vmatprep.subr.bf16.mxu1 %v17485_v21  ;;  %v11728_v20 = vpack.c.bf16 %v11715_v10, %v11715_v10  ;;  %v17528_v21 = vld [vmem:[#allocation4 + $0x1138] ss:$52 sps:$4 sm:$0xff]   ;;  %v17578_v10 = vld [vmem:[#allocation4 + $0x147c] ss:$52 sps:$4 sm:$0xff]  }
 0x674   :  { %11236 = vmatprep.subr.bf16.mxu0 %v17488_v25  ;;  %v11731_v25 = vpack.c.bf16 %v11718_v58, %v11718_v58  ;;  %v17581_v58 = vld [vmem:[#allocation7 + $0x194] ss:$8 sps:$4 sm:$0xff]  }
 0x676   :  { %12976 = vmatpush1.bf16.msra.mxu1 %v17483_v27  ;;  %v17536_v27 = vld [vmem:[#allocation4 + $0x11a4] ss:$52 sps:$4 sm:$0xff]  }
 0x677   :  { %11237 = vmatpush1.bf16.msra.mxu0 %v17486_v28  ;;  %12977 = vmatprep.subr.bf16.mxu1 %v17491_v51  ;;  %v17534_v28 = vld [vmem:[#allocation4 + $0x11a0] ss:$52 sps:$4 sm:$0xff]  }
 0x678   :  { %11238 = vmatprep.subr.bf16.mxu0 %v17494_v55  ;;  %v17539_v51 = vld [vmem:[#allocation7 + $0x124] ss:$8 sps:$4 sm:$0xff]  }
 0x679   :  { %v17542_v55 = vld [vmem:[#allocation4 + $0x120c] ss:$52 sps:$4 sm:$0xff]  }
 0x67a   :  { %12978 = vmatpush1.bf16.msra.mxu1 %v17489_v32  ;;  %v17537_v32 = vld [vmem:[#allocation7 + $0x120] ss:$8 sps:$4 sm:$0xff]  }
 0x67b   :  { %11239 = vmatpush1.bf16.msra.mxu0 %v17492_v14  ;;  %12979 = vmatprep.subr.bf16.mxu1 %v17497_v9  ;;  %v17540_v14 = vld [vmem:[#allocation4 + $0x1208] ss:$52 sps:$4 sm:$0xff]  }
 0x67c   :  { %11240 = vmatprep.subr.bf16.mxu0 %v17500_v35  ;;  %v17545_v9 = vld [vmem:[#allocation7 + $0x134] ss:$8 sps:$4 sm:$0xff]  }
 0x67d   :  { %v17548_v35 = vld [vmem:[#allocation4 + $0x1274] ss:$52 sps:$4 sm:$0xff]  }
 0x67e   :  { %12980 = vmatpush1.bf16.msra.mxu1 %v17495_v38  ;;  %v17543_v38 = vld [vmem:[#allocation7 + $0x130] ss:$8 sps:$4 sm:$0xff]  }
 0x67f   :  { %11241 = vmatpush1.bf16.msra.mxu0 %v17498_v40  ;;  %12981 = vmatprep.subr.bf16.mxu1 %v17503_v41  ;;  %v17546_v40 = vld [vmem:[#allocation4 + $0x1270] ss:$52 sps:$4 sm:$0xff]  }
 0x680   :  { %11242 = vmatprep.subr.bf16.mxu0 %v17506_v44  ;;  %v17551_v41 = vld [vmem:[#allocation7 + $0x144] ss:$8 sps:$4 sm:$0xff]   ;;  %v17554_v44 = vld [vmem:[#allocation4 + $0x12dc] ss:$52 sps:$4 sm:$0xff]  }
 0x682   :  { %12982 = vmatpush1.bf16.msra.mxu1 %v17501_v48  ;;  %v17549_v48 = vld [vmem:[#allocation7 + $0x140] ss:$8 sps:$4 sm:$0xff]  }
 0x683   :  { %11243 = vmatpush1.bf16.msra.mxu0 %v17504_v36  ;;  %12983 = vmatprep.subr.bf16.mxu1 %v17509_v49  ;;  %v17552_v36 = vld [vmem:[#allocation4 + $0x12d8] ss:$52 sps:$4 sm:$0xff]  }
 0x684   :  { %11244 = vmatprep.subr.bf16.mxu0 %v17512_v50  ;;  %v17557_v49 = vld [vmem:[#allocation7 + $0x154] ss:$8 sps:$4 sm:$0xff]  }
 0x685   :  { %v17560_v50 = vld [vmem:[#allocation4 + $0x1344] ss:$52 sps:$4 sm:$0xff]  }
 0x686   :  { %12984 = vmatpush1.bf16.msra.mxu1 %v17507_v52  ;;  %v17555_v52 = vld [vmem:[#allocation7 + $0x150] ss:$8 sps:$4 sm:$0xff]  }
 0x687   :  { %11245 = vmatpush1.bf16.msra.mxu0 %v17510_v53  ;;  %12985 = vmatprep.subr.bf16.mxu1 %v17515_v56  ;;  %v17558_v53 = vld [vmem:[#allocation4 + $0x1340] ss:$52 sps:$4 sm:$0xff]  }
 0x688   :  { %11246 = vmatprep.subr.bf16.mxu0 %v17518_v23  ;;  %v17563_v56 = vld [vmem:[#allocation7 + $0x164] ss:$8 sps:$4 sm:$0xff]   ;;  %v17561_v23 = vld [vmem:[#allocation7 + $0x160] ss:$8 sps:$4 sm:$0xff]  }
 0x68a   :  { %12986 = vmatpush1.bf16.msra.mxu1 %v17513_v61  ;;  %v17564_v61 = vld [vmem:[#allocation4 + $0x13a8] ss:$52 sps:$4 sm:$0xff]  }
 0x68b   :  { %11247 = vmatpush1.bf16.msra.mxu0 %v17516_v1  ;;  %12987 = vmatprep.subr.bf16.mxu1 %v17521_v2  ;;  %v17569_v1 = vld [vmem:[#allocation7 + $0x174] ss:$8 sps:$4 sm:$0xff]  }
 0x68c   :  { %11248 = vmatprep.subr.bf16.mxu0 %v17524_v7  ;;  %v17572_v2 = vld [vmem:[#allocation4 + $0x1414] ss:$52 sps:$4 sm:$0xff]   ;;  %v17570_v7 = vld [vmem:[#allocation4 + $0x1410] ss:$52 sps:$4 sm:$0xff]  }
 0x68e   :  { %12988 = vmatpush1.bf16.msra.mxu1 %v17519_v8  ;;  %v17575_v8 = vld [vmem:[#allocation7 + $0x184] ss:$8 sps:$4 sm:$0xff]  }
 0x68f   :  { %11249 = vmatpush1.bf16.msra.mxu0 %v17522_v11  ;;  %12998 = vmatprep.subr.bf16.mxu1 %v17527_v13  ;;  %v17573_v11 = vld [vmem:[#allocation7 + $0x180] ss:$8 sps:$4 sm:$0xff]   ;;  %v17576_v13 = vld [vmem:[#allocation4 + $0x1478] ss:$52 sps:$4 sm:$0xff]  }
 0x690   :  { %11250 = vmatprep.subr.bf16.mxu0 %v17530_v19  ;;  %v17584_v19 = vld [vmem:[#allocation4 + $0x14e4] ss:$52 sps:$4 sm:$0xff]  }
 0x691   :  { %12990 = vmatmul.mubr.bf16.vlgmr.msra.gmra.mrb[28].mxu1 %v11728_v20  ;;  %v17587_v20 = vld [vmem:[#allocation7 + $0x1a4] ss:$8 sps:$4 sm:$0xff]  }
 0x692   :  { %12999 = vmatpush1.bf16.msra.mxu1 %v17525_v59  ;;  %13030 = vmatprep.mubr.bf16.mxu1 %v11731_v25  ;;  %v17582_v59 = vld [vmem:[#allocation4 + $0x14e0] ss:$52 sps:$4 sm:$0xff]   ;;  %v17588_v25 = vld [vmem:[#allocation4 + $0x1548] ss:$52 sps:$4 sm:$0xff]  }
 0x693   :  { %11251 = vmatpush1.bf16.msra.mxu0 %v17528_v21  ;;  %13000 = vmatprep.subr.bf16.mxu1 %v17533_v17  ;;  %v17590_v21 = vld [vmem:[#allocation4 + $0x154c] ss:$52 sps:$4 sm:$0xff]  }
 0x694   :  { %11252 = vmatprep.subr.bf16.mxu0 %v17536_v27  ;;  %v17585_v17 = vld [vmem:[#allocation7 + $0x1a0] ss:$8 sps:$4 sm:$0xff]   ;;  %v17593_v27 = vld [vmem:[#allocation7 + $0x1b4] ss:$8 sps:$4 sm:$0xff]  }
 0x696   :  { %13001 = vmatpush1.bf16.msra.mxu1 %v17531_v5  ;;  %v17596_v5 = vld [vmem:[#allocation4 + $0x15b4] ss:$52 sps:$4 sm:$0xff]  }
 0x697   :  { %11253 = vmatpush1.bf16.msra.mxu0 %v17534_v28  ;;  %13002 = vmatprep.subr.bf16.mxu1 %v17539_v51  ;;  %v17591_v28 = vld [vmem:[#allocation7 + $0x1b0] ss:$8 sps:$4 sm:$0xff]  }
 0x698   :  { %11254 = vmatprep.subr.bf16.mxu0 %v17542_v55  ;;  %v17594_v51 = vld [vmem:[#allocation4 + $0x15b0] ss:$52 sps:$4 sm:$0xff]  }
 0x699   :  { %v17599_v55 = vld [vmem:[#allocation7 + $0x1c4] ss:$8 sps:$4 sm:$0xff]  }
 0x69a   :  { %13003 = vmatpush1.bf16.msra.mxu1 %v17537_v32  ;;  %v17602_v32 = vld [vmem:[#allocation4 + $0x161c] ss:$52 sps:$4 sm:$0xff]  }
 0x69b   :  { %11255 = vmatpush1.bf16.msra.mxu0 %v17540_v14  ;;  %13004 = vmatprep.subr.bf16.mxu1 %v17545_v9 }
 0x69c   :  { %11256 = vmatprep.subr.bf16.mxu0 %v17548_v35  ;;  %v17597_v35 = vld [vmem:[#allocation7 + $0x1c0] ss:$8 sps:$4 sm:$0xff]  }
 0x69e   :  { %13005 = vmatpush1.bf16.msra.mxu1 %v17543_v38 }
 0x69f   :  { %11257 = vmatpush1.bf16.msra.mxu0 %v17546_v40  ;;  %13006 = vmatprep.subr.bf16.mxu1 %v17551_v41  ;;  %v17600_v40 = vld [vmem:[#allocation4 + $0x1618] ss:$52 sps:$4 sm:$0xff]  }
 0x6a0   :  { %11258 = vmatprep.subr.bf16.mxu0 %v17554_v44  ;;  %v17605_v41 = vld [vmem:[#allocation7 + $0x1d4] ss:$8 sps:$4 sm:$0xff]  }
 0x6a2   :  { %13007 = vmatpush1.bf16.msra.mxu1 %v17549_v48  ;;  %v17608_v48 = vld [vmem:[#allocation4 + $0x1684] ss:$52 sps:$4 sm:$0xff]  }
 0x6a3   :  { %11259 = vmatpush1.bf16.msra.mxu0 %v17552_v36  ;;  %13008 = vmatprep.subr.bf16.mxu1 %v17557_v49  ;;  %v17603_v36 = vld [vmem:[#allocation7 + $0x1d0] ss:$8 sps:$4 sm:$0xff]   ;;  %v3187_v49 = vrot.slane %v19227_v57, %v19035_v37 }
 0x6a4   :  { %11260 = vmatprep.subr.bf16.mxu0 %v17560_v50  ;;  %v17606_v50 = vld [vmem:[#allocation4 + $0x1680] ss:$52 sps:$4 sm:$0xff]  }
 0x6a6   :  { %13009 = vmatpush1.bf16.msra.mxu1 %v17555_v52  ;;  %v17611_v52 = vld [vmem:[#allocation7 + $0x1e4] ss:$8 sps:$4 sm:$0xff]  }
 0x6a7   :  { %11261 = vmatpush1.bf16.msra.mxu0 %v17558_v53  ;;  %13010 = vmatprep.subr.bf16.mxu1 %v17563_v56  ;;  %v3199_v53 = vrot.slane %v19227_v57, %v389_v33  ;;  %v17614_v56 = vld [vmem:[#allocation4 + $0x16ec] ss:$52 sps:$4 sm:$0xff]   ;;  %v17618_v33 = vld [vmem:[#allocation4 + $0x1750] ss:$52 sps:$4 sm:$0xff]  }
 0x6a8   :  { %11271 = vmatprep.subr.bf16.mxu0 %v17566_v34  ;;  %v17609_v34 = vld [vmem:[#allocation7 + $0x1e0] ss:$8 sps:$4 sm:$0xff]  }
 0x6aa   :  { %11263 = vmatmul.mubr.bf16.vlgmr.msra.gmra.mrb[36].mxu0 %v19080_v54  ;;  %13011 = vmatpush1.bf16.msra.mxu1 %v17561_v23  ;;  %v17579_v54 = vld [vmem:[#allocation7 + $0x190] ss:$8 sps:$4 sm:$0xff]   ;;  %v15350_v23 = vadd.f32 %v19189_v15, %v3187_v49  ;;  %v17621_v15 = vld [vmem:[#allocation7 + $0x200] ss:$8 sps:$4 sm:$0xff]  }
 0x6ab   :  { %11272 = vmatpush1.bf16.msra.mxu0 %v17564_v61  ;;  %11303 = vmatprep.mubr.bf16.mxu0 %v19105_v62  ;;  %v17612_v61 = vld [vmem:[#allocation4 + $0x16e8] ss:$52 sps:$4 sm:$0xff]   ;;  %v17648_v49 = vld [vmem:[#allocation4 + $0x1958] ss:$52 sps:$4 sm:$0xff]  }
 0x6ac   :  { %13012 = vmatprep.subr.bf16.mxu1 %v17569_v1  ;;  %11273 = vmatprep.subr.bf16.mxu0 %v17572_v2  ;;  %v17617_v1 = vld [vmem:[#allocation7 + $0x1f4] ss:$8 sps:$4 sm:$0xff]   ;;  %v15353_v2 = vadd.f32 %v19197_v42, %v3199_v53  ;;  %v17651_v53 = vld [vmem:[#allocation7 + $0x250] ss:$8 sps:$4 sm:$0xff]  }
 0x6ae   :  { %13013 = vmatpush1.bf16.msra.mxu1 %v17567_v6  ;;  %v17620_v6 = vld [vmem:[#allocation4 + $0x1754] ss:$52 sps:$4 sm:$0xff]  }
 0x6af   :  { %11274 = vmatpush1.bf16.msra.mxu0 %v17570_v7  ;;  %13014 = vmatprep.subr.bf16.mxu1 %v17575_v8  ;;  %v17615_v7 = vld [vmem:[#allocation7 + $0x1f0] ss:$8 sps:$4 sm:$0xff]   ;;  %v11717_v8 = vmax.f32 %v15350_v23, 0.0 }
 0x6b0   :  { %11275 = vmatprep.subr.bf16.mxu0 %v17578_v10  ;;  %v17623_v10 = vld [vmem:[#allocation7 + $0x204] ss:$8 sps:$4 sm:$0xff]  }
 0x6b1   :  { %v17662_v23 = vld [vmem:[#allocation4 + $0x1a2c] ss:$52 sps:$4 sm:$0xff]  }
 0x6b2   :  { %13015 = vmatpush1.bf16.msra.mxu1 %v17573_v11  ;;  %v11720_v11 = vmax.f32 %v15353_v2, 0.0  ;;  %v17665_v2 = vld [vmem:[#allocation7 + $0x274] ss:$8 sps:$4 sm:$0xff]  }
 0x6b3   :  { %11276 = vmatpush1.bf16.msra.mxu0 %v17576_v13  ;;  %13016 = vmatprep.subr.bf16.mxu1 %v17581_v58  ;;  %v17626_v13 = vld [vmem:[#allocation4 + $0x17bc] ss:$52 sps:$4 sm:$0xff]   ;;  %v11730_v58 = vpack.c.bf16 %v11717_v8, %v11717_v8 }
 0x6b4   :  { %11277 = vmatprep.subr.bf16.mxu0 %v17584_v19  ;;  %v17624_v19 = vld [vmem:[#allocation4 + $0x17b8] ss:$52 sps:$4 sm:$0xff]   ;;  %v11733_v42 = vpack.c.bf16 %v11720_v11, %v11720_v11  ;;  %v17666_v8 = vld [vmem:[#allocation4 + $0x1a90] ss:$52 sps:$4 sm:$0xff]  }
 0x6b5   :  { %v17669_v11 = vld [vmem:[#allocation7 + $0x280] ss:$8 sps:$4 sm:$0xff]  }
 0x6b6   :  { %13017 = vmatpush1.bf16.msra.mxu1 %v17579_v54  ;;  %v17629_v54 = vld [vmem:[#allocation7 + $0x214] ss:$8 sps:$4 sm:$0xff]  }
 0x6b7   :  { %11278 = vmatpush1.bf16.msra.mxu0 %v17582_v59  ;;  %13018 = vmatprep.subr.bf16.mxu1 %v17587_v20  ;;  %v17632_v59 = vld [vmem:[#allocation4 + $0x1824] ss:$52 sps:$4 sm:$0xff]  }
 0x6b8   :  { %11279 = vmatprep.subr.bf16.mxu0 %v17590_v21  ;;  %v17627_v20 = vld [vmem:[#allocation7 + $0x210] ss:$8 sps:$4 sm:$0xff]  }
 0x6b9   :  { %v17630_v21 = vld [vmem:[#allocation4 + $0x1820] ss:$52 sps:$4 sm:$0xff]  }
 0x6ba   :  { %13019 = vmatpush1.bf16.msra.mxu1 %v17585_v17  ;;  %v17635_v17 = vld [vmem:[#allocation7 + $0x224] ss:$8 sps:$4 sm:$0xff]  }
 0x6bb   :  { %11280 = vmatpush1.bf16.msra.mxu0 %v17588_v25  ;;  %13020 = vmatprep.subr.bf16.mxu1 %v17593_v27  ;;  %v17638_v25 = vld [vmem:[#allocation4 + $0x188c] ss:$52 sps:$4 sm:$0xff]  }
 0x6bc   :  { %11281 = vmatprep.subr.bf16.mxu0 %v17596_v5  ;;  %v17633_v27 = vld [vmem:[#allocation7 + $0x220] ss:$8 sps:$4 sm:$0xff]  }
 0x6bd   :  { %v19235_v14 = vpop.f32.mrb[32].mxu0  ;;  %v17636_v5 = vld [vmem:[#allocation4 + $0x1888] ss:$52 sps:$4 sm:$0xff]  }
 0x6be   :  { %13021 = vmatpush1.bf16.msra.mxu1 %v17591_v28  ;;  %v19237_v9 = vpop.f32.mrb[33].mxu0  ;;  %v17641_v28 = vld [vmem:[#allocation7 + $0x234] ss:$8 sps:$4 sm:$0xff]  }
 0x6bf   :  { %11282 = vmatpush1.bf16.msra.mxu0 %v17594_v51  ;;  %v10858_v38 = vpop.f32.mrb[34].mxu0  ;;  %13022 = vmatprep.subr.bf16.mxu1 %v17599_v55  ;;  %v17644_v51 = vld [vmem:[#allocation4 + $0x18f4] ss:$52 sps:$4 sm:$0xff]  }
 0x6c0   :  { %v10859_v44 = vpop.f32.mrb[35].mxu0  ;;  %11283 = vmatprep.subr.bf16.mxu0 %v17602_v32  ;;  %v17639_v55 = vld [vmem:[#allocation7 + $0x230] ss:$8 sps:$4 sm:$0xff]  }
 0x6c1   :  { %v17642_v32 = vld [vmem:[#allocation4 + $0x18f0] ss:$52 sps:$4 sm:$0xff]  }
 0x6c2   :  { %13023 = vmatpush1.bf16.msra.mxu1 %v17597_v35  ;;  %v17647_v35 = vld [vmem:[#allocation7 + $0x244] ss:$8 sps:$4 sm:$0xff]  }
 0x6c3   :  { %11284 = vmatpush1.bf16.msra.mxu0 %v17600_v40  ;;  %13024 = vmatprep.subr.bf16.mxu1 %v17605_v41  ;;  %v17650_v40 = vld [vmem:[#allocation4 + $0x195c] ss:$52 sps:$4 sm:$0xff]  }
 0x6c4   :  { %11285 = vmatprep.subr.bf16.mxu0 %v17608_v48  ;;  %v17645_v48 = vld [vmem:[#allocation7 + $0x240] ss:$8 sps:$4 sm:$0xff]  }
 0x6c6   :  { %13025 = vmatpush1.bf16.msra.mxu1 %v17603_v36 }
 0x6c7   :  { %11286 = vmatpush1.bf16.msra.mxu0 %v17606_v50  ;;  %13026 = vmatprep.subr.bf16.mxu1 %v17611_v52  ;;  %v17653_v50 = vld [vmem:[#allocation7 + $0x254] ss:$8 sps:$4 sm:$0xff]  }
 0x6c8   :  { %11287 = vmatprep.subr.bf16.mxu0 %v17614_v56  ;;  %v17656_v52 = vld [vmem:[#allocation4 + $0x19c4] ss:$52 sps:$4 sm:$0xff]   ;;  %v17654_v56 = vld [vmem:[#allocation4 + $0x19c0] ss:$52 sps:$4 sm:$0xff]  }
 0x6ca   :  { %13027 = vmatpush1.bf16.msra.mxu1 %v17609_v34  ;;  %v17659_v34 = vld [vmem:[#allocation7 + $0x264] ss:$8 sps:$4 sm:$0xff]  }
 0x6cb   :  { %11288 = vmatpush1.bf16.msra.mxu0 %v17612_v61  ;;  %13028 = vmatprep.subr.bf16.mxu1 %v17617_v1  ;;  %v17657_v61 = vld [vmem:[#allocation7 + $0x260] ss:$8 sps:$4 sm:$0xff]  }
 0x6cc   :  { %11289 = vmatprep.subr.bf16.mxu0 %v17620_v6  ;;  %v17660_v1 = vld [vmem:[#allocation4 + $0x1a28] ss:$52 sps:$4 sm:$0xff]  }
 0x6cd   :  { %v17668_v6 = vld [vmem:[#allocation4 + $0x1a94] ss:$52 sps:$4 sm:$0xff]  }
 0x6ce   :  { %13029 = vmatpush1.bf16.msra.mxu1 %v17615_v7  ;;  %v17663_v7 = vld [vmem:[#allocation7 + $0x270] ss:$8 sps:$4 sm:$0xff]  }
 0x6cf   :  { %11290 = vmatpush1.bf16.msra.mxu0 %v17618_v33  ;;  %13039 = vmatprep.subr.bf16.mxu1 %v17623_v10  ;;  %v17671_v33 = vld [vmem:[#allocation7 + $0x284] ss:$8 sps:$4 sm:$0xff]   ;;  %v17674_v10 = vld [vmem:[#allocation4 + $0x1afc] ss:$52 sps:$4 sm:$0xff]  }
 0x6d0   :  { %11291 = vmatprep.subr.bf16.mxu0 %v17626_v13  ;;  %v17672_v13 = vld [vmem:[#allocation4 + $0x1af8] ss:$52 sps:$4 sm:$0xff]  }
 0x6d1   :  { %13031 = vmatmul.mubr.bf16.vlgmr.msra.gmra.mrb[28].mxu1 %v11730_v58  ;;  %v17680_v58 = vld [vmem:[#allocation4 + $0x1b64] ss:$52 sps:$4 sm:$0xff]  }
 0x6d2   :  { %13040 = vmatpush1.bf16.msra.mxu1 %v17621_v15  ;;  %13071 = vmatprep.mubr.bf16.mxu1 %v11733_v42  ;;  %v17677_v15 = vld [vmem:[#allocation7 + $0x294] ss:$8 sps:$4 sm:$0xff]   ;;  %v17683_v42 = vld [vmem:[#allocation7 + $0x2a4] ss:$8 sps:$4 sm:$0xff]  }
 0x6d3   :  { %11292 = vmatpush1.bf16.msra.mxu0 %v17624_v19  ;;  %13041 = vmatprep.subr.bf16.mxu1 %v17629_v54  ;;  %v17675_v19 = vld [vmem:[#allocation7 + $0x290] ss:$8 sps:$4 sm:$0xff]  }
 0x6d4   :  { %11293 = vmatprep.subr.bf16.mxu0 %v17632_v59  ;;  %v17678_v54 = vld [vmem:[#allocation4 + $0x1b60] ss:$52 sps:$4 sm:$0xff]  }
 0x6d5   :  { %v17681_v59 = vld [vmem:[#allocation7 + $0x2a0] ss:$8 sps:$4 sm:$0xff]  }
 0x6d6   :  { %13042 = vmatpush1.bf16.msra.mxu1 %v17627_v20  ;;  %v17684_v20 = vld [vmem:[#allocation4 + $0x1bc8] ss:$52 sps:$4 sm:$0xff]  }
 0x6d7   :  { %11294 = vmatpush1.bf16.msra.mxu0 %v17630_v21  ;;  %13043 = vmatprep.subr.bf16.mxu1 %v17635_v17  ;;  %v17689_v21 = vld [vmem:[#allocation7 + $0x2b4] ss:$8 sps:$4 sm:$0xff]  }
 0x6d8   :  { %11295 = vmatprep.subr.bf16.mxu0 %v17638_v25  ;;  %v17692_v17 = vld [vmem:[#allocation4 + $0x1c34] ss:$52 sps:$4 sm:$0xff]  }
 0x6d9   :  { %v17687_v25 = vld [vmem:[#allocation7 + $0x2b0] ss:$8 sps:$4 sm:$0xff]  }
 0x6da   :  { %13044 = vmatpush1.bf16.msra.mxu1 %v17633_v27  ;;  %v17690_v27 = vld [vmem:[#allocation4 + $0x1c30] ss:$52 sps:$4 sm:$0xff]  }
 0x6db   :  { %11296 = vmatpush1.bf16.msra.mxu0 %v17636_v5  ;;  %13045 = vmatprep.subr.bf16.mxu1 %v17641_v28  ;;  %v17695_v5 = vld [vmem:[#allocation7 + $0x2c4] ss:$8 sps:$4 sm:$0xff]  }
 0x6dc   :  { %v19246_v38 = vpop.f32.mrb[12].mxu1  ;;  %11297 = vmatprep.subr.bf16.mxu0 %v17644_v51  ;;  %v17698_v51 = vld [vmem:[#allocation4 + $0x1c9c] ss:$52 sps:$4 sm:$0xff]  }
 0x6dd   :  { %v19248_v41 = vpop.f32.mrb[13].mxu1 }
 0x6de   :  { %13046 = vmatpush1.bf16.msra.mxu1 %v17639_v55  ;;  %v11145_v44 = vpop.f32.mrb[14].mxu1 }
 0x6df   :  { %11298 = vmatpush1.bf16.msra.mxu0 %v17642_v32  ;;  %v11146_v36 = vpop.f32.mrb[15].mxu1  ;;  %13047 = vmatprep.subr.bf16.mxu1 %v17647_v35 }
 0x6e0   :  { %11299 = vmatprep.subr.bf16.mxu0 %v17650_v40  ;;  %v17693_v40 = vld [vmem:[#allocation7 + $0x2c0] ss:$8 sps:$4 sm:$0xff]   ;;  %v17701_v36 = vld [vmem:[#allocation7 + $0x2d4] ss:$8 sps:$4 sm:$0xff]  }
 0x6e2   :  { %13048 = vmatpush1.bf16.msra.mxu1 %v17645_v48  ;;  %v17696_v48 = vld [vmem:[#allocation4 + $0x1c98] ss:$52 sps:$4 sm:$0xff]  }
 0x6e3   :  { %11300 = vmatpush1.bf16.msra.mxu0 %v17648_v49  ;;  %13049 = vmatprep.subr.bf16.mxu1 %v17653_v50  ;;  %v17704_v49 = vld [vmem:[#allocation4 + $0x1d04] ss:$52 sps:$4 sm:$0xff]  }
 0x6e4   :  { %11301 = vmatprep.subr.bf16.mxu0 %v17656_v52  ;;  %v17699_v50 = vld [vmem:[#allocation7 + $0x2d0] ss:$8 sps:$4 sm:$0xff]   ;;  %v3195_v52 = vrot.slane %v19227_v57, %v19070_v30 }
 0x6e6   :  { %13050 = vmatpush1.bf16.msra.mxu1 %v17651_v53  ;;  %v17702_v53 = vld [vmem:[#allocation4 + $0x1d00] ss:$52 sps:$4 sm:$0xff]  }
 0x6e7   :  { %11302 = vmatpush1.bf16.msra.mxu0 %v17654_v56  ;;  %13051 = vmatprep.subr.bf16.mxu1 %v17659_v34  ;;  %v17707_v56 = vld [vmem:[#allocation7 + $0x2e4] ss:$8 sps:$4 sm:$0xff]   ;;  %v3207_v34 = vrot.slane %v19227_v57, %v397_v31 }
 0x6e8   :  { %11312 = vmatprep.subr.bf16.mxu0 %v17662_v23  ;;  %v17710_v23 = vld [vmem:[#allocation4 + $0x1d6c] ss:$52 sps:$4 sm:$0xff]   ;;  %v17714_v31 = vld [vmem:[#allocation4 + $0x1dd0] ss:$52 sps:$4 sm:$0xff]  }
 0x6ea   :  { %11304 = vmatmul.mubr.bf16.vlgmr.msra.gmra.mrb[36].mxu0 %v19103_v60  ;;  %13052 = vmatpush1.bf16.msra.mxu1 %v17657_v61  ;;  %v17705_v61 = vld [vmem:[#allocation7 + $0x2e0] ss:$8 sps:$4 sm:$0xff]  }
 0x6eb   :  { %11313 = vmatpush1.bf16.msra.mxu0 %v17660_v1  ;;  %11344 = vmatprep.mubr.bf16.mxu0 %v19118_v4  ;;  %v17686_v4 = vld [vmem:[#allocation4 + $0x1bcc] ss:$52 sps:$4 sm:$0xff]   ;;  %v15352_v1 = vadd.f32 %v19195_v12, %v3195_v52 }
 0x6ec   :  { %13053 = vmatprep.subr.bf16.mxu1 %v17665_v2  ;;  %11314 = vmatprep.subr.bf16.mxu0 %v17668_v6  ;;  %v17708_v2 = vld [vmem:[#allocation4 + $0x1d68] ss:$52 sps:$4 sm:$0xff]   ;;  %v17744_v52 = vld [vmem:[#allocation4 + $0x1fd8] ss:$52 sps:$4 sm:$0xff]  }
 0x6ed   :  { %v17713_v6 = vld [vmem:[#allocation7 + $0x2f4] ss:$8 sps:$4 sm:$0xff]   ;;  %v17717_v12 = vld [vmem:[#allocation7 + $0x300] ss:$8 sps:$4 sm:$0xff]  }
 0x6ee   :  { %13054 = vmatpush1.bf16.msra.mxu1 %v17663_v7  ;;  %v15355_v7 = vadd.f32 %v19237_v9, %v3207_v34  ;;  %v17747_v34 = vld [vmem:[#allocation7 + $0x350] ss:$8 sps:$4 sm:$0xff]  }
 0x6ef   :  { %11315 = vmatpush1.bf16.msra.mxu0 %v17666_v8  ;;  %13055 = vmatprep.subr.bf16.mxu1 %v17671_v33  ;;  %v17716_v8 = vld [vmem:[#allocation4 + $0x1dd4] ss:$52 sps:$4 sm:$0xff]  }
 0x6f0   :  { %11316 = vmatprep.subr.bf16.mxu0 %v17674_v10  ;;  %v17711_v33 = vld [vmem:[#allocation7 + $0x2f0] ss:$8 sps:$4 sm:$0xff]   ;;  %v11719_v10 = vmax.f32 %v15352_v1, 0.0 }
 0x6f2   :  { %13056 = vmatpush1.bf16.msra.mxu1 %v17669_v11  ;;  %v17719_v11 = vld [vmem:[#allocation7 + $0x304] ss:$8 sps:$4 sm:$0xff]  }
 0x6f3   :  { %11317 = vmatpush1.bf16.msra.mxu0 %v17672_v13  ;;  %13057 = vmatprep.subr.bf16.mxu1 %v17677_v15  ;;  %v11722_v13 = vmax.f32 %v15355_v7, 0.0  ;;  %v17722_v15 = vld [vmem:[#allocation4 + $0x1e3c] ss:$52 sps:$4 sm:$0xff]  }
 0x6f4   :  { %11318 = vmatprep.subr.bf16.mxu0 %v17680_v58  ;;  %v11732_v58 = vpack.c.bf16 %v11719_v10, %v11719_v10  ;;  %v17756_v10 = vld [vmem:[#allocation4 + $0x20a8] ss:$52 sps:$4 sm:$0xff]  }
 0x6f5   :  { %v11735_v9 = vpack.c.bf16 %v11722_v13, %v11722_v13  ;;  %v17759_v13 = vld [vmem:[#allocation7 + $0x370] ss:$8 sps:$4 sm:$0xff]  }
 0x6f6   :  { %13058 = vmatpush1.bf16.msra.mxu1 %v17675_v19  ;;  %v17720_v19 = vld [vmem:[#allocation4 + $0x1e38] ss:$52 sps:$4 sm:$0xff]  }
 0x6f7   :  { %11319 = vmatpush1.bf16.msra.mxu0 %v17678_v54  ;;  %13059 = vmatprep.subr.bf16.mxu1 %v17683_v42  ;;  %v17725_v54 = vld [vmem:[#allocation7 + $0x314] ss:$8 sps:$4 sm:$0xff]  }
 0x6f8   :  { %11320 = vmatprep.subr.bf16.mxu0 %v17686_v4  ;;  %v17728_v42 = vld [vmem:[#allocation4 + $0x1ea4] ss:$52 sps:$4 sm:$0xff]  }
 0x6f9   :  { %v17723_v4 = vld [vmem:[#allocation7 + $0x310] ss:$8 sps:$4 sm:$0xff]  }
 0x6fa   :  { %13060 = vmatpush1.bf16.msra.mxu1 %v17681_v59  ;;  %v17726_v59 = vld [vmem:[#allocation4 + $0x1ea0] ss:$52 sps:$4 sm:$0xff]  }
 0x6fb   :  { %11321 = vmatpush1.bf16.msra.mxu0 %v17684_v20  ;;  %13061 = vmatprep.subr.bf16.mxu1 %v17689_v21  ;;  %v17731_v20 = vld [vmem:[#allocation7 + $0x324] ss:$8 sps:$4 sm:$0xff]  }
 0x6fc   :  { %v15241_v28 = vpop.f32.mrb[16].mxu1  ;;  %11322 = vmatprep.subr.bf16.mxu0 %v17692_v17  ;;  %v17734_v21 = vld [vmem:[#allocation4 + $0x1f0c] ss:$52 sps:$4 sm:$0xff]  }
 0x6fd   :  { %v15242_v55 = vpop.f32.mrb[17].mxu1  ;;  %v17729_v17 = vld [vmem:[#allocation7 + $0x320] ss:$8 sps:$4 sm:$0xff]  }
 0x6fe   :  { %v19252_v32 = vadd.f32 %v15242_v55, %v15241_v28  ;;  %v15244_v35 = vpop.f32.mrb[18].mxu1  ;;  %13062 = vmatpush1.bf16.msra.mxu1 %v17687_v25  ;;  %v17732_v25 = vld [vmem:[#allocation4 + $0x1f08] ss:$52 sps:$4 sm:$0xff]   ;;  %v17735_v28 = vld [vmem:[#allocation7 + $0x330] ss:$8 sps:$4 sm:$0xff]  }
 0x6ff   :  { %11323 = vmatpush1.bf16.msra.mxu0 %v17690_v27  ;;  %v15245_v44 = vpop.f32.mrb[19].mxu1  ;;  %13063 = vmatprep.subr.bf16.mxu1 %v17695_v5  ;;  %v17737_v27 = vld [vmem:[#allocation7 + $0x334] ss:$8 sps:$4 sm:$0xff]   ;;  %v17743_v55 = vld [vmem:[#allocation7 + $0x344] ss:$8 sps:$4 sm:$0xff]  }
 0x700   :  { %11324 = vmatprep.subr.bf16.mxu0 %v17698_v51  ;;  %v17740_v5 = vld [vmem:[#allocation4 + $0x1f74] ss:$52 sps:$4 sm:$0xff]   ;;  %v17738_v51 = vld [vmem:[#allocation4 + $0x1f70] ss:$52 sps:$4 sm:$0xff]  }
 0x702   :  { %13064 = vmatpush1.bf16.msra.mxu1 %v17693_v40  ;;  %v17746_v40 = vld [vmem:[#allocation4 + $0x1fdc] ss:$52 sps:$4 sm:$0xff]  }
 0x703   :  { %11325 = vmatpush1.bf16.msra.mxu0 %v17696_v48  ;;  %13065 = vmatprep.subr.bf16.mxu1 %v17701_v36 }
 0x704   :  { %11326 = vmatprep.subr.bf16.mxu0 %v17704_v49  ;;  %v17741_v49 = vld [vmem:[#allocation7 + $0x340] ss:$8 sps:$4 sm:$0xff]  }
 0x706   :  { %13066 = vmatpush1.bf16.msra.mxu1 %v17699_v50 }
 0x707   :  { %11327 = vmatpush1.bf16.msra.mxu0 %v17702_v53  ;;  %13067 = vmatprep.subr.bf16.mxu1 %v17707_v56  ;;  %v17749_v53 = vld [vmem:[#allocation7 + $0x354] ss:$8 sps:$4 sm:$0xff]  }
 0x708   :  { %11328 = vmatprep.subr.bf16.mxu0 %v17710_v23  ;;  %v17752_v56 = vld [vmem:[#allocation4 + $0x2044] ss:$52 sps:$4 sm:$0xff]   ;;  %v17750_v23 = vld [vmem:[#allocation4 + $0x2040] ss:$52 sps:$4 sm:$0xff]  }
 0x70a   :  { %13068 = vmatpush1.bf16.msra.mxu1 %v17705_v61  ;;  %v17755_v61 = vld [vmem:[#allocation7 + $0x364] ss:$8 sps:$4 sm:$0xff]  }
 0x70b   :  { %11329 = vmatpush1.bf16.msra.mxu0 %v17708_v2  ;;  %13069 = vmatprep.subr.bf16.mxu1 %v17713_v6  ;;  %v17758_v2 = vld [vmem:[#allocation4 + $0x20ac] ss:$52 sps:$4 sm:$0xff]  }
 0x70c   :  { %11330 = vmatprep.subr.bf16.mxu0 %v17716_v8  ;;  %v17753_v8 = vld [vmem:[#allocation7 + $0x360] ss:$8 sps:$4 sm:$0xff]  }
 0x70e   :  { %13070 = vmatpush1.bf16.msra.mxu1 %v17711_v33 }
 0x70f   :  { %11331 = vmatpush1.bf16.msra.mxu0 %v17714_v31  ;;  %13080 = vmatprep.subr.bf16.mxu1 %v17719_v11  ;;  %v17761_v31 = vld [vmem:[#allocation7 + $0x374] ss:$8 sps:$4 sm:$0xff]  }
 0x710   :  { %11332 = vmatprep.subr.bf16.mxu0 %v17722_v15  ;;  %v17764_v11 = vld [vmem:[#allocation4 + $0x2114] ss:$52 sps:$4 sm:$0xff]   ;;  %v17762_v15 = vld [vmem:[#allocation4 + $0x2110] ss:$52 sps:$4 sm:$0xff]  }
 0x711   :  { %13072 = vmatmul.mubr.bf16.vlgmr.msra.gmra.mrb[28].mxu1 %v11732_v58  ;;  %v17770_v58 = vld [vmem:[#allocation4 + $0x217c] ss:$52 sps:$4 sm:$0xff]  }
 0x712   :  { %13081 = vmatpush1.bf16.msra.mxu1 %v17717_v12  ;;  %13112 = vmatprep.mubr.bf16.mxu1 %v11735_v9  ;;  %v17767_v12 = vld [vmem:[#allocation7 + $0x384] ss:$8 sps:$4 sm:$0xff]   ;;  %v17773_v9 = vld [vmem:[#allocation7 + $0x394] ss:$8 sps:$4 sm:$0xff]  }
 0x713   :  { %11333 = vmatpush1.bf16.msra.mxu0 %v17720_v19  ;;  %13082 = vmatprep.subr.bf16.mxu1 %v17725_v54  ;;  %v17765_v19 = vld [vmem:[#allocation7 + $0x380] ss:$8 sps:$4 sm:$0xff]   ;;  %v17768_v54 = vld [vmem:[#allocation4 + $0x2178] ss:$52 sps:$4 sm:$0xff]  }
 0x714   :  { %11334 = vmatprep.subr.bf16.mxu0 %v17728_v42  ;;  %v17776_v42 = vld [vmem:[#allocation4 + $0x21e4] ss:$52 sps:$4 sm:$0xff]  }
 0x716   :  { %13083 = vmatpush1.bf16.msra.mxu1 %v17723_v4  ;;  %v17774_v4 = vld [vmem:[#allocation4 + $0x21e0] ss:$52 sps:$4 sm:$0xff]  }
 0x717   :  { %11335 = vmatpush1.bf16.msra.mxu0 %v17726_v59  ;;  %13084 = vmatprep.subr.bf16.mxu1 %v17731_v20  ;;  %v17779_v59 = vld [vmem:[#allocation7 + $0x3a4] ss:$8 sps:$4 sm:$0xff]  }
 0x718   :  { %11336 = vmatprep.subr.bf16.mxu0 %v17734_v21  ;;  %v17782_v20 = vld [vmem:[#allocation4 + $0x224c] ss:$52 sps:$4 sm:$0xff]  }
 0x719   :  { %v17777_v21 = vld [vmem:[#allocation7 + $0x3a0] ss:$8 sps:$4 sm:$0xff]  }
 0x71a   :  { %13085 = vmatpush1.bf16.msra.mxu1 %v17729_v17  ;;  %v17780_v17 = vld [vmem:[#allocation4 + $0x2248] ss:$52 sps:$4 sm:$0xff]  }
 0x71b   :  { %11337 = vmatpush1.bf16.msra.mxu0 %v17732_v25  ;;  %13086 = vmatprep.subr.bf16.mxu1 %v17737_v27  ;;  %v17785_v25 = vld [vmem:[#allocation7 + $0x3b4] ss:$8 sps:$4 sm:$0xff]  }
 0x71c   :  { %v15285_v35 = vpop.f32.mrb[20].mxu1  ;;  %11338 = vmatprep.subr.bf16.mxu0 %v17740_v5  ;;  %v17788_v27 = vld [vmem:[#allocation4 + $0x22b4] ss:$52 sps:$4 sm:$0xff]  }
 0x71d   :  { %v15286_v44 = vpop.f32.mrb[21].mxu1  ;;  %v17783_v5 = vld [vmem:[#allocation7 + $0x3b0] ss:$8 sps:$4 sm:$0xff]  }
 0x71e   :  { %v19261_v48 = vadd.f32 %v15286_v44, %v15285_v35  ;;  %v15288_v36 = vpop.f32.mrb[22].mxu1  ;;  %13087 = vmatpush1.bf16.msra.mxu1 %v17735_v28  ;;  %v17786_v28 = vld [vmem:[#allocation4 + $0x22b0] ss:$52 sps:$4 sm:$0xff]  }
 0x71f   :  { %11339 = vmatpush1.bf16.msra.mxu0 %v17738_v51  ;;  %v15289_v50 = vpop.f32.mrb[23].mxu1  ;;  %13088 = vmatprep.subr.bf16.mxu1 %v17743_v55  ;;  %v17791_v51 = vld [vmem:[#allocation7 + $0x3c4] ss:$8 sps:$4 sm:$0xff]   ;;  %v17794_v55 = vld [vmem:[#allocation4 + $0x231c] ss:$52 sps:$4 sm:$0xff]  }
 0x720   :  { %11340 = vmatprep.subr.bf16.mxu0 %v17746_v40  ;;  %v17789_v35 = vld [vmem:[#allocation7 + $0x3c0] ss:$8 sps:$4 sm:$0xff]   ;;  %v17792_v40 = vld [vmem:[#allocation4 + $0x2318] ss:$52 sps:$4 sm:$0xff]  }
 0x721   :  { %v17797_v44 = vld [vmem:[#allocation7 + $0x3d4] ss:$8 sps:$4 sm:$0xff]   ;;  %v17795_v50 = vld [vmem:[#allocation7 + $0x3d0] ss:$8 sps:$4 sm:$0xff]  }
 0x722   :  { %13089 = vmatpush1.bf16.msra.mxu1 %v17741_v49  ;;  %v17800_v36 = vld [vmem:[#allocation4 + $0x2384] ss:$52 sps:$4 sm:$0xff]  }
 0x723   :  { %11341 = vmatpush1.bf16.msra.mxu0 %v17744_v52  ;;  %13090 = vmatprep.subr.bf16.mxu1 %v17749_v53  ;;  %v19267_v49 = vld [vmem:[#allocation6 + $0x8] sm:$0x1f]  ;;  %v3203_v52 = vrot.slane %v19227_v57, %v393_v29  ;;  %v17798_v53 = vld [vmem:[#allocation4 + $0x2380] ss:$52 sps:$4 sm:$0xff]  }
 0x724   :  { %v19263_v1 = vpop.f32.mrb[24].mxu1  ;;  %11342 = vmatprep.subr.bf16.mxu0 %v17752_v56  ;;  %v17803_v56 = vld [vmem:[#allocation7 + $0x3e4] ss:$8 sps:$4 sm:$0xff]   ;;  %v17807_v57 = vld [vmem:[#allocation7 + $0x3f0] ss:$8 sps:$4 sm:$0xff]  }
 0x725   :  { %v15344_v6 = vpop.f32.mrb[25].mxu1  ;;  %v17812_v29 = vld [vmem:[#allocation4 + $0x2454] ss:$52 sps:$4 sm:$0xff]  }
 0x726   :  { %v11712_v7 = vpop.f32.mrb[26].mxu1  ;;  %13091 = vmatpush1.bf16.msra.mxu1 %v17747_v34  ;;  %v3215_v34 = vrot.slane %v19267_v49, %v18924_v24  ;;  %v17804_v6 = vld [vmem:[#allocation4 + $0x23e8] ss:$52 sps:$4 sm:$0xff]  }
 0x727   :  { %11343 = vmatpush1.bf16.msra.mxu0 %v17750_v23  ;;  %v15345_v33 = vpop.f32.mrb[27].mxu1  ;;  %13092 = vmatprep.subr.bf16.mxu1 %v17755_v61  ;;  %v17806_v23 = vld [vmem:[#allocation4 + $0x23ec] ss:$52 sps:$4 sm:$0xff]   ;;  %v17809_v7 = vld [vmem:[#allocation7 + $0x3f4] ss:$8 sps:$4 sm:$0xff]  }
 0x728   :  { %11353 = vmatprep.subr.bf16.mxu0 %v17758_v2  ;;  %v17801_v61 = vld [vmem:[#allocation7 + $0x3e0] ss:$8 sps:$4 sm:$0xff]   ;;  %v15354_v2 = vadd.f32 %v19235_v14, %v3203_v52  ;;  %v15357_v18 = vadd.f32 %v19248_v41, %v3215_v34  ;;  %v17855_v34 = vld [vmem:[#allocation7 + $0x470] ss:$8 sps:$4 sm:$0xff]  }
 0x729   :  { %v17810_v33 = vld [vmem:[#allocation4 + $0x2450] ss:$52 sps:$4 sm:$0xff]   ;;  %v17852_v52 = vld [vmem:[#allocation4 + $0x2728] ss:$52 sps:$4 sm:$0xff]  }
 0x72a   :  { %11345 = vmatmul.mubr.bf16.vlgmr.msra.gmra.mrb[36].mxu0 %v19116_v3  ;;  %13093 = vmatpush1.bf16.msra.mxu1 %v17753_v8  ;;  %v17771_v3 = vld [vmem:[#allocation7 + $0x390] ss:$8 sps:$4 sm:$0xff]   ;;  %v11721_v8 = vmax.f32 %v15354_v2, 0.0  ;;  %v17813_v14 = vld [vmem:[#allocation7 + $0x400] ss:$8 sps:$4 sm:$0xff]  }
 0x72b   :  { %11354 = vmatpush1.bf16.msra.mxu0 %v17756_v10  ;;  %11385 = vmatprep.mubr.bf16.mxu0 %v19120_v47  ;;  %v17815_v10 = vld [vmem:[#allocation7 + $0x404] ss:$8 sps:$4 sm:$0xff]  }
 0x72c   :  { %13094 = vmatprep.subr.bf16.mxu1 %v17761_v31  ;;  %11355 = vmatprep.subr.bf16.mxu0 %v17764_v11  ;;  %v11724_v31 = vmax.f32 %v15357_v18, 0.0  ;;  %v17818_v11 = vld [vmem:[#allocation4 + $0x24bc] ss:$52 sps:$4 sm:$0xff]  }
 0x72d   :  { %v17864_v2 = vld [vmem:[#allocation4 + $0x370] ss:$52 sps:$4 sm:$0xff]  }
 0x72e   :  { %13095 = vmatpush1.bf16.msra.mxu1 %v17759_v13  ;;  %v11734_v13 = vpack.c.bf16 %v11721_v8, %v11721_v8  ;;  %v11737_v41 = vpack.c.bf16 %v11724_v31, %v11724_v31  ;;  %v17865_v18 = vld [vmem:[#allocation7 + $0x490] ss:$8 sps:$4 sm:$0xff]   ;;  %v17872_v8 = vld [vmem:[#allocation7 + $0x4a4] ss:$8 sps:$4 sm:$0xff]   ;;  %v17877_v31 = vld [vmem:[#allocation7 + $0x4b4] ss:$8 sps:$4 sm:$0xff]  }
 0x72f   :  { %11356 = vmatpush1.bf16.msra.mxu0 %v17762_v15  ;;  %13096 = vmatprep.subr.bf16.mxu1 %v17767_v12  ;;  %v17816_v15 = vld [vmem:[#allocation4 + $0x24b8] ss:$52 sps:$4 sm:$0xff]  }
 0x730   :  { %11357 = vmatprep.subr.bf16.mxu0 %v17770_v58  ;;  %v17821_v12 = vld [vmem:[#allocation7 + $0x414] ss:$8 sps:$4 sm:$0xff]  }
 0x731   :  { %v17824_v58 = vld [vmem:[#allocation4 + $0x2524] ss:$52 sps:$4 sm:$0xff]  }
 0x732   :  { %13097 = vmatpush1.bf16.msra.mxu1 %v17765_v19  ;;  %v17819_v19 = vld [vmem:[#allocation7 + $0x410] ss:$8 sps:$4 sm:$0xff]  }
 0x733   :  { %11358 = vmatpush1.bf16.msra.mxu0 %v17768_v54  ;;  %13098 = vmatprep.subr.bf16.mxu1 %v17773_v9  ;;  %v17822_v54 = vld [vmem:[#allocation4 + $0x2520] ss:$52 sps:$4 sm:$0xff]  }
 0x734   :  { %11359 = vmatprep.subr.bf16.mxu0 %v17776_v42  ;;  %v17827_v9 = vld [vmem:[#allocation7 + $0x424] ss:$8 sps:$4 sm:$0xff]  }
 0x735   :  { %v17830_v42 = vld [vmem:[#allocation4 + $0x258c] ss:$52 sps:$4 sm:$0xff]  }
 0x736   :  { %13099 = vmatpush1.bf16.msra.mxu1 %v17771_v3  ;;  %v17825_v3 = vld [vmem:[#allocation7 + $0x420] ss:$8 sps:$4 sm:$0xff]  }
 0x737   :  { %11360 = vmatpush1.bf16.msra.mxu0 %v17774_v4  ;;  %13100 = vmatprep.subr.bf16.mxu1 %v17779_v59  ;;  %v17828_v4 = vld [vmem:[#allocation4 + $0x2588] ss:$52 sps:$4 sm:$0xff]  }
 0x738   :  { %11361 = vmatprep.subr.bf16.mxu0 %v17782_v20  ;;  %v17833_v59 = vld [vmem:[#allocation7 + $0x434] ss:$8 sps:$4 sm:$0xff]  }
 0x739   :  { %v17836_v20 = vld [vmem:[#allocation4 + $0x25f4] ss:$52 sps:$4 sm:$0xff]  }
 0x73a   :  { %13101 = vmatpush1.bf16.msra.mxu1 %v17777_v21  ;;  %v17831_v21 = vld [vmem:[#allocation7 + $0x430] ss:$8 sps:$4 sm:$0xff]  }
 0x73b   :  { %11362 = vmatpush1.bf16.msra.mxu0 %v17780_v17  ;;  %13102 = vmatprep.subr.bf16.mxu1 %v17785_v25  ;;  %v17834_v17 = vld [vmem:[#allocation4 + $0x25f0] ss:$52 sps:$4 sm:$0xff]  }
 0x73c   :  { %11363 = vmatprep.subr.bf16.mxu0 %v17788_v27  ;;  %v17839_v25 = vld [vmem:[#allocation7 + $0x444] ss:$8 sps:$4 sm:$0xff]   ;;  %v17842_v27 = vld [vmem:[#allocation4 + $0x265c] ss:$52 sps:$4 sm:$0xff]  }
 0x73e   :  { %13103 = vmatpush1.bf16.msra.mxu1 %v17783_v5  ;;  %v17837_v5 = vld [vmem:[#allocation7 + $0x440] ss:$8 sps:$4 sm:$0xff]  }
 0x73f   :  { %11364 = vmatpush1.bf16.msra.mxu0 %v17786_v28  ;;  %13104 = vmatprep.subr.bf16.mxu1 %v17791_v51  ;;  %v17840_v28 = vld [vmem:[#allocation4 + $0x2658] ss:$52 sps:$4 sm:$0xff]  }
 0x740   :  { %11365 = vmatprep.subr.bf16.mxu0 %v17794_v55  ;;  %v17845_v51 = vld [vmem:[#allocation7 + $0x454] ss:$8 sps:$4 sm:$0xff]  }
 0x741   :  { %v17848_v55 = vld [vmem:[#allocation4 + $0x26c4] ss:$52 sps:$4 sm:$0xff]  }
 0x742   :  { %13105 = vmatpush1.bf16.msra.mxu1 %v17789_v35  ;;  %v17843_v35 = vld [vmem:[#allocation7 + $0x450] ss:$8 sps:$4 sm:$0xff]  }
 0x743   :  { %11366 = vmatpush1.bf16.msra.mxu0 %v17792_v40  ;;  %13106 = vmatprep.subr.bf16.mxu1 %v17797_v44  ;;  %v17846_v40 = vld [vmem:[#allocation4 + $0x26c0] ss:$52 sps:$4 sm:$0xff]  }
 0x744   :  { %11367 = vmatprep.subr.bf16.mxu0 %v17800_v36  ;;  %v17851_v44 = vld [vmem:[#allocation7 + $0x464] ss:$8 sps:$4 sm:$0xff]  }
 0x745   :  { %v17854_v36 = vld [vmem:[#allocation4 + $0x272c] ss:$52 sps:$4 sm:$0xff]  }
 0x746   :  { %13107 = vmatpush1.bf16.msra.mxu1 %v17795_v50  ;;  %v17849_v50 = vld [vmem:[#allocation7 + $0x460] ss:$8 sps:$4 sm:$0xff]  }
 0x747   :  { %11368 = vmatpush1.bf16.msra.mxu0 %v17798_v53  ;;  %13108 = vmatprep.subr.bf16.mxu1 %v17803_v56  ;;  %v17857_v53 = vld [vmem:[#allocation7 + $0x474] ss:$8 sps:$4 sm:$0xff]  }
 0x748   :  { %11369 = vmatprep.subr.bf16.mxu0 %v17806_v23  ;;  %v17860_v56 = vld [vmem:[#allocation4 + $0x2794] ss:$52 sps:$4 sm:$0xff]   ;;  %v17858_v23 = vld [vmem:[#allocation4 + $0x2790] ss:$52 sps:$4 sm:$0xff]  }
 0x74a   :  { %13109 = vmatpush1.bf16.msra.mxu1 %v17801_v61  ;;  %v17863_v61 = vld [vmem:[#allocation7 + $0x484] ss:$8 sps:$4 sm:$0xff]  }
 0x74b   :  { %11370 = vmatpush1.bf16.msra.mxu0 %v17804_v6  ;;  %13110 = vmatprep.subr.bf16.mxu1 %v17809_v7  ;;  %v17861_v6 = vld [vmem:[#allocation7 + $0x480] ss:$8 sps:$4 sm:$0xff]   ;;  %v17867_v7 = vld [vmem:[#allocation7 + $0x494] ss:$8 sps:$4 sm:$0xff]  }
 0x74c   :  { %11371 = vmatprep.subr.bf16.mxu0 %v17812_v29  ;;  %v17868_v29 = vld [vmem:[#allocation4 + $0x30] ss:$52 sps:$4 sm:$0xff]  }
 0x74e   :  { %13111 = vmatpush1.bf16.msra.mxu1 %v17807_v57  ;;  %v17869_v57 = vld [vmem:[#allocation4 + $0x3d8] ss:$52 sps:$4 sm:$0xff]  }
 0x74f   :  { %11372 = vmatpush1.bf16.msra.mxu0 %v17810_v33  ;;  %13121 = vmatprep.subr.bf16.mxu1 %v17815_v10  ;;  %v17870_v33 = vld [vmem:[#allocation7 + $0x4a0] ss:$8 sps:$4 sm:$0xff]   ;;  %v17873_v10 = vld [vmem:[#allocation4 + $0x98] ss:$52 sps:$4 sm:$0xff]  }
 0x750   :  { %11373 = vmatprep.subr.bf16.mxu0 %v17818_v11  ;;  %v17874_v11 = vld [vmem:[#allocation4 + $0x440] ss:$52 sps:$4 sm:$0xff]  }
 0x751   :  { %13113 = vmatmul.mubr.bf16.vlgmr.msra.gmra.mrb[28].mxu1 %v11734_v13  ;;  %v17878_v13 = vld [vmem:[#allocation4 + $0x100] ss:$52 sps:$4 sm:$0xff]  }
 0x752   :  { %13122 = vmatpush1.bf16.msra.mxu1 %v17813_v14  ;;  %13153 = vmatprep.mubr.bf16.mxu1 %v11737_v41  ;;  %v17875_v14 = vld [vmem:[#allocation7 + $0x4b0] ss:$8 sps:$4 sm:$0xff]   ;;  %v17883_v41 = vld [vmem:[#allocation4 + $0x168] ss:$52 sps:$4 sm:$0xff]  }
 0x753   :  { %11374 = vmatpush1.bf16.msra.mxu0 %v17816_v15  ;;  %13123 = vmatprep.subr.bf16.mxu1 %v17821_v12  ;;  %v17882_v15 = vld [vmem:[#allocation7 + $0x4c4] ss:$8 sps:$4 sm:$0xff]  }
 0x754   :  { %11375 = vmatprep.subr.bf16.mxu0 %v17824_v58  ;;  %v17879_v12 = vld [vmem:[#allocation4 + $0x4a8] ss:$52 sps:$4 sm:$0xff]  }
 0x755   :  { %v17887_v58 = vld [vmem:[#allocation7 + $0x4d4] ss:$8 sps:$4 sm:$0xff]  }
 0x756   :  { %13124 = vmatpush1.bf16.msra.mxu1 %v17819_v19  ;;  %v17885_v19 = vld [vmem:[#allocation7 + $0x4d0] ss:$8 sps:$4 sm:$0xff]  }
 0x757   :  { %11376 = vmatpush1.bf16.msra.mxu0 %v17822_v54  ;;  %13125 = vmatprep.subr.bf16.mxu1 %v17827_v9  ;;  %v3211_v54 = vrot.slane %v19267_v49, %v18919_v22  ;;  %v17888_v9 = vld [vmem:[#allocation4 + $0x1d0] ss:$52 sps:$4 sm:$0xff]  }
 0x758   :  { %11377 = vmatprep.subr.bf16.mxu0 %v17830_v42  ;;  %v17892_v42 = vld [vmem:[#allocation7 + $0x4e4] ss:$8 sps:$4 sm:$0xff]  }
 0x75a   :  { %13126 = vmatpush1.bf16.msra.mxu1 %v17825_v3  ;;  %v17889_v3 = vld [vmem:[#allocation4 + $0x578] ss:$52 sps:$4 sm:$0xff]  }
 0x75b   :  { %11378 = vmatpush1.bf16.msra.mxu0 %v17828_v4  ;;  %13127 = vmatprep.subr.bf16.mxu1 %v17833_v59  ;;  %v17890_v4 = vld [vmem:[#allocation7 + $0x4e0] ss:$8 sps:$4 sm:$0xff]   ;;  %v15356_v59 = vadd.f32 %v19246_v38, %v3211_v54  ;;  %v17978_v54 = vld [vmem:[#allocation7 + $0x594] ss:$8 sps:$4 sm:$0xff]  }
 0x75c   :  { %11379 = vmatprep.subr.bf16.mxu0 %v17836_v20  ;;  %v17893_v20 = vld [vmem:[#allocation4 + $0x238] ss:$52 sps:$4 sm:$0xff]   ;;  %v17900_v38 = vld [vmem:[#allocation4 + $0x308] ss:$52 sps:$4 sm:$0xff]  }
 0x75e   :  { %13128 = vmatpush1.bf16.msra.mxu1 %v17831_v21  ;;  %v17897_v21 = vld [vmem:[#allocation7 + $0x4f4] ss:$8 sps:$4 sm:$0xff]  }
 0x75f   :  { %11380 = vmatpush1.bf16.msra.mxu0 %v17834_v17  ;;  %13129 = vmatprep.subr.bf16.mxu1 %v17839_v25  ;;  %v17894_v17 = vld [vmem:[#allocation4 + $0x5e0] ss:$52 sps:$4 sm:$0xff]  }
 0x760   :  { %11381 = vmatprep.subr.bf16.mxu0 %v17842_v27  ;;  %v17895_v25 = vld [vmem:[#allocation7 + $0x4f0] ss:$8 sps:$4 sm:$0xff]   ;;  %v11723_v27 = vmax.f32 %v15356_v59, 0.0  ;;  %v17981_v59 = vld [vmem:[#allocation7 + $0x5a4] ss:$8 sps:$4 sm:$0xff]  }
 0x762   :  { %13130 = vmatpush1.bf16.msra.mxu1 %v17837_v5  ;;  %v17898_v5 = vld [vmem:[#allocation4 + $0x2a0] ss:$52 sps:$4 sm:$0xff]  }
 0x763   :  { %11382 = vmatpush1.bf16.msra.mxu0 %v17840_v28  ;;  %13131 = vmatprep.subr.bf16.mxu1 %v17845_v51  ;;  %v17951_v28 = vld [vmem:[#allocation7 + $0x504] ss:$8 sps:$4 sm:$0xff]  }
 0x764   :  { %11383 = vmatprep.subr.bf16.mxu0 %v17848_v55  ;;  %v17899_v51 = vld [vmem:[#allocation4 + $0x648] ss:$52 sps:$4 sm:$0xff]  }
 0x765   :  { %v17949_v55 = vld [vmem:[#allocation7 + $0x500] ss:$8 sps:$4 sm:$0xff]  }
 0x766   :  { %13132 = vmatpush1.bf16.msra.mxu1 %v17843_v35  ;;  %v11736_v35 = vpack.c.bf16 %v11723_v27, %v11723_v27  ;;  %v17982_v27 = vld [vmem:[#allocation7 + $0x5b0] ss:$8 sps:$4 sm:$0xff]  }
 0x767   :  { %11384 = vmatpush1.bf16.msra.mxu0 %v17846_v40  ;;  %13133 = vmatprep.subr.bf16.mxu1 %v17851_v44  ;;  %v17954_v40 = vld [vmem:[#allocation7 + $0x514] ss:$8 sps:$4 sm:$0xff]  }
 0x768   :  { %11394 = vmatprep.subr.bf16.mxu0 %v17854_v36  ;;  %v17901_v44 = vld [vmem:[#allocation4 + $0x9f0] ss:$52 sps:$4 sm:$0xff]  }
 0x769   :  { %v17952_v36 = vld [vmem:[#allocation7 + $0x510] ss:$8 sps:$4 sm:$0xff]  }
 0x76a   :  { %11386 = vmatmul.mubr.bf16.vlgmr.msra.gmra.mrb[36].mxu0 %v19133_v26  ;;  %13134 = vmatpush1.bf16.msra.mxu1 %v17849_v50  ;;  %v17902_v50 = vld [vmem:[#allocation4 + $0x6b0] ss:$52 sps:$4 sm:$0xff]  }
 0x76b   :  { %11395 = vmatpush1.bf16.msra.mxu0 %v17852_v52  ;;  %13135 = vmatprep.subr.bf16.mxu1 %v17857_v53  ;;  %v17903_v52 = vld [vmem:[#allocation4 + $0xa58] ss:$52 sps:$4 sm:$0xff]  }
 0x76c   :  { %11396 = vmatprep.subr.bf16.mxu0 %v17860_v56  ;;  %11426 = vmatprep.mubr.bf16.mxu0 %v18231_v16  ;;  %v17957_v53 = vld [vmem:[#allocation7 + $0x524] ss:$8 sps:$4 sm:$0xff]   ;;  %v17955_v56 = vld [vmem:[#allocation7 + $0x520] ss:$8 sps:$4 sm:$0xff]  }
 0x76e   :  { %13136 = vmatpush1.bf16.msra.mxu1 %v17855_v34  ;;  %v17904_v34 = vld [vmem:[#allocation4 + $0x718] ss:$52 sps:$4 sm:$0xff]  }
 0x76f   :  { %11397 = vmatpush1.bf16.msra.mxu0 %v17858_v23  ;;  %13137 = vmatprep.subr.bf16.mxu1 %v17863_v61  ;;  %v17960_v23 = vld [vmem:[#allocation7 + $0x534] ss:$8 sps:$4 sm:$0xff]  }
 0x770   :  { %15181 = vmatprep.subr.bf16.mxu0 %v17864_v2  ;;  %v17905_v61 = vld [vmem:[#allocation4 + $0xac0] ss:$52 sps:$4 sm:$0xff]  }
 0x771   :  { %v17958_v2 = vld [vmem:[#allocation7 + $0x530] ss:$8 sps:$4 sm:$0xff]  }
 0x772   :  { %13138 = vmatpush1.bf16.msra.mxu1 %v17861_v6  ;;  %v17906_v6 = vld [vmem:[#allocation4 + $0x780] ss:$52 sps:$4 sm:$0xff]  }
 0x773   :  { %13139 = vmatprep.subr.bf16.mxu1 %v17867_v7  ;;  %v17963_v7 = vld [vmem:[#allocation7 + $0x544] ss:$8 sps:$4 sm:$0xff]  }
 0x776   :  { %14938 = vmatmul.mubr.msk.bf16.vlgmr.msra.gmra.mrb[36].mxu0 %vm9709_vm0, %v19127_v46  ;;  %13140 = vmatpush1.bf16.msra.mxu1 %v17865_v18  ;;  %v17880_v46 = vld [vmem:[#allocation7 + $0x4c0] ss:$8 sps:$4 sm:$0xff]  }
 0x777   :  { %15182 = vmatpush3.bf16.msra.mxu0 %v17868_v29  ;;  %11467 = vmatprep.mubr.bf16.mxu0 %v18950_v45  ;;  %v17884_v45 = vld [vmem:[#allocation4 + $0x510] ss:$52 sps:$4 sm:$0xff]   ;;  %v17907_v18 = vld [vmem:[#allocation4 + $0xb28] ss:$52 sps:$4 sm:$0xff]  }
 0x778   :  { %15183 = vmatprep.subr.bf16.mxu0 %v17869_v57  ;;  %13141 = vmatprep.subr.bf16.mxu1 %v17872_v8  ;;  %v17908_v29 = vld [vmem:[#allocation4 + $0x7e8] ss:$52 sps:$4 sm:$0xff]   ;;  %v17964_v8 = vld [vmem:[#allocation7 + $0x550] ss:$8 sps:$4 sm:$0xff]  }
 0x779   :  { %v17966_v57 = vld [vmem:[#allocation7 + $0x554] ss:$8 sps:$4 sm:$0xff]  }
 0x77a   :  { %13142 = vmatpush1.bf16.msra.mxu1 %v17870_v33  ;;  %v17910_v33 = vld [vmem:[#allocation4 + $0x850] ss:$52 sps:$4 sm:$0xff]  }
 0x77b   :  { %15184 = vmatpush3.bf16.msra.mxu0 %v17873_v10  ;;  %13143 = vmatprep.subr.bf16.mxu1 %v17877_v31  ;;  %v17969_v10 = vld [vmem:[#allocation7 + $0x564] ss:$8 sps:$4 sm:$0xff]  }
 0x77c   :  { %15185 = vmatprep.subr.bf16.mxu0 %v17874_v11  ;;  %v17911_v31 = vld [vmem:[#allocation4 + $0xbf8] ss:$52 sps:$4 sm:$0xff]   ;;  %v17967_v11 = vld [vmem:[#allocation7 + $0x560] ss:$8 sps:$4 sm:$0xff]  }
 0x77e   :  { %13144 = vmatpush1.bf16.msra.mxu1 %v17875_v14  ;;  %v17912_v14 = vld [vmem:[#allocation4 + $0x8b8] ss:$52 sps:$4 sm:$0xff]  }
 0x77f   :  { %15186 = vmatpush3.bf16.msra.mxu0 %v17878_v13  ;;  %13145 = vmatprep.subr.bf16.mxu1 %v17882_v15  ;;  %v17972_v13 = vld [vmem:[#allocation7 + $0x574] ss:$8 sps:$4 sm:$0xff]  }
 0x780   :  { %15187 = vmatprep.subr.bf16.mxu0 %v17879_v12  ;;  %v17913_v15 = vld [vmem:[#allocation4 + $0xc60] ss:$52 sps:$4 sm:$0xff]  }
 0x781   :  { %v17970_v12 = vld [vmem:[#allocation7 + $0x570] ss:$8 sps:$4 sm:$0xff]  }
 0x782   :  { %13146 = vmatpush1.bf16.msra.mxu1 %v17880_v46  ;;  %v17914_v46 = vld [vmem:[#allocation4 + $0x920] ss:$52 sps:$4 sm:$0xff]  }
 0x783   :  { %15188 = vmatpush3.bf16.msra.mxu0 %v17883_v41  ;;  %13147 = vmatprep.subr.bf16.mxu1 %v17887_v58  ;;  %v17975_v41 = vld [vmem:[#allocation7 + $0x584] ss:$8 sps:$4 sm:$0xff]  }
 0x784   :  { %15189 = vmatprep.subr.bf16.mxu0 %v17884_v45  ;;  %v17915_v58 = vld [vmem:[#allocation4 + $0xcc8] ss:$52 sps:$4 sm:$0xff]  }
 0x785   :  { %v17973_v45 = vld [vmem:[#allocation7 + $0x580] ss:$8 sps:$4 sm:$0xff]  }
 0x786   :  { %13148 = vmatpush1.bf16.msra.mxu1 %v17885_v19  ;;  %v17916_v19 = vld [vmem:[#allocation4 + $0x988] ss:$52 sps:$4 sm:$0xff]  }
 0x787   :  { %15190 = vmatpush3.bf16.msra.mxu0 %v17888_v9  ;;  %13149 = vmatprep.subr.bf16.mxu1 %v17892_v42  ;;  %v17917_v9 = vld [vmem:[#allocation4 + $0x16f0] ss:$52 sps:$4 sm:$0xff]  }
 0x788   :  { %15191 = vmatprep.subr.bf16.mxu0 %v17889_v3  ;;  %v17976_v42 = vld [vmem:[#allocation7 + $0x590] ss:$8 sps:$4 sm:$0xff]  }
 0x789   :  { %v17918_v3 = vld [vmem:[#allocation4 + $0x13b0] ss:$52 sps:$4 sm:$0xff]  }
 0x78a   :  { %13150 = vmatpush1.bf16.msra.mxu1 %v17890_v4  ;;  %v17919_v4 = vld [vmem:[#allocation4 + $0x1758] ss:$52 sps:$4 sm:$0xff]  }
 0x78b   :  { %15192 = vmatpush3.bf16.msra.mxu0 %v17893_v20  ;;  %13151 = vmatprep.subr.bf16.mxu1 %v17897_v21  ;;  %v17979_v20 = vld [vmem:[#allocation7 + $0x5a0] ss:$8 sps:$4 sm:$0xff]   ;;  %v17920_v21 = vld [vmem:[#allocation4 + $0x1418] ss:$52 sps:$4 sm:$0xff]  }
 0x78c   :  { %15193 = vmatprep.subr.bf16.mxu0 %v17894_v17  ;;  %v17984_v17 = vld [vmem:[#allocation7 + $0x5b4] ss:$8 sps:$4 sm:$0xff]  }
 0x78e   :  { %13152 = vmatpush1.bf16.msra.mxu1 %v17895_v25  ;;  %v17921_v25 = vld [vmem:[#allocation4 + $0x17c0] ss:$52 sps:$4 sm:$0xff]  }
 0x78f   :  { %15194 = vmatpush3.bf16.msra.mxu0 %v17898_v5  ;;  %13162 = vmatprep.subr.bf16.mxu1 %v17951_v28  ;;  %v17922_v5 = vld [vmem:[#allocation4 + $0x1480] ss:$52 sps:$4 sm:$0xff]  }
 0x790   :  { %15195 = vmatprep.subr.bf16.mxu0 %v17899_v51  ;;  %v17987_v28 = vld [vmem:[#allocation7 + $0x5c4] ss:$8 sps:$4 sm:$0xff]  }
 0x791   :  { %13154 = vmatmul.mubr.bf16.vlgmr.msra.gmra.mrb[28].mxu1 %v11736_v35  ;;  %v17923_v51 = vld [vmem:[#allocation4 + $0x1828] ss:$52 sps:$4 sm:$0xff]  }
 0x792   :  { %13163 = vmatpush1.bf16.msra.mxu1 %v17949_v55  ;;  %v17924_v55 = vld [vmem:[#allocation4 + $0x14e8] ss:$52 sps:$4 sm:$0xff]  }
 0x793   :  { %15196 = vmatpush3.bf16.msra.mxu0 %v17900_v38  ;;  %13164 = vmatprep.subr.bf16.mxu1 %v17954_v40  ;;  %v17990_v35 = vld [vmem:[#allocation7 + $0x5d4] ss:$8 sps:$4 sm:$0xff]   ;;  %v17988_v38 = vld [vmem:[#allocation7 + $0x5d0] ss:$8 sps:$4 sm:$0xff]  }
 0x794   :  { %15203 = vmatprep.subr.bf16.mxu0 %v17901_v44  ;;  %v17926_v40 = vld [vmem:[#allocation4 + $0x1550] ss:$52 sps:$4 sm:$0xff]   ;;  %v17927_v44 = vld [vmem:[#allocation4 + $0x18f8] ss:$52 sps:$4 sm:$0xff]  }
 0x796   :  { %11468 = vmatmul.mubr.bf16.vlgmr.msra.gmra.mrb[40].mxu0 %v18948_v43  ;;  %13165 = vmatpush1.bf16.msra.mxu1 %v17952_v36  ;;  %v17961_v43 = vld [vmem:[#allocation7 + $0x540] ss:$8 sps:$4 sm:$0xff]   ;;  %v17928_v36 = vld [vmem:[#allocation4 + $0x15b8] ss:$52 sps:$4 sm:$0xff]  }
 0x797   :  { %15204 = vmatpush3.bf16.msra.mxu0 %v17902_v50  ;;  %11507 = vmatprep.mubr.bf16.mxu0 %v19064_v0  ;;  %v17909_v0 = vld [vmem:[#allocation4 + $0xb90] ss:$52 sps:$4 sm:$0xff]   ;;  %v17929_v50 = vld [vmem:[#allocation4 + $0x1960] ss:$52 sps:$4 sm:$0xff]  }
 0x798   :  { %15205 = vmatprep.subr.bf16.mxu0 %v17903_v52  ;;  %13166 = vmatprep.subr.bf16.mxu1 %v17957_v53  ;;  %v17993_v52 = vld [vmem:[#allocation7 + $0x5e4] ss:$8 sps:$4 sm:$0xff]   ;;  %v17991_v53 = vld [vmem:[#allocation7 + $0x5e0] ss:$8 sps:$4 sm:$0xff]  }
 0x79a   :  { %13167 = vmatpush1.bf16.msra.mxu1 %v17955_v56  ;;  %v17930_v56 = vld [vmem:[#allocation4 + $0x1620] ss:$52 sps:$4 sm:$0xff]  }
 0x79b   :  { %15206 = vmatpush3.bf16.msra.mxu0 %v17904_v34  ;;  %13168 = vmatprep.subr.bf16.mxu1 %v17960_v23  ;;  %v17931_v34 = vld [vmem:[#allocation4 + $0x19c8] ss:$52 sps:$4 sm:$0xff]  }
 0x79c   :  { %15207 = vmatprep.subr.bf16.mxu0 %v17905_v61  ;;  %v17996_v23 = vld [vmem:[#allocation7 + $0x5f4] ss:$8 sps:$4 sm:$0xff]   ;;  %v17994_v61 = vld [vmem:[#allocation7 + $0x5f0] ss:$8 sps:$4 sm:$0xff]  }
 0x79e   :  { %13169 = vmatpush1.bf16.msra.mxu1 %v17958_v2  ;;  %v17932_v2 = vld [vmem:[#allocation4 + $0x1688] ss:$52 sps:$4 sm:$0xff]  }
 0x79f   :  { %15208 = vmatpush3.bf16.msra.mxu0 %v17906_v6  ;;  %13170 = vmatprep.subr.bf16.mxu1 %v17963_v7  ;;  %v17933_v6 = vld [vmem:[#allocation4 + $0x23f0] ss:$52 sps:$4 sm:$0xff]  }
 0x7a0   :  { %15209 = vmatprep.subr.bf16.mxu0 %v17907_v18  ;;  %v17934_v7 = vld [vmem:[#allocation4 + $0x20b0] ss:$52 sps:$4 sm:$0xff]   ;;  %v17935_v18 = vld [vmem:[#allocation4 + $0x2458] ss:$52 sps:$4 sm:$0xff]  }
 0x7a2   :  { %13171 = vmatpush1.bf16.msra.mxu1 %v17961_v43  ;;  %v17936_v43 = vld [vmem:[#allocation4 + $0x2118] ss:$52 sps:$4 sm:$0xff]  }
 0x7a3   :  { %15210 = vmatpush3.bf16.msra.mxu0 %v17908_v29  ;;  %13172 = vmatprep.subr.bf16.mxu1 %v17966_v57  ;;  %v17937_v29 = vld [vmem:[#allocation4 + $0x24c0] ss:$52 sps:$4 sm:$0xff]  }
 0x7a4   :  { %15211 = vmatprep.subr.bf16.mxu0 %v17909_v0  ;;  %v17938_v57 = vld [vmem:[#allocation4 + $0x2180] ss:$52 sps:$4 sm:$0xff]   ;;  %v17939_v0 = vld [vmem:[#allocation4 + $0x2528] ss:$52 sps:$4 sm:$0xff]  }
 0x7a6   :  { %13173 = vmatpush1.bf16.msra.mxu1 %v17964_v8  ;;  %v17940_v8 = vld [vmem:[#allocation4 + $0x21e8] ss:$52 sps:$4 sm:$0xff]  }
 0x7a7   :  { %15212 = vmatpush3.bf16.msra.mxu0 %v17910_v33  ;;  %13174 = vmatprep.subr.bf16.mxu1 %v17969_v10  ;;  %v17941_v33 = vld [vmem:[#allocation4 + $0x2590] ss:$52 sps:$4 sm:$0xff]  }
 0x7a8   :  { %15213 = vmatprep.subr.bf16.mxu0 %v17911_v31  ;;  %v17942_v10 = vld [vmem:[#allocation4 + $0x2250] ss:$52 sps:$4 sm:$0xff]   ;;  %v17943_v31 = vld [vmem:[#allocation4 + $0x25f8] ss:$52 sps:$4 sm:$0xff]  }
 0x7aa   :  { %13175 = vmatpush1.bf16.msra.mxu1 %v17967_v11  ;;  %v17945_v11 = vld [vmem:[#allocation4 + $0x2660] ss:$52 sps:$4 sm:$0xff]  }
 0x7ab   :  { %15214 = vmatpush3.bf16.msra.mxu0 %v17912_v14  ;;  %13176 = vmatprep.subr.bf16.mxu1 %v17972_v13  ;;  %v17947_v14 = vld [vmem:[#allocation4 + $0x26c8] ss:$52 sps:$4 sm:$0xff]  }
 0x7ac   :  { %15215 = vmatprep.subr.bf16.mxu0 %v17913_v15  ;;  %v17948_v13 = vld [vmem:[#allocation4 + $0x2388] ss:$52 sps:$4 sm:$0xff]  }
 0x7ad   :  { %v17999_v15 = vld [vmem:[#allocation7 + $0x604] ss:$8 sps:$4 sm:$0xff]  }
 0x7ae   :  { %13177 = vmatpush1.bf16.msra.mxu1 %v17970_v12  ;;  %v3219_v12 = vrot.slane %v19267_v49, %v19035_v37  ;;  %v18005_v37 = vld [vmem:[#allocation7 + $0x624] ss:$8 sps:$4 sm:$0xff]  }
 0x7af   :  { %15216 = vmatpush3.bf16.msra.mxu0 %v17914_v46  ;;  %13178 = vmatprep.subr.bf16.mxu1 %v17975_v41  ;;  %v3223_v46 = vrot.slane %v19267_v49, %v19038_v39  ;;  %v18009_v39 = vld [vmem:[#allocation10 + $0x40] sm:$0xff]  }
 0x7b0   :  { %15217 = vmatprep.subr.bf16.mxu0 %v17915_v58 }
 0x7b2   :  { %13179 = vmatpush1.bf16.msra.mxu1 %v17973_v45 }
 0x7b3   :  { %15218 = vmatpush3.bf16.msra.mxu0 %v17916_v19  ;;  %13180 = vmatprep.subr.bf16.mxu1 %v17978_v54 }
 0x7b4   :  { %15247 = vmatprep.subr.bf16.mxu0 %v17917_v9 }
 0x7b6   :  { %11508 = vmatmul.mubr.bf16.vlgmr.msra.gmra.mrb[44].mxu0 %v19062_v63  ;;  %13181 = vmatpush1.bf16.msra.mxu1 %v17976_v42  ;;  %v17985_v63 = vld [vmem:[#allocation7 + $0x5c0] ss:$8 sps:$4 sm:$0xff]  }
 0x7b7   :  { %15248 = vmatpush3.bf16.msra.mxu0 %v17918_v3  ;;  %11587 = vmatprep.mubr.bf16.mxu0 %v19105_v62  ;;  %v17925_v62 = vld [vmem:[#allocation4 + $0x1890] ss:$52 sps:$4 sm:$0xff]  }
 0x7b8   :  { %15249 = vmatprep.subr.bf16.mxu0 %v17919_v4  ;;  %13182 = vmatprep.subr.bf16.mxu1 %v17981_v59  ;;  %v17997_v59 = vld [vmem:[#allocation7 + $0x600] ss:$8 sps:$4 sm:$0xff]  }
 0x7ba   :  { %13183 = vmatpush1.bf16.msra.mxu1 %v17979_v20 }
 0x7bb   :  { %15250 = vmatpush3.bf16.msra.mxu0 %v17920_v21  ;;  %13184 = vmatprep.subr.bf16.mxu1 %v17984_v17  ;;  %v18000_v21 = vld [vmem:[#allocation7 + $0x610] ss:$8 sps:$4 sm:$0xff]   ;;  %v18010_v17 = vld [vmem:[#allocation10] sm:$0xff]  }
 0x7bc   :  { %15251 = vmatprep.subr.bf16.mxu0 %v17921_v25  ;;  %v18011_v25 = vld [vmem:[#allocation10 + $0x48] sm:$0xff]  }
 0x7be   :  { %13185 = vmatpush1.bf16.msra.mxu1 %v17982_v27  ;;  %v18003_v27 = vld [vmem:[#allocation7 + $0x620] ss:$8 sps:$4 sm:$0xff]  }
 0x7bf   :  { %15252 = vmatpush3.bf16.msra.mxu0 %v17922_v5  ;;  %13186 = vmatprep.subr.bf16.mxu1 %v17987_v28  ;;  %v18008_v5 = vld [vmem:[#allocation7 + $0x634] ss:$8 sps:$4 sm:$0xff]   ;;  %v18012_v28 = vld [vmem:[#allocation10 + $0x8] sm:$0xff]  }
 0x7c0   :  { %15253 = vmatprep.subr.bf16.mxu0 %v17923_v51  ;;  %v18013_v51 = vld [vmem:[#allocation10 + $0x50] sm:$0xff]  }
 0x7c2   :  { %13187 = vmatpush1.bf16.msra.mxu1 %v17985_v63  ;;  %v18006_v63 = vld [vmem:[#allocation7 + $0x630] ss:$8 sps:$4 sm:$0xff]  }
 0x7c3   :  { %15254 = vmatpush3.bf16.msra.mxu0 %v17924_v55  ;;  %13188 = vmatprep.subr.bf16.mxu1 %v17990_v35  ;;  %v18014_v55 = vld [vmem:[#allocation10 + $0x10] sm:$0xff]   ;;  %v18016_v35 = vld [vmem:[#allocation10 + $0x18] sm:$0xff]  }
 0x7c4   :  { %15255 = vmatprep.subr.bf16.mxu0 %v17925_v62  ;;  %v18017_v62 = vld [vmem:[#allocation10 + $0x60] sm:$0xff]  }
 0x7c6   :  { %13189 = vmatpush1.bf16.msra.mxu1 %v17988_v38  ;;  %v18018_v38 = vld [vmem:[#allocation10 + $0x20] sm:$0xff]  }
 0x7c7   :  { %15256 = vmatpush3.bf16.msra.mxu0 %v17926_v40  ;;  %13190 = vmatprep.subr.bf16.mxu1 %v17993_v52  ;;  %v18019_v40 = vld [vmem:[#allocation10 + $0x68] sm:$0xff]  }
 0x7c8   :  { %15257 = vmatprep.subr.bf16.mxu0 %v17927_v44  ;;  %v18020_v44 = vld [vmem:[#allocation10 + $0x28] sm:$0xff]  }
 0x7ca   :  { %13191 = vmatpush1.bf16.msra.mxu1 %v17991_v53 }
 0x7cb   :  { %15258 = vmatpush3.bf16.msra.mxu0 %v17928_v36  ;;  %13192 = vmatprep.subr.bf16.mxu1 %v17996_v23 }
 0x7cc   :  { %15259 = vmatprep.subr.bf16.mxu0 %v17929_v50 }
 0x7ce   :  { %13193 = vmatpush1.bf16.msra.mxu1 %v17994_v61 }
 0x7cf   :  { %15260 = vmatpush3.bf16.msra.mxu0 %v17930_v56  ;;  %13203 = vmatprep.subr.bf16.mxu1 %v17999_v15 }
 0x7d0   :  { %15261 = vmatprep.subr.bf16.mxu0 %v17931_v34  ;;  %v3227_v34 = vrot.slane %v19267_v49, %v19070_v30 }
 0x7d3   :  { %15262 = vmatpush3.bf16.msra.mxu0 %v17932_v2 }
 0x7d4   :  { %15291 = vmatprep.subr.bf16.mxu0 %v17933_v6 }
 0x7d6   :  { %11588 = vmatmul.mubr.bf16.vlgmr.msra.gmra.mrb[48].mxu0 %v19103_v60  ;;  %v17944_v60 = vld [vmem:[#allocation4 + $0x22b8] ss:$52 sps:$4 sm:$0xff]  }
 0x7d7   :  { %15292 = vmatpush3.bf16.msra.mxu0 %v17934_v7  ;;  %11667 = vmatprep.mubr.bf16.mxu0 %v19120_v47  ;;  %v17946_v47 = vld [vmem:[#allocation4 + $0x2320] ss:$52 sps:$4 sm:$0xff]  }
 0x7d8   :  { %15293 = vmatprep.subr.bf16.mxu0 %v17935_v18 }
 0x7db   :  { %15294 = vmatpush3.bf16.msra.mxu0 %v17936_v43 }
 0x7dc   :  { %15295 = vmatprep.subr.bf16.mxu0 %v17937_v29 }
 0x7df   :  { %15296 = vmatpush3.bf16.msra.mxu0 %v17938_v57 }
 0x7e0   :  { %15297 = vmatprep.subr.bf16.mxu0 %v17939_v0 }
 0x7e3   :  { %15298 = vmatpush3.bf16.msra.mxu0 %v17940_v8 }
 0x7e4   :  { %15299 = vmatprep.subr.bf16.mxu0 %v17941_v33 }
 0x7e7   :  { %15300 = vmatpush3.bf16.msra.mxu0 %v17942_v10 }
 0x7e8   :  { %15301 = vmatprep.subr.bf16.mxu0 %v17943_v31 }
 0x7eb   :  { %15302 = vmatpush3.bf16.msra.mxu0 %v17944_v60 }
 0x7ec   :  { %15303 = vmatprep.subr.bf16.mxu0 %v17945_v11 }
 0x7ef   :  { %15304 = vmatpush3.bf16.msra.mxu0 %v17946_v47 }
 0x7f0   :  { %15305 = vmatprep.subr.bf16.mxu0 %v17947_v14 }
 0x7f3   :  { %15306 = vmatpush3.bf16.msra.mxu0 %v17948_v13 }
 0x7f4   :  { %15316 = vmatprep.subr.bf16.mxu0 %v18009_v39 }
 0x7f6   :  { %11668 = vmatmul.mubr.bf16.vlgmr.msra.gmra.mrb[52].mxu0 %v19133_v26  ;;  %v18002_v26 = vld [vmem:[#allocation7 + $0x614] ss:$8 sps:$4 sm:$0xff]  }
 0x7f7   :  { %15317 = vmatpush3.bf16.msra.mxu0 %v18010_v17  ;;  %v15141_v17 = vld [vmem:[#allocation12] ss:$0 sm:$0xff] }
 0x7f8   :  { %15318 = vmatprep.subr.bf16.mxu0 %v18011_v25 }
 0x7fb   :  { %15319 = vmatpush3.bf16.msra.mxu0 %v18012_v28 }
 0x7fc   :  { %15320 = vmatprep.subr.bf16.mxu0 %v18013_v51 }
 0x7ff   :  { %15321 = vmatpush3.bf16.msra.mxu0 %v18014_v55 }
 0x849   :  { %v11428_v41 = vpop.f32.mrb[36].mxu0 }
 0x84a   :  { %v15358_v58 = vadd.f32 %v11428_v41, %v3219_v12  ;;  %v11430_v45 = vpop.f32.mrb[37].mxu0  ;;  %v18022_v41 = vld [vmem:[#allocation10 + $0x30] sm:$0xff]  }
 0x84b   :  { %v15359_v19 = vadd.f32 %v11430_v45, %v3223_v46  ;;  %v11432_v54 = vpop.f32.mrb[38].mxu0  ;;  %v18024_v45 = vld [vmem:[#allocation10 + $0x38] sm:$0xff]  }
 0x84c   :  { %v11725_v9 = vmax.f32 %v15358_v58, 0.0  ;;  %v11433_v42 = vpop.f32.mrb[39].mxu0  ;;  %v18023_v58 = vld [vmem:[#allocation10 + $0x78] sm:$0xff]  }
 0x84d   :  { %v11726_v3 = vmax.f32 %v15359_v19, 0.0 }
 0x84e   :  { %v11738_v20 = vpack.c.bf16 %v11725_v9, %v11725_v9 }
 0x84f   :  { %v11739_v4 = vpack.c.bf16 %v11726_v3, %v11726_v3 }
 0x851   :  { %13194 = vmatprep.mubr.bf16.mxu1 %v11739_v4 }
 0x852   :  { %13195 = vmatmul.mubr.bf16.vlgmr.msra.gmra.mrb[28].mxu1 %v11738_v20 }
 0x853   :  { %13204 = vmatpush1.bf16.msra.mxu1 %v17997_v59  ;;  %13235 = vmatprep.mubr.bf16.mxu1 %v18231_v16  ;;  %v18015_v16 = vld [vmem:[#allocation10 + $0x58] sm:$0xff]  }
 0x854   :  { %13205 = vmatprep.subr.bf16.mxu1 %v18002_v26  ;;  %15322 = vmatprep.subr.bf16.mxu0 %v18015_v16 }
 0x855   :  { %15323 = vmatpush3.bf16.msra.mxu0 %v18016_v35 }
 0x856   :  { %15324 = vmatprep.subr.bf16.mxu0 %v18017_v62 }
 0x857   :  { %13206 = vmatpush1.bf16.msra.mxu1 %v18000_v21 }
 0x858   :  { %13207 = vmatprep.subr.bf16.mxu1 %v18005_v37 }
 0x859   :  { %15325 = vmatpush3.bf16.msra.mxu0 %v18018_v38 }
 0x85a   :  { %15326 = vmatprep.subr.bf16.mxu0 %v18019_v40 }
 0x85b   :  { %13208 = vmatpush1.bf16.msra.mxu1 %v18003_v27 }
 0x85c   :  { %13209 = vmatprep.subr.bf16.mxu1 %v18008_v5 }
 0x85d   :  { %15327 = vmatpush3.bf16.msra.mxu0 %v18020_v44 }
 0x85f   :  { %13210 = vmatpush1.bf16.msra.mxu1 %v18006_v63 }
 0x869   :  { %v15197_v36 = vpop.f32.mrb[40].mxu0 }
 0x86a   :  { %v15198_v50 = vpop.f32.mrb[41].mxu0 }
 0x86b   :  { %v15199_v52 = vadd.f32 %v15198_v50, %v15197_v36  ;;  %v15200_v53 = vpop.f32.mrb[42].mxu0 }
 0x86c   :  { %v15201_v56 = vpop.f32.mrb[43].mxu0 }
 0x86d   :  { %v11470_v2 = vadd.f32 %v15199_v52, %v3227_v34 }
 0x889   :  { %v15219_v23 = vpop.f32.mrb[44].mxu0 }
 0x88a   :  { %v15220_v61 = vpop.f32.mrb[45].mxu0 }
 0x88b   :  { %v15221_v6 = vadd.f32 %v15220_v61, %v15219_v23  ;;  %v15222_v7 = vpop.f32.mrb[46].mxu0 }
 0x88c   :  { %v15223_v18 = vpop.f32.mrb[47].mxu0 }
 0x88d   :  { %v11510_v43 = vadd.f32 %v15221_v6, %v11470_v2 }
 0x88f   :  { %v11550_v29 = vadd.f32 %v19252_v32, %v11510_v43  ;;  %v18021_v32 = vld [vmem:[#allocation10 + $0x70] sm:$0xff]  }
 0x890   :  { %15328 = vmatprep.subr.bf16.mxu0 %v18021_v32 }
 0x891   :  { %15329 = vmatpush3.bf16.msra.mxu0 %v18022_v41 }
 0x892   :  { %15330 = vmatprep.subr.bf16.mxu0 %v18023_v58 }
 0x895   :  { %15331 = vmatpush3.bf16.msra.mxu0 %v18024_v45 }
 0x8a9   :  { %v15263_v57 = vpop.f32.mrb[48].mxu0 }
 0x8aa   :  { %v15264_v0 = vpop.f32.mrb[49].mxu0 }
 0x8ab   :  { %v15265_v8 = vadd.f32 %v15264_v0, %v15263_v57  ;;  %v15266_v33 = vpop.f32.mrb[50].mxu0 }
 0x8ac   :  { %v15267_v10 = vpop.f32.mrb[51].mxu0 }
 0x8ad   :  { %v11590_v31 = vadd.f32 %v15265_v8, %v11550_v29 }
 0x8af   :  { %v11630_v60 = vadd.f32 %v19261_v48, %v11590_v31  ;;  %v11941_v48 = vld [vmem:[#allocation9] sm:$0x3] }
 0x8b0   :  { %v11946_v19 = vrot.slane %v11941_v48, %v18919_v22  ;;  %v11950_v54 = vrot.slane %v11941_v48, %v18924_v24  ;;  %v15158_v24 = vld [vmem:[#allocation13] ss:$0 sm:$0xff] }
 0x8c9   :  { %v15307_v11 = vpop.f32.mrb[52].mxu0 }
 0x8ca   :  { %v15308_v47 = vpop.f32.mrb[53].mxu0 }
 0x8cb   :  { %v15309_v30 = vadd.f32 %v15308_v47, %v15307_v11  ;;  %v15310_v49 = vpop.f32.mrb[54].mxu0 }
 0x8cc   :  { %v15311_v14 = vpop.f32.mrb[55].mxu0 }
 0x8cd   :  { %v11670_v13 = vadd.f32 %v15309_v30, %v11630_v60 }
 0x8cf   :  { %v11710_v15 = vadd.f32 %v19263_v1, %v11670_v13 }
 0x8d1   :  { %v11727_v12 = vmax.f32 %v11710_v15, 0.0 }
 0x8d3   :  { %v11740_v46 = vpack.c.bf16 %v11727_v12, %v11727_v12 }
 0x8d5   :  { %15140 = vmatmul.mubr.msk.bf16.vlgmr.msra.gmra.mrb[28].mxu1 %vm12953_vm2, %v11740_v46 }
 0x9a8   :  { %v13237_v9 = vpop.f32.mrb[28].mxu1 }
 0x9a9   :  { %v15360_v42 = vadd.f32 %v13237_v9, %v11946_v19  ;;  %v13239_v1 = vpop.f32.mrb[29].mxu1 }
 0x9aa   :  { %v15361_v3 = vadd.f32 %v13239_v1, %v11950_v54  ;;  %v13241_v4 = vpop.f32.mrb[30].mxu1 }
 0x9ab   :  { %v13244_v59 = vmax.f32 %v15360_v42, 0.0  ;;  %v13242_v20 = vpop.f32.mrb[31].mxu1 }
 0x9ac   :  { %v13245_v26 = vmax.f32 %v15361_v3, 0.0 }
 0x9ad   :  { %v13246_v37 = vpack.c.bf16 %v13244_v59, %v13244_v59 }
 0x9ae   :  { %v13247_v21 = vpack.c.bf16 %v13245_v26, %v13245_v26 }
 0x9b0   :  { %13415 = vmatprep.mubr.bf16.mxu0 %v13247_v21 }
 0x9b1   :  { %13416 = vmatmul.mubr.bf16.vlgmr.msra.gmra.mrb[56].mxu0 %v13246_v37 }
 0xa84   :  { %v15332_v39 = vpop.f32.mrb[56].mxu0 }
 0xa85   :  { %v15333_v25 = vpop.f32.mrb[57].mxu0 }
 0xa86   :  { %v15334_v27 = vadd.f32 %v15333_v25, %v15332_v39  ;;  %v15335_v5 = vpop.f32.mrb[58].mxu0 }
 0xa87   :  { %v15336_v22 = vpop.f32.mrb[59].mxu0 }
 0xa88   :  { %v13418_v28 = vadd.f32 %v15334_v27, %v15141_v17 }
 0xa8a   :  { %v13423_v51 = vmax.f32 %v13418_v28, 0.0 }
 0xa8c   :  { %v13431_v63 = vadd.f32 %v15158_v24, %v13423_v51 }
 0xa8e   :  { %13432 = vmax.xlane.f32.xlu0 %v13431_v63 }
 0xb1b   :  { %v13433_v55 = vpop.xlane.xlu0 %13432 }
 0xb1c   :  { %v13434_v16 = vsub.f32 %v13431_v63, %v13433_v55 }
 0xb1e   :  { %v13435_v35 = vmul.f32 1.442695, %v13434_v16 }
 0xb20   :  { %18025 = vpow2.f32 %v13435_v35 }
 0xb2a   :  { %v18026_v62 = vpop.eup %18025 }
 0xb2b   :  { %13437 = vadd.xlane.f32.xlu0 %v18026_v62 }
 0xbb8   :  { %v13438_v38 = vpop.xlane.xlu0 %13437 }
 0xbb9   :  { %18027 = vrcp.f32 %v13438_v38 }
 0xbc3   :  { %v18028_v40 = vpop.eup %18027 }
 0xbc4   :  { %v13440_v44 = vmul.f32 %v18028_v40, %v18026_v62 }
 0xbc6   :  { %13441 = vst [vmem:[%s19316_s10] sm:$0xff] %v13440_v44 }
 0xbc7   :  { %13446 = vsyncpa [#allocation3], 1 }
 0xbc8   :  { %13447 = vsyncpa [#allocation5], 1 }
 0xbc9   :  { %13448 = vsyncpa [#allocation8], 1 }
 0xbca   :  { %13449 = vsyncpa [#allocation11], 1 }
 0xbcb   :  { %13450 = vsyncpa [#allocation14], 1 }

</bundles_post_ra>
